<compile_context>
chip_gen: v7x
topology: tpu7x:2x2x1
jax: 0.10.0
libtpu: 0.0.40
codegen_flags: <defaults>
</compile_context>

<pallas_src>
import functools

import jax
import jax.numpy as jnp
from jax.experimental import pallas as pl
from jax.experimental.pallas import tpu as pltpu

CONV_K = 25      # Conv2d kernel (1, 25)
CONV_PAD = 12    # padding='same' for an odd kernel of 25
POOL_K = 3       # MaxPool2d((1, 3), stride=3, padding=(0, 1))
POOL_PAD = 1

W_IN = 784       # input width: 784 -> pool 262 -> pool 88 (== fc1's 88*64)


def _pool_out_width(wc):
    # floor((W + 2*pad - k) / stride) + 1  with k = stride = 3, pad = 1
    return (wc + 2 * POOL_PAD - POOL_K) // POOL_K + 1


W_P1 = _pool_out_width(W_IN)   # 262
W_P2 = _pool_out_width(W_P1)   # 88


def _pick_batch_tile(n):
    for b in (8, 4, 2):
        if n % b == 0:
            return b
    return 1


# ----------------------------------------------------------------------------
# Kernel 1: fused 1x25 'same' conv (im2col, single matmul) + bias + ReLU +
#           MaxPool((1,3), 3, pad 1) with the stride-3 subsample done in-kernel
# ----------------------------------------------------------------------------
def _conv_relu_pool_kernel(x_ref, w_ref, bias_ref, o_ref, ybuf,
                           *, n_taps, Wc, Wp):
    """Processes a batch tile of B elements.

    x_ref   : (B, Wc + n_taps - 1, Cin)  width-padded input     (n_taps > 1)
              (B, Wc, K)                 pre-built im2col patches (n_taps == 1)
    w_ref   : (K, Cout)   with K = n_taps * Cin (taps folded into contraction)
    bias_ref: (1, Cout)
    o_ref   : (B, Wp, Cout)   pooled output (3x fewer rows than the conv)
    ybuf    : (3*Wp + 8, Cout) f32 scratch.  Rows [2, 2+Wc) hold the conv
              activations; all other rows are zero.  Zero is a valid stand-in
              for MaxPool's -inf padding ONLY because ReLU guarantees y >= 0.
    """
    # Zero the scratch every invocation (cheap); do NOT rely on persistence
    # across grid steps -- the 'parallel' batch axis may be sharded across
    # TensorCores on megacore chips.
    ybuf[...] = jnp.zeros_like(ybuf)

    w = w_ref[...]
    bias = bias_ref[...]
    B = o_ref.shape[0]

    @pl.loop(0, B)
    def _per_element(i):
        if n_taps > 1:
            # im2col: concatenate the 25 shifted slices along lanes so the
            # whole conv is a single K = 25*Cin contraction on the MXU.
            cols = [x_ref[i, k:k + Wc, :] for k in range(n_taps)]
            pats = jnp.concatenate(cols, axis=-1)          # (Wc, n_taps*Cin)
        else:
            pats = x_ref[i]                                # (Wc, K)

        y = jnp.dot(pats, w, preferred_element_type=jnp.float32) + bias
        y = jnp.maximum(y, 0.0)                            # ReLU  =>  y >= 0

        # MaxPool window i covers y[3i-1], y[3i], y[3i+1]; out-of-range taps
        # hit the zero rows of ybuf (exact because y >= 0, see docstring).
        ybuf[2:2 + Wc, :] = y
        left = ybuf[pl.ds(1, Wp, stride=3), :]             # y[3i-1]
        center = ybuf[pl.ds(2, Wp, stride=3), :]           # y[3i]
        right = ybuf[pl.ds(3, Wp, stride=3), :]            # y[3i+1]
        o_ref[i, :, :] = jnp.maximum(jnp.maximum(left, center), right)


def conv_relu_pool_layer(x, w_flat, bias, *, n_taps, Wc):
    """x: (N, Wx, C) -> pooled (N, Wp, Cout) via the fused conv/relu/pool kernel."""
    N, Wx, C = x.shape
    K, Cout = w_flat.shape
    Wp = _pool_out_width(Wc)
    B = _pick_batch_tile(N)
    kernel = functools.partial(_conv_relu_pool_kernel,
                               n_taps=n_taps, Wc=Wc, Wp=Wp)
    return pl.pallas_call(
        kernel,
        out_shape=jax.ShapeDtypeStruct((N, Wp, Cout), jnp.float32),
        grid_spec=pltpu.PrefetchScalarGridSpec(
            num_scalar_prefetch=0,
            grid=(N // B,),
            in_specs=[
                pl.BlockSpec((B, Wx, C), lambda n: (n, 0, 0)),
                pl.BlockSpec((K, Cout), lambda n: (0, 0)),
                pl.BlockSpec((1, Cout), lambda n: (0, 0)),
            ],
            out_specs=pl.BlockSpec((B, Wp, Cout), lambda n: (n, 0, 0)),
            scratch_shapes=[pltpu.VMEM((3 * Wp + 8, Cout), jnp.float32)],
        ),
        compiler_params=pltpu.CompilerParams(
            dimension_semantics=("parallel",)),
    )(x, w_flat, bias.reshape(1, Cout))


# ----------------------------------------------------------------------------
# Kernel 2: fc head — Linear(5632 -> 1024) [K-tiled, bf16 weight stream]
#           + Linear(1024 -> labels).  Dropouts are identity in eval mode.
# ----------------------------------------------------------------------------
def _fc_kernel(f_ref, w1_ref, b1_ref, w2_ref, b2_ref, out_ref, acc_ref):
    k = pl.program_id(0)

    @pl.when(k == 0)
    def _():
        acc_ref[...] = jnp.zeros_like(acc_ref)

    w1 = w1_ref[...]                        # bf16: halves the HBM weight stream
    a = f_ref[...].astype(w1.dtype)
    acc_ref[...] += jnp.dot(a, w1, preferred_element_type=jnp.float32)

    @pl.when(k == pl.num_programs(0) - 1)
    def _():
        h = acc_ref[...] + b1_ref[...]      # Dropout(0.5): identity in eval
        out_ref[...] = (jnp.dot(h, w2_ref[...],
                                preferred_element_type=jnp.float32)
                        + b2_ref[...])      # Dropout(0.3): identity in eval


def _pick_tk(d, cap=2048):
    """Largest divisor of d that is a multiple of 128 and <= cap (VMEM-safe)."""
    for cand in range(min(d, cap), 127, -1):
        if d % cand == 0 and cand % 128 == 0:
            return cand
    return d


def fc_head(f, w1, b1, w2, b2):
    N, D = f.shape
    H = w1.shape[1]
    L = w2.shape[1]
    Lp = ((L + 127) // 128) * 128           # lane-dense logits block
    w2p = jnp.pad(w2, ((0, 0), (0, Lp - L)))
    b2p = jnp.pad(b2, ((0, Lp - L),))
    tk = _pick_tk(D)                        # 1408 for D=5632; derived, not hard-coded
    out = pl.pallas_call(
        _fc_kernel,
        out_shape=jax.ShapeDtypeStruct((N, Lp), jnp.float32),
        grid_spec=pltpu.PrefetchScalarGridSpec(
            num_scalar_prefetch=0,
            grid=(D // tk,),
            in_specs=[
                pl.BlockSpec((N, tk), lambda k: (0, k)),
                pl.BlockSpec((tk, H), lambda k: (k, 0)),
                pl.BlockSpec((1, H), lambda k: (0, 0)),
                pl.BlockSpec((H, Lp), lambda k: (0, 0)),
                pl.BlockSpec((1, Lp), lambda k: (0, 0)),
            ],
            out_specs=pl.BlockSpec((N, Lp), lambda k: (0, 0)),
            scratch_shapes=[pltpu.VMEM((N, H), jnp.float32)],
        ),
        compiler_params=pltpu.CompilerParams(
            dimension_semantics=("arbitrary",)),
    )(f, w1, b1.reshape(1, H), w2p, b2p.reshape(1, Lp))
    return out[:, :L]


# ----------------------------------------------------------------------------
# Full forward
# ----------------------------------------------------------------------------
def one_cnnc_forward(x_nchw, params):
    N = x_nchw.shape[0]
    x = x_nchw.reshape(N, W_IN)             # (N, 1, 1, 784) -> (N, 784)

    # layer_1: conv1 has a single input channel (no channel padding to 8
    # anymore), so its im2col patches (N, 784, 25) are built in the wrapper —
    # pure layout plumbing on a tiny 1-channel signal; shifting a 1-lane-wide
    # value 25 times in-kernel would be far slower.
    xp = jnp.pad(x, ((0, 0), (CONV_PAD, CONV_PAD)))            # 'same' pad
    patches1 = jnp.stack([xp[:, k:k + W_IN] for k in range(CONV_K)], axis=-1)
    w1 = params["conv1_w"].reshape(CONV_K * 1, -1)             # (25, 32)
    p1 = conv_relu_pool_layer(patches1, w1, params["conv1_b"],
                              n_taps=1, Wc=W_IN)               # (N, 262, 32)

    # layer_2: im2col happens inside the kernel (25 shifted slices folded into
    # one K=800 contraction); only the +/-12 'same' width pad is done here.
    # TODO(synk): the width pad could also be produced in-kernel with a manual
    # DMA (memory_space=pl.ANY) input to save this small HBM pass.
    p1p = jnp.pad(p1, ((0, 0), (CONV_PAD, CONV_PAD), (0, 0)))  # (N, 286, 32)
    w2 = params["conv2_w"].reshape(CONV_K * p1.shape[2], -1)   # (800, 64)
    p2 = conv_relu_pool_layer(p1p, w2, params["conv2_b"],
                              n_taps=CONV_K, Wc=W_P1)          # (N, 88, 64)

    # Flatten in PyTorch NCHW order: (N, 64, 1, 88) -> (N, 64*88).
    f = jnp.transpose(p2, (0, 2, 1)).reshape(N, p2.shape[2] * p2.shape[1])
    # TODO(synk): Dropout layers omitted (identity in eval-mode forward).
    return fc_head(f, params["fc1_w"], params["fc1_b"],
                   params["fc2_w"], params["fc2_b"])


def init_params(key, label_num):
    ks = jax.random.split(key, 8)
    return {
        "conv1_w": jax.random.normal(ks[0], (CONV_K, 1, 32), jnp.float32) * 0.05,
        "conv1_b": jax.random.normal(ks[1], (32,), jnp.float32) * 0.05,
        "conv2_w": jax.random.normal(ks[2], (CONV_K, 32, 64), jnp.float32) * 0.05,
        "conv2_b": jax.random.normal(ks[3], (64,), jnp.float32) * 0.05,
        # fc1 is HBM-bound: store its weights in bf16 so the kernel streams
        # half the bytes (a PyTorch port would cast once offline).
        "fc1_w": (jax.random.normal(ks[4], (W_P2 * 64, 1024), jnp.float32)
                  * 0.02).astype(jnp.bfloat16),
        "fc1_b": jax.random.normal(ks[5], (1024,), jnp.float32) * 0.02,
        "fc2_w": jax.random.normal(ks[6], (1024, label_num), jnp.float32) * 0.02,
        "fc2_b": jax.random.normal(ks[7], (label_num,), jnp.float32) * 0.02,
    }


if __name__ == "__main__":
    label_num = 10
    key = jax.random.PRNGKey(0)
    kx, kp = jax.random.split(key)
    params = init_params(kp, label_num)
    # Width must be 784 so two (pool k=3, s=3, pad=1) stages give 88, matching
    # the PyTorch module's fc1 input of 88 * 64.
    x = jax.random.normal(kx, (2, 1, 1, W_IN), jnp.float32)

    fwd = jax.jit(one_cnnc_forward)
    out = jax.block_until_ready(fwd(x, params))
    assert out.shape == (2, label_num), out.shape
    assert jnp.all(jnp.isfinite(out))
    print("KERNEL_OK")
</pallas_src>

<mosaic_0001>
module attributes {stable_mosaic.version = 11 : i64} {
  func.func @_conv_relu_pool_kernel(%arg0: i32, %arg1: memref<2x784x25xf32, #tpu.memory_space<vmem>>, %arg2: memref<25x32xf32, #tpu.memory_space<vmem>>, %arg3: memref<1x32xf32, #tpu.memory_space<vmem>>, %arg4: memref<2x262x32xf32, #tpu.memory_space<vmem>>, %arg5: memref<794x32xf32, #tpu.memory_space<vmem>>) attributes {dimension_semantics = [#tpu.dimension_semantics<parallel>], iteration_bounds = array<i64: 1>, scalar_prefetch = 0 : i64, scratch_operands = 1 : i64, tpu.core_type = #tpu.core_type<tc>, window_params = [{transform_indices = @transform_0, window_bounds = array<i64: 2, 784, 25>}, {pipeline_mode = #tpu.pipeline_mode<synchronous>, transform_indices = @transform_1, window_bounds = array<i64: 25, 32>}, {pipeline_mode = #tpu.pipeline_mode<synchronous>, transform_indices = @transform_2, window_bounds = array<i64: 1, 32>}, {transform_indices = @transform_3, window_bounds = array<i64: 2, 262, 32>}]} {
    %cst = arith.constant 0.000000e+00 : f32
    %0 = vector.broadcast %cst : f32 to vector<794x32xf32>
    %c0 = arith.constant 0 : index
    %c0_0 = arith.constant 0 : index
    %1 = vector.load %arg5[%c0, %c0_0] : memref<794x32xf32, #tpu.memory_space<vmem>>, vector<794x32xf32>
    tpu.vector_store %arg5[%c0, %c0_0], %0 {strides = array<i32>} : memref<794x32xf32, #tpu.memory_space<vmem>>, vector<794x32xf32>,
    %c0_1 = arith.constant 0 : index
    %c0_2 = arith.constant 0 : index
    %2 = vector.load %arg2[%c0_1, %c0_2] : memref<25x32xf32, #tpu.memory_space<vmem>>, vector<25x32xf32>
    %c0_3 = arith.constant 0 : index
    %c0_4 = arith.constant 0 : index
    %3 = vector.load %arg3[%c0_3, %c0_4] : memref<1x32xf32, #tpu.memory_space<vmem>>, vector<1x32xf32>
    %c0_i32 = arith.constant 0 : i32
    %c2_i32 = arith.constant 2 : i32
    %4 = arith.addi %c0_i32, %c2_i32 : i32
    %c1_i32 = arith.constant 1 : i32
    scf.for %arg6 = %c0_i32 to %4 step %c1_i32  : i32 {
      %c1_i32_6 = arith.constant 1 : i32
      %5 = arith.muli %arg6, %c1_i32_6 : i32
      %c0_i32_7 = arith.constant 0 : i32
      %6 = arith.addi %c0_i32_7, %5 : i32
      %7 = arith.index_cast %6 : i32 to index
      %c0_8 = arith.constant 0 : index
      %c0_9 = arith.constant 0 : index
      %8 = vector.load %arg1[%7, %c0_8, %c0_9] : memref<2x784x25xf32, #tpu.memory_space<vmem>>, vector<1x784x25xf32>
      %9 = vector.shape_cast %8 : vector<1x784x25xf32> to vector<784x25xf32>
      %cst_10 = arith.constant dense<0.000000e+00> : vector<784x32xf32>
      %10 = tpu.matmul %9, %2, %cst_10 {dimension_numbers = #tpu.dot_dimension_numbers<[1], [0], [0], [1], [0, 0, 1, 1], [], []>} : vector<784x25xf32>, vector<25x32xf32>, vector<784x32xf32> -> vector<784x32xf32>
      %11 = vector.broadcast %3 : vector<1x32xf32> to vector<784x32xf32>
      %12 = arith.addf %10, %11 : vector<784x32xf32>
      %cst_11 = arith.constant 0.000000e+00 : f32
      %13 = vector.broadcast %cst_11 : f32 to vector<784x32xf32>
      %14 = arith.maximumf %12, %13 : vector<784x32xf32>
      %c2 = arith.constant 2 : index
      %c0_12 = arith.constant 0 : index
      %15 = vector.load %arg5[%c2, %c0_12] : memref<794x32xf32, #tpu.memory_space<vmem>>, vector<784x32xf32>
      tpu.vector_store %arg5[%c2, %c0_12], %14 {strides = array<i32>} : memref<794x32xf32, #tpu.memory_space<vmem>>, vector<784x32xf32>,
      %c1 = arith.constant 1 : index
      %c0_13 = arith.constant 0 : index
      %16 = tpu.strided_load %arg5[%c1, %c0_13] {strides = array<i32: 3, 1>} : memref<794x32xf32, #tpu.memory_space<vmem>>, vector<262x32xf32>
      %c2_14 = arith.constant 2 : index
      %c0_15 = arith.constant 0 : index
      %17 = tpu.strided_load %arg5[%c2_14, %c0_15] {strides = array<i32: 3, 1>} : memref<794x32xf32, #tpu.memory_space<vmem>>, vector<262x32xf32>
      %c3 = arith.constant 3 : index
      %c0_16 = arith.constant 0 : index
      %18 = tpu.strided_load %arg5[%c3, %c0_16] {strides = array<i32: 3, 1>} : memref<794x32xf32, #tpu.memory_space<vmem>>, vector<262x32xf32>
      %19 = arith.maximumf %16, %17 : vector<262x32xf32>
      %20 = arith.maximumf %19, %18 : vector<262x32xf32>
      %21 = arith.index_cast %6 : i32 to index
      %c0_17 = arith.constant 0 : index
      %c0_18 = arith.constant 0 : index
      %22 = vector.load %arg4[%21, %c0_17, %c0_18] : memref<2x262x32xf32, #tpu.memory_space<vmem>>, vector<1x262x32xf32>
      %23 = vector.shape_cast %22 : vector<1x262x32xf32> to vector<262x32xf32>
      %24 = vector.shape_cast %20 : vector<262x32xf32> to vector<1x262x32xf32>
      tpu.vector_store %arg4[%21, %c0_17, %c0_18], %24 {strides = array<i32>} : memref<2x262x32xf32, #tpu.memory_space<vmem>>, vector<1x262x32xf32>,
    }
    %c2_i32_5 = arith.constant 2 : i32
    return
  }
  func.func @transform_0(%arg0: i32) -> (i32, i32, i32) {
    %c0_i32 = arith.constant 0 : i32
    %c0_i32_0 = arith.constant 0 : i32
    %c0_i32_1 = arith.constant 0 : i32
    return %arg0, %c0_i32, %c0_i32_0 : i32, i32, i32
  }
  func.func @transform_1(%arg0: i32) -> (i32, i32) {
    %c0_i32 = arith.constant 0 : i32
    %c0_i32_0 = arith.constant 0 : i32
    %c0_i32_1 = arith.constant 0 : i32
    return %c0_i32, %c0_i32_0 : i32, i32
  }
  func.func @transform_2(%arg0: i32) -> (i32, i32) {
    %c0_i32 = arith.constant 0 : i32
    %c0_i32_0 = arith.constant 0 : i32
    %c0_i32_1 = arith.constant 0 : i32
    return %c0_i32, %c0_i32_0 : i32, i32
  }
  func.func @transform_3(%arg0: i32) -> (i32, i32, i32) {
    %c0_i32 = arith.constant 0 : i32
    %c0_i32_0 = arith.constant 0 : i32
    %c0_i32_1 = arith.constant 0 : i32
    return %arg0, %c0_i32, %c0_i32_0 : i32, i32, i32
  }
}

module attributes {stable_mosaic.version = 11 : i64} {
  func.func @_conv_relu_pool_kernel(%arg0: i32, %arg1: memref<2x286x32xf32, #tpu.memory_space<vmem>>, %arg2: memref<800x64xf32, #tpu.memory_space<vmem>>, %arg3: memref<1x64xf32, #tpu.memory_space<vmem>>, %arg4: memref<2x88x64xf32, #tpu.memory_space<vmem>>, %arg5: memref<272x64xf32, #tpu.memory_space<vmem>>) attributes {dimension_semantics = [#tpu.dimension_semantics<parallel>], iteration_bounds = array<i64: 1>, scalar_prefetch = 0 : i64, scratch_operands = 1 : i64, tpu.core_type = #tpu.core_type<tc>, window_params = [{transform_indices = @transform_0, window_bounds = array<i64: 2, 286, 32>}, {pipeline_mode = #tpu.pipeline_mode<synchronous>, transform_indices = @transform_1, window_bounds = array<i64: 800, 64>}, {pipeline_mode = #tpu.pipeline_mode<synchronous>, transform_indices = @transform_2, window_bounds = array<i64: 1, 64>}, {transform_indices = @transform_3, window_bounds = array<i64: 2, 88, 64>}]} {
    %cst = arith.constant 0.000000e+00 : f32
    %0 = vector.broadcast %cst : f32 to vector<272x64xf32>
    %c0 = arith.constant 0 : index
    %c0_0 = arith.constant 0 : index
    %1 = vector.load %arg5[%c0, %c0_0] : memref<272x64xf32, #tpu.memory_space<vmem>>, vector<272x64xf32>
    tpu.vector_store %arg5[%c0, %c0_0], %0 {strides = array<i32>} : memref<272x64xf32, #tpu.memory_space<vmem>>, vector<272x64xf32>,
    %c0_1 = arith.constant 0 : index
    %c0_2 = arith.constant 0 : index
    %2 = vector.load %arg2[%c0_1, %c0_2] : memref<800x64xf32, #tpu.memory_space<vmem>>, vector<800x64xf32>
    %c0_3 = arith.constant 0 : index
    %c0_4 = arith.constant 0 : index
    %3 = vector.load %arg3[%c0_3, %c0_4] : memref<1x64xf32, #tpu.memory_space<vmem>>, vector<1x64xf32>
    %c0_i32 = arith.constant 0 : i32
    %c2_i32 = arith.constant 2 : i32
    %4 = arith.addi %c0_i32, %c2_i32 : i32
    %c1_i32 = arith.constant 1 : i32
    scf.for %arg6 = %c0_i32 to %4 step %c1_i32  : i32 {
      %c1_i32_6 = arith.constant 1 : i32
      %5 = arith.muli %arg6, %c1_i32_6 : i32
      %c0_i32_7 = arith.constant 0 : i32
      %6 = arith.addi %c0_i32_7, %5 : i32
      %7 = arith.index_cast %6 : i32 to index
      %c0_8 = arith.constant 0 : index
      %c0_9 = arith.constant 0 : index
      %8 = vector.load %arg1[%7, %c0_8, %c0_9] : memref<2x286x32xf32, #tpu.memory_space<vmem>>, vector<1x262x32xf32>
      %9 = vector.shape_cast %8 : vector<1x262x32xf32> to vector<262x32xf32>
      %10 = arith.index_cast %6 : i32 to index
      %c1 = arith.constant 1 : index
      %c0_10 = arith.constant 0 : index
      %11 = vector.load %arg1[%10, %c1, %c0_10] : memref<2x286x32xf32, #tpu.memory_space<vmem>>, vector<1x262x32xf32>
      %12 = vector.shape_cast %11 : vector<1x262x32xf32> to vector<262x32xf32>
      %13 = arith.index_cast %6 : i32 to index
      %c2 = arith.constant 2 : index
      %c0_11 = arith.constant 0 : index
      %14 = vector.load %arg1[%13, %c2, %c0_11] : memref<2x286x32xf32, #tpu.memory_space<vmem>>, vector<1x262x32xf32>
      %15 = vector.shape_cast %14 : vector<1x262x32xf32> to vector<262x32xf32>
      %16 = arith.index_cast %6 : i32 to index
      %c3 = arith.constant 3 : index
      %c0_12 = arith.constant 0 : index
      %17 = vector.load %arg1[%16, %c3, %c0_12] : memref<2x286x32xf32, #tpu.memory_space<vmem>>, vector<1x262x32xf32>
      %18 = vector.shape_cast %17 : vector<1x262x32xf32> to vector<262x32xf32>
      %19 = arith.index_cast %6 : i32 to index
      %c4 = arith.constant 4 : index
      %c0_13 = arith.constant 0 : index
      %20 = vector.load %arg1[%19, %c4, %c0_13] : memref<2x286x32xf32, #tpu.memory_space<vmem>>, vector<1x262x32xf32>
      %21 = vector.shape_cast %20 : vector<1x262x32xf32> to vector<262x32xf32>
      %22 = arith.index_cast %6 : i32 to index
      %c5 = arith.constant 5 : index
      %c0_14 = arith.constant 0 : index
      %23 = vector.load %arg1[%22, %c5, %c0_14] : memref<2x286x32xf32, #tpu.memory_space<vmem>>, vector<1x262x32xf32>
      %24 = vector.shape_cast %23 : vector<1x262x32xf32> to vector<262x32xf32>
      %25 = arith.index_cast %6 : i32 to index
      %c6 = arith.constant 6 : index
      %c0_15 = arith.constant 0 : index
      %26 = vector.load %arg1[%25, %c6, %c0_15] : memref<2x286x32xf32, #tpu.memory_space<vmem>>, vector<1x262x32xf32>
      %27 = vector.shape_cast %26 : vector<1x262x32xf32> to vector<262x32xf32>
      %28 = arith.index_cast %6 : i32 to index
      %c7 = arith.constant 7 : index
      %c0_16 = arith.constant 0 : index
      %29 = vector.load %arg1[%28, %c7, %c0_16] : memref<2x286x32xf32, #tpu.memory_space<vmem>>, vector<1x262x32xf32>
      %30 = vector.shape_cast %29 : vector<1x262x32xf32> to vector<262x32xf32>
      %31 = arith.index_cast %6 : i32 to index
      %c8 = arith.constant 8 : index
      %c0_17 = arith.constant 0 : index
      %32 = vector.load %arg1[%31, %c8, %c0_17] : memref<2x286x32xf32, #tpu.memory_space<vmem>>, vector<1x262x32xf32>
      %33 = vector.shape_cast %32 : vector<1x262x32xf32> to vector<262x32xf32>
      %34 = arith.index_cast %6 : i32 to index
      %c9 = arith.constant 9 : index
      %c0_18 = arith.constant 0 : index
      %35 = vector.load %arg1[%34, %c9, %c0_18] : memref<2x286x32xf32, #tpu.memory_space<vmem>>, vector<1x262x32xf32>
      %36 = vector.shape_cast %35 : vector<1x262x32xf32> to vector<262x32xf32>
      %37 = arith.index_cast %6 : i32 to index
      %c10 = arith.constant 10 : index
      %c0_19 = arith.constant 0 : index
      %38 = vector.load %arg1[%37, %c10, %c0_19] : memref<2x286x32xf32, #tpu.memory_space<vmem>>, vector<1x262x32xf32>
      %39 = vector.shape_cast %38 : vector<1x262x32xf32> to vector<262x32xf32>
      %40 = arith.index_cast %6 : i32 to index
      %c11 = arith.constant 11 : index
      %c0_20 = arith.constant 0 : index
      %41 = vector.load %arg1[%40, %c11, %c0_20] : memref<2x286x32xf32, #tpu.memory_space<vmem>>, vector<1x262x32xf32>
      %42 = vector.shape_cast %41 : vector<1x262x32xf32> to vector<262x32xf32>
      %43 = arith.index_cast %6 : i32 to index
      %c12 = arith.constant 12 : index
      %c0_21 = arith.constant 0 : index
      %44 = vector.load %arg1[%43, %c12, %c0_21] : memref<2x286x32xf32, #tpu.memory_space<vmem>>, vector<1x262x32xf32>
      %45 = vector.shape_cast %44 : vector<1x262x32xf32> to vector<262x32xf32>
      %46 = arith.index_cast %6 : i32 to index
      %c13 = arith.constant 13 : index
      %c0_22 = arith.constant 0 : index
      %47 = vector.load %arg1[%46, %c13, %c0_22] : memref<2x286x32xf32, #tpu.memory_space<vmem>>, vector<1x262x32xf32>
      %48 = vector.shape_cast %47 : vector<1x262x32xf32> to vector<262x32xf32>
      %49 = arith.index_cast %6 : i32 to index
      %c14 = arith.constant 14 : index
      %c0_23 = arith.constant 0 : index
      %50 = vector.load %arg1[%49, %c14, %c0_23] : memref<2x286x32xf32, #tpu.memory_space<vmem>>, vector<1x262x32xf32>
      %51 = vector.shape_cast %50 : vector<1x262x32xf32> to vector<262x32xf32>
      %52 = arith.index_cast %6 : i32 to index
      %c15 = arith.constant 15 : index
      %c0_24 = arith.constant 0 : index
      %53 = vector.load %arg1[%52, %c15, %c0_24] : memref<2x286x32xf32, #tpu.memory_space<vmem>>, vector<1x262x32xf32>
      %54 = vector.shape_cast %53 : vector<1x262x32xf32> to vector<262x32xf32>
      %55 = arith.index_cast %6 : i32 to index
      %c16 = arith.constant 16 : index
      %c0_25 = arith.constant 0 : index
      %56 = vector.load %arg1[%55, %c16, %c0_25] : memref<2x286x32xf32, #tpu.memory_space<vmem>>, vector<1x262x32xf32>
      %57 = vector.shape_cast %56 : vector<1x262x32xf32> to vector<262x32xf32>
      %58 = arith.index_cast %6 : i32 to index
      %c17 = arith.constant 17 : index
      %c0_26 = arith.constant 0 : index
      %59 = vector.load %arg1[%58, %c17, %c0_26] : memref<2x286x32xf32, #tpu.memory_space<vmem>>, vector<1x262x32xf32>
      %60 = vector.shape_cast %59 : vector<1x262x32xf32> to vector<262x32xf32>
      %61 = arith.index_cast %6 : i32 to index
      %c18 = arith.constant 18 : index
      %c0_27 = arith.constant 0 : index
      %62 = vector.load %arg1[%61, %c18, %c0_27] : memref<2x286x32xf32, #tpu.memory_space<vmem>>, vector<1x262x32xf32>
      %63 = vector.shape_cast %62 : vector<1x262x32xf32> to vector<262x32xf32>
      %64 = arith.index_cast %6 : i32 to index
      %c19 = arith.constant 19 : index
      %c0_28 = arith.constant 0 : index
      %65 = vector.load %arg1[%64, %c19, %c0_28] : memref<2x286x32xf32, #tpu.memory_space<vmem>>, vector<1x262x32xf32>
      %66 = vector.shape_cast %65 : vector<1x262x32xf32> to vector<262x32xf32>
      %67 = arith.index_cast %6 : i32 to index
      %c20 = arith.constant 20 : index
      %c0_29 = arith.constant 0 : index
      %68 = vector.load %arg1[%67, %c20, %c0_29] : memref<2x286x32xf32, #tpu.memory_space<vmem>>, vector<1x262x32xf32>
      %69 = vector.shape_cast %68 : vector<1x262x32xf32> to vector<262x32xf32>
      %70 = arith.index_cast %6 : i32 to index
      %c21 = arith.constant 21 : index
      %c0_30 = arith.constant 0 : index
      %71 = vector.load %arg1[%70, %c21, %c0_30] : memref<2x286x32xf32, #tpu.memory_space<vmem>>, vector<1x262x32xf32>
      %72 = vector.shape_cast %71 : vector<1x262x32xf32> to vector<262x32xf32>
      %73 = arith.index_cast %6 : i32 to index
      %c22 = arith.constant 22 : index
      %c0_31 = arith.constant 0 : index
      %74 = vector.load %arg1[%73, %c22, %c0_31] : memref<2x286x32xf32, #tpu.memory_space<vmem>>, vector<1x262x32xf32>
      %75 = vector.shape_cast %74 : vector<1x262x32xf32> to vector<262x32xf32>
      %76 = arith.index_cast %6 : i32 to index
      %c23 = arith.constant 23 : index
      %c0_32 = arith.constant 0 : index
      %77 = vector.load %arg1[%76, %c23, %c0_32] : memref<2x286x32xf32, #tpu.memory_space<vmem>>, vector<1x262x32xf32>
      %78 = vector.shape_cast %77 : vector<1x262x32xf32> to vector<262x32xf32>
      %79 = arith.index_cast %6 : i32 to index
      %c24 = arith.constant 24 : index
      %c0_33 = arith.constant 0 : index
      %80 = vector.load %arg1[%79, %c24, %c0_33] : memref<2x286x32xf32, #tpu.memory_space<vmem>>, vector<1x262x32xf32>
      %81 = vector.shape_cast %80 : vector<1x262x32xf32> to vector<262x32xf32>
      %82 = tpu.concatenate %9, %12, %15, %18, %21, %24, %27, %30, %33, %36, %39, %42, %45, %48, %51, %54 in 1 : vector<262x32xf32>, vector<262x32xf32>, vector<262x32xf32>, vector<262x32xf32>, vector<262x32xf32>, vector<262x32xf32>, vector<262x32xf32>, vector<262x32xf32>, vector<262x32xf32>, vector<262x32xf32>, vector<262x32xf32>, vector<262x32xf32>, vector<262x32xf32>, vector<262x32xf32>, vector<262x32xf32>, vector<262x32xf32> -> vector<262x512xf32>
      %83 = tpu.concatenate %57, %60, %63, %66, %69, %72, %75, %78, %81 in 1 : vector<262x32xf32>, vector<262x32xf32>, vector<262x32xf32>, vector<262x32xf32>, vector<262x32xf32>, vector<262x32xf32>, vector<262x32xf32>, vector<262x32xf32>, vector<262x32xf32> -> vector<262x288xf32>
      %84 = tpu.concatenate %82, %83 in 1 : vector<262x512xf32>, vector<262x288xf32> -> vector<262x800xf32>
      %cst_34 = arith.constant dense<0.000000e+00> : vector<262x64xf32>
      %85 = tpu.matmul %84, %2, %cst_34 {dimension_numbers = #tpu.dot_dimension_numbers<[1], [0], [0], [1], [0, 0, 1, 1], [], []>} : vector<262x800xf32>, vector<800x64xf32>, vector<262x64xf32> -> vector<262x64xf32>
      %86 = vector.broadcast %3 : vector<1x64xf32> to vector<262x64xf32>
      %87 = arith.addf %85, %86 : vector<262x64xf32>
      %cst_35 = arith.constant 0.000000e+00 : f32
      %88 = vector.broadcast %cst_35 : f32 to vector<262x64xf32>
      %89 = arith.maximumf %87, %88 : vector<262x64xf32>
      %c2_36 = arith.constant 2 : index
      %c0_37 = arith.constant 0 : index
      %90 = vector.load %arg5[%c2_36, %c0_37] : memref<272x64xf32, #tpu.memory_space<vmem>>, vector<262x64xf32>
      tpu.vector_store %arg5[%c2_36, %c0_37], %89 {strides = array<i32>} : memref<272x64xf32, #tpu.memory_space<vmem>>, vector<262x64xf32>,
      %c1_38 = arith.constant 1 : index
      %c0_39 = arith.constant 0 : index
      %91 = tpu.strided_load %arg5[%c1_38, %c0_39] {strides = array<i32: 3, 1>} : memref<272x64xf32, #tpu.memory_space<vmem>>, vector<88x64xf32>
      %c2_40 = arith.constant 2 : index
      %c0_41 = arith.constant 0 : index
      %92 = tpu.strided_load %arg5[%c2_40, %c0_41] {strides = array<i32: 3, 1>} : memref<272x64xf32, #tpu.memory_space<vmem>>, vector<88x64xf32>
      %c3_42 = arith.constant 3 : index
      %c0_43 = arith.constant 0 : index
      %93 = tpu.strided_load %arg5[%c3_42, %c0_43] {strides = array<i32: 3, 1>} : memref<272x64xf32, #tpu.memory_space<vmem>>, vector<88x64xf32>
      %94 = arith.maximumf %91, %92 : vector<88x64xf32>
      %95 = arith.maximumf %94, %93 : vector<88x64xf32>
      %96 = arith.index_cast %6 : i32 to index
      %c0_44 = arith.constant 0 : index
      %c0_45 = arith.constant 0 : index
      %97 = vector.load %arg4[%96, %c0_44, %c0_45] : memref<2x88x64xf32, #tpu.memory_space<vmem>>, vector<1x88x64xf32>
      %98 = vector.shape_cast %97 : vector<1x88x64xf32> to vector<88x64xf32>
      %99 = vector.shape_cast %95 : vector<88x64xf32> to vector<1x88x64xf32>
      tpu.vector_store %arg4[%96, %c0_44, %c0_45], %99 {strides = array<i32>} : memref<2x88x64xf32, #tpu.memory_space<vmem>>, vector<1x88x64xf32>,
    }
    %c2_i32_5 = arith.constant 2 : i32
    return
  }
  func.func @transform_0(%arg0: i32) -> (i32, i32, i32) {
    %c0_i32 = arith.constant 0 : i32
    %c0_i32_0 = arith.constant 0 : i32
    %c0_i32_1 = arith.constant 0 : i32
    return %arg0, %c0_i32, %c0_i32_0 : i32, i32, i32
  }
  func.func @transform_1(%arg0: i32) -> (i32, i32) {
    %c0_i32 = arith.constant 0 : i32
    %c0_i32_0 = arith.constant 0 : i32
    %c0_i32_1 = arith.constant 0 : i32
    return %c0_i32, %c0_i32_0 : i32, i32
  }
  func.func @transform_2(%arg0: i32) -> (i32, i32) {
    %c0_i32 = arith.constant 0 : i32
    %c0_i32_0 = arith.constant 0 : i32
    %c0_i32_1 = arith.constant 0 : i32
    return %c0_i32, %c0_i32_0 : i32, i32
  }
  func.func @transform_3(%arg0: i32) -> (i32, i32, i32) {
    %c0_i32 = arith.constant 0 : i32
    %c0_i32_0 = arith.constant 0 : i32
    %c0_i32_1 = arith.constant 0 : i32
    return %arg0, %c0_i32, %c0_i32_0 : i32, i32, i32
  }
}

module attributes {stable_mosaic.version = 11 : i64} {
  func.func @_fc_kernel(%arg0: i32, %arg1: memref<2x1408xf32, #tpu.memory_space<vmem>>, %arg2: memref<1408x1024xbf16, #tpu.memory_space<vmem>>, %arg3: memref<1x1024xf32, #tpu.memory_space<vmem>>, %arg4: memref<1024x128xf32, #tpu.memory_space<vmem>>, %arg5: memref<1x128xf32, #tpu.memory_space<vmem>>, %arg6: memref<2x128xf32, #tpu.memory_space<vmem>>, %arg7: memref<2x1024xf32, #tpu.memory_space<vmem>>) attributes {dimension_semantics = [#tpu.dimension_semantics<arbitrary>], iteration_bounds = array<i64: 4>, scalar_prefetch = 0 : i64, scratch_operands = 1 : i64, tpu.core_type = #tpu.core_type<tc>, window_params = [{transform_indices = @transform_0, window_bounds = array<i64: 2, 1408>}, {transform_indices = @transform_1, window_bounds = array<i64: 1408, 1024>}, {pipeline_mode = #tpu.pipeline_mode<synchronous>, transform_indices = @transform_2, window_bounds = array<i64: 1, 1024>}, {pipeline_mode = #tpu.pipeline_mode<synchronous>, transform_indices = @transform_3, window_bounds = array<i64: 1024, 128>}, {pipeline_mode = #tpu.pipeline_mode<synchronous>, transform_indices = @transform_4, window_bounds = array<i64: 1, 128>}, {pipeline_mode = #tpu.pipeline_mode<synchronous>, transform_indices = @transform_5, window_bounds = array<i64: 2, 128>}]} {
    %c0_i32 = arith.constant 0 : i32
    %0 = arith.cmpi eq, %arg0, %c0_i32 : i32
    %1 = arith.extui %0 : i1 to i32
    %c0_i32_0 = arith.constant 0 : i32
    %2 = arith.cmpi ne, %1, %c0_i32_0 : i32
    scf.if %2 {
      %cst_9 = arith.constant 0.000000e+00 : f32
      %13 = vector.broadcast %cst_9 : f32 to vector<2x1024xf32>
      %c0_10 = arith.constant 0 : index
      %c0_11 = arith.constant 0 : index
      %14 = vector.load %arg7[%c0_10, %c0_11] : memref<2x1024xf32, #tpu.memory_space<vmem>>, vector<2x1024xf32>
      tpu.vector_store %arg7[%c0_10, %c0_11], %13 {strides = array<i32>} : memref<2x1024xf32, #tpu.memory_space<vmem>>, vector<2x1024xf32>,
    } else {
    }
    %c0 = arith.constant 0 : index
    %c0_1 = arith.constant 0 : index
    %3 = vector.load %arg2[%c0, %c0_1] : memref<1408x1024xbf16, #tpu.memory_space<vmem>>, vector<1408x1024xbf16>
    %c0_2 = arith.constant 0 : index
    %c0_3 = arith.constant 0 : index
    %4 = vector.load %arg1[%c0_2, %c0_3] : memref<2x1408xf32, #tpu.memory_space<vmem>>, vector<2x1408xf32>
    %5 = arith.truncf %4 : vector<2x1408xf32> to vector<2x1408xbf16>
    %c0_4 = arith.constant 0 : index
    %c0_5 = arith.constant 0 : index
    %6 = vector.load %arg7[%c0_4, %c0_5] : memref<2x1024xf32, #tpu.memory_space<vmem>>, vector<2x1024xf32>
    %cst = arith.constant dense<0.000000e+00> : vector<2x1024xf32>
    %7 = tpu.matmul %5, %3, %cst {dimension_numbers = #tpu.dot_dimension_numbers<[1], [0], [0], [1], [0, 0, 1, 1], [], []>} : vector<2x1408xbf16>, vector<1408x1024xbf16>, vector<2x1024xf32> -> vector<2x1024xf32>
    %8 = arith.addf %6, %7 : vector<2x1024xf32>
    %c0_6 = arith.constant 0 : index
    %c0_7 = arith.constant 0 : index
    %9 = vector.load %arg7[%c0_6, %c0_7] : memref<2x1024xf32, #tpu.memory_space<vmem>>, vector<2x1024xf32>
    tpu.vector_store %arg7[%c0_6, %c0_7], %8 {strides = array<i32>} : memref<2x1024xf32, #tpu.memory_space<vmem>>, vector<2x1024xf32>,
    %c3_i32 = arith.constant 3 : i32
    %10 = arith.cmpi eq, %arg0, %c3_i32 : i32
    %11 = arith.extui %10 : i1 to i32
    %c0_i32_8 = arith.constant 0 : i32
    %12 = arith.cmpi ne, %11, %c0_i32_8 : i32
    scf.if %12 {
      %c0_9 = arith.constant 0 : index
      %c0_10 = arith.constant 0 : index
      %13 = vector.load %arg7[%c0_9, %c0_10] : memref<2x1024xf32, #tpu.memory_space<vmem>>, vector<2x1024xf32>
      %c0_11 = arith.constant 0 : index
      %c0_12 = arith.constant 0 : index
      %14 = vector.load %arg3[%c0_11, %c0_12] : memref<1x1024xf32, #tpu.memory_space<vmem>>, vector<1x1024xf32>
      %15 = vector.broadcast %14 : vector<1x1024xf32> to vector<2x1024xf32>
      %16 = arith.addf %13, %15 : vector<2x1024xf32>
      %c0_13 = arith.constant 0 : index
      %c0_14 = arith.constant 0 : index
      %17 = vector.load %arg4[%c0_13, %c0_14] : memref<1024x128xf32, #tpu.memory_space<vmem>>, vector<1024x128xf32>
      %cst_15 = arith.constant dense<0.000000e+00> : vector<2x128xf32>
      %18 = tpu.matmul %16, %17, %cst_15 {dimension_numbers = #tpu.dot_dimension_numbers<[1], [0], [0], [1], [0, 0, 1, 1], [], []>} : vector<2x1024xf32>, vector<1024x128xf32>, vector<2x128xf32> -> vector<2x128xf32>
      %c0_16 = arith.constant 0 : index
      %c0_17 = arith.constant 0 : index
      %19 = vector.load %arg5[%c0_16, %c0_17] : memref<1x128xf32, #tpu.memory_space<vmem>>, vector<1x128xf32>
      %20 = vector.broadcast %19 : vector<1x128xf32> to vector<2x128xf32>
      %21 = arith.addf %18, %20 : vector<2x128xf32>
      %c0_18 = arith.constant 0 : index
      %c0_19 = arith.constant 0 : index
      %22 = vector.load %arg6[%c0_18, %c0_19] : memref<2x128xf32, #tpu.memory_space<vmem>>, vector<2x128xf32>
      tpu.vector_store %arg6[%c0_18, %c0_19], %21 {strides = array<i32>} : memref<2x128xf32, #tpu.memory_space<vmem>>, vector<2x128xf32>,
    } else {
    }
    return
  }
  func.func @transform_0(%arg0: i32) -> (i32, i32) {
    %c0_i32 = arith.constant 0 : i32
    %c0_i32_0 = arith.constant 0 : i32
    return %c0_i32, %arg0 : i32, i32
  }
  func.func @transform_1(%arg0: i32) -> (i32, i32) {
    %c0_i32 = arith.constant 0 : i32
    %c0_i32_0 = arith.constant 0 : i32
    return %arg0, %c0_i32 : i32, i32
  }
  func.func @transform_2(%arg0: i32) -> (i32, i32) {
    %c0_i32 = arith.constant 0 : i32
    %c0_i32_0 = arith.constant 0 : i32
    %c0_i32_1 = arith.constant 0 : i32
    return %c0_i32, %c0_i32_0 : i32, i32
  }
  func.func @transform_3(%arg0: i32) -> (i32, i32) {
    %c0_i32 = arith.constant 0 : i32
    %c0_i32_0 = arith.constant 0 : i32
    %c0_i32_1 = arith.constant 0 : i32
    return %c0_i32, %c0_i32_0 : i32, i32
  }
  func.func @transform_4(%arg0: i32) -> (i32, i32) {
    %c0_i32 = arith.constant 0 : i32
    %c0_i32_0 = arith.constant 0 : i32
    %c0_i32_1 = arith.constant 0 : i32
    return %c0_i32, %c0_i32_0 : i32, i32
  }
  func.func @transform_5(%arg0: i32) -> (i32, i32) {
    %c0_i32 = arith.constant 0 : i32
    %c0_i32_0 = arith.constant 0 : i32
    %c0_i32_1 = arith.constant 0 : i32
    return %c0_i32, %c0_i32_0 : i32, i32
  }
}

</mosaic_0001>

<bundles_post_ra>
// kernel: one_cnnc_forward.3
= control target key start
LH: loop header
LB: loop body
LE: loop exit
PB: predicated region body
PF: predicated region fallthrough
CT: control target
= control target key end

     0   :  { %8 = vsyncpa [#allocation4], 0  ;;  %s2023_s12 = smov [#allocation3]   ;;  %s2759_s0 = inlined_call_operand.vmem [shape: f32[2,784,25], index: 0, kind: input, shape index: {}]   ;;  %s2760_s1 = inlined_call_operand.vmem [shape: f32[25,32], index: 1, kind: input, shape index: {}]   ;;  %s2761_s2 = inlined_call_operand.hbm [shape: f32[1,32], index: 2, kind: input, shape index: {}]   ;;  %s2762_s3 = inlined_call_operand.vmem [shape: f32[2,262,32], index: 3, kind: output, shape index: {}]  }
   0x1   :  { %s19_s13 = sshll.u32 %s2023_s12, 4  ;;  %s1991_s16 = scalar_lea.hbm %s2761_s2, 16  ;;  %s20_s13 = int_to_ptr.vmem [resolvable:$true] %s19_s13 }
   0x2   :  { %p1992_p0 = scmp.ne.s32.totalorder %s2761_s2, %s1991_s16  ;;  %p1995_p1 = scmp.lt.u32.totalorder %s1991_s16, %s2761_s2 }
   0x4   :  { %p1997_p2 = pnand %p1995_p1, %p1992_p0 }
   0x6   :  { %2000 = shalt.err (!%p1997_p2)
}
   0x7   :  { %s2001_s21 = scalar_lea.vmem %s20_s13, 16  ;;  %s2005_s22 = scalar_lea.vmem %s20_s13, 32 }
   0x8   :  { %p2002_p3 = scmp.ne.s32.totalorder %s20_s13, %s2001_s21  ;;  %p2006_p4 = scmp.lt.s32.totalorder %s20_s13, %s20_s13 }
   0x9   :  { %p2007_p5 = scmp.lt.s32.totalorder %s2005_s22, %s2001_s21 }
   0xb   :  { %p2008_p6 = por %p2007_p5, %p2006_p4 }
   0xd   :  { %p2009_p7 = pnand %p2008_p6, %p2002_p3 }
   0xf   :  { %2012 = shalt.err (!%p2009_p7)
}
  0x10   :  { %22 = dma.hbm_to_vmem [thread:$0]  %s2761_s2, 16, %s20_s13, [#allocation4]  }
  0x11   :  { %2017 = dma.done.wait [#allocation4], 16  }
  0x12   :  { %2018 = vsyncadd [#allocation4], 4294967280  ;;  %vm26_vm0 = vcmask 261120   ;;  %v2024_v0 = vmov 0.0   ;;  %v2259_v1 = vld [vmem:[%s2760_s1] sm:$0xff]  ;;  %v2264_v2 = vld [vmem:[%s2760_s1 + $0x8] sm:$0xff] }
  0x13   :  { %27 = vst.msk [vmem:[#allocation2] sm:$0xff] %vm26_vm0, %v2024_v0  ;;  %28 = vst.msk [vmem:[#allocation2 + $0x8] sm:$0xff] %vm26_vm0, %v2024_v0  ;;  %v2269_v3 = vld [vmem:[%s2760_s1 + $0x10] sm:$0xff]  ;;  %v2274_v4 = vld [vmem:[%s2760_s1 + $0x18] sm:$0x1]  ;;  %s2278_s5 = smov 0  }
  0x14   :  { %29 = vst.msk [vmem:[#allocation2 + $0x10] sm:$0xff] %vm26_vm0, %v2024_v0  ;;  %30 = vst.msk [vmem:[#allocation2 + $0x18] sm:$0xff] %vm26_vm0, %v2024_v0  ;;  %v2276_v5 = vld [vmem:[#allocation3] ss:$0 sm:$0xff] }
  0x15   :  { %31 = vst.msk [vmem:[#allocation2 + $0x20] sm:$0xff] %vm26_vm0, %v2024_v0  ;;  %32 = vst.msk [vmem:[#allocation2 + $0x28] sm:$0xff] %vm26_vm0, %v2024_v0 }
  0x16   :  { %33 = vst.msk [vmem:[#allocation2 + $0x30] sm:$0xff] %vm26_vm0, %v2024_v0  ;;  %34 = vst.msk [vmem:[#allocation2 + $0x38] sm:$0xff] %vm26_vm0, %v2024_v0 }
  0x17   :  { %35 = vst.msk [vmem:[#allocation2 + $0x40] sm:$0xff] %vm26_vm0, %v2024_v0  ;;  %36 = vst.msk [vmem:[#allocation2 + $0x48] sm:$0xff] %vm26_vm0, %v2024_v0 }
  0x18   :  { %37 = vst.msk [vmem:[#allocation2 + $0x50] sm:$0xff] %vm26_vm0, %v2024_v0  ;;  %38 = vst.msk [vmem:[#allocation2 + $0x58] sm:$0xff] %vm26_vm0, %v2024_v0 }
  0x19   :  { %39 = vst.msk [vmem:[#allocation2 + $0x60] sm:$0xff] %vm26_vm0, %v2024_v0  ;;  %40 = vst.msk [vmem:[#allocation2 + $0x68] sm:$0xff] %vm26_vm0, %v2024_v0 }
  0x1a   :  { %41 = vst.msk [vmem:[#allocation2 + $0x70] sm:$0xff] %vm26_vm0, %v2024_v0  ;;  %42 = vst.msk [vmem:[#allocation2 + $0x78] sm:$0xff] %vm26_vm0, %v2024_v0 }
  0x1b   :  { %43 = vst.msk [vmem:[#allocation2 + $0x80] sm:$0xff] %vm26_vm0, %v2024_v0  ;;  %44 = vst.msk [vmem:[#allocation2 + $0x88] sm:$0xff] %vm26_vm0, %v2024_v0 }
  0x1c   :  { %45 = vst.msk [vmem:[#allocation2 + $0x90] sm:$0xff] %vm26_vm0, %v2024_v0  ;;  %46 = vst.msk [vmem:[#allocation2 + $0x98] sm:$0xff] %vm26_vm0, %v2024_v0 }
  0x1d   :  { %47 = vst.msk [vmem:[#allocation2 + $0xa0] sm:$0xff] %vm26_vm0, %v2024_v0  ;;  %48 = vst.msk [vmem:[#allocation2 + $0xa8] sm:$0xff] %vm26_vm0, %v2024_v0 }
  0x1e   :  { %49 = vst.msk [vmem:[#allocation2 + $0xb0] sm:$0xff] %vm26_vm0, %v2024_v0  ;;  %50 = vst.msk [vmem:[#allocation2 + $0xb8] sm:$0xff] %vm26_vm0, %v2024_v0 }
  0x1f   :  { %51 = vst.msk [vmem:[#allocation2 + $0xc0] sm:$0xff] %vm26_vm0, %v2024_v0  ;;  %52 = vst.msk [vmem:[#allocation2 + $0xc8] sm:$0xff] %vm26_vm0, %v2024_v0 }
  0x20   :  { %53 = vst.msk [vmem:[#allocation2 + $0xd0] sm:$0xff] %vm26_vm0, %v2024_v0  ;;  %54 = vst.msk [vmem:[#allocation2 + $0xd8] sm:$0xff] %vm26_vm0, %v2024_v0 }
  0x21   :  { %55 = vst.msk [vmem:[#allocation2 + $0xe0] sm:$0xff] %vm26_vm0, %v2024_v0  ;;  %56 = vst.msk [vmem:[#allocation2 + $0xe8] sm:$0xff] %vm26_vm0, %v2024_v0 }
  0x22   :  { %57 = vst.msk [vmem:[#allocation2 + $0xf0] sm:$0xff] %vm26_vm0, %v2024_v0  ;;  %58 = vst.msk [vmem:[#allocation2 + $0xf8] sm:$0xff] %vm26_vm0, %v2024_v0 }
  0x23   :  { %59 = vst.msk [vmem:[#allocation2 + $0x100] sm:$0xff] %vm26_vm0, %v2024_v0  ;;  %60 = vst.msk [vmem:[#allocation2 + $0x108] sm:$0xff] %vm26_vm0, %v2024_v0 }
  0x24   :  { %61 = vst.msk [vmem:[#allocation2 + $0x110] sm:$0xff] %vm26_vm0, %v2024_v0  ;;  %62 = vst.msk [vmem:[#allocation2 + $0x118] sm:$0xff] %vm26_vm0, %v2024_v0 }
  0x25   :  { %63 = vst.msk [vmem:[#allocation2 + $0x120] sm:$0xff] %vm26_vm0, %v2024_v0  ;;  %64 = vst.msk [vmem:[#allocation2 + $0x128] sm:$0xff] %vm26_vm0, %v2024_v0 }
  0x26   :  { %65 = vst.msk [vmem:[#allocation2 + $0x130] sm:$0xff] %vm26_vm0, %v2024_v0  ;;  %66 = vst.msk [vmem:[#allocation2 + $0x138] sm:$0xff] %vm26_vm0, %v2024_v0 }
  0x27   :  { %67 = vst.msk [vmem:[#allocation2 + $0x140] sm:$0xff] %vm26_vm0, %v2024_v0  ;;  %68 = vst.msk [vmem:[#allocation2 + $0x148] sm:$0xff] %vm26_vm0, %v2024_v0 }
  0x28   :  { %69 = vst.msk [vmem:[#allocation2 + $0x150] sm:$0xff] %vm26_vm0, %v2024_v0  ;;  %70 = vst.msk [vmem:[#allocation2 + $0x158] sm:$0xff] %vm26_vm0, %v2024_v0 }
  0x29   :  { %71 = vst.msk [vmem:[#allocation2 + $0x160] sm:$0xff] %vm26_vm0, %v2024_v0  ;;  %72 = vst.msk [vmem:[#allocation2 + $0x168] sm:$0xff] %vm26_vm0, %v2024_v0 }
  0x2a   :  { %73 = vst.msk [vmem:[#allocation2 + $0x170] sm:$0xff] %vm26_vm0, %v2024_v0  ;;  %74 = vst.msk [vmem:[#allocation2 + $0x178] sm:$0xff] %vm26_vm0, %v2024_v0 }
  0x2b   :  { %75 = vst.msk [vmem:[#allocation2 + $0x180] sm:$0xff] %vm26_vm0, %v2024_v0  ;;  %76 = vst.msk [vmem:[#allocation2 + $0x188] sm:$0xff] %vm26_vm0, %v2024_v0 }
  0x2c   :  { %77 = vst.msk [vmem:[#allocation2 + $0x190] sm:$0xff] %vm26_vm0, %v2024_v0  ;;  %78 = vst.msk [vmem:[#allocation2 + $0x198] sm:$0xff] %vm26_vm0, %v2024_v0 }
  0x2d   :  { %79 = vst.msk [vmem:[#allocation2 + $0x1a0] sm:$0xff] %vm26_vm0, %v2024_v0  ;;  %80 = vst.msk [vmem:[#allocation2 + $0x1a8] sm:$0xff] %vm26_vm0, %v2024_v0 }
  0x2e   :  { %81 = vst.msk [vmem:[#allocation2 + $0x1b0] sm:$0xff] %vm26_vm0, %v2024_v0  ;;  %82 = vst.msk [vmem:[#allocation2 + $0x1b8] sm:$0xff] %vm26_vm0, %v2024_v0 }
  0x2f   :  { %83 = vst.msk [vmem:[#allocation2 + $0x1c0] sm:$0xff] %vm26_vm0, %v2024_v0  ;;  %84 = vst.msk [vmem:[#allocation2 + $0x1c8] sm:$0xff] %vm26_vm0, %v2024_v0 }
  0x30   :  { %85 = vst.msk [vmem:[#allocation2 + $0x1d0] sm:$0xff] %vm26_vm0, %v2024_v0  ;;  %86 = vst.msk [vmem:[#allocation2 + $0x1d8] sm:$0xff] %vm26_vm0, %v2024_v0 }
  0x31   :  { %87 = vst.msk [vmem:[#allocation2 + $0x1e0] sm:$0xff] %vm26_vm0, %v2024_v0  ;;  %88 = vst.msk [vmem:[#allocation2 + $0x1e8] sm:$0xff] %vm26_vm0, %v2024_v0 }
  0x32   :  { %89 = vst.msk [vmem:[#allocation2 + $0x1f0] sm:$0xff] %vm26_vm0, %v2024_v0  ;;  %90 = vst.msk [vmem:[#allocation2 + $0x1f8] sm:$0xff] %vm26_vm0, %v2024_v0 }
  0x33   :  { %91 = vst.msk [vmem:[#allocation2 + $0x200] sm:$0xff] %vm26_vm0, %v2024_v0  ;;  %92 = vst.msk [vmem:[#allocation2 + $0x208] sm:$0xff] %vm26_vm0, %v2024_v0 }
  0x34   :  { %93 = vst.msk [vmem:[#allocation2 + $0x210] sm:$0xff] %vm26_vm0, %v2024_v0  ;;  %94 = vst.msk [vmem:[#allocation2 + $0x218] sm:$0xff] %vm26_vm0, %v2024_v0 }
  0x35   :  { %95 = vst.msk [vmem:[#allocation2 + $0x220] sm:$0xff] %vm26_vm0, %v2024_v0  ;;  %96 = vst.msk [vmem:[#allocation2 + $0x228] sm:$0xff] %vm26_vm0, %v2024_v0 }
  0x36   :  { %97 = vst.msk [vmem:[#allocation2 + $0x230] sm:$0xff] %vm26_vm0, %v2024_v0  ;;  %98 = vst.msk [vmem:[#allocation2 + $0x238] sm:$0xff] %vm26_vm0, %v2024_v0 }
  0x37   :  { %99 = vst.msk [vmem:[#allocation2 + $0x240] sm:$0xff] %vm26_vm0, %v2024_v0  ;;  %100 = vst.msk [vmem:[#allocation2 + $0x248] sm:$0xff] %vm26_vm0, %v2024_v0 }
  0x38   :  { %101 = vst.msk [vmem:[#allocation2 + $0x250] sm:$0xff] %vm26_vm0, %v2024_v0  ;;  %102 = vst.msk [vmem:[#allocation2 + $0x258] sm:$0xff] %vm26_vm0, %v2024_v0 }
  0x39   :  { %103 = vst.msk [vmem:[#allocation2 + $0x260] sm:$0xff] %vm26_vm0, %v2024_v0  ;;  %104 = vst.msk [vmem:[#allocation2 + $0x268] sm:$0xff] %vm26_vm0, %v2024_v0 }
  0x3a   :  { %105 = vst.msk [vmem:[#allocation2 + $0x270] sm:$0xff] %vm26_vm0, %v2024_v0  ;;  %106 = vst.msk [vmem:[#allocation2 + $0x278] sm:$0xff] %vm26_vm0, %v2024_v0 }
  0x3b   :  { %107 = vst.msk [vmem:[#allocation2 + $0x280] sm:$0xff] %vm26_vm0, %v2024_v0  ;;  %108 = vst.msk [vmem:[#allocation2 + $0x288] sm:$0xff] %vm26_vm0, %v2024_v0 }
  0x3c   :  { %109 = vst.msk [vmem:[#allocation2 + $0x290] sm:$0xff] %vm26_vm0, %v2024_v0  ;;  %110 = vst.msk [vmem:[#allocation2 + $0x298] sm:$0xff] %vm26_vm0, %v2024_v0 }
  0x3d   :  { %111 = vst.msk [vmem:[#allocation2 + $0x2a0] sm:$0xff] %vm26_vm0, %v2024_v0  ;;  %112 = vst.msk [vmem:[#allocation2 + $0x2a8] sm:$0xff] %vm26_vm0, %v2024_v0 }
  0x3e   :  { %113 = vst.msk [vmem:[#allocation2 + $0x2b0] sm:$0xff] %vm26_vm0, %v2024_v0  ;;  %114 = vst.msk [vmem:[#allocation2 + $0x2b8] sm:$0xff] %vm26_vm0, %v2024_v0 }
  0x3f   :  { %115 = vst.msk [vmem:[#allocation2 + $0x2c0] sm:$0xff] %vm26_vm0, %v2024_v0  ;;  %116 = vst.msk [vmem:[#allocation2 + $0x2c8] sm:$0xff] %vm26_vm0, %v2024_v0 }
  0x40   :  { %117 = vst.msk [vmem:[#allocation2 + $0x2d0] sm:$0xff] %vm26_vm0, %v2024_v0  ;;  %118 = vst.msk [vmem:[#allocation2 + $0x2d8] sm:$0xff] %vm26_vm0, %v2024_v0 }
  0x41   :  { %119 = vst.msk [vmem:[#allocation2 + $0x2e0] sm:$0xff] %vm26_vm0, %v2024_v0  ;;  %120 = vst.msk [vmem:[#allocation2 + $0x2e8] sm:$0xff] %vm26_vm0, %v2024_v0 }
  0x42   :  { %121 = vst.msk [vmem:[#allocation2 + $0x2f0] sm:$0xff] %vm26_vm0, %v2024_v0  ;;  %122 = vst.msk [vmem:[#allocation2 + $0x2f8] sm:$0xff] %vm26_vm0, %v2024_v0 }
  0x43   :  { %123 = vst.msk [vmem:[#allocation2 + $0x300] sm:$0xff] %vm26_vm0, %v2024_v0  ;;  %124 = vst.msk [vmem:[#allocation2 + $0x308] sm:$0xff] %vm26_vm0, %v2024_v0 }
  0x44   :  { %125 = vst.msk [vmem:[#allocation2 + $0x310] sm:$0xff] %vm26_vm0, %v2024_v0 }
  0x45 LB: > { %v1966_v6 = vpack.c.bf16 %v2264_v2, %v2259_v1  ;;  %vm540_vm1 = vcmask 1040384   ;;  %v1970_v7 = vpack.c.bf16 %v2274_v4, %v2269_v3  ;;  %vm2025_vm2 = vmmov 1   ;;  %s139_s1 = smul.u32 784, %s2021_s5  ;;  %s2021_s5 = sphi %s2278_s5, %s138_s5  }
  0x46   : > { %vm1971_vm3 = vmpackc.low %vm540_vm1, %vm2025_vm2  ;;  %vm245_vm4 = vcmask 203776   ;;  %s1559_s9 = smul.u32 264, %s2021_s5  ;;  %vm1593_vm5 = vcmask 259072   ;;  %s138_s5 = sadd.s32 1, %s2021_s5  }
  0x47   : > { %1967 = vmatprep.subr.bf16.mxu0 %v1966_v6  ;;  %1976 = vmatprep.subr.bf16.mxu1 %v1966_v6  ;;  %s2291_s8 = scalar_lea.vmem %s2759_s0, %s139_s1  ;;  %p135_p8 = scmp.ge.s32.totalorder %s138_s5, 2  }
  0x48   : > { %1969 = vmatpush3.bf16.msra.mxu0 %v1966_v6  ;;  %1978 = vmatpush3.bf16.msra.mxu1 %v1966_v6  ;;  %v141_v8 = vld [vmem:[%s2291_s8] sm:$0xff]  ;;  %v191_v9 = vld [vmem:[%s2291_s8 + $0x190] sm:$0xff]  ;;  %v142_v10 = vld [vmem:[%s2291_s8 + $0x8] sm:$0xff]  ;;  %s2527_s12 = scalar_lea.vmem %s2762_s3, %s1559_s9 }
  0x49   : > { %1972 = vmatprep.subr.msk.bf16.mxu0 %vm1971_vm3, %v1970_v7  ;;  %1977 = vmatprep.subr.msk.bf16.mxu1 %vm1971_vm3, %v1970_v7  ;;  %v192_v11 = vld [vmem:[%s2291_s8 + $0x198] sm:$0xff]  ;;  %v143_v12 = vld [vmem:[%s2291_s8 + $0x10] sm:$0xff]  ;;  %v193_v13 = vld [vmem:[%s2291_s8 + $0x1a0] sm:$0xff] }
  0x4a   : > { %1819 = vmatprep.mubr.msk.f32.mxu0 %vm245_vm4, %v141_v8  ;;  %1894 = vmatprep.mubr.msk.f32.mxu1 %vm245_vm4, %v191_v9  ;;  %v144_v14 = vld [vmem:[%s2291_s8 + $0x18] sm:$0xff]  ;;  %v194_v15 = vld [vmem:[%s2291_s8 + $0x1a8] sm:$0xff]  ;;  %v145_v16 = vld [vmem:[%s2291_s8 + $0x20] sm:$0xff] }
  0x4b   : > { %v195_v17 = vld [vmem:[%s2291_s8 + $0x1b0] sm:$0xff]  ;;  %v146_v18 = vld [vmem:[%s2291_s8 + $0x28] sm:$0xff]  ;;  %v196_v19 = vld [vmem:[%s2291_s8 + $0x1b8] sm:$0xff] }
  0x4c   : > { %1975 = vmatpush3.bf16.msk.msra.mxu0 %vm1971_vm3, %v1970_v7  ;;  %1979 = vmatpush3.bf16.msk.msra.mxu1 %vm1971_vm3, %v1970_v7  ;;  %v147_v20 = vld [vmem:[%s2291_s8 + $0x30] sm:$0xff]  ;;  %v197_v21 = vld [vmem:[%s2291_s8 + $0x1c0] sm:$0xff]  ;;  %v148_v22 = vld [vmem:[%s2291_s8 + $0x38] sm:$0xff] }
  0x4d   : > { %v198_v23 = vld [vmem:[%s2291_s8 + $0x1c8] sm:$0xff]  ;;  %v149_v24 = vld [vmem:[%s2291_s8 + $0x40] sm:$0xff]  ;;  %v199_v25 = vld [vmem:[%s2291_s8 + $0x1d0] sm:$0xff] }
  0x4e   : > { %v150_v26 = vld [vmem:[%s2291_s8 + $0x48] sm:$0xff]  ;;  %v200_v27 = vld [vmem:[%s2291_s8 + $0x1d8] sm:$0xff]  ;;  %v151_v28 = vld [vmem:[%s2291_s8 + $0x50] sm:$0xff] }
  0x4f   : > { %1820 = vmatmul.mubr.msk.f32.vlgmr.msra.gmra.mrb[0].mxu0 %vm245_vm4, %v142_v10  ;;  %1895 = vmatmul.mubr.msk.f32.vlgmr.msra.gmra.mrb[0].mxu1 %vm245_vm4, %v192_v11  ;;  %v201_v29 = vld [vmem:[%s2291_s8 + $0x1e0] sm:$0xff]  ;;  %v152_v30 = vld [vmem:[%s2291_s8 + $0x58] sm:$0xff]  ;;  %v202_v31 = vld [vmem:[%s2291_s8 + $0x1e8] sm:$0xff] }
  0x50   : > { %1822 = vmatprep.mubr.msk.f32.mxu0 %vm245_vm4, %v143_v12  ;;  %1897 = vmatprep.mubr.msk.f32.mxu1 %vm245_vm4, %v193_v13  ;;  %v153_v32 = vld [vmem:[%s2291_s8 + $0x60] sm:$0xff]  ;;  %v203_v33 = vld [vmem:[%s2291_s8 + $0x1f0] sm:$0xff]  ;;  %v154_v34 = vld [vmem:[%s2291_s8 + $0x68] sm:$0xff] }
  0x51   : > { %v204_v35 = vld [vmem:[%s2291_s8 + $0x1f8] sm:$0xff]  ;;  %v155_v36 = vld [vmem:[%s2291_s8 + $0x70] sm:$0xff]  ;;  %v205_v37 = vld [vmem:[%s2291_s8 + $0x200] sm:$0xff] }
  0x52   : > { %v156_v38 = vld [vmem:[%s2291_s8 + $0x78] sm:$0xff]  ;;  %v206_v39 = vld [vmem:[%s2291_s8 + $0x208] sm:$0xff]  ;;  %v157_v40 = vld [vmem:[%s2291_s8 + $0x80] sm:$0xff] }
  0x53   : > { %1823 = vmatmul.mubr.msk.f32.gmra.mrb[2].mxu0 %vm245_vm4, %v144_v14  ;;  %1898 = vmatmul.mubr.msk.f32.gmra.mrb[2].mxu1 %vm245_vm4, %v194_v15  ;;  %v207_v41 = vld [vmem:[%s2291_s8 + $0x210] sm:$0xff]  ;;  %v158_v42 = vld [vmem:[%s2291_s8 + $0x88] sm:$0xff]  ;;  %v208_v43 = vld [vmem:[%s2291_s8 + $0x218] sm:$0xff] }
  0x54   : > { %1825 = vmatprep.mubr.msk.f32.mxu0 %vm245_vm4, %v145_v16  ;;  %1900 = vmatprep.mubr.msk.f32.mxu1 %vm245_vm4, %v195_v17  ;;  %v159_v44 = vld [vmem:[%s2291_s8 + $0x90] sm:$0xff]  ;;  %v209_v45 = vld [vmem:[%s2291_s8 + $0x220] sm:$0xff]  ;;  %v160_v46 = vld [vmem:[%s2291_s8 + $0x98] sm:$0xff] }
  0x55   : > { %v210_v47 = vld [vmem:[%s2291_s8 + $0x228] sm:$0xff]  ;;  %v161_v48 = vld [vmem:[%s2291_s8 + $0xa0] sm:$0xff]  ;;  %v211_v49 = vld [vmem:[%s2291_s8 + $0x230] sm:$0xff] }
  0x56   : > { %v162_v50 = vld [vmem:[%s2291_s8 + $0xa8] sm:$0xff]  ;;  %v212_v51 = vld [vmem:[%s2291_s8 + $0x238] sm:$0xff]  ;;  %v163_v52 = vld [vmem:[%s2291_s8 + $0xb0] sm:$0xff] }
  0x57   : > { %1826 = vmatmul.mubr.msk.f32.gmra.mrb[4].mxu0 %vm245_vm4, %v146_v18  ;;  %1901 = vmatmul.mubr.msk.f32.gmra.mrb[4].mxu1 %vm245_vm4, %v196_v19  ;;  %v213_v53 = vld [vmem:[%s2291_s8 + $0x240] sm:$0xff]  ;;  %v164_v54 = vld [vmem:[%s2291_s8 + $0xb8] sm:$0xff]  ;;  %v214_v55 = vld [vmem:[%s2291_s8 + $0x248] sm:$0xff] }
  0x58   : > { %1828 = vmatprep.mubr.msk.f32.mxu0 %vm245_vm4, %v147_v20  ;;  %1903 = vmatprep.mubr.msk.f32.mxu1 %vm245_vm4, %v197_v21  ;;  %v165_v56 = vld [vmem:[%s2291_s8 + $0xc0] sm:$0xff]  ;;  %v215_v57 = vld [vmem:[%s2291_s8 + $0x250] sm:$0xff]  ;;  %v166_v58 = vld [vmem:[%s2291_s8 + $0xc8] sm:$0xff] }
  0x59   : > { %v216_v59 = vld [vmem:[%s2291_s8 + $0x258] sm:$0xff]  ;;  %v167_v60 = vld [vmem:[%s2291_s8 + $0xd0] sm:$0xff]  ;;  %v217_v61 = vld [vmem:[%s2291_s8 + $0x260] sm:$0xff] }
  0x5a   : > { %v168_v62 = vld [vmem:[%s2291_s8 + $0xd8] sm:$0xff]  ;;  %v218_v63 = vld [vmem:[%s2291_s8 + $0x268] sm:$0xff]  ;;  %v169_v0 = vld [vmem:[%s2291_s8 + $0xe0] sm:$0xff] }
  0x5b   : > { %1829 = vmatmul.mubr.msk.f32.gmra.mrb[6].mxu0 %vm245_vm4, %v148_v22  ;;  %1904 = vmatmul.mubr.msk.f32.gmra.mrb[6].mxu1 %vm245_vm4, %v198_v23  ;;  %v219_v6 = vld [vmem:[%s2291_s8 + $0x270] sm:$0xff]  ;;  %v170_v7 = vld [vmem:[%s2291_s8 + $0xe8] sm:$0xff]  ;;  %v220_v8 = vld [vmem:[%s2291_s8 + $0x278] sm:$0xff] }
  0x5c   : > { %1831 = vmatprep.mubr.msk.f32.mxu0 %vm245_vm4, %v149_v24  ;;  %1906 = vmatprep.mubr.msk.f32.mxu1 %vm245_vm4, %v199_v25  ;;  %v171_v9 = vld [vmem:[%s2291_s8 + $0xf0] sm:$0xff]  ;;  %v221_v10 = vld [vmem:[%s2291_s8 + $0x280] sm:$0xff]  ;;  %v172_v11 = vld [vmem:[%s2291_s8 + $0xf8] sm:$0xff] }
  0x5d   : > { %v222_v12 = vld [vmem:[%s2291_s8 + $0x288] sm:$0xff]  ;;  %v173_v13 = vld [vmem:[%s2291_s8 + $0x100] sm:$0xff]  ;;  %v223_v14 = vld [vmem:[%s2291_s8 + $0x290] sm:$0xff] }
  0x5e   : > { %v174_v15 = vld [vmem:[%s2291_s8 + $0x108] sm:$0xff]  ;;  %v224_v16 = vld [vmem:[%s2291_s8 + $0x298] sm:$0xff]  ;;  %v175_v17 = vld [vmem:[%s2291_s8 + $0x110] sm:$0xff] }
  0x5f   : > { %1832 = vmatmul.mubr.msk.f32.gmra.mrb[8].mxu0 %vm245_vm4, %v150_v26  ;;  %1907 = vmatmul.mubr.msk.f32.gmra.mrb[8].mxu1 %vm245_vm4, %v200_v27  ;;  %v225_v18 = vld [vmem:[%s2291_s8 + $0x2a0] sm:$0xff]  ;;  %v176_v19 = vld [vmem:[%s2291_s8 + $0x118] sm:$0xff]  ;;  %v226_v20 = vld [vmem:[%s2291_s8 + $0x2a8] sm:$0xff] }
  0x60   : > { %1834 = vmatprep.mubr.msk.f32.mxu0 %vm245_vm4, %v151_v28  ;;  %1909 = vmatprep.mubr.msk.f32.mxu1 %vm245_vm4, %v201_v29  ;;  %v177_v21 = vld [vmem:[%s2291_s8 + $0x120] sm:$0xff]  ;;  %v227_v22 = vld [vmem:[%s2291_s8 + $0x2b0] sm:$0xff]  ;;  %v178_v23 = vld [vmem:[%s2291_s8 + $0x128] sm:$0xff] }
  0x61   : > { %v228_v24 = vld [vmem:[%s2291_s8 + $0x2b8] sm:$0xff]  ;;  %v179_v25 = vld [vmem:[%s2291_s8 + $0x130] sm:$0xff]  ;;  %v229_v26 = vld [vmem:[%s2291_s8 + $0x2c0] sm:$0xff] }
  0x62   : > { %v180_v27 = vld [vmem:[%s2291_s8 + $0x138] sm:$0xff]  ;;  %v230_v28 = vld [vmem:[%s2291_s8 + $0x2c8] sm:$0xff]  ;;  %v181_v29 = vld [vmem:[%s2291_s8 + $0x140] sm:$0xff] }
  0x63   : > { %1835 = vmatmul.mubr.msk.f32.gmra.mrb[10].mxu0 %vm245_vm4, %v152_v30  ;;  %1910 = vmatmul.mubr.msk.f32.gmra.mrb[10].mxu1 %vm245_vm4, %v202_v31  ;;  %v231_v30 = vld [vmem:[%s2291_s8 + $0x2d0] sm:$0xff]  ;;  %v182_v31 = vld [vmem:[%s2291_s8 + $0x148] sm:$0xff] }
  0x64   : > { %1837 = vmatprep.mubr.msk.f32.mxu0 %vm245_vm4, %v153_v32  ;;  %1912 = vmatprep.mubr.msk.f32.mxu1 %vm245_vm4, %v203_v33  ;;  %v232_v32 = vld [vmem:[%s2291_s8 + $0x2d8] sm:$0xff]  ;;  %v183_v33 = vld [vmem:[%s2291_s8 + $0x150] sm:$0xff] }
  0x67   : > { %1838 = vmatmul.mubr.msk.f32.gmra.mrb[12].mxu0 %vm245_vm4, %v154_v34  ;;  %1913 = vmatmul.mubr.msk.f32.gmra.mrb[12].mxu1 %vm245_vm4, %v204_v35  ;;  %v233_v34 = vld [vmem:[%s2291_s8 + $0x2e0] sm:$0xff]  ;;  %v184_v35 = vld [vmem:[%s2291_s8 + $0x158] sm:$0xff] }
  0x68   : > { %1840 = vmatprep.mubr.msk.f32.mxu0 %vm245_vm4, %v155_v36  ;;  %1915 = vmatprep.mubr.msk.f32.mxu1 %vm245_vm4, %v205_v37  ;;  %v234_v36 = vld [vmem:[%s2291_s8 + $0x2e8] sm:$0xff]  ;;  %v185_v37 = vld [vmem:[%s2291_s8 + $0x160] sm:$0xff] }
  0x6b   : > { %1841 = vmatmul.mubr.msk.f32.gmra.mrb[14].mxu0 %vm245_vm4, %v156_v38  ;;  %1916 = vmatmul.mubr.msk.f32.gmra.mrb[14].mxu1 %vm245_vm4, %v206_v39  ;;  %v235_v38 = vld [vmem:[%s2291_s8 + $0x2f0] sm:$0xff]  ;;  %v186_v39 = vld [vmem:[%s2291_s8 + $0x168] sm:$0xff] }
  0x6c   : > { %1843 = vmatprep.mubr.msk.f32.mxu0 %vm245_vm4, %v157_v40  ;;  %1918 = vmatprep.mubr.msk.f32.mxu1 %vm245_vm4, %v207_v41  ;;  %v236_v40 = vld [vmem:[%s2291_s8 + $0x2f8] sm:$0xff]  ;;  %v187_v41 = vld [vmem:[%s2291_s8 + $0x170] sm:$0xff] }
  0x6f   : > { %1844 = vmatmul.mubr.msk.f32.gmra.mrb[16].mxu0 %vm245_vm4, %v158_v42  ;;  %1919 = vmatmul.mubr.msk.f32.gmra.mrb[16].mxu1 %vm245_vm4, %v208_v43  ;;  %v237_v42 = vld [vmem:[%s2291_s8 + $0x300] sm:$0xff]  ;;  %v188_v43 = vld [vmem:[%s2291_s8 + $0x178] sm:$0xff] }
  0x70   : > { %1846 = vmatprep.mubr.msk.f32.mxu0 %vm245_vm4, %v159_v44  ;;  %1921 = vmatprep.mubr.msk.f32.mxu1 %vm245_vm4, %v209_v45  ;;  %v238_v44 = vld [vmem:[%s2291_s8 + $0x308] sm:$0xff]  ;;  %v189_v45 = vld [vmem:[%s2291_s8 + $0x180] sm:$0xff] }
  0x73   : > { %1847 = vmatmul.mubr.msk.f32.gmra.mrb[18].mxu0 %vm245_vm4, %v160_v46  ;;  %1922 = vmatmul.mubr.msk.f32.gmra.mrb[18].mxu1 %vm245_vm4, %v210_v47  ;;  %v190_v46 = vld [vmem:[%s2291_s8 + $0x188] sm:$0xff] }
  0x74   : > { %1849 = vmatprep.mubr.msk.f32.mxu0 %vm245_vm4, %v161_v48  ;;  %1924 = vmatprep.mubr.msk.f32.mxu1 %vm245_vm4, %v211_v49 }
  0x77   : > { %1850 = vmatmul.mubr.msk.f32.gmra.mrb[20].mxu0 %vm245_vm4, %v162_v50  ;;  %1925 = vmatmul.mubr.msk.f32.gmra.mrb[20].mxu1 %vm245_vm4, %v212_v51 }
  0x78   : > { %1852 = vmatprep.mubr.msk.f32.mxu0 %vm245_vm4, %v163_v52  ;;  %1927 = vmatprep.mubr.msk.f32.mxu1 %vm245_vm4, %v213_v53 }
  0x7b   : > { %1853 = vmatmul.mubr.msk.f32.gmra.mrb[22].mxu0 %vm245_vm4, %v164_v54  ;;  %1928 = vmatmul.mubr.msk.f32.gmra.mrb[22].mxu1 %vm245_vm4, %v214_v55 }
  0x7c   : > { %1855 = vmatprep.mubr.msk.f32.mxu0 %vm245_vm4, %v165_v56  ;;  %1930 = vmatprep.mubr.msk.f32.mxu1 %vm245_vm4, %v215_v57 }
  0x7f   : > { %1856 = vmatmul.mubr.msk.f32.gmra.mrb[24].mxu0 %vm245_vm4, %v166_v58  ;;  %1931 = vmatmul.mubr.msk.f32.gmra.mrb[24].mxu1 %vm245_vm4, %v216_v59 }
  0x80   : > { %1858 = vmatprep.mubr.msk.f32.mxu0 %vm245_vm4, %v167_v60  ;;  %1933 = vmatprep.mubr.msk.f32.mxu1 %vm245_vm4, %v217_v61 }
  0x83   : > { %1859 = vmatmul.mubr.msk.f32.gmra.mrb[26].mxu0 %vm245_vm4, %v168_v62  ;;  %1934 = vmatmul.mubr.msk.f32.gmra.mrb[26].mxu1 %vm245_vm4, %v218_v63 }
  0x84   : > { %1861 = vmatprep.mubr.msk.f32.mxu0 %vm245_vm4, %v169_v0  ;;  %1936 = vmatprep.mubr.msk.f32.mxu1 %vm245_vm4, %v219_v6 }
  0x87   : > { %1862 = vmatmul.mubr.msk.f32.gmra.mrb[28].mxu0 %vm245_vm4, %v170_v7  ;;  %1937 = vmatmul.mubr.msk.f32.gmra.mrb[28].mxu1 %vm245_vm4, %v220_v8 }
  0x88   : > { %1864 = vmatprep.mubr.msk.f32.mxu0 %vm245_vm4, %v171_v9  ;;  %1939 = vmatprep.mubr.msk.f32.mxu1 %vm245_vm4, %v221_v10 }
  0x8b   : > { %1865 = vmatmul.mubr.msk.f32.gmra.mrb[30].mxu0 %vm245_vm4, %v172_v11  ;;  %1940 = vmatmul.mubr.msk.f32.gmra.mrb[30].mxu1 %vm245_vm4, %v222_v12 }
  0x8c   : > { %1867 = vmatprep.mubr.msk.f32.mxu0 %vm245_vm4, %v173_v13  ;;  %1942 = vmatprep.mubr.msk.f32.mxu1 %vm245_vm4, %v223_v14 }
  0x8f   : > { %1868 = vmatmul.mubr.msk.f32.gmra.mrb[32].mxu0 %vm245_vm4, %v174_v15  ;;  %1943 = vmatmul.mubr.msk.f32.gmra.mrb[32].mxu1 %vm245_vm4, %v224_v16 }
  0x90   : > { %1870 = vmatprep.mubr.msk.f32.mxu0 %vm245_vm4, %v175_v17  ;;  %1945 = vmatprep.mubr.msk.f32.mxu1 %vm245_vm4, %v225_v18 }
  0x93   : > { %1871 = vmatmul.mubr.msk.f32.gmra.mrb[34].mxu0 %vm245_vm4, %v176_v19  ;;  %1946 = vmatmul.mubr.msk.f32.gmra.mrb[34].mxu1 %vm245_vm4, %v226_v20 }
  0x94   : > { %1873 = vmatprep.mubr.msk.f32.mxu0 %vm245_vm4, %v177_v21  ;;  %1948 = vmatprep.mubr.msk.f32.mxu1 %vm245_vm4, %v227_v22 }
  0x97   : > { %1874 = vmatmul.mubr.msk.f32.gmra.mrb[36].mxu0 %vm245_vm4, %v178_v23  ;;  %1949 = vmatmul.mubr.msk.f32.gmra.mrb[36].mxu1 %vm245_vm4, %v228_v24 }
  0x98   : > { %1876 = vmatprep.mubr.msk.f32.mxu0 %vm245_vm4, %v179_v25  ;;  %1951 = vmatprep.mubr.msk.f32.mxu1 %vm245_vm4, %v229_v26 }
  0x9b   : > { %1877 = vmatmul.mubr.msk.f32.gmra.mrb[38].mxu0 %vm245_vm4, %v180_v27  ;;  %1952 = vmatmul.mubr.msk.f32.gmra.mrb[38].mxu1 %vm245_vm4, %v230_v28 }
  0x9c   : > { %1879 = vmatprep.mubr.msk.f32.mxu0 %vm245_vm4, %v181_v29  ;;  %1954 = vmatprep.mubr.msk.f32.mxu1 %vm245_vm4, %v231_v30 }
  0x9f   : > { %1880 = vmatmul.mubr.msk.f32.gmra.mrb[40].mxu0 %vm245_vm4, %v182_v31  ;;  %1955 = vmatmul.mubr.msk.f32.gmra.mrb[40].mxu1 %vm245_vm4, %v232_v32 }
  0xa0   : > { %1882 = vmatprep.mubr.msk.f32.mxu0 %vm245_vm4, %v183_v33  ;;  %1957 = vmatprep.mubr.msk.f32.mxu1 %vm245_vm4, %v233_v34 }
  0xa3   : > { %1883 = vmatmul.mubr.msk.f32.gmra.mrb[42].mxu0 %vm245_vm4, %v184_v35  ;;  %1958 = vmatmul.mubr.msk.f32.gmra.mrb[42].mxu1 %vm245_vm4, %v234_v36 }
  0xa4   : > { %1885 = vmatprep.mubr.msk.f32.mxu0 %vm245_vm4, %v185_v37  ;;  %1960 = vmatprep.mubr.msk.f32.mxu1 %vm245_vm4, %v235_v38 }
  0xa7   : > { %1886 = vmatmul.mubr.msk.f32.gmra.mrb[44].mxu0 %vm245_vm4, %v186_v39  ;;  %1961 = vmatmul.mubr.msk.f32.gmra.mrb[44].mxu1 %vm245_vm4, %v236_v40 }
  0xa8   : > { %1888 = vmatprep.mubr.msk.f32.mxu0 %vm245_vm4, %v187_v41  ;;  %1963 = vmatprep.mubr.msk.f32.mxu1 %vm245_vm4, %v237_v42 }
  0xab   : > { %1889 = vmatmul.mubr.msk.f32.gmra.mrb[46].mxu0 %vm245_vm4, %v188_v43  ;;  %1964 = vmatmul.mubr.msk.f32.gmra.mrb[46].mxu1 %vm245_vm4, %v238_v44 }
  0xac   : > { %1891 = vmatprep.mubr.msk.f32.mxu0 %vm245_vm4, %v189_v45 }
  0xaf   : > { %1892 = vmatmul.mubr.msk.f32.gmra.mrb[48].mxu0 %vm245_vm4, %v190_v46 }
 0x122   : > { %v1821_v47 = vpop.f32.mrb[0].mxu0  ;;  %v1896_v48 = vpop.f32.mrb[0].mxu1 }
 0x123   : > { %v616_v49 = vadd.f32 %v1821_v47, %v2276_v5  ;;  %v610_v50 = vpop.f32.mrb[1].mxu0  ;;  %v866_v51 = vadd.f32 %v1896_v48, %v2276_v5  ;;  %v860_v52 = vpop.f32.mrb[1].mxu1 }
 0x124   : > { %v611_v53 = vadd.f32 %v2276_v5, %v610_v50  ;;  %v861_v54 = vadd.f32 %v2276_v5, %v860_v52 }
 0x125   : > { %v1100_v55 = vmax.f32 %v616_v49, 0.0  ;;  %v1150_v56 = vmax.f32 %v866_v51, 0.0 }
 0x126   : > { %v1099_v57 = vmax.f32 %v611_v53, 0.0  ;;  %v1149_v58 = vmax.f32 %v861_v54, 0.0  ;;  %v1824_v59 = vpop.f32.mrb[2].mxu0  ;;  %v1899_v60 = vpop.f32.mrb[2].mxu1 }
 0x127   : > { %1198 = vst.msk [vmem:[#allocation2 + $0xa] sm:$0xff] %vm26_vm0, %v1100_v55  ;;  %1248 = vst.msk [vmem:[#allocation2 + $0x19a] sm:$0xff] %vm26_vm0, %v1150_v56  ;;  %v626_v61 = vadd.f32 %v1824_v59, %v2276_v5  ;;  %v876_v62 = vadd.f32 %v1899_v60, %v2276_v5  ;;  %v620_v63 = vpop.f32.mrb[3].mxu0  ;;  %v870_v0 = vpop.f32.mrb[3].mxu1 }
 0x128   : > { %1197 = vst.msk [vmem:[#allocation2 + $0x2] sm:$0xff] %vm26_vm0, %v1099_v57  ;;  %1247 = vst.msk [vmem:[#allocation2 + $0x192] sm:$0xff] %vm26_vm0, %v1149_v58  ;;  %v621_v6 = vadd.f32 %v2276_v5, %v620_v63  ;;  %v871_v7 = vadd.f32 %v2276_v5, %v870_v0 }
 0x129   : > { %v1102_v8 = vmax.f32 %v626_v61, 0.0  ;;  %v1152_v9 = vmax.f32 %v876_v62, 0.0 }
 0x12a   : > { %v1101_v10 = vmax.f32 %v621_v6, 0.0  ;;  %v1151_v11 = vmax.f32 %v871_v7, 0.0  ;;  %v1827_v12 = vpop.f32.mrb[4].mxu0  ;;  %v1902_v13 = vpop.f32.mrb[4].mxu1 }
 0x12b   : > { %1200 = vst.msk [vmem:[#allocation2 + $0x1a] sm:$0xff] %vm26_vm0, %v1102_v8  ;;  %1250 = vst.msk [vmem:[#allocation2 + $0x1aa] sm:$0xff] %vm26_vm0, %v1152_v9  ;;  %v636_v14 = vadd.f32 %v1827_v12, %v2276_v5  ;;  %v630_v15 = vpop.f32.mrb[5].mxu0  ;;  %v886_v16 = vadd.f32 %v1902_v13, %v2276_v5  ;;  %v880_v17 = vpop.f32.mrb[5].mxu1 }
 0x12c   : > { %1199 = vst.msk [vmem:[#allocation2 + $0x12] sm:$0xff] %vm26_vm0, %v1101_v10  ;;  %1249 = vst.msk [vmem:[#allocation2 + $0x1a2] sm:$0xff] %vm26_vm0, %v1151_v11  ;;  %v631_v18 = vadd.f32 %v2276_v5, %v630_v15  ;;  %v881_v19 = vadd.f32 %v2276_v5, %v880_v17 }
 0x12d   : > { %v1104_v20 = vmax.f32 %v636_v14, 0.0  ;;  %v1154_v21 = vmax.f32 %v886_v16, 0.0 }
 0x12e   : > { %v1103_v22 = vmax.f32 %v631_v18, 0.0  ;;  %v1153_v23 = vmax.f32 %v881_v19, 0.0  ;;  %v1830_v24 = vpop.f32.mrb[6].mxu0  ;;  %v1905_v25 = vpop.f32.mrb[6].mxu1 }
 0x12f   : > { %1202 = vst.msk [vmem:[#allocation2 + $0x2a] sm:$0xff] %vm26_vm0, %v1104_v20  ;;  %1252 = vst.msk [vmem:[#allocation2 + $0x1ba] sm:$0xff] %vm26_vm0, %v1154_v21  ;;  %v646_v26 = vadd.f32 %v1830_v24, %v2276_v5  ;;  %v896_v27 = vadd.f32 %v1905_v25, %v2276_v5  ;;  %v640_v28 = vpop.f32.mrb[7].mxu0  ;;  %v890_v29 = vpop.f32.mrb[7].mxu1 }
 0x130   : > { %1201 = vst.msk [vmem:[#allocation2 + $0x22] sm:$0xff] %vm26_vm0, %v1103_v22  ;;  %1251 = vst.msk [vmem:[#allocation2 + $0x1b2] sm:$0xff] %vm26_vm0, %v1153_v23  ;;  %v641_v30 = vadd.f32 %v2276_v5, %v640_v28  ;;  %v891_v31 = vadd.f32 %v2276_v5, %v890_v29 }
 0x131   : > { %v1106_v32 = vmax.f32 %v646_v26, 0.0  ;;  %v1156_v33 = vmax.f32 %v896_v27, 0.0 }
 0x132   : > { %v1105_v34 = vmax.f32 %v641_v30, 0.0  ;;  %v1155_v35 = vmax.f32 %v891_v31, 0.0  ;;  %v1833_v36 = vpop.f32.mrb[8].mxu0  ;;  %v1908_v37 = vpop.f32.mrb[8].mxu1 }
 0x133   : > { %v1296_v38 = vld [vmem:[#allocation2 + $0x1] ss:$3 sm:$0xff]  ;;  %v1362_v39 = vld [vmem:[#allocation2 + $0x2] ss:$3 sm:$0xff]  ;;  %1204 = vst.msk [vmem:[#allocation2 + $0x3a] sm:$0xff] %vm26_vm0, %v1106_v32  ;;  %1254 = vst.msk [vmem:[#allocation2 + $0x1ca] sm:$0xff] %vm26_vm0, %v1156_v33  ;;  %v656_v40 = vadd.f32 %v1833_v36, %v2276_v5  ;;  %v906_v41 = vadd.f32 %v1908_v37, %v2276_v5 }
 0x134   : > { %v1493_v42 = vmax.f32 %v1296_v38, %v1362_v39  ;;  %v1330_v43 = vld [vmem:[#allocation2 + $0x199] ss:$3 sm:$0xff]  ;;  %v1396_v44 = vld [vmem:[#allocation2 + $0x19a] ss:$3 sm:$0xff]  ;;  %1203 = vst.msk [vmem:[#allocation2 + $0x32] sm:$0xff] %vm26_vm0, %v1105_v34  ;;  %1253 = vst.msk [vmem:[#allocation2 + $0x1c2] sm:$0xff] %vm26_vm0, %v1155_v35 }
 0x135   : > { %v1428_v45 = vld [vmem:[#allocation2 + $0x3] ss:$3 sm:$0xff]  ;;  %v1510_v46 = vmax.f32 %v1330_v43, %v1396_v44  ;;  %v1108_v47 = vmax.f32 %v656_v40, 0.0  ;;  %v1158_v48 = vmax.f32 %v906_v41, 0.0  ;;  %v650_v49 = vpop.f32.mrb[9].mxu0  ;;  %v900_v50 = vpop.f32.mrb[9].mxu1 }
 0x136   : > { %v1526_v51 = vmax.f32 %v1493_v42, %v1428_v45  ;;  %v1462_v52 = vld [vmem:[#allocation2 + $0x19b] ss:$3 sm:$0xff]  ;;  %v651_v53 = vadd.f32 %v2276_v5, %v650_v49  ;;  %v901_v54 = vadd.f32 %v2276_v5, %v900_v50  ;;  %v1836_v55 = vpop.f32.mrb[10].mxu0  ;;  %v1911_v56 = vpop.f32.mrb[10].mxu1 }
 0x137   : > { %v1543_v57 = vmax.f32 %v1510_v46, %v1462_v52  ;;  %v1298_v58 = vld [vmem:[#allocation2 + $0x19] ss:$3 sm:$0xff]  ;;  %v1364_v59 = vld [vmem:[#allocation2 + $0x1a] ss:$3 sm:$0xff]  ;;  %1206 = vst.msk [vmem:[#allocation2 + $0x4a] sm:$0xff] %vm26_vm0, %v1108_v47  ;;  %1256 = vst.msk [vmem:[#allocation2 + $0x1da] sm:$0xff] %vm26_vm0, %v1158_v48  ;;  %v666_v60 = vadd.f32 %v1836_v55, %v2276_v5  ;;  %v916_v61 = vadd.f32 %v1911_v56, %v2276_v5 }
 0x138   : > { %1561 = vst.msk [vmem:[%s2527_s12] sm:$0xff] %vm26_vm0, %v1526_v51  ;;  %v1494_v62 = vmax.f32 %v1298_v58, %v1364_v59  ;;  %v1107_v63 = vmax.f32 %v651_v53, 0.0  ;;  %v1157_v0 = vmax.f32 %v901_v54, 0.0  ;;  %v660_v6 = vpop.f32.mrb[11].mxu0  ;;  %v910_v7 = vpop.f32.mrb[11].mxu1 }
 0x139   : > { %1578 = vst.msk [vmem:[%s2527_s12 + $0x88] sm:$0xff] %vm26_vm0, %v1543_v57  ;;  %v1430_v8 = vld [vmem:[#allocation2 + $0x1b] ss:$3 sm:$0xff]  ;;  %v1110_v9 = vmax.f32 %v666_v60, 0.0  ;;  %v661_v10 = vadd.f32 %v2276_v5, %v660_v6  ;;  %v1160_v11 = vmax.f32 %v916_v61, 0.0  ;;  %v911_v12 = vadd.f32 %v2276_v5, %v910_v7 }
 0x13a   : > { %v1527_v13 = vmax.f32 %v1494_v62, %v1430_v8  ;;  %1205 = vst.msk [vmem:[#allocation2 + $0x42] sm:$0xff] %vm26_vm0, %v1107_v63  ;;  %1255 = vst.msk [vmem:[#allocation2 + $0x1d2] sm:$0xff] %vm26_vm0, %v1157_v0  ;;  %v1839_v14 = vpop.f32.mrb[12].mxu0  ;;  %v1914_v15 = vpop.f32.mrb[12].mxu1 }
 0x13b   : > { %v1332_v16 = vld [vmem:[#allocation2 + $0x1b1] ss:$3 sm:$0xff]  ;;  %v1398_v17 = vld [vmem:[#allocation2 + $0x1b2] ss:$3 sm:$0xff]  ;;  %1208 = vst.msk [vmem:[#allocation2 + $0x5a] sm:$0xff] %vm26_vm0, %v1110_v9  ;;  %1258 = vst.msk [vmem:[#allocation2 + $0x1ea] sm:$0xff] %vm26_vm0, %v1160_v11  ;;  %v676_v18 = vadd.f32 %v1839_v14, %v2276_v5  ;;  %v926_v19 = vadd.f32 %v1914_v15, %v2276_v5 }
 0x13c   : > { %1562 = vst.msk [vmem:[%s2527_s12 + $0x8] sm:$0xff] %vm26_vm0, %v1527_v13  ;;  %v1511_v20 = vmax.f32 %v1332_v16, %v1398_v17  ;;  %v1109_v21 = vmax.f32 %v661_v10, 0.0  ;;  %v1159_v22 = vmax.f32 %v911_v12, 0.0  ;;  %v670_v23 = vpop.f32.mrb[13].mxu0  ;;  %v920_v24 = vpop.f32.mrb[13].mxu1 }
 0x13d   : > { %v1464_v25 = vld [vmem:[#allocation2 + $0x1b3] ss:$3 sm:$0xff]  ;;  %v1112_v26 = vmax.f32 %v676_v18, 0.0  ;;  %v1162_v27 = vmax.f32 %v926_v19, 0.0  ;;  %v671_v28 = vadd.f32 %v2276_v5, %v670_v23  ;;  %v921_v29 = vadd.f32 %v2276_v5, %v920_v24 }
 0x13e   : > { %v1544_v30 = vmax.f32 %v1511_v20, %v1464_v25  ;;  %1207 = vst.msk [vmem:[#allocation2 + $0x52] sm:$0xff] %vm26_vm0, %v1109_v21  ;;  %1257 = vst.msk [vmem:[#allocation2 + $0x1e2] sm:$0xff] %vm26_vm0, %v1159_v22  ;;  %v1842_v31 = vpop.f32.mrb[14].mxu0  ;;  %v1917_v32 = vpop.f32.mrb[14].mxu1 }
 0x13f   : > { %1210 = vst.msk [vmem:[#allocation2 + $0x6a] sm:$0xff] %vm26_vm0, %v1112_v26  ;;  %1260 = vst.msk [vmem:[#allocation2 + $0x1fa] sm:$0xff] %vm26_vm0, %v1162_v27  ;;  %v1111_v33 = vmax.f32 %v671_v28, 0.0  ;;  %v1161_v34 = vmax.f32 %v921_v29, 0.0  ;;  %v686_v35 = vadd.f32 %v1842_v31, %v2276_v5  ;;  %v936_v36 = vadd.f32 %v1917_v32, %v2276_v5  ;;  %v680_v37 = vpop.f32.mrb[15].mxu0  ;;  %v930_v38 = vpop.f32.mrb[15].mxu1 }
 0x140   : > { %1579 = vst.msk [vmem:[%s2527_s12 + $0x90] sm:$0xff] %vm26_vm0, %v1544_v30  ;;  %v681_v39 = vadd.f32 %v2276_v5, %v680_v37  ;;  %v931_v40 = vadd.f32 %v2276_v5, %v930_v38 }
 0x141   : > { %v1300_v41 = vld [vmem:[#allocation2 + $0x31] ss:$3 sm:$0xff]  ;;  %v1366_v42 = vld [vmem:[#allocation2 + $0x32] ss:$3 sm:$0xff]  ;;  %1209 = vst.msk [vmem:[#allocation2 + $0x62] sm:$0xff] %vm26_vm0, %v1111_v33  ;;  %1259 = vst.msk [vmem:[#allocation2 + $0x1f2] sm:$0xff] %vm26_vm0, %v1161_v34 }
 0x142   : > { %v1432_v43 = vld [vmem:[#allocation2 + $0x33] ss:$3 sm:$0xff]  ;;  %v1495_v44 = vmax.f32 %v1300_v41, %v1366_v42  ;;  %v1334_v45 = vld [vmem:[#allocation2 + $0x1c9] ss:$3 sm:$0xff]  ;;  %v1114_v48 = vmax.f32 %v686_v35, 0.0  ;;  %v1164_v49 = vmax.f32 %v936_v36, 0.0 }
 0x143   : > { %v1400_v46 = vld [vmem:[#allocation2 + $0x1ca] ss:$3 sm:$0xff]  ;;  %v1113_v50 = vmax.f32 %v681_v39, 0.0  ;;  %v1845_v51 = vpop.f32.mrb[16].mxu0  ;;  %v1920_v52 = vpop.f32.mrb[16].mxu1  ;;  %v1163_v55 = vmax.f32 %v931_v40, 0.0 }
 0x144   : > { %v1512_v47 = vmax.f32 %v1334_v45, %v1400_v46  ;;  %v1528_v53 = vmax.f32 %v1495_v44, %v1432_v43  ;;  %v1466_v54 = vld [vmem:[#allocation2 + $0x1cb] ss:$3 sm:$0xff]  ;;  %v696_v56 = vadd.f32 %v1845_v51, %v2276_v5  ;;  %v690_v57 = vpop.f32.mrb[17].mxu0  ;;  %v946_v58 = vadd.f32 %v1920_v52, %v2276_v5  ;;  %v940_v59 = vpop.f32.mrb[17].mxu1  ;;  %1212 = vst.msk [vmem:[#allocation2 + $0x7a] sm:$0xff] %vm26_vm0, %v1114_v48 }
 0x145   : > { %v1302_v61 = vld [vmem:[#allocation2 + $0x49] ss:$3 sm:$0xff]  ;;  %v1368_v62 = vld [vmem:[#allocation2 + $0x4a] ss:$3 sm:$0xff]  ;;  %1262 = vst.msk [vmem:[#allocation2 + $0x20a] sm:$0xff] %vm26_vm0, %v1164_v49  ;;  %1211 = vst.msk [vmem:[#allocation2 + $0x72] sm:$0xff] %vm26_vm0, %v1113_v50  ;;  %v691_v63 = vadd.f32 %v2276_v5, %v690_v57  ;;  %v941_v0 = vadd.f32 %v2276_v5, %v940_v59 }
 0x146   : > { %v1545_v60 = vmax.f32 %v1512_v47, %v1466_v54  ;;  %1563 = vst.msk [vmem:[%s2527_s12 + $0x10] sm:$0xff] %vm26_vm0, %v1528_v53  ;;  %v1496_v6 = vmax.f32 %v1302_v61, %v1368_v62  ;;  %1261 = vst.msk [vmem:[#allocation2 + $0x202] sm:$0xff] %vm26_vm0, %v1163_v55  ;;  %v1116_v7 = vmax.f32 %v696_v56, 0.0  ;;  %v1166_v8 = vmax.f32 %v946_v58, 0.0  ;;  %v1848_v9 = vpop.f32.mrb[18].mxu0  ;;  %v1923_v10 = vpop.f32.mrb[18].mxu1 }
 0x147   : > { %v1434_v11 = vld [vmem:[#allocation2 + $0x4b] ss:$3 sm:$0xff]  ;;  %v1115_v12 = vmax.f32 %v691_v63, 0.0  ;;  %v1165_v13 = vmax.f32 %v941_v0, 0.0  ;;  %v706_v14 = vadd.f32 %v1848_v9, %v2276_v5  ;;  %v956_v15 = vadd.f32 %v1923_v10, %v2276_v5  ;;  %v700_v16 = vpop.f32.mrb[19].mxu0  ;;  %v950_v17 = vpop.f32.mrb[19].mxu1 }
 0x148   : > { %1580 = vst.msk [vmem:[%s2527_s12 + $0x98] sm:$0xff] %vm26_vm0, %v1545_v60  ;;  %v1529_v18 = vmax.f32 %v1496_v6, %v1434_v11  ;;  %v1336_v19 = vld [vmem:[#allocation2 + $0x1e1] ss:$3 sm:$0xff]  ;;  %v1402_v20 = vld [vmem:[#allocation2 + $0x1e2] ss:$3 sm:$0xff]  ;;  %1214 = vst.msk [vmem:[#allocation2 + $0x8a] sm:$0xff] %vm26_vm0, %v1116_v7  ;;  %v701_v21 = vadd.f32 %v2276_v5, %v700_v16  ;;  %v951_v22 = vadd.f32 %v2276_v5, %v950_v17 }
 0x149   : > { %1264 = vst.msk [vmem:[#allocation2 + $0x21a] sm:$0xff] %vm26_vm0, %v1166_v8  ;;  %v1513_v23 = vmax.f32 %v1336_v19, %v1402_v20  ;;  %1213 = vst.msk [vmem:[#allocation2 + $0x82] sm:$0xff] %vm26_vm0, %v1115_v12  ;;  %v1118_v24 = vmax.f32 %v706_v14, 0.0  ;;  %v1168_v25 = vmax.f32 %v956_v15, 0.0  ;;  %v1468_v26 = vld [vmem:[#allocation2 + $0x1e3] ss:$3 sm:$0xff] }
 0x14a   : > { %1263 = vst.msk [vmem:[#allocation2 + $0x212] sm:$0xff] %vm26_vm0, %v1165_v13  ;;  %1564 = vst.msk [vmem:[%s2527_s12 + $0x18] sm:$0xff] %vm26_vm0, %v1529_v18  ;;  %v1117_v27 = vmax.f32 %v701_v21, 0.0  ;;  %v1167_v28 = vmax.f32 %v951_v22, 0.0  ;;  %v1851_v29 = vpop.f32.mrb[20].mxu0  ;;  %v1926_v30 = vpop.f32.mrb[20].mxu1 }
 0x14b   : > { %v1546_v31 = vmax.f32 %v1513_v23, %v1468_v26  ;;  %1216 = vst.msk [vmem:[#allocation2 + $0x9a] sm:$0xff] %vm26_vm0, %v1118_v24  ;;  %1266 = vst.msk [vmem:[#allocation2 + $0x22a] sm:$0xff] %vm26_vm0, %v1168_v25  ;;  %v716_v32 = vadd.f32 %v1851_v29, %v2276_v5  ;;  %v966_v33 = vadd.f32 %v1926_v30, %v2276_v5  ;;  %v710_v34 = vpop.f32.mrb[21].mxu0  ;;  %v960_v35 = vpop.f32.mrb[21].mxu1 }
 0x14c   : > { %v1304_v36 = vld [vmem:[#allocation2 + $0x61] ss:$3 sm:$0xff]  ;;  %v1370_v37 = vld [vmem:[#allocation2 + $0x62] ss:$3 sm:$0xff]  ;;  %1215 = vst.msk [vmem:[#allocation2 + $0x92] sm:$0xff] %vm26_vm0, %v1117_v27  ;;  %1265 = vst.msk [vmem:[#allocation2 + $0x222] sm:$0xff] %vm26_vm0, %v1167_v28  ;;  %v711_v38 = vadd.f32 %v2276_v5, %v710_v34  ;;  %v961_v39 = vadd.f32 %v2276_v5, %v960_v35 }
 0x14d   : > { %1581 = vst.msk [vmem:[%s2527_s12 + $0xa0] sm:$0xff] %vm26_vm0, %v1546_v31  ;;  %v1436_v40 = vld [vmem:[#allocation2 + $0x63] ss:$3 sm:$0xff]  ;;  %v1497_v41 = vmax.f32 %v1304_v36, %v1370_v37  ;;  %v1338_v42 = vld [vmem:[#allocation2 + $0x1f9] ss:$3 sm:$0xff]  ;;  %v1120_v45 = vmax.f32 %v716_v32, 0.0 }
 0x14e   : > { %v1404_v43 = vld [vmem:[#allocation2 + $0x1fa] ss:$3 sm:$0xff]  ;;  %v1170_v46 = vmax.f32 %v966_v33, 0.0  ;;  %v1119_v47 = vmax.f32 %v711_v38, 0.0  ;;  %v1854_v48 = vpop.f32.mrb[22].mxu0  ;;  %v1929_v49 = vpop.f32.mrb[22].mxu1 }
 0x14f   : > { %v1514_v44 = vmax.f32 %v1338_v42, %v1404_v43  ;;  %v1530_v50 = vmax.f32 %v1497_v41, %v1436_v40  ;;  %v1470_v51 = vld [vmem:[#allocation2 + $0x1fb] ss:$3 sm:$0xff]  ;;  %v1169_v52 = vmax.f32 %v961_v39, 0.0  ;;  %v726_v53 = vadd.f32 %v1854_v48, %v2276_v5  ;;  %v720_v54 = vpop.f32.mrb[23].mxu0  ;;  %v970_v56 = vpop.f32.mrb[23].mxu1  ;;  %1218 = vst.msk [vmem:[#allocation2 + $0xaa] sm:$0xff] %vm26_vm0, %v1120_v45 }
 0x150   : > { %v976_v55 = vadd.f32 %v1929_v49, %v2276_v5  ;;  %v1306_v58 = vld [vmem:[#allocation2 + $0x79] ss:$3 sm:$0xff]  ;;  %v1372_v59 = vld [vmem:[#allocation2 + $0x7a] ss:$3 sm:$0xff]  ;;  %1268 = vst.msk [vmem:[#allocation2 + $0x23a] sm:$0xff] %vm26_vm0, %v1170_v46  ;;  %1217 = vst.msk [vmem:[#allocation2 + $0xa2] sm:$0xff] %vm26_vm0, %v1119_v47  ;;  %v721_v60 = vadd.f32 %v2276_v5, %v720_v54  ;;  %v971_v61 = vadd.f32 %v2276_v5, %v970_v56 }
 0x151   : > { %v1547_v57 = vmax.f32 %v1514_v44, %v1470_v51  ;;  %1565 = vst.msk [vmem:[%s2527_s12 + $0x20] sm:$0xff] %vm26_vm0, %v1530_v50  ;;  %v1498_v62 = vmax.f32 %v1306_v58, %v1372_v59  ;;  %1267 = vst.msk [vmem:[#allocation2 + $0x232] sm:$0xff] %vm26_vm0, %v1169_v52  ;;  %v1122_v63 = vmax.f32 %v726_v53, 0.0  ;;  %v1438_v6 = vld [vmem:[#allocation2 + $0x7b] ss:$3 sm:$0xff] }
 0x152   : > { %v1172_v0 = vmax.f32 %v976_v55, 0.0  ;;  %v1121_v7 = vmax.f32 %v721_v60, 0.0  ;;  %v1171_v8 = vmax.f32 %v971_v61, 0.0  ;;  %v1857_v9 = vpop.f32.mrb[24].mxu0  ;;  %v1932_v10 = vpop.f32.mrb[24].mxu1 }
 0x153   : > { %1582 = vst.msk [vmem:[%s2527_s12 + $0xa8] sm:$0xff] %vm26_vm0, %v1547_v57  ;;  %v1531_v11 = vmax.f32 %v1498_v62, %v1438_v6  ;;  %v1340_v12 = vld [vmem:[#allocation2 + $0x211] ss:$3 sm:$0xff]  ;;  %v1406_v13 = vld [vmem:[#allocation2 + $0x212] ss:$3 sm:$0xff]  ;;  %1220 = vst.msk [vmem:[#allocation2 + $0xba] sm:$0xff] %vm26_vm0, %v1122_v63  ;;  %v736_v14 = vadd.f32 %v1857_v9, %v2276_v5  ;;  %v986_v15 = vadd.f32 %v1932_v10, %v2276_v5 }
 0x154   : > { %1270 = vst.msk [vmem:[#allocation2 + $0x24a] sm:$0xff] %vm26_vm0, %v1172_v0  ;;  %v1515_v16 = vmax.f32 %v1340_v12, %v1406_v13  ;;  %1219 = vst.msk [vmem:[#allocation2 + $0xb2] sm:$0xff] %vm26_vm0, %v1121_v7  ;;  %v730_v17 = vpop.f32.mrb[25].mxu0  ;;  %v980_v18 = vpop.f32.mrb[25].mxu1  ;;  %v1472_v19 = vld [vmem:[#allocation2 + $0x213] ss:$3 sm:$0xff] }
 0x155   : > { %1269 = vst.msk [vmem:[#allocation2 + $0x242] sm:$0xff] %vm26_vm0, %v1171_v8  ;;  %1566 = vst.msk [vmem:[%s2527_s12 + $0x28] sm:$0xff] %vm26_vm0, %v1531_v11  ;;  %v1124_v20 = vmax.f32 %v736_v14, 0.0  ;;  %v1174_v21 = vmax.f32 %v986_v15, 0.0  ;;  %v731_v22 = vadd.f32 %v2276_v5, %v730_v17  ;;  %v981_v23 = vadd.f32 %v2276_v5, %v980_v18 }
 0x156   : > { %v1548_v24 = vmax.f32 %v1515_v16, %v1472_v19  ;;  %v1860_v25 = vpop.f32.mrb[26].mxu0  ;;  %v1935_v26 = vpop.f32.mrb[26].mxu1 }
 0x157   : > { %v1308_v27 = vld [vmem:[#allocation2 + $0x91] ss:$3 sm:$0xff]  ;;  %v1374_v28 = vld [vmem:[#allocation2 + $0x92] ss:$3 sm:$0xff]  ;;  %1222 = vst.msk [vmem:[#allocation2 + $0xca] sm:$0xff] %vm26_vm0, %v1124_v20  ;;  %1272 = vst.msk [vmem:[#allocation2 + $0x25a] sm:$0xff] %vm26_vm0, %v1174_v21  ;;  %v746_v29 = vadd.f32 %v1860_v25, %v2276_v5  ;;  %v996_v30 = vadd.f32 %v1935_v26, %v2276_v5 }
 0x158   : > { %1583 = vst.msk [vmem:[%s2527_s12 + $0xb0] sm:$0xff] %vm26_vm0, %v1548_v24  ;;  %v1440_v31 = vld [vmem:[#allocation2 + $0x93] ss:$3 sm:$0xff]  ;;  %v1499_v32 = vmax.f32 %v1308_v27, %v1374_v28  ;;  %v1342_v33 = vld [vmem:[#allocation2 + $0x229] ss:$3 sm:$0xff]  ;;  %v1123_v36 = vmax.f32 %v731_v22, 0.0 }
 0x159   : > { %v1408_v34 = vld [vmem:[#allocation2 + $0x22a] ss:$3 sm:$0xff]  ;;  %v1173_v37 = vmax.f32 %v981_v23, 0.0  ;;  %v1126_v38 = vmax.f32 %v746_v29, 0.0  ;;  %v740_v39 = vpop.f32.mrb[27].mxu0  ;;  %v990_v40 = vpop.f32.mrb[27].mxu1 }
 0x15a   : > { %v1516_v35 = vmax.f32 %v1342_v33, %v1408_v34  ;;  %v1532_v41 = vmax.f32 %v1499_v32, %v1440_v31  ;;  %v1474_v42 = vld [vmem:[#allocation2 + $0x22b] ss:$3 sm:$0xff]  ;;  %v1176_v43 = vmax.f32 %v996_v30, 0.0  ;;  %v741_v44 = vadd.f32 %v2276_v5, %v740_v39  ;;  %v1863_v46 = vpop.f32.mrb[28].mxu0  ;;  %v1938_v47 = vpop.f32.mrb[28].mxu1  ;;  %1221 = vst.msk [vmem:[#allocation2 + $0xc2] sm:$0xff] %vm26_vm0, %v1123_v36 }
 0x15b   : > { %v991_v45 = vadd.f32 %v2276_v5, %v990_v40  ;;  %v1310_v49 = vld [vmem:[#allocation2 + $0xa9] ss:$3 sm:$0xff]  ;;  %v1376_v50 = vld [vmem:[#allocation2 + $0xaa] ss:$3 sm:$0xff]  ;;  %1271 = vst.msk [vmem:[#allocation2 + $0x252] sm:$0xff] %vm26_vm0, %v1173_v37  ;;  %1224 = vst.msk [vmem:[#allocation2 + $0xda] sm:$0xff] %vm26_vm0, %v1126_v38  ;;  %v756_v51 = vadd.f32 %v1863_v46, %v2276_v5  ;;  %v1006_v52 = vadd.f32 %v1938_v47, %v2276_v5 }
 0x15c   : > { %v1549_v48 = vmax.f32 %v1516_v35, %v1474_v42  ;;  %1567 = vst.msk [vmem:[%s2527_s12 + $0x30] sm:$0xff] %vm26_vm0, %v1532_v41  ;;  %v1500_v53 = vmax.f32 %v1310_v49, %v1376_v50  ;;  %1274 = vst.msk [vmem:[#allocation2 + $0x26a] sm:$0xff] %vm26_vm0, %v1176_v43  ;;  %v1125_v54 = vmax.f32 %v741_v44, 0.0  ;;  %v750_v56 = vpop.f32.mrb[29].mxu0  ;;  %v1000_v57 = vpop.f32.mrb[29].mxu1 }
 0x15d   : > { %v1175_v55 = vmax.f32 %v991_v45, 0.0  ;;  %v1442_v58 = vld [vmem:[#allocation2 + $0xab] ss:$3 sm:$0xff]  ;;  %v1128_v59 = vmax.f32 %v756_v51, 0.0  ;;  %v751_v60 = vadd.f32 %v2276_v5, %v750_v56  ;;  %v1178_v61 = vmax.f32 %v1006_v52, 0.0 }
 0x15e   : > { %1584 = vst.msk [vmem:[%s2527_s12 + $0xb8] sm:$0xff] %vm26_vm0, %v1549_v48  ;;  %v1001_v62 = vadd.f32 %v2276_v5, %v1000_v57  ;;  %v1533_v63 = vmax.f32 %v1500_v53, %v1442_v58  ;;  %1223 = vst.msk [vmem:[#allocation2 + $0xd2] sm:$0xff] %vm26_vm0, %v1125_v54  ;;  %v1866_v0 = vpop.f32.mrb[30].mxu0  ;;  %v1941_v6 = vpop.f32.mrb[30].mxu1 }
 0x15f   : > { %1273 = vst.msk [vmem:[#allocation2 + $0x262] sm:$0xff] %vm26_vm0, %v1175_v55  ;;  %1226 = vst.msk [vmem:[#allocation2 + $0xea] sm:$0xff] %vm26_vm0, %v1128_v59  ;;  %v1127_v7 = vmax.f32 %v751_v60, 0.0  ;;  %v766_v9 = vadd.f32 %v1866_v0, %v2276_v5  ;;  %v1016_v10 = vadd.f32 %v1941_v6, %v2276_v5  ;;  %v760_v11 = vpop.f32.mrb[31].mxu0  ;;  %v1010_v12 = vpop.f32.mrb[31].mxu1 }
 0x160   : > { %1276 = vst.msk [vmem:[#allocation2 + $0x27a] sm:$0xff] %vm26_vm0, %v1178_v61  ;;  %v1177_v8 = vmax.f32 %v1001_v62, 0.0  ;;  %1568 = vst.msk [vmem:[%s2527_s12 + $0x38] sm:$0xff] %vm26_vm0, %v1533_v63  ;;  %v761_v13 = vadd.f32 %v2276_v5, %v760_v11  ;;  %v1011_v14 = vadd.f32 %v2276_v5, %v1010_v12 }
 0x161   : > { %1225 = vst.msk [vmem:[#allocation2 + $0xe2] sm:$0xff] %vm26_vm0, %v1127_v7  ;;  %v1130_v15 = vmax.f32 %v766_v9, 0.0  ;;  %v1180_v16 = vmax.f32 %v1016_v10, 0.0 }
 0x162   : > { %1275 = vst.msk [vmem:[#allocation2 + $0x272] sm:$0xff] %vm26_vm0, %v1177_v8  ;;  %v1344_v17 = vld [vmem:[#allocation2 + $0x241] ss:$3 sm:$0xff]  ;;  %v1410_v18 = vld [vmem:[#allocation2 + $0x242] ss:$3 sm:$0xff]  ;;  %v1129_v20 = vmax.f32 %v761_v13, 0.0 }
 0x163   : > { %v1517_v19 = vmax.f32 %v1344_v17, %v1410_v18  ;;  %1228 = vst.msk [vmem:[#allocation2 + $0xfa] sm:$0xff] %vm26_vm0, %v1130_v15  ;;  %1278 = vst.msk [vmem:[#allocation2 + $0x28a] sm:$0xff] %vm26_vm0, %v1180_v16  ;;  %v1179_v21 = vmax.f32 %v1011_v14, 0.0  ;;  %v1869_v22 = vpop.f32.mrb[32].mxu0  ;;  %v1944_v23 = vpop.f32.mrb[32].mxu1 }
 0x164   : > { %v1476_v24 = vld [vmem:[#allocation2 + $0x243] ss:$3 sm:$0xff]  ;;  %v776_v25 = vadd.f32 %v1869_v22, %v2276_v5  ;;  %v1026_v26 = vadd.f32 %v1944_v23, %v2276_v5  ;;  %v770_v27 = vpop.f32.mrb[33].mxu0  ;;  %v1020_v28 = vpop.f32.mrb[33].mxu1  ;;  %1227 = vst.msk [vmem:[#allocation2 + $0xf2] sm:$0xff] %vm26_vm0, %v1129_v20 }
 0x165   : > { %v1550_v29 = vmax.f32 %v1517_v19, %v1476_v24  ;;  %v1312_v30 = vld [vmem:[#allocation2 + $0xc1] ss:$3 sm:$0xff]  ;;  %v1378_v31 = vld [vmem:[#allocation2 + $0xc2] ss:$3 sm:$0xff]  ;;  %1277 = vst.msk [vmem:[#allocation2 + $0x282] sm:$0xff] %vm26_vm0, %v1179_v21  ;;  %v771_v32 = vadd.f32 %v2276_v5, %v770_v27  ;;  %v1021_v33 = vadd.f32 %v2276_v5, %v1020_v28 }
 0x166   : > { %v1444_v34 = vld [vmem:[#allocation2 + $0xc3] ss:$3 sm:$0xff]  ;;  %v1501_v35 = vmax.f32 %v1312_v30, %v1378_v31  ;;  %v1346_v36 = vld [vmem:[#allocation2 + $0x259] ss:$3 sm:$0xff]  ;;  %v1132_v39 = vmax.f32 %v776_v25, 0.0  ;;  %v1182_v40 = vmax.f32 %v1026_v26, 0.0 }
 0x167   : > { %v1412_v37 = vld [vmem:[#allocation2 + $0x25a] ss:$3 sm:$0xff]  ;;  %1585 = vst.msk [vmem:[%s2527_s12 + $0xc0] sm:$0xff] %vm26_vm0, %v1550_v29  ;;  %v1131_v41 = vmax.f32 %v771_v32, 0.0  ;;  %v1872_v42 = vpop.f32.mrb[34].mxu0  ;;  %v1947_v43 = vpop.f32.mrb[34].mxu1 }
 0x168   : > { %v1518_v38 = vmax.f32 %v1346_v36, %v1412_v37  ;;  %v1534_v44 = vmax.f32 %v1501_v35, %v1444_v34  ;;  %v1478_v45 = vld [vmem:[#allocation2 + $0x25b] ss:$3 sm:$0xff]  ;;  %v1314_v46 = vld [vmem:[#allocation2 + $0xd9] ss:$3 sm:$0xff]  ;;  %v1380_v47 = vld [vmem:[#allocation2 + $0xda] ss:$3 sm:$0xff]  ;;  %v786_v48 = vadd.f32 %v1872_v42, %v2276_v5  ;;  %v1036_v49 = vadd.f32 %v1947_v43, %v2276_v5 }
 0x169   : > { %v1502_v51 = vmax.f32 %v1314_v46, %v1380_v47  ;;  %1230 = vst.msk [vmem:[#allocation2 + $0x10a] sm:$0xff] %vm26_vm0, %v1132_v39  ;;  %1280 = vst.msk [vmem:[#allocation2 + $0x29a] sm:$0xff] %vm26_vm0, %v1182_v40  ;;  %v1181_v52 = vmax.f32 %v1021_v33, 0.0  ;;  %v780_v53 = vpop.f32.mrb[35].mxu0  ;;  %v1030_v54 = vpop.f32.mrb[35].mxu1 }
 0x16a   : > { %v1551_v50 = vmax.f32 %v1518_v38, %v1478_v45  ;;  %1229 = vst.msk [vmem:[#allocation2 + $0x102] sm:$0xff] %vm26_vm0, %v1131_v41  ;;  %1569 = vst.msk [vmem:[%s2527_s12 + $0x40] sm:$0xff] %vm26_vm0, %v1534_v44  ;;  %v1446_v55 = vld [vmem:[#allocation2 + $0xdb] ss:$3 sm:$0xff]  ;;  %v1134_v56 = vmax.f32 %v786_v48, 0.0  ;;  %v781_v57 = vadd.f32 %v2276_v5, %v780_v53  ;;  %v1184_v58 = vmax.f32 %v1036_v49, 0.0 }
 0x16b   : > { %v1031_v59 = vadd.f32 %v2276_v5, %v1030_v54  ;;  %v1875_v60 = vpop.f32.mrb[36].mxu0  ;;  %v1950_v61 = vpop.f32.mrb[36].mxu1  ;;  %v1535_v62 = vmax.f32 %v1502_v51, %v1446_v55  ;;  %1279 = vst.msk [vmem:[#allocation2 + $0x292] sm:$0xff] %vm26_vm0, %v1181_v52 }
 0x16c   : > { %1586 = vst.msk [vmem:[%s2527_s12 + $0xc8] sm:$0xff] %vm26_vm0, %v1551_v50  ;;  %v796_v63 = vadd.f32 %v1875_v60, %v2276_v5  ;;  %v1046_v0 = vadd.f32 %v1950_v61, %v2276_v5  ;;  %v790_v6 = vpop.f32.mrb[37].mxu0  ;;  %v1040_v7 = vpop.f32.mrb[37].mxu1  ;;  %v1348_v8 = vld [vmem:[#allocation2 + $0x271] ss:$3 sm:$0xff]  ;;  %1232 = vst.msk [vmem:[#allocation2 + $0x11a] sm:$0xff] %vm26_vm0, %v1134_v56 }
 0x16d   : > { %v1414_v9 = vld [vmem:[#allocation2 + $0x272] ss:$3 sm:$0xff]  ;;  %1282 = vst.msk [vmem:[#allocation2 + $0x2aa] sm:$0xff] %vm26_vm0, %v1184_v58  ;;  %v791_v10 = vadd.f32 %v2276_v5, %v790_v6  ;;  %v1041_v11 = vadd.f32 %v2276_v5, %v1040_v7  ;;  %1570 = vst.msk [vmem:[%s2527_s12 + $0x48] sm:$0xff] %vm26_vm0, %v1535_v62  ;;  %v1480_v12 = vld [vmem:[#allocation2 + $0x273] ss:$3 sm:$0xff] }
 0x16e   : > { %v1519_v13 = vmax.f32 %v1348_v8, %v1414_v9  ;;  %v1133_v14 = vmax.f32 %v781_v57, 0.0  ;;  %v1183_v15 = vmax.f32 %v1031_v59, 0.0  ;;  %v1136_v16 = vmax.f32 %v796_v63, 0.0  ;;  %v1878_v20 = vpop.f32.mrb[38].mxu0  ;;  %v1953_v21 = vpop.f32.mrb[38].mxu1 }
 0x16f   : > { %v1186_v17 = vmax.f32 %v1046_v0, 0.0  ;;  %v1135_v18 = vmax.f32 %v791_v10, 0.0  ;;  %v1185_v19 = vmax.f32 %v1041_v11, 0.0  ;;  %v806_v23 = vadd.f32 %v1878_v20, %v2276_v5  ;;  %v800_v25 = vpop.f32.mrb[39].mxu0  ;;  %v1050_v26 = vpop.f32.mrb[39].mxu1 }
 0x170   : > { %v1552_v22 = vmax.f32 %v1519_v13, %v1480_v12  ;;  %1231 = vst.msk [vmem:[#allocation2 + $0x112] sm:$0xff] %vm26_vm0, %v1133_v14  ;;  %1281 = vst.msk [vmem:[#allocation2 + $0x2a2] sm:$0xff] %vm26_vm0, %v1183_v15  ;;  %v1056_v24 = vadd.f32 %v1953_v21, %v2276_v5  ;;  %v801_v29 = vadd.f32 %v2276_v5, %v800_v25 }
 0x171   : > { %1234 = vst.msk [vmem:[#allocation2 + $0x12a] sm:$0xff] %vm26_vm0, %v1136_v16  ;;  %v1316_v27 = vld [vmem:[#allocation2 + $0xf1] ss:$3 sm:$0xff]  ;;  %v1382_v28 = vld [vmem:[#allocation2 + $0xf2] ss:$3 sm:$0xff]  ;;  %1284 = vst.msk [vmem:[#allocation2 + $0x2ba] sm:$0xff] %vm26_vm0, %v1186_v17  ;;  %v1051_v30 = vadd.f32 %v2276_v5, %v1050_v26 }
 0x172   : > { %1233 = vst.msk [vmem:[#allocation2 + $0x122] sm:$0xff] %vm26_vm0, %v1135_v18  ;;  %1283 = vst.msk [vmem:[#allocation2 + $0x2b2] sm:$0xff] %vm26_vm0, %v1185_v19  ;;  %v1503_v31 = vmax.f32 %v1316_v27, %v1382_v28  ;;  %v1138_v32 = vmax.f32 %v806_v23, 0.0  ;;  %v1188_v33 = vmax.f32 %v1056_v24, 0.0  ;;  %v1448_v34 = vld [vmem:[#allocation2 + $0xf3] ss:$3 sm:$0xff] }
 0x173   : > { %1587 = vst.msk [vmem:[%s2527_s12 + $0xd0] sm:$0xff] %vm26_vm0, %v1552_v22  ;;  %v1350_v35 = vld [vmem:[#allocation2 + $0x289] ss:$3 sm:$0xff]  ;;  %v1416_v36 = vld [vmem:[#allocation2 + $0x28a] ss:$3 sm:$0xff]  ;;  %v1137_v39 = vmax.f32 %v801_v29, 0.0 }
 0x174   : > { %v1536_v37 = vmax.f32 %v1503_v31, %v1448_v34  ;;  %v1520_v38 = vmax.f32 %v1350_v35, %v1416_v36  ;;  %1236 = vst.msk [vmem:[#allocation2 + $0x13a] sm:$0xff] %vm26_vm0, %v1138_v32  ;;  %1286 = vst.msk [vmem:[#allocation2 + $0x2ca] sm:$0xff] %vm26_vm0, %v1188_v33  ;;  %v1187_v40 = vmax.f32 %v1051_v30, 0.0  ;;  %v1881_v41 = vpop.f32.mrb[40].mxu0  ;;  %v1956_v42 = vpop.f32.mrb[40].mxu1 }
 0x175   : > { %v1482_v43 = vld [vmem:[#allocation2 + $0x28b] ss:$3 sm:$0xff]  ;;  %v816_v44 = vadd.f32 %v1881_v41, %v2276_v5  ;;  %v810_v45 = vpop.f32.mrb[41].mxu0  ;;  %v1066_v46 = vadd.f32 %v1956_v42, %v2276_v5  ;;  %v1060_v47 = vpop.f32.mrb[41].mxu1  ;;  %1235 = vst.msk [vmem:[#allocation2 + $0x132] sm:$0xff] %vm26_vm0, %v1137_v39 }
 0x176   : > { %1571 = vst.msk [vmem:[%s2527_s12 + $0x50] sm:$0xff] %vm26_vm0, %v1536_v37  ;;  %v1553_v48 = vmax.f32 %v1520_v38, %v1482_v43  ;;  %1285 = vst.msk [vmem:[#allocation2 + $0x2c2] sm:$0xff] %vm26_vm0, %v1187_v40  ;;  %v811_v49 = vadd.f32 %v2276_v5, %v810_v45  ;;  %v1061_v50 = vadd.f32 %v2276_v5, %v1060_v47  ;;  %v1884_v61 = vpop.f32.mrb[42].mxu0  ;;  %v1959_v62 = vpop.f32.mrb[42].mxu1 }
 0x177   : > { %v1318_v51 = vld [vmem:[#allocation2 + $0x109] ss:$3 sm:$0xff]  ;;  %v1384_v52 = vld [vmem:[#allocation2 + $0x10a] ss:$3 sm:$0xff]  ;;  %v1450_v53 = vld [vmem:[#allocation2 + $0x10b] ss:$3 sm:$0xff]  ;;  %v826_v7 = vadd.f32 %v1884_v61, %v2276_v5  ;;  %v1076_v8 = vadd.f32 %v1959_v62, %v2276_v5 }
 0x178   : > { %1588 = vst.msk [vmem:[%s2527_s12 + $0xd8] sm:$0xff] %vm26_vm0, %v1553_v48  ;;  %v1504_v54 = vmax.f32 %v1318_v51, %v1384_v52  ;;  %v1140_v58 = vmax.f32 %v816_v44, 0.0  ;;  %v1139_v59 = vmax.f32 %v811_v49, 0.0  ;;  %v1190_v60 = vmax.f32 %v1066_v46, 0.0  ;;  %v820_v9 = vpop.f32.mrb[43].mxu0  ;;  %v1070_v10 = vpop.f32.mrb[43].mxu1 }
 0x179   : > { %v1352_v55 = vld [vmem:[#allocation2 + $0x2a1] ss:$3 sm:$0xff]  ;;  %v1418_v56 = vld [vmem:[#allocation2 + $0x2a2] ss:$3 sm:$0xff]  ;;  %v1484_v0 = vld [vmem:[#allocation2 + $0x2a3] ss:$3 sm:$0xff]  ;;  %v821_v12 = vadd.f32 %v2276_v5, %v820_v9  ;;  %v1071_v13 = vadd.f32 %v2276_v5, %v1070_v10 }
 0x17a   : > { %v1521_v57 = vmax.f32 %v1352_v55, %v1418_v56  ;;  %v1537_v63 = vmax.f32 %v1504_v54, %v1450_v53  ;;  %v1189_v6 = vmax.f32 %v1061_v50, 0.0  ;;  %1238 = vst.msk [vmem:[#allocation2 + $0x14a] sm:$0xff] %vm26_vm0, %v1140_v58  ;;  %1237 = vst.msk [vmem:[#allocation2 + $0x142] sm:$0xff] %vm26_vm0, %v1139_v59  ;;  %v1887_v14 = vpop.f32.mrb[44].mxu0  ;;  %v1962_v15 = vpop.f32.mrb[44].mxu1  ;;  %v1142_v16 = vmax.f32 %v826_v7, 0.0 }
 0x17b   : > { %1288 = vst.msk [vmem:[#allocation2 + $0x2da] sm:$0xff] %vm26_vm0, %v1190_v60  ;;  %v1192_v17 = vmax.f32 %v1076_v8, 0.0  ;;  %v836_v18 = vadd.f32 %v1887_v14, %v2276_v5  ;;  %v1086_v19 = vadd.f32 %v1962_v15, %v2276_v5  ;;  %v830_v20 = vpop.f32.mrb[45].mxu0  ;;  %v1080_v21 = vpop.f32.mrb[45].mxu1  ;;  %v1141_v32 = vmax.f32 %v821_v12, 0.0 }
 0x17c   : > { %v1554_v11 = vmax.f32 %v1521_v57, %v1484_v0  ;;  %1572 = vst.msk [vmem:[%s2527_s12 + $0x58] sm:$0xff] %vm26_vm0, %v1537_v63  ;;  %1287 = vst.msk [vmem:[#allocation2 + $0x2d2] sm:$0xff] %vm26_vm0, %v1189_v6  ;;  %v1320_v22 = vld [vmem:[#allocation2 + $0x121] ss:$3 sm:$0xff]  ;;  %v1386_v23 = vld [vmem:[#allocation2 + $0x122] ss:$3 sm:$0xff]  ;;  %v831_v25 = vadd.f32 %v2276_v5, %v830_v20  ;;  %v1081_v26 = vadd.f32 %v2276_v5, %v1080_v21 }
 0x17d   : > { %v1452_v24 = vld [vmem:[#allocation2 + $0x123] ss:$3 sm:$0xff]  ;;  %v1505_v27 = vmax.f32 %v1320_v22, %v1386_v23  ;;  %v1354_v28 = vld [vmem:[#allocation2 + $0x2b9] ss:$3 sm:$0xff]  ;;  %v1486_v30 = vld [vmem:[#allocation2 + $0x2bb] ss:$3 sm:$0xff] }
 0x17e   : > { %1589 = vst.msk [vmem:[%s2527_s12 + $0xe0] sm:$0xff] %vm26_vm0, %v1554_v11  ;;  %v1420_v29 = vld [vmem:[#allocation2 + $0x2ba] ss:$3 sm:$0xff]  ;;  %1240 = vst.msk [vmem:[#allocation2 + $0x15a] sm:$0xff] %vm26_vm0, %v1142_v16  ;;  %v1191_v33 = vmax.f32 %v1071_v13, 0.0  ;;  %v1144_v34 = vmax.f32 %v836_v18, 0.0 }
 0x17f   : > { %1290 = vst.msk [vmem:[#allocation2 + $0x2ea] sm:$0xff] %vm26_vm0, %v1192_v17  ;;  %v1522_v31 = vmax.f32 %v1354_v28, %v1420_v29  ;;  %v1890_v35 = vpop.f32.mrb[46].mxu0  ;;  %v1965_v36 = vpop.f32.mrb[46].mxu1  ;;  %v1538_v37 = vmax.f32 %v1505_v27, %v1452_v24  ;;  %v1194_v38 = vmax.f32 %v1086_v19, 0.0  ;;  %v1143_v39 = vmax.f32 %v831_v25, 0.0  ;;  %1239 = vst.msk [vmem:[#allocation2 + $0x152] sm:$0xff] %vm26_vm0, %v1141_v32 }
 0x180   : > { %v1193_v40 = vmax.f32 %v1081_v26, 0.0  ;;  %v840_v41 = vpop.f32.mrb[47].mxu0  ;;  %v1090_v42 = vpop.f32.mrb[47].mxu1  ;;  %1289 = vst.msk [vmem:[#allocation2 + $0x2e2] sm:$0xff] %vm26_vm0, %v1191_v33  ;;  %1242 = vst.msk [vmem:[#allocation2 + $0x16a] sm:$0xff] %vm26_vm0, %v1144_v34  ;;  %v846_v44 = vadd.f32 %v1890_v35, %v2276_v5  ;;  %v1096_v45 = vadd.f32 %v1965_v36, %v2276_v5 }
 0x181   : > { %v1555_v43 = vmax.f32 %v1522_v31, %v1486_v30  ;;  %v841_v46 = vadd.f32 %v2276_v5, %v840_v41  ;;  %1573 = vst.msk [vmem:[%s2527_s12 + $0x60] sm:$0xff] %vm26_vm0, %v1538_v37  ;;  %v1322_v47 = vld [vmem:[#allocation2 + $0x139] ss:$3 sm:$0xff]  ;;  %v1388_v48 = vld [vmem:[#allocation2 + $0x13a] ss:$3 sm:$0xff]  ;;  %1292 = vst.msk [vmem:[#allocation2 + $0x2fa] sm:$0xff] %vm26_vm0, %v1194_v38  ;;  %v1091_v49 = vadd.f32 %v2276_v5, %v1090_v42 }
 0x182   : > { %1241 = vst.msk [vmem:[#allocation2 + $0x162] sm:$0xff] %vm26_vm0, %v1143_v39  ;;  %1291 = vst.msk [vmem:[#allocation2 + $0x2f2] sm:$0xff] %vm26_vm0, %v1193_v40  ;;  %v1506_v50 = vmax.f32 %v1322_v47, %v1388_v48  ;;  %v1146_v51 = vmax.f32 %v846_v44, 0.0  ;;  %v1196_v52 = vmax.f32 %v1096_v45, 0.0  ;;  %v1893_v54 = vpop.f32.mrb[48].mxu0 }
 0x183   : > { %1590 = vst.msk [vmem:[%s2527_s12 + $0xe8] sm:$0xff] %vm26_vm0, %v1555_v43  ;;  %v1145_v53 = vmax.f32 %v841_v46, 0.0  ;;  %v1454_v55 = vld [vmem:[#allocation2 + $0x13b] ss:$3 sm:$0xff]  ;;  %v1195_v56 = vmax.f32 %v1091_v49, 0.0  ;;  %v856_v57 = vadd.f32 %v1893_v54, %v2276_v5  ;;  %v850_v58 = vpop.f32.mrb[49].mxu0 }
 0x184   : > { %v1539_v59 = vmax.f32 %v1506_v50, %v1454_v55  ;;  %1244 = vst.msk [vmem:[#allocation2 + $0x17a] sm:$0xff] %vm26_vm0, %v1146_v51  ;;  %1294 = vst.msk [vmem:[#allocation2 + $0x30a] sm:$0xff] %vm26_vm0, %v1196_v52  ;;  %v851_v60 = vadd.f32 %v2276_v5, %v850_v58 }
 0x185   : > { %1243 = vst.msk [vmem:[#allocation2 + $0x172] sm:$0xff] %vm26_vm0, %v1145_v53  ;;  %1293 = vst.msk [vmem:[#allocation2 + $0x302] sm:$0xff] %vm26_vm0, %v1195_v56  ;;  %v1148_v61 = vmax.f32 %v856_v57, 0.0 }
 0x186   : > { %1574 = vst.msk [vmem:[%s2527_s12 + $0x68] sm:$0xff] %vm26_vm0, %v1539_v59  ;;  %v1147_v62 = vmax.f32 %v851_v60, 0.0 }
 0x187   : > { %v1356_v63 = vld [vmem:[#allocation2 + $0x2d1] ss:$3 sm:$0xff]  ;;  %v1422_v0 = vld [vmem:[#allocation2 + $0x2d2] ss:$3 sm:$0xff]  ;;  %1246 = vst.msk [vmem:[#allocation2 + $0x18a] sm:$0xff] %vm26_vm0, %v1148_v61 }
 0x188   : > { %v1523_v6 = vmax.f32 %v1356_v63, %v1422_v0  ;;  %1245 = vst.msk [vmem:[#allocation2 + $0x182] sm:$0xff] %vm26_vm0, %v1147_v62  ;;  %v1488_v9 = vld [vmem:[#allocation2 + $0x2d3] ss:$3 sm:$0xff] }
 0x189   : > { %v1324_v7 = vld [vmem:[#allocation2 + $0x151] ss:$3 sm:$0xff]  ;;  %v1390_v8 = vld [vmem:[#allocation2 + $0x152] ss:$3 sm:$0xff]  ;;  %v1424_v12 = vld [vmem:[#allocation2 + $0x2ea] ss:$3 sm:$0xff] }
 0x18a   : > { %v1507_v10 = vmax.f32 %v1324_v7, %v1390_v8  ;;  %v1358_v11 = vld [vmem:[#allocation2 + $0x2e9] ss:$3 sm:$0xff]  ;;  %v1556_v13 = vmax.f32 %v1523_v6, %v1488_v9  ;;  %v1456_v14 = vld [vmem:[#allocation2 + $0x153] ss:$3 sm:$0xff]  ;;  %v1490_v17 = vld [vmem:[#allocation2 + $0x2eb] ss:$3 sm:$0xff] }
 0x18b   : > { %v1524_v15 = vmax.f32 %v1358_v11, %v1424_v12 }
 0x18c   : > { %v1540_v16 = vmax.f32 %v1507_v10, %v1456_v14  ;;  %v1326_v18 = vld [vmem:[#allocation2 + $0x169] ss:$3 sm:$0xff]  ;;  %v1392_v19 = vld [vmem:[#allocation2 + $0x16a] ss:$3 sm:$0xff]  ;;  %1591 = vst.msk [vmem:[%s2527_s12 + $0xf0] sm:$0xff] %vm26_vm0, %v1556_v13 }
 0x18d   : > { %v1557_v20 = vmax.f32 %v1524_v15, %v1490_v17  ;;  %v1508_v21 = vmax.f32 %v1326_v18, %v1392_v19  ;;  %v1360_v22 = vld [vmem:[#allocation2 + $0x301] ss:$3 sm:$0x3f]  ;;  %v1426_v23 = vld [vmem:[#allocation2 + $0x302] ss:$3 sm:$0x3f] }
 0x18e   : > { %1575 = vst.msk [vmem:[%s2527_s12 + $0x70] sm:$0xff] %vm26_vm0, %v1540_v16  ;;  %v1458_v24 = vld [vmem:[#allocation2 + $0x16b] ss:$3 sm:$0xff]  ;;  %v1492_v25 = vld [vmem:[#allocation2 + $0x303] ss:$3 sm:$0x3f]  ;;  %v1525_v26 = vmax.f32 %v1360_v22, %v1426_v23 }
 0x18f   : > { %1592 = vst.msk [vmem:[%s2527_s12 + $0xf8] sm:$0xff] %vm26_vm0, %v1557_v20  ;;  %v1541_v27 = vmax.f32 %v1508_v21, %v1458_v24  ;;  %v1328_v29 = vld [vmem:[#allocation2 + $0x181] ss:$3 sm:$0xff]  ;;  %v1394_v30 = vld [vmem:[#allocation2 + $0x182] ss:$3 sm:$0xff]  ;;  %137 = sbr.rel (!%p135_p8) target bundleno = 69 (0x45), region = 144 }
 0x190   : > { %v1558_v28 = vmax.f32 %v1525_v26, %v1492_v25  ;;  %v1509_v31 = vmax.f32 %v1328_v29, %v1394_v30  ;;  %v1460_v32 = vld [vmem:[#allocation2 + $0x183] ss:$3 sm:$0xff] }
 0x191   : > { %1576 = vst.msk [vmem:[%s2527_s12 + $0x78] sm:$0xff] %vm26_vm0, %v1541_v27 }
 0x192   : > { %1594 = vst.msk [vmem:[%s2527_s12 + $0x100] sm:$0x3f] %vm1593_vm5, %v1558_v28  ;;  %v1542_v33 = vmax.f32 %v1509_v31, %v1460_v32 }
 0x194   : > { %1577 = vst.msk [vmem:[%s2527_s12 + $0x80] sm:$0xff] %vm26_vm0, %v1542_v33 }
 0x196   :  { %1599 = vsyncpa [#allocation4], 1 }

// kernel: one_cnnc_forward.4
= control target key start
LH: loop header
LB: loop body
LE: loop exit
PB: predicated region body
PF: predicated region fallthrough
CT: control target
= control target key end

     0   :  { %8 = vsyncpa [#allocation4], 0  ;;  %s5658_s0 = inlined_call_operand.vmem [shape: f32[2,286,32], index: 0, kind: input, shape index: {}]   ;;  %s5659_s1 = inlined_call_operand.hbm [shape: f32[800,64], index: 1, kind: input, shape index: {}]   ;;  %s5660_s2 = inlined_call_operand.hbm [shape: f32[1,64], index: 2, kind: input, shape index: {}]   ;;  %s5661_s3 = inlined_call_operand.vmem [shape: f32[2,88,64], index: 3, kind: output, shape index: {}]  }
   0x1   :  { %9 = vsyncpa [#allocation6], 0  ;;  %s3971_s12 = smov [#allocation3]   ;;  %s3915_s16 = scalar_lea.hbm %s5659_s1, 12800 }
   0x2   :  { %s17_s13 = sshll.u32 %s3971_s12, 4  ;;  %p3916_p0 = scmp.ne.s32.totalorder %s5659_s1, %s3915_s16  ;;  %s18_s13 = int_to_ptr.vmem [resolvable:$true] %s17_s13 }
   0x3   :  { %p3919_p1 = scmp.lt.u32.totalorder %s3915_s16, %s5659_s1 }
   0x5   :  { %p3921_p2 = pnand %p3919_p1, %p3916_p0 }
   0x7   :  { %3924 = shalt.err (!%p3921_p2)
}
   0x8   :  { %s3925_s21 = scalar_lea.vmem %s18_s13, 12800  ;;  %p3930_p4 = scmp.lt.s32.totalorder %s18_s13, %s18_s13 }
   0x9   :  { %p3926_p3 = scmp.ne.s32.totalorder %s18_s13, %s3925_s21  ;;  %p3931_p5 = scmp.lt.s32.totalorder %s3925_s21, %s3925_s21 }
   0xb   :  { %p3932_p6 = por %p3931_p5, %p3930_p4 }
   0xd   :  { %p3933_p7 = pnand %p3932_p6, %p3926_p3 }
   0xf   :  { %3936 = shalt.err (!%p3933_p7)
}
  0x10   :  { %s3972_s22 = smov 128   ;;  %s3973_s23 = smov 8  }
  0x11   :  { %23 = dma.hbm_to_vmem [thread:$0]  %s5659_s1, 12800, %s18_s13, [#allocation4], %s3972_s22, %s3972_s22, %s3973_s23  }
  0x12   :  { %s3974_s26 = smov [#allocation5]   ;;  %s3937_s30 = scalar_lea.hbm %s5660_s2, 16 }
  0x13   :  { %s30_s27 = sshll.u32 %s3974_s26, 4  ;;  %p3938_p8 = scmp.ne.s32.totalorder %s5660_s2, %s3937_s30  ;;  %s31_s27 = int_to_ptr.vmem [resolvable:$true] %s30_s27 }
  0x14   :  { %p3941_p9 = scmp.lt.u32.totalorder %s3937_s30, %s5660_s2 }
  0x16   :  { %p3943_p10 = pnand %p3941_p9, %p3938_p8 }
  0x18   :  { %3946 = shalt.err (!%p3943_p10)
}
  0x19   :  { %s3947_s8 = scalar_lea.vmem %s31_s27, 16  ;;  %s3951_s1 = scalar_lea.vmem %s31_s27, 32 }
  0x1a   :  { %p3948_p11 = scmp.ne.s32.totalorder %s31_s27, %s3947_s8  ;;  %p3952_p12 = scmp.lt.s32.totalorder %s31_s27, %s31_s27 }
  0x1b   :  { %p3953_p13 = scmp.lt.s32.totalorder %s3951_s1, %s3947_s8 }
  0x1d   :  { %p3954_p0 = por %p3953_p13, %p3952_p12 }
  0x1f   :  { %p3955_p1 = pnand %p3954_p0, %p3948_p11 }
  0x21   :  { %3958 = shalt.err (!%p3955_p1)
}
  0x22   :  { %33 = dma.hbm_to_vmem [thread:$0]  %s5660_s2, 16, %s31_s27, [#allocation6]  }
  0x23   :  { %3963 = dma.done.wait [#allocation4], 12800  }
  0x24   :  { %3964 = vsyncadd [#allocation4], 4294954496 }
  0x25   :  { %3965 = dma.done.wait [#allocation6], 16  }
  0x26   :  { %3966 = vsyncadd [#allocation6], 4294967280  ;;  %vm40_vm0 = vcmask 523264   ;;  %v3975_v0 = vmov 0.0   ;;  %v4060_v1 = vld [vmem:[#allocation3] sm:$0xff]  ;;  %v4062_v2 = vld [vmem:[#allocation3 + $0x8] sm:$0xff] }
  0x27   :  { %41 = vst.msk [vmem:[#allocation2] sm:$0xff] %vm40_vm0, %v3975_v0  ;;  %42 = vst.msk [vmem:[#allocation2 + $0x8] sm:$0xff] %vm40_vm0, %v3975_v0  ;;  %v4064_v3 = vld [vmem:[#allocation3 + $0x10] sm:$0xff]  ;;  %v4066_v4 = vld [vmem:[#allocation3 + $0x18] sm:$0xff]  ;;  %s4262_s2 = smov 0  }
  0x28   :  { %43 = vst.msk [vmem:[#allocation2 + $0x10] sm:$0xff] %vm40_vm0, %v3975_v0  ;;  %44 = vst.msk [vmem:[#allocation2 + $0x18] sm:$0xff] %vm40_vm0, %v3975_v0  ;;  %v4068_v5 = vld [vmem:[#allocation3 + $0x20] sm:$0xff]  ;;  %v4070_v6 = vld [vmem:[#allocation3 + $0x28] sm:$0xff] }
  0x29   :  { %45 = vst.msk [vmem:[#allocation2 + $0x20] sm:$0xff] %vm40_vm0, %v3975_v0  ;;  %46 = vst.msk [vmem:[#allocation2 + $0x28] sm:$0xff] %vm40_vm0, %v3975_v0  ;;  %v4072_v7 = vld [vmem:[#allocation3 + $0x30] sm:$0xff]  ;;  %v4074_v8 = vld [vmem:[#allocation3 + $0x38] sm:$0xff] }
  0x2a   :  { %47 = vst.msk [vmem:[#allocation2 + $0x30] sm:$0xff] %vm40_vm0, %v3975_v0  ;;  %48 = vst.msk [vmem:[#allocation2 + $0x38] sm:$0xff] %vm40_vm0, %v3975_v0  ;;  %v4076_v9 = vld [vmem:[#allocation3 + $0x40] sm:$0xff]  ;;  %v4078_v10 = vld [vmem:[#allocation3 + $0x48] sm:$0xff] }
  0x2b   :  { %49 = vst.msk [vmem:[#allocation2 + $0x40] sm:$0xff] %vm40_vm0, %v3975_v0  ;;  %50 = vst.msk [vmem:[#allocation2 + $0x48] sm:$0xff] %vm40_vm0, %v3975_v0  ;;  %v4080_v11 = vld [vmem:[#allocation3 + $0x50] sm:$0xff]  ;;  %v4082_v12 = vld [vmem:[#allocation3 + $0x58] sm:$0xff] }
  0x2c   :  { %51 = vst.msk [vmem:[#allocation2 + $0x50] sm:$0xff] %vm40_vm0, %v3975_v0  ;;  %52 = vst.msk [vmem:[#allocation2 + $0x58] sm:$0xff] %vm40_vm0, %v3975_v0  ;;  %v4084_v13 = vld [vmem:[#allocation3 + $0x60] sm:$0xff]  ;;  %v4086_v14 = vld [vmem:[#allocation3 + $0x68] sm:$0xff] }
  0x2d   :  { %53 = vst.msk [vmem:[#allocation2 + $0x60] sm:$0xff] %vm40_vm0, %v3975_v0  ;;  %54 = vst.msk [vmem:[#allocation2 + $0x68] sm:$0xff] %vm40_vm0, %v3975_v0  ;;  %v4088_v15 = vld [vmem:[#allocation3 + $0x70] sm:$0xff]  ;;  %v4090_v16 = vld [vmem:[#allocation3 + $0x78] sm:$0xff] }
  0x2e   :  { %55 = vst.msk [vmem:[#allocation2 + $0x70] sm:$0xff] %vm40_vm0, %v3975_v0  ;;  %56 = vst.msk [vmem:[#allocation2 + $0x78] sm:$0xff] %vm40_vm0, %v3975_v0  ;;  %v4092_v17 = vld [vmem:[#allocation3 + $0x80] sm:$0xff]  ;;  %v4094_v18 = vld [vmem:[#allocation3 + $0x88] sm:$0xff] }
  0x2f   :  { %57 = vst.msk [vmem:[#allocation2 + $0x80] sm:$0xff] %vm40_vm0, %v3975_v0  ;;  %58 = vst.msk [vmem:[#allocation2 + $0x88] sm:$0xff] %vm40_vm0, %v3975_v0  ;;  %v4096_v19 = vld [vmem:[#allocation3 + $0x90] sm:$0xff]  ;;  %v4098_v20 = vld [vmem:[#allocation3 + $0x98] sm:$0xff] }
  0x30   :  { %59 = vst.msk [vmem:[#allocation2 + $0x90] sm:$0xff] %vm40_vm0, %v3975_v0  ;;  %60 = vst.msk [vmem:[#allocation2 + $0x98] sm:$0xff] %vm40_vm0, %v3975_v0  ;;  %v4100_v21 = vld [vmem:[#allocation3 + $0xa0] sm:$0xff]  ;;  %v4102_v22 = vld [vmem:[#allocation3 + $0xa8] sm:$0xff] }
  0x31   :  { %61 = vst.msk [vmem:[#allocation2 + $0xa0] sm:$0xff] %vm40_vm0, %v3975_v0  ;;  %62 = vst.msk [vmem:[#allocation2 + $0xa8] sm:$0xff] %vm40_vm0, %v3975_v0  ;;  %v4104_v23 = vld [vmem:[#allocation3 + $0xb0] sm:$0xff]  ;;  %v4106_v24 = vld [vmem:[#allocation3 + $0xb8] sm:$0xff] }
  0x32   :  { %63 = vst.msk [vmem:[#allocation2 + $0xb0] sm:$0xff] %vm40_vm0, %v3975_v0  ;;  %64 = vst.msk [vmem:[#allocation2 + $0xb8] sm:$0xff] %vm40_vm0, %v3975_v0  ;;  %v4108_v25 = vld [vmem:[#allocation3 + $0xc0] sm:$0xff]  ;;  %v4110_v26 = vld [vmem:[#allocation3 + $0xc8] sm:$0xff] }
  0x33   :  { %65 = vst.msk [vmem:[#allocation2 + $0xc0] sm:$0xff] %vm40_vm0, %v3975_v0  ;;  %66 = vst.msk [vmem:[#allocation2 + $0xc8] sm:$0xff] %vm40_vm0, %v3975_v0  ;;  %v4112_v27 = vld [vmem:[#allocation3 + $0xd0] sm:$0xff]  ;;  %v4114_v28 = vld [vmem:[#allocation3 + $0xd8] sm:$0xff] }
  0x34   :  { %67 = vst.msk [vmem:[#allocation2 + $0xd0] sm:$0xff] %vm40_vm0, %v3975_v0  ;;  %68 = vst.msk [vmem:[#allocation2 + $0xd8] sm:$0xff] %vm40_vm0, %v3975_v0  ;;  %v4116_v29 = vld [vmem:[#allocation3 + $0xe0] sm:$0xff]  ;;  %v4118_v30 = vld [vmem:[#allocation3 + $0xe8] sm:$0xff] }
  0x35   :  { %69 = vst.msk [vmem:[#allocation2 + $0xe0] sm:$0xff] %vm40_vm0, %v3975_v0  ;;  %70 = vst.msk [vmem:[#allocation2 + $0xe8] sm:$0xff] %vm40_vm0, %v3975_v0  ;;  %v4120_v31 = vld [vmem:[#allocation3 + $0xf0] sm:$0xff]  ;;  %v4122_v32 = vld [vmem:[#allocation3 + $0xf8] sm:$0xff] }
  0x36   :  { %71 = vst.msk [vmem:[#allocation2 + $0xf0] sm:$0xff] %vm40_vm0, %v3975_v0  ;;  %72 = vst.msk [vmem:[#allocation2 + $0xf8] sm:$0xff] %vm40_vm0, %v3975_v0  ;;  %v4124_v33 = vld [vmem:[#allocation3 + $0x100] sm:$0xff]  ;;  %v4126_v34 = vld [vmem:[#allocation3 + $0x108] sm:$0xff] }
  0x37   :  { %73 = vst.msk [vmem:[#allocation2 + $0x100] sm:$0xff] %vm40_vm0, %v3975_v0  ;;  %74 = vst.msk [vmem:[#allocation2 + $0x108] sm:$0xff] %vm40_vm0, %v3975_v0  ;;  %v4128_v35 = vld [vmem:[#allocation3 + $0x110] sm:$0xff]  ;;  %v4130_v36 = vld [vmem:[#allocation3 + $0x118] sm:$0xff] }
  0x38   :  { %5706 = vst [vmem:[#allocation9_spill] sm:$0xff] %v4060_v1  ;;  %5707 = vst [vmem:[#allocation10_spill] sm:$0xff] %v4062_v2  ;;  %v4132_v37 = vld [vmem:[#allocation3 + $0x120] sm:$0xff]  ;;  %v4134_v38 = vld [vmem:[#allocation3 + $0x128] sm:$0xff] }
  0x39   :  { %5708 = vst [vmem:[#allocation11_spill] sm:$0xff] %v4064_v3  ;;  %5709 = vst [vmem:[#allocation12_spill] sm:$0xff] %v4066_v4  ;;  %v4136_v39 = vld [vmem:[#allocation3 + $0x130] sm:$0xff]  ;;  %v4138_v40 = vld [vmem:[#allocation3 + $0x138] sm:$0xff] }
  0x3a   :  { %5710 = vst [vmem:[#allocation13_spill] sm:$0xff] %v4068_v5  ;;  %5711 = vst [vmem:[#allocation14_spill] sm:$0xff] %v4070_v6  ;;  %v4140_v41 = vld [vmem:[#allocation3 + $0x140] sm:$0xff]  ;;  %v4142_v42 = vld [vmem:[#allocation3 + $0x148] sm:$0xff] }
  0x3b   :  { %5712 = vst [vmem:[#allocation15_spill] sm:$0xff] %v4072_v7  ;;  %5713 = vst [vmem:[#allocation16_spill] sm:$0xff] %v4074_v8  ;;  %v4144_v43 = vld [vmem:[#allocation3 + $0x150] sm:$0xff]  ;;  %v4146_v44 = vld [vmem:[#allocation3 + $0x158] sm:$0xff] }
  0x3c   :  { %5714 = vst [vmem:[#allocation17_spill] sm:$0xff] %v4076_v9  ;;  %5715 = vst [vmem:[#allocation18_spill] sm:$0xff] %v4078_v10  ;;  %v4148_v45 = vld [vmem:[#allocation3 + $0x160] sm:$0xff]  ;;  %v4150_v46 = vld [vmem:[#allocation3 + $0x168] sm:$0xff] }
  0x3d   :  { %5716 = vst [vmem:[#allocation19_spill] sm:$0xff] %v4080_v11  ;;  %5717 = vst [vmem:[#allocation20_spill] sm:$0xff] %v4082_v12  ;;  %v4152_v47 = vld [vmem:[#allocation3 + $0x170] sm:$0xff]  ;;  %v4154_v48 = vld [vmem:[#allocation3 + $0x178] sm:$0xff] }
  0x3e   :  { %5718 = vst [vmem:[#allocation21_spill] sm:$0xff] %v4084_v13  ;;  %5719 = vst [vmem:[#allocation22_spill] sm:$0xff] %v4086_v14  ;;  %v4156_v49 = vld [vmem:[#allocation3 + $0x180] sm:$0xff]  ;;  %v4158_v50 = vld [vmem:[#allocation3 + $0x188] sm:$0xff] }
  0x3f   :  { %5720 = vst [vmem:[#allocation23_spill] sm:$0xff] %v4088_v15  ;;  %5721 = vst [vmem:[#allocation24_spill] sm:$0xff] %v4090_v16  ;;  %v4160_v51 = vld [vmem:[#allocation3 + $0x190] sm:$0xff]  ;;  %v4162_v52 = vld [vmem:[#allocation3 + $0x198] sm:$0xff] }
  0x40   :  { %5722 = vst [vmem:[#allocation25_spill] sm:$0xff] %v4092_v17  ;;  %5723 = vst [vmem:[#allocation26_spill] sm:$0xff] %v4094_v18  ;;  %v4164_v53 = vld [vmem:[#allocation3 + $0x1a0] sm:$0xff]  ;;  %v4166_v54 = vld [vmem:[#allocation3 + $0x1a8] sm:$0xff] }
  0x41   :  { %5724 = vst [vmem:[#allocation27_spill] sm:$0xff] %v4096_v19  ;;  %5725 = vst [vmem:[#allocation28_spill] sm:$0xff] %v4098_v20  ;;  %v4168_v55 = vld [vmem:[#allocation3 + $0x1b0] sm:$0xff]  ;;  %v4170_v56 = vld [vmem:[#allocation3 + $0x1b8] sm:$0xff] }
  0x42   :  { %5726 = vst [vmem:[#allocation29_spill] sm:$0xff] %v4100_v21  ;;  %5727 = vst [vmem:[#allocation30_spill] sm:$0xff] %v4102_v22  ;;  %v4172_v57 = vld [vmem:[#allocation3 + $0x1c0] sm:$0xff]  ;;  %v4174_v58 = vld [vmem:[#allocation3 + $0x1c8] sm:$0xff] }
  0x43   :  { %5728 = vst [vmem:[#allocation31_spill] sm:$0xff] %v4104_v23  ;;  %5729 = vst [vmem:[#allocation32_spill] sm:$0xff] %v4106_v24  ;;  %v4176_v59 = vld [vmem:[#allocation3 + $0x1d0] sm:$0xff]  ;;  %v4178_v60 = vld [vmem:[#allocation3 + $0x1d8] sm:$0xff] }
  0x44   :  { %5730 = vst [vmem:[#allocation33_spill] sm:$0xff] %v4108_v25  ;;  %5731 = vst [vmem:[#allocation34_spill] sm:$0xff] %v4110_v26  ;;  %v4180_v61 = vld [vmem:[#allocation3 + $0x1e0] sm:$0xff]  ;;  %v4182_v62 = vld [vmem:[#allocation3 + $0x1e8] sm:$0xff] }
  0x45   :  { %5732 = vst [vmem:[#allocation35_spill] sm:$0xff] %v4112_v27  ;;  %5733 = vst [vmem:[#allocation36_spill] sm:$0xff] %v4114_v28  ;;  %v4184_v63 = vld [vmem:[#allocation3 + $0x1f0] sm:$0xff]  ;;  %v4186_v0 = vld [vmem:[#allocation3 + $0x1f8] sm:$0xff] }
  0x46   :  { %5734 = vst [vmem:[#allocation37_spill] sm:$0xff] %v4116_v29  ;;  %5735 = vst [vmem:[#allocation38_spill] sm:$0xff] %v4118_v30  ;;  %v4256_v30 = vld [vmem:[#allocation3 + $0x310] sm:$0xff]  ;;  %v4258_v29 = vld [vmem:[#allocation3 + $0x318] sm:$0xff] }
  0x47   :  { %5736 = vst [vmem:[#allocation39_spill] sm:$0xff] %v4120_v31  ;;  %5737 = vst [vmem:[#allocation40_spill] sm:$0xff] %v4122_v32  ;;  %v4252_v32 = vld [vmem:[#allocation3 + $0x300] sm:$0xff]  ;;  %v4254_v31 = vld [vmem:[#allocation3 + $0x308] sm:$0xff] }
  0x48   :  { %5738 = vst [vmem:[#allocation41_spill] sm:$0xff] %v4124_v33  ;;  %5739 = vst [vmem:[#allocation42_spill] sm:$0xff] %v4126_v34  ;;  %v4248_v34 = vld [vmem:[#allocation3 + $0x2f0] sm:$0xff]  ;;  %v4250_v33 = vld [vmem:[#allocation3 + $0x2f8] sm:$0xff] }
  0x49   :  { %5740 = vst [vmem:[#allocation43_spill] sm:$0xff] %v4128_v35  ;;  %5741 = vst [vmem:[#allocation44_spill] sm:$0xff] %v4130_v36  ;;  %v4244_v36 = vld [vmem:[#allocation3 + $0x2e0] sm:$0xff]  ;;  %v4246_v35 = vld [vmem:[#allocation3 + $0x2e8] sm:$0xff] }
  0x4a   :  { %5742 = vst [vmem:[#allocation45_spill] sm:$0xff] %v4132_v37  ;;  %5743 = vst [vmem:[#allocation46_spill] sm:$0xff] %v4134_v38  ;;  %v4240_v38 = vld [vmem:[#allocation3 + $0x2d0] sm:$0xff]  ;;  %v4242_v37 = vld [vmem:[#allocation3 + $0x2d8] sm:$0xff] }
  0x4b   :  { %5744 = vst [vmem:[#allocation47_spill] sm:$0xff] %v4136_v39  ;;  %5745 = vst [vmem:[#allocation48_spill] sm:$0xff] %v4138_v40  ;;  %v4236_v40 = vld [vmem:[#allocation3 + $0x2c0] sm:$0xff]  ;;  %v4238_v39 = vld [vmem:[#allocation3 + $0x2c8] sm:$0xff] }
  0x4c   :  { %5746 = vst [vmem:[#allocation49_spill] sm:$0xff] %v4140_v41  ;;  %5747 = vst [vmem:[#allocation50_spill] sm:$0xff] %v4142_v42  ;;  %v4232_v42 = vld [vmem:[#allocation3 + $0x2b0] sm:$0xff]  ;;  %v4234_v41 = vld [vmem:[#allocation3 + $0x2b8] sm:$0xff] }
  0x4d   :  { %5748 = vst [vmem:[#allocation51_spill] sm:$0xff] %v4144_v43  ;;  %5749 = vst [vmem:[#allocation52_spill] sm:$0xff] %v4146_v44  ;;  %v4228_v44 = vld [vmem:[#allocation3 + $0x2a0] sm:$0xff]  ;;  %v4230_v43 = vld [vmem:[#allocation3 + $0x2a8] sm:$0xff] }
  0x4e   :  { %5750 = vst [vmem:[#allocation53_spill] sm:$0xff] %v4148_v45  ;;  %5751 = vst [vmem:[#allocation54_spill] sm:$0xff] %v4150_v46  ;;  %v4224_v46 = vld [vmem:[#allocation3 + $0x290] sm:$0xff]  ;;  %v4226_v45 = vld [vmem:[#allocation3 + $0x298] sm:$0xff] }
  0x4f   :  { %5752 = vst [vmem:[#allocation55_spill] sm:$0xff] %v4152_v47  ;;  %5753 = vst [vmem:[#allocation56_spill] sm:$0xff] %v4154_v48  ;;  %v4220_v48 = vld [vmem:[#allocation3 + $0x280] sm:$0xff]  ;;  %v4222_v47 = vld [vmem:[#allocation3 + $0x288] sm:$0xff] }
  0x50   :  { %5754 = vst [vmem:[#allocation57_spill] sm:$0xff] %v4156_v49  ;;  %5755 = vst [vmem:[#allocation58_spill] sm:$0xff] %v4158_v50  ;;  %v4216_v50 = vld [vmem:[#allocation3 + $0x270] sm:$0xff]  ;;  %v4218_v49 = vld [vmem:[#allocation3 + $0x278] sm:$0xff] }
  0x51   :  { %5756 = vst [vmem:[#allocation59_spill] sm:$0xff] %v4160_v51  ;;  %5757 = vst [vmem:[#allocation60_spill] sm:$0xff] %v4162_v52  ;;  %v4212_v52 = vld [vmem:[#allocation3 + $0x260] sm:$0xff]  ;;  %v4214_v51 = vld [vmem:[#allocation3 + $0x268] sm:$0xff] }
  0x52   :  { %5758 = vst [vmem:[#allocation61_spill] sm:$0xff] %v4164_v53  ;;  %5759 = vst [vmem:[#allocation62_spill] sm:$0xff] %v4166_v54  ;;  %v4188_v54 = vld [vmem:[#allocation3 + $0x200] sm:$0xff]  ;;  %v4210_v53 = vld [vmem:[#allocation3 + $0x258] sm:$0xff] }
  0x53   :  { %5760 = vst [vmem:[#allocation63_spill] sm:$0xff] %v4168_v55  ;;  %5761 = vst [vmem:[#allocation64_spill] sm:$0xff] %v4170_v56  ;;  %v4190_v55 = vld [vmem:[#allocation3 + $0x208] sm:$0xff]  ;;  %v4192_v56 = vld [vmem:[#allocation3 + $0x210] sm:$0xff] }
  0x54   :  { %5762 = vst [vmem:[#allocation65_spill] sm:$0xff] %v4172_v57  ;;  %5763 = vst [vmem:[#allocation66_spill] sm:$0xff] %v4174_v58  ;;  %v4194_v57 = vld [vmem:[#allocation3 + $0x218] sm:$0xff]  ;;  %v4196_v58 = vld [vmem:[#allocation3 + $0x220] sm:$0xff] }
  0x55   :  { %5764 = vst [vmem:[#allocation67_spill] sm:$0xff] %v4176_v59  ;;  %5765 = vst [vmem:[#allocation68_spill] sm:$0xff] %v4178_v60  ;;  %v4198_v59 = vld [vmem:[#allocation3 + $0x228] sm:$0xff]  ;;  %v4200_v60 = vld [vmem:[#allocation3 + $0x230] sm:$0xff] }
  0x56   :  { %5766 = vst [vmem:[#allocation69_spill] sm:$0xff] %v4180_v61  ;;  %5767 = vst [vmem:[#allocation70_spill] sm:$0xff] %v4182_v62  ;;  %v4202_v61 = vld [vmem:[#allocation3 + $0x238] sm:$0xff]  ;;  %v4204_v62 = vld [vmem:[#allocation3 + $0x240] sm:$0xff] }
  0x57   :  { %5768 = vst [vmem:[#allocation71_spill] sm:$0xff] %v4184_v63  ;;  %5769 = vst [vmem:[#allocation72_spill] sm:$0xff] %v4186_v0  ;;  %v4206_v63 = vld [vmem:[#allocation3 + $0x248] sm:$0xff]  ;;  %v4208_v0 = vld [vmem:[#allocation3 + $0x250] sm:$0xff] }
  0x58   :  { %5770 = vst [vmem:[#allocation73_spill] sm:$0xff] %v4188_v54  ;;  %5771 = vst [vmem:[#allocation74_spill] sm:$0xff] %v4190_v55  ;;  %v4260_v28 = vld [vmem:[#allocation5] ss:$0 sm:$0xff] }
  0x59   :  { %5772 = vst [vmem:[#allocation75_spill] sm:$0xff] %v4192_v56  ;;  %5773 = vst [vmem:[#allocation76_spill] sm:$0xff] %v4194_v57 }
  0x5a   :  { %5774 = vst [vmem:[#allocation77_spill] sm:$0xff] %v4196_v58  ;;  %5775 = vst [vmem:[#allocation78_spill] sm:$0xff] %v4198_v59 }
  0x5b   :  { %5776 = vst [vmem:[#allocation79_spill] sm:$0xff] %v4200_v60  ;;  %5777 = vst [vmem:[#allocation80_spill] sm:$0xff] %v4202_v61 }
  0x5c   :  { %5778 = vst [vmem:[#allocation81_spill] sm:$0xff] %v4204_v62  ;;  %5779 = vst [vmem:[#allocation82_spill] sm:$0xff] %v4206_v63 }
  0x5d   :  { %5780 = vst [vmem:[#allocation83_spill] sm:$0xff] %v4208_v0  ;;  %5781 = vst [vmem:[#allocation84_spill] sm:$0xff] %v4210_v53 }
  0x5e   :  { %5782 = vst [vmem:[#allocation85_spill] sm:$0xff] %v4212_v52  ;;  %5783 = vst [vmem:[#allocation86_spill] sm:$0xff] %v4214_v51 }
  0x5f   :  { %5784 = vst [vmem:[#allocation87_spill] sm:$0xff] %v4216_v50  ;;  %5785 = vst [vmem:[#allocation88_spill] sm:$0xff] %v4218_v49 }
  0x60   :  { %5786 = vst [vmem:[#allocation89_spill] sm:$0xff] %v4220_v48  ;;  %5787 = vst [vmem:[#allocation90_spill] sm:$0xff] %v4222_v47 }
  0x61   :  { %5788 = vst [vmem:[#allocation91_spill] sm:$0xff] %v4224_v46  ;;  %5789 = vst [vmem:[#allocation92_spill] sm:$0xff] %v4226_v45 }
  0x62   :  { %5790 = vst [vmem:[#allocation93_spill] sm:$0xff] %v4228_v44  ;;  %5791 = vst [vmem:[#allocation94_spill] sm:$0xff] %v4230_v43 }
  0x63   :  { %5792 = vst [vmem:[#allocation95_spill] sm:$0xff] %v4232_v42  ;;  %5793 = vst [vmem:[#allocation96_spill] sm:$0xff] %v4234_v41 }
  0x64   :  { %5794 = vst [vmem:[#allocation97_spill] sm:$0xff] %v4236_v40  ;;  %5795 = vst [vmem:[#allocation98_spill] sm:$0xff] %v4238_v39 }
  0x65   :  { %5796 = vst [vmem:[#allocation99_spill] sm:$0xff] %v4240_v38  ;;  %5797 = vst [vmem:[#allocation100_spill] sm:$0xff] %v4242_v37 }
  0x66   :  { %5798 = vst [vmem:[#allocation101_spill] sm:$0xff] %v4244_v36  ;;  %5799 = vst [vmem:[#allocation102_spill] sm:$0xff] %v4246_v35 }
  0x67   :  { %5800 = vst [vmem:[#allocation103_spill] sm:$0xff] %v4248_v34  ;;  %5801 = vst [vmem:[#allocation104_spill] sm:$0xff] %v4250_v33 }
  0x68   :  { %5802 = vst [vmem:[#allocation105_spill] sm:$0xff] %v4252_v32  ;;  %5803 = vst [vmem:[#allocation106_spill] sm:$0xff] %v4254_v31 }
  0x69   :  { %5804 = vst [vmem:[#allocation107_spill] sm:$0xff] %v4256_v30  ;;  %5805 = vst [vmem:[#allocation108_spill] sm:$0xff] %v4258_v29 }
  0x6a   :  { %5806 = vst [vmem:[#allocation109_spill] sm:$0xff] %v4260_v28 }
  0x6b LB: > { %v5807_v1 = vld [vmem:[#allocation9_spill] sm:$0xff]  ;;  %v5808_v2 = vld [vmem:[#allocation10_spill] sm:$0xff]  ;;  %v5663_v32 = vmov 0.0|0.0   ;;  %s182_s11 = smul.u32 288, %s3969_s2  ;;  %v5811_v3 = vld [vmem:[#allocation11_spill] sm:$0xff]  ;;  %v5819_v34 = vmov 0.0|0.0   ;;  %s3969_s2 = sphi %s4262_s2, %s181_s2  }
  0x6c   : > { %v2981_v33 = vpack.c.bf16 %v5808_v2, %v5807_v1  ;;  %v5809_v54 = vld [vmem:[#allocation73_spill] sm:$0xff]  ;;  %v5810_v55 = vld [vmem:[#allocation74_spill] sm:$0xff]  ;;  %2980 = vmatprep.subr.bf16.mxu1 %v5663_v32  ;;  %3076 = vmatprep.subr.bf16.mxu0 %v5663_v32  ;;  %v5812_v4 = vld [vmem:[#allocation12_spill] sm:$0xff]  ;;  %s3977_s15 = smov 32   ;;  %s3978_s16 = smov 96   ;;  %vm1322_vm1 = vcmask 261120  }
  0x6d   : > { %v3077_v31 = vpack.c.bf16 %v5810_v55, %v5809_v54  ;;  %v2984_v28 = vpack.c.bf16 %v5812_v4, %v5811_v3  ;;  %v5813_v56 = vld [vmem:[#allocation75_spill] sm:$0xff]  ;;  %v5814_v57 = vld [vmem:[#allocation76_spill] sm:$0xff]  ;;  %s4283_s14 = scalar_lea.vmem %s5658_s0, %s182_s11  ;;  %v5815_v5 = vld [vmem:[#allocation13_spill] sm:$0xff]  ;;  %s3979_s17 = smov 64   ;;  %vm1389_vm2 = vcmask 785408   ;;  %vm3980_vm3 = vmmov 0  }
  0x6e   : > { %2982 = vmatpush1.bf16.msra.mxu1 %v2981_v33  ;;  %v3080_v29 = vpack.c.bf16 %v5814_v57, %v5813_v56  ;;  %v351_v33 = vld [vmem:[%s4283_s14 + $0x15] sm:$0xff]  ;;  %v217_v1 = vld [vmem:[%s4283_s14 + $0x1] sm:$0xff]  ;;  %v5821_v8 = vld [vmem:[#allocation16_spill] sm:$0xff]  ;;  %s2774_s18 = smul.u32 88, %s3969_s2  ;;  %vm2684_vm4 = vcmask 521216   ;;  %s181_s2 = sadd.s32 1, %s3969_s2  }
  0x6f   : > { %3078 = vmatpush1.bf16.msra.mxu0 %v3077_v31  ;;  %2983 = vmatprep.subr.bf16.mxu1 %v5663_v32  ;;  %v219_v31 = vld [vmem:[%s4283_s14 + $0x11] sm:$0xff]  ;;  %v349_v3 = vld [vmem:[%s4283_s14 + $0x5] sm:$0xff]  ;;  %v5816_v6 = vld [vmem:[#allocation14_spill] sm:$0xff]  ;;  %p178_p2 = scmp.ge.s32.totalorder %s181_s2, 2  }
  0x70   : > { %3079 = vmatprep.subr.bf16.mxu0 %v5663_v32  ;;  %v3357_v2 = vpack.i.bf16 %v219_v31, %v351_v33  ;;  %v283_v4 = vld [vmem:[%s4283_s14 + $0x3] sm:$0xff]  ;;  %v2987_v54 = vpack.c.bf16 %v5816_v6, %v5815_v5  ;;  %v5817_v58 = vld [vmem:[#allocation77_spill] sm:$0xff]  ;;  %v5818_v59 = vld [vmem:[#allocation78_spill] sm:$0xff]  ;;  %v3347_v56 = vpack.i.bf16 %v217_v1, %v349_v3  ;;  %s5577_s21 = scalar_lea.vmem %s5661_s3, %s2774_s18 }
  0x71   : > { %v415_v32 = vld [vmem:[%s4283_s14 + $0x7] sm:$0xff]  ;;  %v3083_v55 = vpack.c.bf16 %v5818_v59, %v5817_v58  ;;  %v252_v5 = vld [vmem:[%s4283_s14 + $0x12] sm:$0xff]  ;;  %v5825_v10 = vld [vmem:[#allocation18_spill] sm:$0xff] }
  0x72   : > { %2985 = vmatpush1.bf16.msra.mxu1 %v2984_v28  ;;  %v250_v57 = vld [vmem:[%s4283_s14 + $0x2] sm:$0xff]  ;;  %3358 = vrot.lane.b32.xlu1 %v3357_v2, %s3977_s15  ;;  %v3362_v28 = vpack.i.bf16 %v283_v4, %v415_v32  ;;  %v384_v1 = vld [vmem:[%s4283_s14 + $0x16] sm:$0xff]  ;;  %v5823_v61 = vld [vmem:[#allocation80_spill] sm:$0xff] }
  0x73   : > { %3081 = vmatpush1.bf16.msra.mxu0 %v3080_v29  ;;  %v382_v30 = vld [vmem:[%s4283_s14 + $0x6] sm:$0xff]  ;;  %2986 = vmatprep.subr.bf16.mxu1 %v5819_v34  ;;  %v5824_v9 = vld [vmem:[#allocation17_spill] sm:$0xff]  ;;  %v5827_v63 = vld [vmem:[#allocation82_spill] sm:$0xff] }
  0x74   : > { %3082 = vmatprep.subr.bf16.mxu0 %v5819_v34  ;;  %3348 = vrot.lane.b32.xlu0 %v3347_v56, %s3977_s15  ;;  %v3352_v31 = vpack.i.bf16 %v250_v57, %v382_v30  ;;  %v218_v33 = vld [vmem:[%s4283_s14 + $0x9] sm:$0xff]  ;;  %v3367_v30 = vpack.i.bf16 %v252_v5, %v384_v1  ;;  %v417_v56 = vld [vmem:[%s4283_s14 + $0x17] sm:$0xff]  ;;  %v2993_v57 = vpack.c.bf16 %v5825_v10, %v5824_v9 }
  0x75   : > { %v350_v29 = vld [vmem:[%s4283_s14 + $0xd] sm:$0xff]  ;;  %v5820_v7 = vld [vmem:[#allocation15_spill] sm:$0xff]  ;;  %v220_v1 = vld [vmem:[%s4283_s14 + $0x19] sm:$0xff] }
  0x76   : > { %2988 = vmatpush1.bf16.msra.mxu1 %v2987_v54  ;;  %v2990_v3 = vpack.c.bf16 %v5821_v8, %v5820_v7  ;;  %v5822_v60 = vld [vmem:[#allocation79_spill] sm:$0xff]  ;;  %3363 = vrot.lane.b32.xlu1 %v3362_v28, %s3978_s16  ;;  %v3372_v4 = vpack.i.bf16 %v218_v33, %v350_v29  ;;  %v251_v32 = vld [vmem:[%s4283_s14 + $0xa] sm:$0xff]  ;;  %v5826_v62 = vld [vmem:[#allocation81_spill] sm:$0xff] }
  0x77   : > { %3084 = vmatpush1.bf16.msra.mxu0 %v3083_v55  ;;  %v3086_v2 = vpack.c.bf16 %v5823_v61, %v5822_v60  ;;  %2989 = vmatprep.subr.bf16.mxu1 %v5819_v34  ;;  %v383_v54 = vld [vmem:[%s4283_s14 + $0xe] sm:$0xff]  ;;  %v3089_v28 = vpack.c.bf16 %v5827_v63, %v5826_v62  ;;  %v5828_v11 = vld [vmem:[#allocation19_spill] sm:$0xff]  ;;  %v5833_v14 = vld [vmem:[#allocation22_spill] sm:$0xff] }
  0x78   : > { %3085 = vmatprep.subr.bf16.mxu0 %v5819_v34  ;;  %3353 = vrot.lane.b32.xlu0 %v3352_v31, %s3979_s17  ;;  %v285_v55 = vld [vmem:[%s4283_s14 + $0x13] sm:$0xff]  ;;  %v3382_v5 = vpack.i.bf16 %v251_v32, %v383_v54  ;;  %v284_v33 = vld [vmem:[%s4283_s14 + $0xb] sm:$0xff]  ;;  %v5830_v0 = vld [vmem:[#allocation83_spill] sm:$0xff] }
  0x79   : > { %v3377_v31 = vpack.i.bf16 %v285_v55, %v417_v56  ;;  %v416_v29 = vld [vmem:[%s4283_s14 + $0xf] sm:$0xff]  ;;  %v286_v54 = vld [vmem:[%s4283_s14 + $0x1b] sm:$0xff] }
  0x7a   : > { %2991 = vmatpush1.bf16.msra.mxu1 %v2990_v3  ;;  %3373 = vrot.lane.b32.xlu1 %v3372_v4, %s3977_s15  ;;  %v352_v3 = vld [vmem:[%s4283_s14 + $0x1d] sm:$0xff]  ;;  %v5829_v12 = vld [vmem:[#allocation20_spill] sm:$0xff]  ;;  %v5832_v13 = vld [vmem:[#allocation21_spill] sm:$0xff] }
  0x7b   : > { %3087 = vmatpush1.bf16.msra.mxu0 %v3086_v2  ;;  %2992 = vmatprep.subr.bf16.mxu1 %v5819_v34  ;;  %v2996_v2 = vpack.c.bf16 %v5829_v12, %v5828_v11  ;;  %v5831_v53 = vld [vmem:[#allocation84_spill] sm:$0xff]  ;;  %v3387_v32 = vpack.i.bf16 %v220_v1, %v352_v3  ;;  %v418_v55 = vld [vmem:[%s4283_s14 + $0x1f] sm:$0xff]  ;;  %v5834_v52 = vld [vmem:[#allocation85_spill] sm:$0xff] }
  0x7c   : > { %3088 = vmatprep.subr.bf16.mxu0 %v5819_v34  ;;  %3368 = vrot.lane.b32.xlu0 %v3367_v30, %s3979_s17  ;;  %v3092_v4 = vpack.c.bf16 %v5831_v53, %v5830_v0  ;;  %v3392_v30 = vpack.i.bf16 %v284_v33, %v416_v29  ;;  %v253_v56 = vld [vmem:[%s4283_s14 + $0x1a] sm:$0xff]  ;;  %v254_v29 = vld [vmem:[%s4283_s14 + $0x22] sm:$0xff]  ;;  %v5837_v16 = vld [vmem:[#allocation24_spill] sm:$0xff] }
  0x7d   : > { %v5835_v51 = vld [vmem:[#allocation86_spill] sm:$0xff]  ;;  %v386_v1 = vld [vmem:[%s4283_s14 + $0x26] sm:$0xff]  ;;  %v5840_v17 = vld [vmem:[#allocation25_spill] sm:$0xff] }
  0x7e   : > { %2994 = vmatpush1.bf16.msra.mxu1 %v2993_v57  ;;  %3383 = vrot.lane.b32.xlu1 %v3382_v5, %s3979_s17  ;;  %v385_v57 = vld [vmem:[%s4283_s14 + $0x1e] sm:$0xff]  ;;  %v3095_v5 = vpack.c.bf16 %v5835_v51, %v5834_v52  ;;  %v5839_v49 = vld [vmem:[#allocation88_spill] sm:$0xff]  ;;  %v5842_v48 = vld [vmem:[#allocation89_spill] sm:$0xff] }
  0x7f   : > { %3090 = vmatpush1.bf16.msra.mxu0 %v3089_v28  ;;  %2995 = vmatprep.subr.bf16.mxu1 %v5819_v34  ;;  %v2999_v28 = vpack.c.bf16 %v5833_v14, %v5832_v13  ;;  %v3397_v33 = vpack.i.bf16 %v253_v56, %v385_v57  ;;  %v221_v3 = vld [vmem:[%s4283_s14 + $0x21] sm:$0xff]  ;;  %v354_v56 = vld [vmem:[%s4283_s14 + $0x2d] sm:$0xff] }
  0x80   : > { %3091 = vmatprep.subr.bf16.mxu0 %v5819_v34  ;;  %3378 = vrot.lane.b32.xlu0 %v3377_v31, %s3978_s16  ;;  %v3402_v31 = vpack.i.bf16 %v286_v54, %v418_v55  ;;  %v5836_v15 = vld [vmem:[#allocation23_spill] sm:$0xff]  ;;  %v5841_v18 = vld [vmem:[#allocation26_spill] sm:$0xff]  ;;  %v5845_v20 = vld [vmem:[#allocation28_spill] sm:$0xff] }
  0x81   : > { %v5838_v50 = vld [vmem:[#allocation87_spill] sm:$0xff]  ;;  %v5843_v47 = vld [vmem:[#allocation90_spill] sm:$0xff]  ;;  %v5847_v45 = vld [vmem:[#allocation92_spill] sm:$0xff] }
  0x82   : > { %2997 = vmatpush1.bf16.msra.mxu1 %v2996_v2  ;;  %3393 = vrot.lane.b32.xlu1 %v3392_v30, %s3978_s16  ;;  %v353_v2 = vld [vmem:[%s4283_s14 + $0x25] sm:$0xff]  ;;  %v3098_v30 = vpack.c.bf16 %v5839_v49, %v5838_v50  ;;  %v5848_v21 = vld [vmem:[#allocation29_spill] sm:$0xff]  ;;  %v5849_v22 = vld [vmem:[#allocation30_spill] sm:$0xff] }
  0x83   : > { %3093 = vmatpush1.bf16.msra.mxu0 %v3092_v4  ;;  %2998 = vmatprep.subr.bf16.mxu1 %v5819_v34  ;;  %v3002_v4 = vpack.c.bf16 %v5837_v16, %v5836_v15  ;;  %v3407_v54 = vpack.i.bf16 %v221_v3, %v353_v2  ;;  %v222_v55 = vld [vmem:[%s4283_s14 + $0x29] sm:$0xff]  ;;  %v5850_v44 = vld [vmem:[#allocation93_spill] sm:$0xff]  ;;  %v5851_v43 = vld [vmem:[#allocation94_spill] sm:$0xff] }
  0x84   : > { %3094 = vmatprep.subr.bf16.mxu0 %v5819_v34  ;;  %3388 = vrot.lane.b32.xlu0 %v3387_v32, %s3977_s15  ;;  %v3412_v32 = vpack.i.bf16 %v254_v29, %v386_v1  ;;  %v287_v57 = vld [vmem:[%s4283_s14 + $0x23] sm:$0xff]  ;;  %v288_v1 = vld [vmem:[%s4283_s14 + $0x2b] sm:$0xff]  ;;  %v5857_v26 = vld [vmem:[#allocation34_spill] sm:$0xff] }
  0x85   : > { %v420_v3 = vld [vmem:[%s4283_s14 + $0x2f] sm:$0xff]  ;;  %v5844_v19 = vld [vmem:[#allocation27_spill] sm:$0xff]  ;;  %v5859_v39 = vld [vmem:[#allocation98_spill] sm:$0xff] }
  0x86   : > { %3000 = vmatpush1.bf16.msra.mxu1 %v2999_v28  ;;  %3403 = vrot.lane.b32.xlu1 %v3402_v31, %s3978_s16  ;;  %v419_v28 = vld [vmem:[%s4283_s14 + $0x27] sm:$0xff]  ;;  %v3101_v31 = vpack.c.bf16 %v5843_v47, %v5842_v48  ;;  %v5856_v25 = vld [vmem:[#allocation33_spill] sm:$0xff]  ;;  %v5867_v35 = vld [vmem:[#allocation102_spill] sm:$0xff] }
  0x87   : > { %3096 = vmatpush1.bf16.msra.mxu0 %v3095_v5  ;;  %3001 = vmatprep.subr.bf16.mxu1 %v5819_v34  ;;  %v3005_v5 = vpack.c.bf16 %v5841_v18, %v5840_v17  ;;  %v3417_v29 = vpack.i.bf16 %v287_v57, %v419_v28  ;;  %v255_v2 = vld [vmem:[%s4283_s14 + $0x2a] sm:$0xff]  ;;  %v5846_v46 = vld [vmem:[#allocation91_spill] sm:$0xff]  ;;  %v388_v57 = vld [vmem:[%s4283_s14 + $0x36] sm:$0xff] }
  0x88   : > { %3097 = vmatprep.subr.bf16.mxu0 %v5819_v34  ;;  %3398 = vrot.lane.b32.xlu0 %v3397_v33, %s3979_s17  ;;  %v3422_v33 = vpack.i.bf16 %v222_v55, %v354_v56  ;;  %v256_v56 = vld [vmem:[%s4283_s14 + $0x32] sm:$0xff]  ;;  %v5852_v23 = vld [vmem:[#allocation31_spill] sm:$0xff]  ;;  %v5853_v24 = vld [vmem:[#allocation32_spill] sm:$0xff] }
  0x89   : > { %v223_v28 = vld [vmem:[%s4283_s14 + $0x31] sm:$0xff]  ;;  %v5854_v42 = vld [vmem:[#allocation95_spill] sm:$0xff]  ;;  %v5873_v13 = vld [vmem:[#allocation42_spill] sm:$0xff] }
  0x8a   : > { %3003 = vmatpush1.bf16.msra.mxu1 %v3002_v4  ;;  %3413 = vrot.lane.b32.xlu1 %v3412_v32, %s3979_s17  ;;  %v387_v4 = vld [vmem:[%s4283_s14 + $0x2e] sm:$0xff]  ;;  %v3104_v32 = vpack.c.bf16 %v5847_v45, %v5846_v46  ;;  %v5860_v27 = vld [vmem:[#allocation35_spill] sm:$0xff]  ;;  %v5877_v18 = vld [vmem:[#allocation106_spill] sm:$0xff] }
  0x8b   : > { %3099 = vmatpush1.bf16.msra.mxu0 %v3098_v30  ;;  %3004 = vmatprep.subr.bf16.mxu1 %v5819_v34  ;;  %v3008_v30 = vpack.c.bf16 %v5845_v20, %v5844_v19  ;;  %v3427_v55 = vpack.i.bf16 %v255_v2, %v387_v4  ;;  %v356_v2 = vld [vmem:[%s4283_s14 + $0x3d] sm:$0xff]  ;;  %v289_v4 = vld [vmem:[%s4283_s14 + $0x33] sm:$0xff]  ;;  %v5855_v41 = vld [vmem:[#allocation96_spill] sm:$0xff] }
  0x8c   : > { %3100 = vmatprep.subr.bf16.mxu0 %v5819_v34  ;;  %3408 = vrot.lane.b32.xlu0 %v3407_v54, %s3977_s15  ;;  %v3432_v54 = vpack.i.bf16 %v288_v1, %v420_v3  ;;  %v224_v3 = vld [vmem:[%s4283_s14 + $0x39] sm:$0xff]  ;;  %v5862_v38 = vld [vmem:[#allocation99_spill] sm:$0xff]  ;;  %v5863_v37 = vld [vmem:[#allocation100_spill] sm:$0xff] }
  0x8d   : > { %v5858_v40 = vld [vmem:[#allocation97_spill] sm:$0xff]  ;;  %v5870_v7 = vld [vmem:[#allocation103_spill] sm:$0xff]  ;;  %v5871_v8 = vld [vmem:[#allocation104_spill] sm:$0xff] }
  0x8e   : > { %3006 = vmatpush1.bf16.msra.mxu1 %v3005_v5  ;;  %3423 = vrot.lane.b32.xlu1 %v3422_v33, %s3977_s15  ;;  %v355_v5 = vld [vmem:[%s4283_s14 + $0x35] sm:$0xff]  ;;  %v3107_v33 = vpack.c.bf16 %v5851_v43, %v5850_v44  ;;  %v304_v11 = vld [vmem:[%s4283_s14 + $0xab] sm:$0xff]  ;;  %v5084_v52 = vld [vmem:[%s4283_s14 + $0xa0] sm:$0xff] }
  0x8f   : > { %3102 = vmatpush1.bf16.msra.mxu0 %v3101_v31  ;;  %3007 = vmatprep.subr.bf16.mxu1 %v5819_v34  ;;  %v3011_v31 = vpack.c.bf16 %v5849_v22, %v5848_v21  ;;  %v3437_v1 = vpack.i.bf16 %v223_v28, %v355_v5  ;;  %v422_v28 = vld [vmem:[%s4283_s14 + $0x3f] sm:$0xff]  ;;  %v5866_v36 = vld [vmem:[#allocation101_spill] sm:$0xff]  ;;  %v5875_v15 = vld [vmem:[#allocation44_spill] sm:$0xff]  ;;  %5909 = vst [vmem:[#allocation111_spill] sm:$0xff] %v5084_v52 }
  0x90   : > { %3103 = vmatprep.subr.bf16.mxu0 %v5819_v34  ;;  %3418 = vrot.lane.b32.xlu0 %v3417_v29, %s3978_s16  ;;  %v3442_v29 = vpack.i.bf16 %v256_v56, %v388_v57  ;;  %v290_v57 = vld [vmem:[%s4283_s14 + $0x3b] sm:$0xff]  ;;  %v186_v14 = vld [vmem:[%s4283_s14 + $0x10] sm:$0xff]  ;;  %v451_v46 = vld [vmem:[%s4283_s14 + $0x109] sm:$0x3f] }
  0x91   : > { %v257_v5 = vld [vmem:[%s4283_s14 + $0x3a] sm:$0xff]  ;;  %v5876_v17 = vld [vmem:[#allocation105_spill] sm:$0xff]  ;;  %v5019_v51 = vld [vmem:[%s4283_s14 + $0x88] sm:$0xff] }
  0x92   : > { %3009 = vmatpush1.bf16.msra.mxu1 %v3008_v30  ;;  %3433 = vrot.lane.b32.xlu1 %v3432_v54, %s3978_s16  ;;  %v421_v30 = vld [vmem:[%s4283_s14 + $0x37] sm:$0xff]  ;;  %v3110_v54 = vpack.c.bf16 %v5855_v41, %v5854_v42  ;;  %v3125_v19 = vpack.c.bf16 %v5877_v18, %v5876_v17  ;;  %v462_v41 = vld [vmem:[%s4283_s14 + $0x107] sm:$0xff] }
  0x93   : > { %3105 = vmatpush1.bf16.msra.mxu0 %v3104_v32  ;;  %3010 = vmatprep.subr.bf16.mxu1 %v5819_v34  ;;  %v3014_v32 = vpack.c.bf16 %v5853_v24, %v5852_v23  ;;  %v3447_v56 = vpack.i.bf16 %v289_v4, %v421_v30  ;;  %v390_v4 = vld [vmem:[%s4283_s14 + $0x46] sm:$0xff]  ;;  %v5879_v21 = vld [vmem:[#allocation46_spill] sm:$0xff]  ;;  %v5122_v62 = vld [vmem:[%s4283_s14 + $0xb0] sm:$0xff] }
  0x94   : > { %3106 = vmatprep.subr.bf16.mxu0 %v5819_v34  ;;  %3428 = vrot.lane.b32.xlu0 %v3427_v55, %s3979_s17  ;;  %v3452_v55 = vpack.i.bf16 %v224_v3, %v356_v2  ;;  %v258_v2 = vld [vmem:[%s4283_s14 + $0x42] sm:$0xff]  ;;  %v475_v44 = vld [vmem:[%s4283_s14 + $0x115] sm:$0x3f]  ;;  %v459_v47 = vld [vmem:[%s4283_s14 + $0x10d] sm:$0x3f]  ;;  %5915 = vst [vmem:[#allocation117_spill] sm:$0xff] %v5122_v62 }
  0x95   : > { %v225_v30 = vld [vmem:[%s4283_s14 + $0x41] sm:$0xff]  ;;  %v333_v50 = vld [vmem:[%s4283_s14 + $0x8c] sm:$0xff] }
  0x96   : > { %3012 = vmatpush1.bf16.msra.mxu1 %v3011_v31  ;;  %3443 = vrot.lane.b32.xlu1 %v3442_v29, %s3979_s17  ;;  %v389_v31 = vld [vmem:[%s4283_s14 + $0x3e] sm:$0xff]  ;;  %v3113_v29 = vpack.c.bf16 %v5859_v39, %v5858_v40  ;;  %v460_v40 = vld [vmem:[%s4283_s14 + $0x106] sm:$0xff] }
  0x97   : > { %3108 = vmatpush1.bf16.msra.mxu0 %v3107_v33  ;;  %3013 = vmatprep.subr.bf16.mxu1 %v5819_v34  ;;  %v3017_v33 = vpack.c.bf16 %v5857_v26, %v5856_v25  ;;  %v3457_v3 = vpack.i.bf16 %v257_v5, %v389_v31  ;;  %v358_v5 = vld [vmem:[%s4283_s14 + $0x4d] sm:$0xff]  ;;  %v291_v31 = vld [vmem:[%s4283_s14 + $0x43] sm:$0xff] }
  0x98   : > { %3109 = vmatprep.subr.bf16.mxu0 %v5819_v34  ;;  %3438 = vrot.lane.b32.xlu0 %v3437_v1, %s3977_s15  ;;  %v3462_v1 = vpack.i.bf16 %v290_v57, %v422_v28  ;;  %v226_v28 = vld [vmem:[%s4283_s14 + $0x49] sm:$0xff] }
  0x99   : > { %v443_v26 = vld [vmem:[%s4283_s14 + $0xe7] sm:$0xff] }
  0x9a   : > { %3015 = vmatpush1.bf16.msra.mxu1 %v3014_v32  ;;  %3453 = vrot.lane.b32.xlu1 %v3452_v55, %s3977_s15  ;;  %v357_v32 = vld [vmem:[%s4283_s14 + $0x45] sm:$0xff]  ;;  %v3116_v55 = vpack.c.bf16 %v5863_v37, %v5862_v38  ;;  %v445_v37 = vld [vmem:[%s4283_s14 + $0xf7] sm:$0xff] }
  0x9b   : > { %3111 = vmatpush1.bf16.msra.mxu0 %v3110_v54  ;;  %3016 = vmatprep.subr.bf16.mxu1 %v5819_v34  ;;  %v5861_v54 = vld [vmem:[#allocation36_spill] sm:$0xff]  ;;  %v3467_v57 = vpack.i.bf16 %v225_v30, %v357_v32 }
  0x9c   : > { %3112 = vmatprep.subr.bf16.mxu0 %v5819_v34  ;;  %3448 = vrot.lane.b32.xlu0 %v3447_v56, %s3978_s16  ;;  %v3020_v0 = vpack.c.bf16 %v5861_v54, %v5860_v27  ;;  %v3472_v56 = vpack.i.bf16 %v258_v2, %v390_v4  ;;  %v5865_v54 = vld [vmem:[#allocation38_spill] sm:$0xff]  ;;  %v424_v4 = vld [vmem:[%s4283_s14 + $0x4f] sm:$0xff] }
  0x9d   : > { %v259_v30 = vld [vmem:[%s4283_s14 + $0x4a] sm:$0xff] }
  0x9e   : > { %3018 = vmatpush1.bf16.msra.mxu1 %v3017_v33  ;;  %3463 = vrot.lane.b32.xlu1 %v3462_v1, %s3978_s16  ;;  %v423_v33 = vld [vmem:[%s4283_s14 + $0x47] sm:$0xff]  ;;  %v3119_v1 = vpack.c.bf16 %v5867_v35, %v5866_v36  ;;  %v412_v36 = vld [vmem:[%s4283_s14 + $0xf6] sm:$0xff] }
  0x9f   : > { %3114 = vmatpush1.bf16.msra.mxu0 %v3113_v29  ;;  %3019 = vmatprep.subr.bf16.mxu1 %v5819_v34  ;;  %v5864_v29 = vld [vmem:[#allocation37_spill] sm:$0xff]  ;;  %v3477_v2 = vpack.i.bf16 %v291_v31, %v423_v33  ;;  %v5097_v60 = vld [vmem:[%s4283_s14 + $0xa8] sm:$0xff] }
  0xa0   : > { %3115 = vmatprep.subr.bf16.mxu0 %v5819_v34  ;;  %3458 = vrot.lane.b32.xlu0 %v3457_v3, %s3979_s17  ;;  %v3023_v6 = vpack.c.bf16 %v5865_v54, %v5864_v29  ;;  %v3482_v3 = vpack.i.bf16 %v226_v28, %v358_v5  ;;  %v391_v32 = vld [vmem:[%s4283_s14 + $0x4e] sm:$0xff]  ;;  %v392_v5 = vld [vmem:[%s4283_s14 + $0x56] sm:$0xff]  ;;  %5910 = vst [vmem:[#allocation112_spill] sm:$0xff] %v5097_v60 }
  0xa1   : > { %v5869_v29 = vld [vmem:[#allocation40_spill] sm:$0xff]  ;;  %v260_v28 = vld [vmem:[%s4283_s14 + $0x52] sm:$0xff] }
  0xa2   : > { %3021 = vmatpush1.bf16.msra.mxu1 %v3020_v0  ;;  %3473 = vrot.lane.b32.xlu1 %v3472_v56, %s3979_s17  ;;  %v292_v0 = vld [vmem:[%s4283_s14 + $0x4b] sm:$0xff]  ;;  %v3122_v56 = vpack.c.bf16 %v5871_v8, %v5870_v7  ;;  %v359_v33 = vld [vmem:[%s4283_s14 + $0x55] sm:$0xff]  ;;  %v3502_v7 = vpack.i.bf16 %v260_v28, %v392_v5  ;;  %v229_v5 = vld [vmem:[%s4283_s14 + $0x61] sm:$0xff] }
  0xa3   : > { %3117 = vmatpush1.bf16.msra.mxu0 %v3116_v55  ;;  %3022 = vmatprep.subr.bf16.mxu1 %v5819_v34  ;;  %v5868_v55 = vld [vmem:[#allocation39_spill] sm:$0xff]  ;;  %v227_v31 = vld [vmem:[%s4283_s14 + $0x51] sm:$0xff] }
  0xa4   : > { %3118 = vmatprep.subr.bf16.mxu0 %v5819_v34  ;;  %3468 = vrot.lane.b32.xlu0 %v3467_v57, %s3977_s15  ;;  %v3026_v54 = vpack.c.bf16 %v5869_v29, %v5868_v55  ;;  %v3492_v57 = vpack.i.bf16 %v292_v0, %v424_v4  ;;  %v3497_v8 = vpack.i.bf16 %v227_v31, %v359_v33  ;;  %v425_v0 = vld [vmem:[%s4283_s14 + $0x57] sm:$0xff]  ;;  %v426_v55 = vld [vmem:[%s4283_s14 + $0x5f] sm:$0xff]  ;;  %v337_v59 = vld [vmem:[%s4283_s14 + $0xac] sm:$0xff] }
  0xa5   : > { %v261_v29 = vld [vmem:[%s4283_s14 + $0x5a] sm:$0xff]  ;;  %v394_v28 = vld [vmem:[%s4283_s14 + $0x66] sm:$0xff] }
  0xa6   : > { %3024 = vmatpush1.bf16.msra.mxu1 %v3023_v6  ;;  %3483 = vrot.lane.b32.xlu1 %v3482_v3, %s3977_s15  ;;  %v3487_v6 = vpack.i.bf16 %v259_v30, %v391_v32  ;;  %v360_v3 = vld [vmem:[%s4283_s14 + $0x5d] sm:$0xff]  ;;  %v361_v31 = vld [vmem:[%s4283_s14 + $0x65] sm:$0xff] }
  0xa7   : > { %3120 = vmatpush1.bf16.msra.mxu0 %v3119_v1  ;;  %3025 = vmatprep.subr.bf16.mxu1 %v5819_v34  ;;  %v228_v1 = vld [vmem:[%s4283_s14 + $0x59] sm:$0xff] }
  0xa8   : > { %3121 = vmatprep.subr.bf16.mxu0 %v5819_v34  ;;  %3478 = vrot.lane.b32.xlu0 %v3477_v2, %s3978_s16  ;;  %v293_v2 = vld [vmem:[%s4283_s14 + $0x53] sm:$0xff]  ;;  %v3512_v4 = vpack.i.bf16 %v228_v1, %v360_v3  ;;  %v294_v32 = vld [vmem:[%s4283_s14 + $0x5b] sm:$0xff]  ;;  %v295_v3 = vld [vmem:[%s4283_s14 + $0x63] sm:$0xff] }
  0xa9   : > { %v3507_v30 = vpack.i.bf16 %v293_v2, %v425_v0  ;;  %v362_v1 = vld [vmem:[%s4283_s14 + $0x6d] sm:$0xff] }
  0xaa   : > { %3027 = vmatpush1.bf16.msra.mxu1 %v3026_v54  ;;  %3493 = vrot.lane.b32.xlu1 %v3492_v57, %s3978_s16  ;;  %v393_v54 = vld [vmem:[%s4283_s14 + $0x5e] sm:$0xff]  ;;  %v427_v2 = vld [vmem:[%s4283_s14 + $0x67] sm:$0xff] }
  0xab   : > { %3123 = vmatpush1.bf16.msra.mxu0 %v3122_v56  ;;  %3028 = vmatprep.subr.bf16.mxu1 %v5819_v34  ;;  %v3522_v56 = vpack.i.bf16 %v294_v32, %v426_v55  ;;  %v3517_v57 = vpack.i.bf16 %v261_v29, %v393_v54  ;;  %v428_v32 = vld [vmem:[%s4283_s14 + $0x6f] sm:$0xff] }
  0xac   : > { %3124 = vmatprep.subr.bf16.mxu0 %v5819_v34  ;;  %3488 = vrot.lane.b32.xlu0 %v3487_v6, %s3979_s17  ;;  %v262_v6 = vld [vmem:[%s4283_s14 + $0x62] sm:$0xff]  ;;  %v263_v55 = vld [vmem:[%s4283_s14 + $0x6a] sm:$0xff] }
  0xad   : > { %v3532_v33 = vpack.i.bf16 %v262_v6, %v394_v28  ;;  %v395_v29 = vld [vmem:[%s4283_s14 + $0x6e] sm:$0xff]  ;;  %v396_v6 = vld [vmem:[%s4283_s14 + $0x76] sm:$0xff] }
  0xae   : > { %3503 = vrot.lane.b32.xlu1 %v3502_v7, %s3979_s17  ;;  %v3527_v7 = vpack.i.bf16 %v229_v5, %v361_v31  ;;  %v231_v28 = vld [vmem:[%s4283_s14 + $0x71] sm:$0xff] }
  0xaf   : > { %v363_v5 = vld [vmem:[%s4283_s14 + $0x75] sm:$0xff] }
  0xb0   : > { %3498 = vrot.lane.b32.xlu0 %v3497_v8, %s3977_s15  ;;  %v230_v8 = vld [vmem:[%s4283_s14 + $0x69] sm:$0xff] }
  0xb1   : > { %v3542_v0 = vpack.i.bf16 %v230_v8, %v362_v1  ;;  %v364_v8 = vld [vmem:[%s4283_s14 + $0x7d] sm:$0xff]  ;;  %v297_v1 = vld [vmem:[%s4283_s14 + $0x73] sm:$0xff] }
  0xb2   : > { %3513 = vrot.lane.b32.xlu1 %v3512_v4, %s3977_s15  ;;  %v3537_v4 = vpack.i.bf16 %v295_v3, %v427_v2  ;;  %v429_v3 = vld [vmem:[%s4283_s14 + $0x77] sm:$0xff] }
  0xb4   : > { %3508 = vrot.lane.b32.xlu0 %v3507_v30, %s3978_s16  ;;  %v296_v30 = vld [vmem:[%s4283_s14 + $0x6b] sm:$0xff] }
  0xb5   : > { %v3552_v54 = vpack.i.bf16 %v296_v30, %v428_v32  ;;  %v430_v30 = vld [vmem:[%s4283_s14 + $0x7f] sm:$0xff] }
  0xb6   : > { %3523 = vrot.lane.b32.xlu1 %v3522_v56, %s3978_s16  ;;  %v3547_v56 = vpack.i.bf16 %v263_v55, %v395_v29  ;;  %v265_v32 = vld [vmem:[%s4283_s14 + $0x7a] sm:$0xff] }
  0xb7   : > { %v397_v55 = vld [vmem:[%s4283_s14 + $0x7e] sm:$0xff] }
  0xb8   : > { %3518 = vrot.lane.b32.xlu0 %v3517_v57, %s3979_s17  ;;  %v264_v57 = vld [vmem:[%s4283_s14 + $0x72] sm:$0xff] }
  0xb9   : > { %v3562_v31 = vpack.i.bf16 %v264_v57, %v396_v6  ;;  %v398_v57 = vld [vmem:[%s4283_s14 + $0x86] sm:$0xff] }
  0xba   : > { %3533 = vrot.lane.b32.xlu1 %v3532_v33, %s3979_s17  ;;  %v3557_v33 = vpack.i.bf16 %v231_v28, %v363_v5  ;;  %v233_v6 = vld [vmem:[%s4283_s14 + $0x81] sm:$0xff] }
  0xbb   : > { %v365_v28 = vld [vmem:[%s4283_s14 + $0x85] sm:$0xff] }
  0xbc   : > { %3528 = vrot.lane.b32.xlu0 %v3527_v7, %s3977_s15  ;;  %v232_v7 = vld [vmem:[%s4283_s14 + $0x79] sm:$0xff] }
  0xbd   : > { %v3572_v2 = vpack.i.bf16 %v232_v7, %v364_v8  ;;  %v366_v7 = vld [vmem:[%s4283_s14 + $0x8d] sm:$0xff]  ;;  %v299_v8 = vld [vmem:[%s4283_s14 + $0x83] sm:$0xff] }
  0xbe   : > { %3543 = vrot.lane.b32.xlu1 %v3542_v0, %s3977_s15  ;;  %v3567_v0 = vpack.i.bf16 %v297_v1, %v429_v3  ;;  %v431_v1 = vld [vmem:[%s4283_s14 + $0x87] sm:$0xff] }
  0xc0   : > { %3538 = vrot.lane.b32.xlu0 %v3537_v4, %s3978_s16  ;;  %v298_v4 = vld [vmem:[%s4283_s14 + $0x7b] sm:$0xff] }
  0xc1   : > { %v3582_v29 = vpack.i.bf16 %v298_v4, %v430_v30  ;;  %v432_v4 = vld [vmem:[%s4283_s14 + $0x8f] sm:$0xff] }
  0xc2   : > { %3553 = vrot.lane.b32.xlu1 %v3552_v54, %s3978_s16  ;;  %v3577_v54 = vpack.i.bf16 %v265_v32, %v397_v55  ;;  %v267_v30 = vld [vmem:[%s4283_s14 + $0x8a] sm:$0xff] }
  0xc3   : > { %v399_v32 = vld [vmem:[%s4283_s14 + $0x8e] sm:$0xff] }
  0xc4   : > { %3548 = vrot.lane.b32.xlu0 %v3547_v56, %s3979_s17  ;;  %v266_v56 = vld [vmem:[%s4283_s14 + $0x82] sm:$0xff] }
  0xc5   : > { %v3592_v5 = vpack.i.bf16 %v266_v56, %v398_v57  ;;  %v400_v56 = vld [vmem:[%s4283_s14 + $0x96] sm:$0xff] }
  0xc6   : > { %3563 = vrot.lane.b32.xlu1 %v3562_v31, %s3979_s17  ;;  %v3587_v31 = vpack.i.bf16 %v233_v6, %v365_v28  ;;  %v235_v57 = vld [vmem:[%s4283_s14 + $0x91] sm:$0xff] }
  0xc7   : > { %v367_v6 = vld [vmem:[%s4283_s14 + $0x95] sm:$0xff] }
  0xc8   : > { %3558 = vrot.lane.b32.xlu0 %v3557_v33, %s3977_s15  ;;  %v234_v33 = vld [vmem:[%s4283_s14 + $0x89] sm:$0xff] }
  0xc9   : > { %v3602_v3 = vpack.i.bf16 %v234_v33, %v366_v7  ;;  %v368_v33 = vld [vmem:[%s4283_s14 + $0x9d] sm:$0xff]  ;;  %v301_v7 = vld [vmem:[%s4283_s14 + $0x93] sm:$0xff] }
  0xca   : > { %3573 = vrot.lane.b32.xlu1 %v3572_v2, %s3977_s15  ;;  %v3597_v2 = vpack.i.bf16 %v299_v8, %v431_v1  ;;  %v433_v8 = vld [vmem:[%s4283_s14 + $0x97] sm:$0xff] }
  0xcc   : > { %3568 = vrot.lane.b32.xlu0 %v3567_v0, %s3978_s16  ;;  %v300_v0 = vld [vmem:[%s4283_s14 + $0x8b] sm:$0xff] }
  0xcd   : > { %v3612_v55 = vpack.i.bf16 %v300_v0, %v432_v4  ;;  %v434_v0 = vld [vmem:[%s4283_s14 + $0x9f] sm:$0xff] }
  0xce   : > { %3583 = vrot.lane.b32.xlu1 %v3582_v29, %s3978_s16  ;;  %v3607_v29 = vpack.i.bf16 %v267_v30, %v399_v32  ;;  %v269_v4 = vld [vmem:[%s4283_s14 + $0x9a] sm:$0xff] }
  0xcf   : > { %v401_v30 = vld [vmem:[%s4283_s14 + $0x9e] sm:$0xff] }
  0xd0   : > { %3578 = vrot.lane.b32.xlu0 %v3577_v54, %s3979_s17  ;;  %v268_v54 = vld [vmem:[%s4283_s14 + $0x92] sm:$0xff] }
  0xd1   : > { %v3622_v28 = vpack.i.bf16 %v268_v54, %v400_v56  ;;  %v402_v54 = vld [vmem:[%s4283_s14 + $0xa6] sm:$0xff] }
  0xd2   : > { %3593 = vrot.lane.b32.xlu1 %v3592_v5, %s3979_s17  ;;  %v3617_v5 = vpack.i.bf16 %v235_v57, %v367_v6  ;;  %v237_v57 = vld [vmem:[%s4283_s14 + $0xa1] sm:$0xff] }
  0xd3   : > { %v369_v6 = vld [vmem:[%s4283_s14 + $0xa5] sm:$0xff] }
  0xd4   : > { %3588 = vrot.lane.b32.xlu0 %v3587_v31, %s3977_s15  ;;  %v236_v31 = vld [vmem:[%s4283_s14 + $0x99] sm:$0xff] }
  0xd5   : > { %v3632_v1 = vpack.i.bf16 %v236_v31, %v368_v33 }
  0xd6   : > { %3603 = vrot.lane.b32.xlu1 %v3602_v3, %s3977_s15  ;;  %v3627_v3 = vpack.i.bf16 %v301_v7, %v433_v8  ;;  %v3647_v7 = vpack.i.bf16 %v237_v57, %v369_v6  ;;  %v316_v8 = vld [vmem:[%s4283_s14 + $0x4] sm:$0xff] }
  0xd8   : > { %3598 = vrot.lane.b32.xlu0 %v3597_v2, %s3978_s16  ;;  %v302_v2 = vld [vmem:[%s4283_s14 + $0x9b] sm:$0xff] }
  0xd9   : > { %v3642_v32 = vpack.i.bf16 %v302_v2, %v434_v0  ;;  %v303_v0 = vld [vmem:[%s4283_s14 + $0xa3] sm:$0xff] }
  0xda   : > { %3613 = vrot.lane.b32.xlu1 %v3612_v55, %s3978_s16  ;;  %v3637_v55 = vpack.i.bf16 %v269_v4, %v401_v30  ;;  %v435_v4 = vld [vmem:[%s4283_s14 + $0xa7] sm:$0xff] }
  0xdb   : > { %v184_v30 = vld [vmem:[%s4283_s14] sm:$0xff]  ;;  %v3657_v6 = vpack.i.bf16 %v303_v0, %v435_v4 }
  0xdc   : > { %3608 = vrot.lane.b32.xlu0 %v3607_v29, %s3979_s17  ;;  %v270_v29 = vld [vmem:[%s4283_s14 + $0xa2] sm:$0xff] }
  0xde   : > { %3623 = vrot.lane.b32.xlu1 %v3622_v28, %s3979_s17 }
  0xe0   : > { %3618 = vrot.lane.b32.xlu0 %v3617_v5, %s3977_s15  ;;  %v3652_v5 = vpack.i.bf16 %v270_v29, %v402_v54 }
  0xe2   : > { %3633 = vrot.lane.b32.xlu1 %v3632_v1, %s3977_s15  ;;  %v238_v1 = vld [vmem:[%s4283_s14 + $0xa9] sm:$0xff] }
  0xe4   : > { %3628 = vrot.lane.b32.xlu0 %v3627_v3, %s3978_s16  ;;  %v4551_v56 = vpop.permute.xlu1 %3358  ;;  %v370_v3 = vld [vmem:[%s4283_s14 + $0xad] sm:$0xff] }
  0xe5   : > { %v3360_v0 = vunpack.i.l.bf16 %v4551_v56 }
  0xe6   : > { %v3349_v28 = vpop.permute.xlu0 %3348  ;;  %3643 = vrot.lane.b32.xlu1 %v3642_v32, %s3978_s16 }
  0xe7   : > { %v3351_v31 = vunpack.i.h.bf16 %v3349_v28  ;;  %v3350_v33 = vunpack.i.l.bf16 %v3349_v28 }
  0xe8   : > { %3638 = vrot.lane.b32.xlu0 %v3637_v55, %s3979_s17  ;;  %v3364_v2 = vpop.permute.xlu1 %3363  ;;  %v3662_v55 = vpack.i.bf16 %v238_v1, %v370_v3  ;;  %v271_v1 = vld [vmem:[%s4283_s14 + $0xaa] sm:$0xff] }
  0xe9   : > { %v3366_v9 = vunpack.i.h.bf16 %v3364_v2  ;;  %v3365_v10 = vunpack.i.l.bf16 %v3364_v2  ;;  %v1423_v57 = vsel %vm1322_vm1, %v316_v8, %v3350_v33  ;;  %v1323_v28 = vsel %vm1322_vm1, %v184_v30, %v3351_v31  ;;  %v436_v2 = vld [vmem:[%s4283_s14 + $0xaf] sm:$0xff] }
  0xea   : > { %v3354_v32 = vpop.permute.xlu0 %3353  ;;  %3653 = vrot.lane.b32.xlu1 %v3652_v5, %s3979_s17  ;;  %v403_v3 = vld [vmem:[%s4283_s14 + $0xae] sm:$0xff]  ;;  %v3361_v8 = vunpack.i.h.bf16 %v4551_v56 }
  0xeb   : > { %v3356_v29 = vunpack.i.h.bf16 %v3354_v32  ;;  %v3355_v54 = vunpack.i.l.bf16 %v3354_v32 }
  0xec   : > { %3648 = vrot.lane.b32.xlu0 %v3647_v7, %s3977_s15  ;;  %v4569_v12 = vpop.permute.xlu1 %3373  ;;  %v5872_v7 = vld [vmem:[#allocation41_spill] sm:$0xff] }
  0xed   : > { %v1456_v32 = vsel %vm40_vm0, %v1423_v57, %v3355_v54  ;;  %v1356_v5 = vsel %vm40_vm0, %v1323_v28, %v3356_v29  ;;  %v3029_v33 = vpack.c.bf16 %v5873_v13, %v5872_v7  ;;  %v272_v54 = vld [vmem:[%s4283_s14 + $0xb2] sm:$0xff]  ;;  %v3672_v29 = vpack.i.bf16 %v304_v11, %v436_v2 }
  0xee   : > { %v3369_v31 = vpop.permute.xlu0 %3368  ;;  %v1489_v4 = vsel %vm1389_vm2, %v1456_v32, %v3365_v10  ;;  %v1390_v30 = vsel %vm1389_vm2, %v1356_v5, %v3366_v9  ;;  %v404_v57 = vld [vmem:[%s4283_s14 + $0xb6] sm:$0xff]  ;;  %3663 = vrot.lane.b32.xlu1 %v3662_v55, %s3977_s15  ;;  %v3667_v10 = vpack.i.bf16 %v271_v1, %v403_v3  ;;  %v3376_v55 = vunpack.i.h.bf16 %v4569_v12 }
  0xef   : > { %1763 = vmatprep.mubr.f32.mxu1 %v1489_v4  ;;  %v318_v28 = vld [vmem:[%s4283_s14 + $0x14] sm:$0xff]  ;;  %v3371_v13 = vunpack.i.h.bf16 %v3369_v31  ;;  %v3370_v7 = vunpack.i.l.bf16 %v3369_v31  ;;  %v3682_v32 = vpack.i.bf16 %v272_v54, %v404_v57  ;;  %v5874_v4 = vld [vmem:[#allocation43_spill] sm:$0xff]  ;;  %v3375_v2 = vunpack.i.l.bf16 %v4569_v12 }
  0xf0   : > { %3658 = vrot.lane.b32.xlu0 %v3657_v6, %s3978_s16  ;;  %1764 = vmatmul.mubr.f32.vlgmr.msra.gmra.mrb[0].mxu1 %v1390_v30  ;;  %v3384_v56 = vpop.permute.xlu1 %3383  ;;  %v239_v9 = vld [vmem:[%s4283_s14 + $0xb1] sm:$0xff]  ;;  %v3032_v11 = vpack.c.bf16 %v5875_v15, %v5874_v4  ;;  %v1425_v16 = vsel %vm1322_vm1, %v318_v28, %v3360_v0  ;;  %v1325_v6 = vsel %vm1322_vm1, %v186_v14, %v3361_v8  ;;  %v240_v1 = vld [vmem:[%s4283_s14 + $0xb9] sm:$0xff]  ;;  %v185_v4 = vld [vmem:[%s4283_s14 + $0x8] sm:$0xff] }
  0xf1   : > { %v371_v5 = vld [vmem:[%s4283_s14 + $0xb5] sm:$0xff]  ;;  %3030 = vmatpush1.bf16.msra.mxu1 %v3029_v33  ;;  %v372_v3 = vld [vmem:[%s4283_s14 + $0xbd] sm:$0xff]  ;;  %v3386_v33 = vunpack.i.h.bf16 %v3384_v56  ;;  %v3385_v30 = vunpack.i.l.bf16 %v3384_v56  ;;  %v317_v15 = vld [vmem:[%s4283_s14 + $0xc] sm:$0xff]  ;;  %v1458_v12 = vsel %vm40_vm0, %v1425_v16, %v3370_v7  ;;  %v1358_v0 = vsel %vm40_vm0, %v1325_v6, %v3371_v13 }
  0xf2   : > { %v3379_v31 = vpop.permute.xlu0 %3378  ;;  %3031 = vmatprep.subr.bf16.mxu1 %v5819_v34  ;;  %3673 = vrot.lane.b32.xlu1 %v3672_v29, %s3978_s16  ;;  %v3677_v14 = vpack.i.bf16 %v239_v9, %v371_v5  ;;  %v305_v8 = vld [vmem:[%s4283_s14 + $0xb3] sm:$0xff]  ;;  %v1424_v17 = vsel %vm1322_vm1, %v317_v15, %v3375_v2  ;;  %v1324_v18 = vsel %vm1322_vm1, %v185_v4, %v3376_v55  ;;  %v5880_v15 = vld [vmem:[#allocation47_spill] sm:$0xff]  ;;  %v5881_v4 = vld [vmem:[#allocation48_spill] sm:$0xff] }
  0xf3   : > { %v3381_v54 = vunpack.i.h.bf16 %v3379_v31  ;;  %v3380_v57 = vunpack.i.l.bf16 %v3379_v31  ;;  %v437_v28 = vld [vmem:[%s4283_s14 + $0xb7] sm:$0xff]  ;;  %v3692_v31 = vpack.i.bf16 %v240_v1, %v372_v3 }
  0xf4   : > { %3668 = vrot.lane.b32.xlu0 %v3667_v10, %s3979_s17  ;;  %v3394_v20 = vpop.permute.xlu1 %3393  ;;  %v5878_v10 = vld [vmem:[#allocation45_spill] sm:$0xff]  ;;  %v3687_v5 = vpack.i.bf16 %v305_v8, %v437_v28  ;;  %v319_v1 = vld [vmem:[%s4283_s14 + $0x1c] sm:$0xff] }
  0xf5   : > { %v4609_v56 = vsel %vm1389_vm2, %v1458_v12, %v3380_v57  ;;  %v4612_v29 = vsel %vm1389_vm2, %v1358_v0, %v3381_v54  ;;  %3033 = vmatpush1.bf16.msra.mxu1 %v3032_v11  ;;  %v3035_v16 = vpack.c.bf16 %v5879_v21, %v5878_v10  ;;  %v3396_v7 = vunpack.i.h.bf16 %v3394_v20  ;;  %v306_v3 = vld [vmem:[%s4283_s14 + $0xbb] sm:$0xff] }
  0xf6   : > { %v3395_v13 = vunpack.i.l.bf16 %v3394_v20  ;;  %v3389_v9 = vpop.permute.xlu0 %3388  ;;  %2223 = vmatprep.mubr.f32.mxu0 %v4609_v56  ;;  %3034 = vmatprep.subr.bf16.mxu1 %v5819_v34  ;;  %v1457_v20 = vsel %vm40_vm0, %v1424_v17, %v3385_v30  ;;  %v1357_v21 = vsel %vm40_vm0, %v1324_v18, %v3386_v33  ;;  %v273_v30 = vld [vmem:[%s4283_s14 + $0xba] sm:$0xff]  ;;  %v3038_v12 = vpack.c.bf16 %v5881_v4, %v5880_v15  ;;  %v406_v17 = vld [vmem:[%s4283_s14 + $0xc6] sm:$0xff] }
  0xf7   : > { %2224 = vmatmul.mubr.f32.vlgmr.msra.gmra.mrb[0].mxu0 %v4612_v29  ;;  %3683 = vrot.lane.b32.xlu1 %v3682_v32, %s3979_s17  ;;  %v3391_v11 = vunpack.i.h.bf16 %v3389_v9  ;;  %v3390_v6 = vunpack.i.l.bf16 %v3389_v9  ;;  %v4629_v2 = vsel %vm1389_vm2, %v1357_v21, %v3396_v7  ;;  %v438_v32 = vld [vmem:[%s4283_s14 + $0xbf] sm:$0xff] }
  0xf8   : > { %3678 = vrot.lane.b32.xlu0 %v3677_v14, %s3977_s15  ;;  %v4626_v55 = vsel %vm1389_vm2, %v1457_v20, %v3395_v13  ;;  %3126 = vmatpush3.bf16.msra.mxu0 %v3125_v19  ;;  %v3404_v54 = vpop.permute.xlu1 %3403  ;;  %v405_v33 = vld [vmem:[%s4283_s14 + $0xbe] sm:$0xff]  ;;  %v3702_v10 = vpack.i.bf16 %v306_v3, %v438_v32 }
  0xf9   : > { %1768 = vmatprep.mubr.f32.mxu1 %v4626_v55  ;;  %v187_v57 = vld [vmem:[%s4283_s14 + $0x18] sm:$0xff]  ;;  %3036 = vmatpush1.bf16.msra.mxu1 %v3035_v16  ;;  %v3406_v0 = vunpack.i.h.bf16 %v3404_v54  ;;  %v3405_v14 = vunpack.i.l.bf16 %v3404_v54  ;;  %v1426_v16 = vsel %vm1322_vm1, %v319_v1, %v3390_v6  ;;  %v3697_v7 = vpack.i.bf16 %v273_v30, %v405_v33  ;;  %v274_v9 = vld [vmem:[%s4283_s14 + $0xc2] sm:$0xff] }
  0xfa   : > { %v3399_v8 = vpop.permute.xlu0 %3398  ;;  %1769 = vmatmul.mubr.f32.gmra.mrb[2].mxu1 %v4629_v2  ;;  %3037 = vmatprep.subr.bf16.mxu1 %v5819_v34  ;;  %v1326_v13 = vsel %vm1322_vm1, %v187_v57, %v3391_v11  ;;  %v241_v21 = vld [vmem:[%s4283_s14 + $0xc1] sm:$0xff]  ;;  %v3712_v4 = vpack.i.bf16 %v274_v9, %v406_v17  ;;  %v5885_v17 = vld [vmem:[#allocation52_spill] sm:$0xff] }
  0xfb   : > { %v3401_v19 = vunpack.i.h.bf16 %v3399_v8  ;;  %v3400_v28 = vunpack.i.l.bf16 %v3399_v8  ;;  %3693 = vrot.lane.b32.xlu1 %v3692_v31, %s3977_s15  ;;  %1773 = vmatprep.mubr.f32.mxu1 %v4609_v56  ;;  %v373_v3 = vld [vmem:[%s4283_s14 + $0xc5] sm:$0xff]  ;;  %v5883_v6 = vld [vmem:[#allocation50_spill] sm:$0xff]  ;;  %v374_v8 = vld [vmem:[%s4283_s14 + $0xcd] sm:$0xff] }
  0xfc   : > { %3688 = vrot.lane.b32.xlu0 %v3687_v5, %s3978_s16  ;;  %3127 = vmatprep.subr.bf16.mxu0 %v5819_v34  ;;  %v3414_v18 = vpop.permute.xlu1 %3413  ;;  %v5882_v5 = vld [vmem:[#allocation49_spill] sm:$0xff]  ;;  %v320_v30 = vld [vmem:[%s4283_s14 + $0x24] sm:$0xff] }
  0xfd   : > { %v1459_v20 = vsel %vm40_vm0, %v1426_v16, %v3400_v28  ;;  %v1359_v31 = vsel %vm40_vm0, %v1326_v13, %v3401_v19  ;;  %3039 = vmatpush1.bf16.msra.mxu1 %v3038_v12  ;;  %v3041_v1 = vpack.c.bf16 %v5883_v6, %v5882_v5  ;;  %v188_v33 = vld [vmem:[%s4283_s14 + $0x20] sm:$0xff]  ;;  %v242_v12 = vld [vmem:[%s4283_s14 + $0xc9] sm:$0xff]  ;;  %v3415_v19 = vunpack.i.l.bf16 %v3414_v18 }
  0xfe   : > { %v3409_v32 = vpop.permute.xlu0 %3408  ;;  %1774 = vmatmul.mubr.f32.gmra.mrb[4].mxu1 %v4612_v29  ;;  %v4658_v11 = vsel %vm1389_vm2, %v1459_v20, %v3405_v14  ;;  %v4661_v54 = vsel %vm1389_vm2, %v1359_v31, %v3406_v0  ;;  %3040 = vmatprep.subr.bf16.mxu1 %v5819_v34  ;;  %v3416_v14 = vunpack.i.h.bf16 %v3414_v18  ;;  %v3707_v0 = vpack.i.bf16 %v241_v21, %v373_v3  ;;  %v307_v28 = vld [vmem:[%s4283_s14 + $0xc3] sm:$0xff] }
  0xff   : > { %v3411_v57 = vunpack.i.h.bf16 %v3409_v32  ;;  %v3410_v15 = vunpack.i.l.bf16 %v3409_v32  ;;  %2228 = vmatprep.mubr.f32.mxu0 %v4658_v11  ;;  %3703 = vrot.lane.b32.xlu1 %v3702_v10, %s3978_s16  ;;  %v439_v16 = vld [vmem:[%s4283_s14 + $0xc7] sm:$0xff] }
 0x100   : > { %3698 = vrot.lane.b32.xlu0 %v3697_v7, %s3979_s17  ;;  %1778 = vmatprep.mubr.f32.mxu1 %v4658_v11  ;;  %v3424_v13 = vpop.permute.xlu1 %3423  ;;  %v5884_v9 = vld [vmem:[#allocation51_spill] sm:$0xff]  ;;  %v3722_v7 = vpack.i.bf16 %v242_v12, %v374_v8  ;;  %v3717_v5 = vpack.i.bf16 %v307_v28, %v439_v16  ;;  %v308_v8 = vld [vmem:[%s4283_s14 + $0xcb] sm:$0xff] }
 0x101   : > { %2229 = vmatmul.mubr.f32.gmra.mrb[2].mxu0 %v4661_v54  ;;  %v1427_v20 = vsel %vm1322_vm1, %v320_v30, %v3410_v15  ;;  %v1327_v10 = vsel %vm1322_vm1, %v188_v33, %v3411_v57  ;;  %3042 = vmatpush1.bf16.msra.mxu1 %v3041_v1  ;;  %v3044_v31 = vpack.c.bf16 %v5885_v17, %v5884_v9  ;;  %v5886_v6 = vld [vmem:[#allocation107_spill] sm:$0xff]  ;;  %v5887_v1 = vld [vmem:[#allocation108_spill] sm:$0xff]  ;;  %v3426_v30 = vunpack.i.h.bf16 %v3424_v13 }
 0x102   : > { %v3419_v18 = vpop.permute.xlu0 %3418  ;;  %1779 = vmatmul.mubr.f32.gmra.mrb[6].mxu1 %v4661_v54  ;;  %3043 = vmatprep.subr.bf16.mxu1 %v5819_v34  ;;  %v3128_v32 = vpack.c.bf16 %v5887_v1, %v5886_v6  ;;  %v3425_v33 = vunpack.i.l.bf16 %v3424_v13  ;;  %v321_v57 = vld [vmem:[%s4283_s14 + $0x2c] sm:$0xff]  ;;  %v1460_v15 = vsel %vm40_vm0, %v1427_v20, %v3415_v19  ;;  %v1360_v12 = vsel %vm40_vm0, %v1327_v10, %v3416_v14  ;;  %v5889_v20 = vld [vmem:[#allocation54_spill] sm:$0xff] }
 0x103   : > { %v3421_v21 = vunpack.i.h.bf16 %v3419_v18  ;;  %v3420_v3 = vunpack.i.l.bf16 %v3419_v18  ;;  %3713 = vrot.lane.b32.xlu1 %v3712_v4, %s3979_s17  ;;  %v440_v9 = vld [vmem:[%s4283_s14 + $0xcf] sm:$0xff] }
 0x104   : > { %3708 = vrot.lane.b32.xlu0 %v3707_v0, %s3977_s15  ;;  %v3434_v17 = vpop.permute.xlu1 %3433  ;;  %v189_v18 = vld [vmem:[%s4283_s14 + $0x28] sm:$0xff]  ;;  %3129 = vmatpush3.bf16.msra.mxu0 %v3128_v32  ;;  %v5888_v14 = vld [vmem:[#allocation53_spill] sm:$0xff]  ;;  %v1428_v1 = vsel %vm1322_vm1, %v321_v57, %v3425_v33 }
 0x105   : > { %v4692_v4 = vsel %vm1389_vm2, %v1460_v15, %v3420_v3  ;;  %v4695_v28 = vsel %vm1389_vm2, %v1360_v12, %v3421_v21  ;;  %v275_v16 = vld [vmem:[%s4283_s14 + $0xca] sm:$0xff]  ;;  %3045 = vmatpush1.bf16.msra.mxu1 %v3044_v31  ;;  %v3436_v0 = vunpack.i.h.bf16 %v3434_v17  ;;  %v3435_v13 = vunpack.i.l.bf16 %v3434_v17  ;;  %v276_v12 = vld [vmem:[%s4283_s14 + $0xd2] sm:$0xff] }
 0x106   : > { %v407_v6 = vld [vmem:[%s4283_s14 + $0xce] sm:$0xff]  ;;  %v3429_v19 = vpop.permute.xlu0 %3428  ;;  %1783 = vmatprep.mubr.f32.mxu1 %v4692_v4  ;;  %2233 = vmatprep.mubr.f32.mxu0 %v4692_v4  ;;  %v3047_v10 = vpack.c.bf16 %v5889_v20, %v5888_v14  ;;  %v3732_v31 = vpack.i.bf16 %v308_v8, %v440_v9  ;;  %v1328_v32 = vsel %vm1322_vm1, %v189_v18, %v3426_v30  ;;  %v408_v8 = vld [vmem:[%s4283_s14 + $0xd6] sm:$0xff] }
 0x107   : > { %v3431_v3 = vunpack.i.h.bf16 %v3429_v19  ;;  %v3430_v21 = vunpack.i.l.bf16 %v3429_v19  ;;  %1784 = vmatmul.mubr.f32.gmra.mrb[8].mxu1 %v4695_v28  ;;  %2234 = vmatmul.mubr.f32.gmra.mrb[4].mxu0 %v4695_v28  ;;  %v3727_v15 = vpack.i.bf16 %v275_v16, %v407_v6  ;;  %v243_v9 = vld [vmem:[%s4283_s14 + $0xd1] sm:$0xff]  ;;  %v244_v20 = vld [vmem:[%s4283_s14 + $0xd9] sm:$0xff] }
 0x108   : > { %3723 = vrot.lane.b32.xlu1 %v3722_v7, %s3977_s15  ;;  %3718 = vrot.lane.b32.xlu0 %v3717_v5, %s3978_s16  ;;  %v3444_v14 = vpop.permute.xlu1 %3443  ;;  %v375_v33 = vld [vmem:[%s4283_s14 + $0xd5] sm:$0xff] }
 0x109   : > { %v1361_v17 = vsel %vm40_vm0, %v1328_v32, %v3431_v3  ;;  %v1461_v19 = vsel %vm40_vm0, %v1428_v1, %v3430_v21  ;;  %3046 = vmatprep.subr.bf16.mxu1 %v5819_v34  ;;  %v322_v5 = vld [vmem:[%s4283_s14 + $0x34] sm:$0xff]  ;;  %v376_v3 = vld [vmem:[%s4283_s14 + $0xdd] sm:$0xff]  ;;  %v5891_v1 = vld [vmem:[#allocation56_spill] sm:$0xff]  ;;  %v3446_v32 = vunpack.i.h.bf16 %v3444_v14 }
 0x10a   : > { %v3439_v30 = vpop.permute.xlu0 %3438  ;;  %v4717_v57 = vsel %vm1389_vm2, %v1461_v19, %v3435_v13  ;;  %v4720_v7 = vsel %vm1389_vm2, %v1361_v17, %v3436_v0  ;;  %v190_v18 = vld [vmem:[%s4283_s14 + $0x30] sm:$0xff]  ;;  %3048 = vmatpush1.bf16.msra.mxu1 %v3047_v10  ;;  %v5890_v21 = vld [vmem:[#allocation55_spill] sm:$0xff]  ;;  %v3445_v19 = vunpack.i.l.bf16 %v3444_v14  ;;  %v3742_v0 = vpack.i.bf16 %v276_v12, %v408_v8 }
 0x10b   : > { %v3441_v16 = vunpack.i.h.bf16 %v3439_v30  ;;  %v3440_v6 = vunpack.i.l.bf16 %v3439_v30  ;;  %1788 = vmatprep.mubr.f32.mxu1 %v4717_v57  ;;  %2238 = vmatprep.mubr.f32.mxu0 %v4717_v57  ;;  %v3050_v13 = vpack.c.bf16 %v5891_v1, %v5890_v21  ;;  %v3737_v10 = vpack.i.bf16 %v243_v9, %v375_v33  ;;  %v309_v17 = vld [vmem:[%s4283_s14 + $0xd3] sm:$0xff]  ;;  %v323_v12 = vld [vmem:[%s4283_s14 + $0x3c] sm:$0xff] }
 0x10c   : > { %3733 = vrot.lane.b32.xlu1 %v3732_v31, %s3978_s16  ;;  %3728 = vrot.lane.b32.xlu0 %v3727_v15, %s3979_s17  ;;  %v441_v30 = vld [vmem:[%s4283_s14 + $0xd7] sm:$0xff]  ;;  %v3454_v22 = vpop.permute.xlu1 %3453  ;;  %v3752_v8 = vpack.i.bf16 %v244_v20, %v376_v3 }
 0x10d   : > { %1789 = vmatmul.mubr.f32.gmra.mrb[10].mxu1 %v4720_v7  ;;  %2239 = vmatmul.mubr.f32.gmra.mrb[6].mxu0 %v4720_v7  ;;  %v1429_v23 = vsel %vm1322_vm1, %v322_v5, %v3440_v6  ;;  %v1329_v21 = vsel %vm1322_vm1, %v190_v18, %v3441_v16  ;;  %v3747_v9 = vpack.i.bf16 %v309_v17, %v441_v30  ;;  %v3456_v33 = vunpack.i.h.bf16 %v3454_v22  ;;  %v310_v16 = vld [vmem:[%s4283_s14 + $0xdb] sm:$0xff] }
 0x10e   : > { %v3449_v14 = vpop.permute.xlu0 %3448  ;;  %3049 = vmatprep.subr.bf16.mxu1 %v5819_v34  ;;  %v3455_v1 = vunpack.i.l.bf16 %v3454_v22  ;;  %v1462_v5 = vsel %vm40_vm0, %v1429_v23, %v3445_v19  ;;  %v1362_v18 = vsel %vm40_vm0, %v1329_v21, %v3446_v32  ;;  %v442_v6 = vld [vmem:[%s4283_s14 + $0xdf] sm:$0xff] }
 0x10f   : > { %v3451_v31 = vunpack.i.h.bf16 %v3449_v14  ;;  %v3450_v15 = vunpack.i.l.bf16 %v3449_v14  ;;  %3051 = vmatpush1.bf16.msra.mxu1 %v3050_v13  ;;  %v191_v14 = vld [vmem:[%s4283_s14 + $0x38] sm:$0xff]  ;;  %v3762_v21 = vpack.i.bf16 %v310_v16, %v442_v6  ;;  %v245_v16 = vld [vmem:[%s4283_s14 + $0xe1] sm:$0xff] }
 0x110   : > { %3743 = vrot.lane.b32.xlu1 %v3742_v0, %s3979_s17  ;;  %3738 = vrot.lane.b32.xlu0 %v3737_v10, %s3977_s15  ;;  %v3464_v24 = vpop.permute.xlu1 %3463  ;;  %v277_v3 = vld [vmem:[%s4283_s14 + $0xda] sm:$0xff]  ;;  %v5892_v13 = vld [vmem:[#allocation57_spill] sm:$0xff] }
 0x111   : > { %v4748_v25 = vsel %vm1389_vm2, %v1462_v5, %v3450_v15  ;;  %v4751_v20 = vsel %vm1389_vm2, %v1362_v18, %v3451_v31  ;;  %v409_v22 = vld [vmem:[%s4283_s14 + $0xde] sm:$0xff]  ;;  %3052 = vmatprep.subr.bf16.mxu1 %v5819_v34  ;;  %v3466_v23 = vunpack.i.h.bf16 %v3464_v24  ;;  %v3465_v32 = vunpack.i.l.bf16 %v3464_v24 }
 0x112   : > { %v5893_v0 = vld [vmem:[#allocation58_spill] sm:$0xff]  ;;  %v3459_v19 = vpop.permute.xlu0 %3458  ;;  %1793 = vmatprep.mubr.f32.mxu1 %v4748_v25  ;;  %2243 = vmatprep.mubr.f32.mxu0 %v4748_v25  ;;  %v1430_v31 = vsel %vm1322_vm1, %v323_v12, %v3455_v1  ;;  %v1330_v24 = vsel %vm1322_vm1, %v191_v14, %v3456_v33  ;;  %v3757_v15 = vpack.i.bf16 %v277_v3, %v409_v22  ;;  %v278_v5 = vld [vmem:[%s4283_s14 + $0xe2] sm:$0xff]  ;;  %v5895_v3 = vld [vmem:[#allocation60_spill] sm:$0xff] }
 0x113   : > { %v3053_v10 = vpack.c.bf16 %v5893_v0, %v5892_v13  ;;  %v3461_v17 = vunpack.i.h.bf16 %v3459_v19  ;;  %v3460_v30 = vunpack.i.l.bf16 %v3459_v19  ;;  %1794 = vmatmul.mubr.f32.gmra.mrb[12].mxu1 %v4751_v20  ;;  %2244 = vmatmul.mubr.f32.gmra.mrb[8].mxu0 %v4751_v20  ;;  %v410_v19 = vld [vmem:[%s4283_s14 + $0xe6] sm:$0xff] }
 0x114   : > { %3753 = vrot.lane.b32.xlu1 %v3752_v8, %s3977_s15  ;;  %3748 = vrot.lane.b32.xlu0 %v3747_v9, %s3978_s16  ;;  %v3474_v0 = vpop.permute.xlu1 %3473  ;;  %v377_v12 = vld [vmem:[%s4283_s14 + $0xe5] sm:$0xff] }
 0x115   : > { %v1363_v18 = vsel %vm40_vm0, %v1330_v24, %v3461_v17  ;;  %v1463_v13 = vsel %vm40_vm0, %v1430_v31, %v3460_v30  ;;  %3054 = vmatpush1.bf16.msra.mxu1 %v3053_v10  ;;  %v324_v9 = vld [vmem:[%s4283_s14 + $0x44] sm:$0xff]  ;;  %v3476_v31 = vunpack.i.h.bf16 %v3474_v0  ;;  %v3772_v24 = vpack.i.bf16 %v278_v5, %v410_v19  ;;  %v325_v5 = vld [vmem:[%s4283_s14 + $0x4c] sm:$0xff] }
 0x116   : > { %v3469_v1 = vpop.permute.xlu0 %3468  ;;  %v4773_v33 = vsel %vm1389_vm2, %v1463_v13, %v3465_v32  ;;  %v4776_v8 = vsel %vm1389_vm2, %v1363_v18, %v3466_v23  ;;  %v192_v6 = vld [vmem:[%s4283_s14 + $0x40] sm:$0xff]  ;;  %3055 = vmatprep.subr.bf16.mxu1 %v5819_v34  ;;  %v246_v10 = vld [vmem:[%s4283_s14 + $0xe9] sm:$0xff]  ;;  %v3475_v23 = vunpack.i.l.bf16 %v3474_v0  ;;  %v3767_v18 = vpack.i.bf16 %v245_v16, %v377_v12 }
 0x117   : > { %v5894_v14 = vld [vmem:[#allocation59_spill] sm:$0xff]  ;;  %v3471_v17 = vunpack.i.h.bf16 %v3469_v1  ;;  %v3470_v30 = vunpack.i.l.bf16 %v3469_v1  ;;  %1798 = vmatprep.mubr.f32.mxu1 %v4773_v33  ;;  %2248 = vmatprep.mubr.f32.mxu0 %v4773_v33  ;;  %v378_v32 = vld [vmem:[%s4283_s14 + $0xed] sm:$0xff] }
 0x118   : > { %v3056_v22 = vpack.c.bf16 %v5895_v3, %v5894_v14  ;;  %3763 = vrot.lane.b32.xlu1 %v3762_v21, %s3978_s16  ;;  %3758 = vrot.lane.b32.xlu0 %v3757_v15, %s3979_s17  ;;  %v311_v13 = vld [vmem:[%s4283_s14 + $0xe3] sm:$0xff]  ;;  %v3484_v1 = vpop.permute.xlu1 %3483  ;;  %v3782_v19 = vpack.i.bf16 %v246_v10, %v378_v32 }
 0x119   : > { %1799 = vmatmul.mubr.f32.gmra.mrb[14].mxu1 %v4776_v8  ;;  %2249 = vmatmul.mubr.f32.gmra.mrb[10].mxu0 %v4776_v8  ;;  %v1431_v14 = vsel %vm1322_vm1, %v324_v9, %v3470_v30  ;;  %v1331_v3 = vsel %vm1322_vm1, %v192_v6, %v3471_v17  ;;  %v3777_v16 = vpack.i.bf16 %v311_v13, %v443_v26  ;;  %v3486_v12 = vunpack.i.h.bf16 %v3484_v1  ;;  %v444_v17 = vld [vmem:[%s4283_s14 + $0xef] sm:$0xff] }
 0x11a   : > { %v3479_v0 = vpop.permute.xlu0 %3478  ;;  %3057 = vmatpush1.bf16.msra.mxu1 %v3056_v22  ;;  %v3485_v27 = vunpack.i.l.bf16 %v3484_v1  ;;  %v1464_v9 = vsel %vm40_vm0, %v1431_v14, %v3475_v23  ;;  %v1364_v6 = vsel %vm40_vm0, %v1331_v3, %v3476_v31  ;;  %v312_v22 = vld [vmem:[%s4283_s14 + $0xeb] sm:$0xff] }
 0x11b   : > { %v3481_v21 = vunpack.i.h.bf16 %v3479_v0  ;;  %v3480_v15 = vunpack.i.l.bf16 %v3479_v0  ;;  %3058 = vmatprep.subr.bf16.mxu1 %v5819_v34  ;;  %v193_v0 = vld [vmem:[%s4283_s14 + $0x48] sm:$0xff]  ;;  %v5896_v1 = vld [vmem:[#allocation61_spill] sm:$0xff] }
 0x11c   : > { %3773 = vrot.lane.b32.xlu1 %v3772_v24, %s3979_s17  ;;  %3768 = vrot.lane.b32.xlu0 %v3767_v18, %s3977_s15  ;;  %v3494_v30 = vpop.permute.xlu1 %3493  ;;  %v279_v32 = vld [vmem:[%s4283_s14 + $0xea] sm:$0xff]  ;;  %v5897_v24 = vld [vmem:[#allocation62_spill] sm:$0xff] }
 0x11d   : > { %v4805_v10 = vsel %vm1389_vm2, %v1464_v9, %v3480_v15  ;;  %v4808_v26 = vsel %vm1389_vm2, %v1364_v6, %v3481_v21  ;;  %v411_v13 = vld [vmem:[%s4283_s14 + $0xee] sm:$0xff]  ;;  %v3059_v35 = vpack.c.bf16 %v5897_v24, %v5896_v1  ;;  %v3496_v18 = vunpack.i.h.bf16 %v3494_v30 }
 0x11e   : > { %v3495_v23 = vunpack.i.l.bf16 %v3494_v30  ;;  %v3489_v14 = vpop.permute.xlu0 %3488  ;;  %1803 = vmatprep.mubr.f32.mxu1 %v4805_v10  ;;  %2253 = vmatprep.mubr.f32.mxu0 %v4805_v10  ;;  %v3792_v21 = vpack.i.bf16 %v312_v22, %v444_v17  ;;  %v1432_v15 = vsel %vm1322_vm1, %v325_v5, %v3485_v27  ;;  %v1332_v9 = vsel %vm1322_vm1, %v193_v0, %v3486_v12  ;;  %v280_v30 = vld [vmem:[%s4283_s14 + $0xf2] sm:$0xff]  ;;  %v5898_v0 = vld [vmem:[#allocation63_spill] sm:$0xff] }
 0x11f   : > { %v3491_v31 = vunpack.i.h.bf16 %v3489_v14  ;;  %v3490_v3 = vunpack.i.l.bf16 %v3489_v14  ;;  %1804 = vmatmul.mubr.f32.gmra.mrb[16].mxu1 %v4808_v26  ;;  %2254 = vmatmul.mubr.f32.gmra.mrb[12].mxu0 %v4808_v26  ;;  %v3787_v6 = vpack.i.bf16 %v279_v32, %v411_v13  ;;  %v247_v22 = vld [vmem:[%s4283_s14 + $0xf1] sm:$0xff] }
 0x120   : > { %3783 = vrot.lane.b32.xlu1 %v3782_v19, %s3977_s15  ;;  %3778 = vrot.lane.b32.xlu0 %v3777_v16, %s3978_s16  ;;  %v3504_v14 = vpop.permute.xlu1 %3503  ;;  %v379_v27 = vld [vmem:[%s4283_s14 + $0xf5] sm:$0xff]  ;;  %v5899_v32 = vld [vmem:[#allocation64_spill] sm:$0xff] }
 0x121   : > { %v1365_v1 = vsel %vm40_vm0, %v1332_v9, %v3491_v31  ;;  %v1465_v24 = vsel %vm40_vm0, %v1432_v15, %v3490_v3  ;;  %3060 = vmatpush1.bf16.msra.mxu1 %v3059_v35  ;;  %v326_v16 = vld [vmem:[%s4283_s14 + $0x54] sm:$0xff]  ;;  %v3062_v13 = vpack.c.bf16 %v5899_v32, %v5898_v0  ;;  %v3506_v15 = vunpack.i.h.bf16 %v3504_v14 }
 0x122   : > { %v3499_v5 = vpop.permute.xlu0 %3498  ;;  %v4829_v12 = vsel %vm1389_vm2, %v1465_v24, %v3495_v23  ;;  %v4832_v19 = vsel %vm1389_vm2, %v1365_v1, %v3496_v18  ;;  %v194_v17 = vld [vmem:[%s4283_s14 + $0x50] sm:$0xff]  ;;  %3061 = vmatprep.subr.bf16.mxu1 %v5819_v34  ;;  %v248_v35 = vld [vmem:[%s4283_s14 + $0xf9] sm:$0xff]  ;;  %v3505_v18 = vunpack.i.l.bf16 %v3504_v14  ;;  %v3802_v9 = vpack.i.bf16 %v280_v30, %v412_v36 }
 0x123   : > { %v3501_v31 = vunpack.i.h.bf16 %v3499_v5  ;;  %v3500_v3 = vunpack.i.l.bf16 %v3499_v5  ;;  %1808 = vmatprep.mubr.f32.mxu1 %v4829_v12  ;;  %2258 = vmatprep.mubr.f32.mxu0 %v4829_v12  ;;  %v380_v23 = vld [vmem:[%s4283_s14 + $0xfd] sm:$0xff]  ;;  %v3797_v1 = vpack.i.bf16 %v247_v22, %v379_v27  ;;  %v313_v24 = vld [vmem:[%s4283_s14 + $0xf3] sm:$0xff] }
 0x124   : > { %3793 = vrot.lane.b32.xlu1 %v3792_v21, %s3978_s16  ;;  %3788 = vrot.lane.b32.xlu0 %v3787_v6, %s3979_s17  ;;  %v3514_v5 = vpop.permute.xlu1 %3513  ;;  %v327_v36 = vld [vmem:[%s4283_s14 + $0x5c] sm:$0xff]  ;;  %v3812_v30 = vpack.i.bf16 %v248_v35, %v380_v23  ;;  %v3807_v22 = vpack.i.bf16 %v313_v24, %v445_v37 }
 0x125   : > { %1809 = vmatmul.mubr.f32.gmra.mrb[18].mxu1 %v4832_v19  ;;  %2259 = vmatmul.mubr.f32.gmra.mrb[14].mxu0 %v4832_v19  ;;  %v1433_v0 = vsel %vm1322_vm1, %v326_v16, %v3500_v3  ;;  %v1333_v32 = vsel %vm1322_vm1, %v194_v17, %v3501_v31  ;;  %v3516_v27 = vunpack.i.h.bf16 %v3514_v5  ;;  %v3515_v38 = vunpack.i.l.bf16 %v3514_v5  ;;  %v446_v31 = vld [vmem:[%s4283_s14 + $0xff] sm:$0xff]  ;;  %v5900_v5 = vld [vmem:[#allocation65_spill] sm:$0xff] }
 0x126   : > { %v3509_v14 = vpop.permute.xlu0 %3508  ;;  %3063 = vmatpush1.bf16.msra.mxu1 %v3062_v13  ;;  %v1466_v16 = vsel %vm40_vm0, %v1433_v0, %v3505_v18  ;;  %v1366_v17 = vsel %vm40_vm0, %v1333_v32, %v3506_v15  ;;  %v314_v13 = vld [vmem:[%s4283_s14 + $0xfb] sm:$0xff] }
 0x127   : > { %v3511_v21 = vunpack.i.h.bf16 %v3509_v14  ;;  %v3510_v6 = vunpack.i.l.bf16 %v3509_v14  ;;  %3064 = vmatprep.subr.bf16.mxu1 %v5819_v34  ;;  %v195_v14 = vld [vmem:[%s4283_s14 + $0x58] sm:$0xff] }
 0x128   : > { %3803 = vrot.lane.b32.xlu1 %v3802_v9, %s3979_s17  ;;  %3798 = vrot.lane.b32.xlu0 %v3797_v1, %s3977_s15  ;;  %v3524_v3 = vpop.permute.xlu1 %3523  ;;  %v281_v23 = vld [vmem:[%s4283_s14 + $0xfa] sm:$0xff] }
 0x129   : > { %v4861_v35 = vsel %vm1389_vm2, %v1466_v16, %v3510_v6  ;;  %v4864_v37 = vsel %vm1389_vm2, %v1366_v17, %v3511_v21  ;;  %v413_v24 = vld [vmem:[%s4283_s14 + $0xfe] sm:$0xff]  ;;  %v3526_v1 = vunpack.i.h.bf16 %v3524_v3  ;;  %v3525_v18 = vunpack.i.l.bf16 %v3524_v3 }
 0x12a   : > { %v5901_v9 = vld [vmem:[#allocation66_spill] sm:$0xff]  ;;  %v3519_v0 = vpop.permute.xlu0 %3518  ;;  %1813 = vmatprep.mubr.f32.mxu1 %v4861_v35  ;;  %2263 = vmatprep.mubr.f32.mxu0 %v4861_v35  ;;  %v3822_v21 = vpack.i.bf16 %v314_v13, %v446_v31  ;;  %v1434_v6 = vsel %vm1322_vm1, %v327_v36, %v3515_v38  ;;  %v1334_v16 = vsel %vm1322_vm1, %v195_v14, %v3516_v27  ;;  %v452_v3 = vld [vmem:[%s4283_s14 + $0x102] sm:$0xff] }
 0x12b   : > { %v3065_v39 = vpack.c.bf16 %v5901_v9, %v5900_v5  ;;  %v3521_v15 = vunpack.i.h.bf16 %v3519_v0  ;;  %v3520_v32 = vunpack.i.l.bf16 %v3519_v0  ;;  %1814 = vmatmul.mubr.f32.gmra.mrb[20].mxu1 %v4864_v37  ;;  %2264 = vmatmul.mubr.f32.gmra.mrb[16].mxu0 %v4864_v37  ;;  %v3817_v17 = vpack.i.bf16 %v281_v23, %v413_v24  ;;  %v450_v13 = vld [vmem:[%s4283_s14 + $0x101] sm:$0xff]  ;;  %v5903_v23 = vld [vmem:[#allocation68_spill] sm:$0xff] }
 0x12c   : > { %3813 = vrot.lane.b32.xlu1 %v3812_v30, %s3977_s15  ;;  %3808 = vrot.lane.b32.xlu0 %v3807_v22, %s3978_s16  ;;  %v3534_v0 = vpop.permute.xlu1 %3533  ;;  %v458_v38 = vld [vmem:[%s4283_s14 + $0x105] sm:$0xff] }
 0x12d   : > { %v1367_v5 = vsel %vm40_vm0, %v1334_v16, %v3521_v15  ;;  %v1467_v9 = vsel %vm40_vm0, %v1434_v6, %v3520_v32  ;;  %3066 = vmatpush1.bf16.msra.mxu1 %v3065_v39  ;;  %v328_v22 = vld [vmem:[%s4283_s14 + $0x64] sm:$0xff]  ;;  %v3536_v6 = vunpack.i.h.bf16 %v3534_v0  ;;  %v3832_v16 = vpack.i.bf16 %v452_v3, %v460_v40  ;;  %v329_v40 = vld [vmem:[%s4283_s14 + $0x6c] sm:$0xff] }
 0x12e   : > { %v3529_v36 = vpop.permute.xlu0 %3528  ;;  %v4885_v27 = vsel %vm1389_vm2, %v1467_v9, %v3525_v18  ;;  %v4888_v30 = vsel %vm1389_vm2, %v1367_v5, %v3526_v1  ;;  %v196_v31 = vld [vmem:[%s4283_s14 + $0x60] sm:$0xff]  ;;  %3067 = vmatprep.subr.bf16.mxu1 %v5819_v34  ;;  %v466_v39 = vld [vmem:[%s4283_s14 + $0x109] sm:$0xff]  ;;  %v3535_v1 = vunpack.i.l.bf16 %v3534_v0  ;;  %v3827_v5 = vpack.i.bf16 %v450_v13, %v458_v38 }
 0x12f   : > { %v5902_v14 = vld [vmem:[#allocation67_spill] sm:$0xff]  ;;  %v3531_v15 = vunpack.i.h.bf16 %v3529_v36  ;;  %v3530_v32 = vunpack.i.l.bf16 %v3529_v36  ;;  %1818 = vmatprep.mubr.f32.mxu1 %v4885_v27  ;;  %2268 = vmatprep.mubr.f32.mxu0 %v4885_v27  ;;  %v474_v18 = vld [vmem:[%s4283_s14 + $0x10d] sm:$0xff] }
 0x130   : > { %v3068_v24 = vpack.c.bf16 %v5903_v23, %v5902_v14  ;;  %3823 = vrot.lane.b32.xlu1 %v3822_v21, %s3978_s16  ;;  %3818 = vrot.lane.b32.xlu0 %v3817_v17, %s3979_s17  ;;  %v454_v9 = vld [vmem:[%s4283_s14 + $0x103] sm:$0xff]  ;;  %v3544_v36 = vpop.permute.xlu1 %3543  ;;  %v3842_v3 = vpack.i.bf16 %v466_v39, %v474_v18 }
 0x131   : > { %1819 = vmatmul.mubr.f32.gmra.mrb[22].mxu1 %v4888_v30  ;;  %2269 = vmatmul.mubr.f32.gmra.mrb[18].mxu0 %v4888_v30  ;;  %v1435_v14 = vsel %vm1322_vm1, %v328_v22, %v3530_v32  ;;  %v1335_v23 = vsel %vm1322_vm1, %v196_v31, %v3531_v15  ;;  %v3837_v13 = vpack.i.bf16 %v454_v9, %v462_v41  ;;  %v3546_v38 = vunpack.i.h.bf16 %v3544_v36  ;;  %v381_v15 = vld [vmem:[%s4283_s14 + $0x105] sm:$0x3f]  ;;  %v476_v9 = vld [vmem:[%s4283_s14 + $0x10e] sm:$0xff] }
 0x132   : > { %v3539_v0 = vpop.permute.xlu0 %3538  ;;  %3069 = vmatpush1.bf16.msra.mxu1 %v3068_v24  ;;  %v3545_v42 = vunpack.i.l.bf16 %v3544_v36  ;;  %v1468_v22 = vsel %vm40_vm0, %v1435_v14, %v3535_v1  ;;  %v1368_v31 = vsel %vm40_vm0, %v1335_v23, %v3536_v6  ;;  %v249_v24 = vld [vmem:[%s4283_s14 + $0x101] sm:$0x3f]  ;;  %v468_v18 = vld [vmem:[%s4283_s14 + $0x10a] sm:$0xff]  ;;  %v5904_v36 = vld [vmem:[#allocation69_spill] sm:$0xff] }
 0x133   : > { %v3541_v21 = vunpack.i.h.bf16 %v3539_v0  ;;  %v3540_v17 = vunpack.i.l.bf16 %v3539_v0  ;;  %3070 = vmatprep.subr.bf16.mxu1 %v5819_v34  ;;  %v197_v0 = vld [vmem:[%s4283_s14 + $0x68] sm:$0xff] }
 0x134   : > { %3833 = vrot.lane.b32.xlu1 %v3832_v16, %s3979_s17  ;;  %3828 = vrot.lane.b32.xlu0 %v3827_v5, %s3977_s15  ;;  %v3554_v32 = vpop.permute.xlu1 %3553  ;;  %v5905_v16 = vld [vmem:[#allocation70_spill] sm:$0xff] }
 0x135   : > { %v4917_v39 = vsel %vm1389_vm2, %v1468_v22, %v3540_v17  ;;  %v4920_v41 = vsel %vm1389_vm2, %v1368_v31, %v3541_v21  ;;  %v3071_v43 = vpack.c.bf16 %v5905_v16, %v5904_v36  ;;  %v3556_v5 = vunpack.i.h.bf16 %v3554_v32 }
 0x136   : > { %v3555_v1 = vunpack.i.l.bf16 %v3554_v32  ;;  %v3549_v14 = vpop.permute.xlu0 %3548  ;;  %1823 = vmatprep.mubr.f32.mxu1 %v4917_v39  ;;  %2273 = vmatprep.mubr.f32.mxu0 %v4917_v39  ;;  %v3852_v21 = vpack.i.bf16 %v249_v24, %v381_v15  ;;  %v1436_v17 = vsel %vm1322_vm1, %v329_v40, %v3545_v42  ;;  %v1336_v22 = vsel %vm1322_vm1, %v197_v0, %v3546_v38  ;;  %v282_v32 = vld [vmem:[%s4283_s14 + $0x102] sm:$0x3f]  ;;  %v470_v15 = vld [vmem:[%s4283_s14 + $0x10b] sm:$0xff] }
 0x137   : > { %v3551_v6 = vunpack.i.h.bf16 %v3549_v14  ;;  %v3550_v23 = vunpack.i.l.bf16 %v3549_v14  ;;  %1824 = vmatmul.mubr.f32.gmra.mrb[24].mxu1 %v4920_v41  ;;  %2274 = vmatmul.mubr.f32.gmra.mrb[20].mxu0 %v4920_v41  ;;  %v3847_v31 = vpack.i.bf16 %v468_v18, %v476_v9  ;;  %v414_v24 = vld [vmem:[%s4283_s14 + $0x106] sm:$0x3f]  ;;  %v478_v42 = vld [vmem:[%s4283_s14 + $0x10f] sm:$0xff] }
 0x138   : > { %3843 = vrot.lane.b32.xlu1 %v3842_v3, %s3977_s15  ;;  %3838 = vrot.lane.b32.xlu0 %v3837_v13, %s3978_s16  ;;  %v3564_v14 = vpop.permute.xlu1 %3563  ;;  %v330_v13 = vld [vmem:[%s4283_s14 + $0x74] sm:$0xff] }
 0x139   : > { %v1369_v36 = vsel %vm40_vm0, %v1336_v22, %v3551_v6  ;;  %v1469_v16 = vsel %vm40_vm0, %v1436_v17, %v3550_v23  ;;  %3072 = vmatpush1.bf16.msra.mxu1 %v3071_v43  ;;  %v198_v0 = vld [vmem:[%s4283_s14 + $0x70] sm:$0xff]  ;;  %v315_v43 = vld [vmem:[%s4283_s14 + $0x103] sm:$0x3f]  ;;  %v3566_v22 = vunpack.i.h.bf16 %v3564_v14 }
 0x13a   : > { %v3559_v40 = vpop.permute.xlu0 %3558  ;;  %v4941_v38 = vsel %vm1389_vm2, %v1469_v16, %v3555_v1  ;;  %v4944_v3 = vsel %vm1389_vm2, %v1369_v36, %v3556_v5  ;;  %3073 = vmatprep.subr.bf16.mxu1 %v5819_v34  ;;  %v447_v6 = vld [vmem:[%s4283_s14 + $0x107] sm:$0x3f]  ;;  %v3565_v5 = vunpack.i.l.bf16 %v3564_v14  ;;  %v3862_v36 = vpack.i.bf16 %v282_v32, %v414_v24  ;;  %v467_v34 = vld [vmem:[%s4283_s14 + $0x111] sm:$0x3f] }
 0x13b   : > { %v3561_v18 = vunpack.i.h.bf16 %v3559_v40  ;;  %v3560_v9 = vunpack.i.l.bf16 %v3559_v40  ;;  %1828 = vmatprep.mubr.f32.mxu1 %v4941_v38  ;;  %2278 = vmatprep.mubr.f32.mxu0 %v4941_v38  ;;  %v5906_v23 = vld [vmem:[#allocation71_spill] sm:$0xff]  ;;  %v5907_v1 = vld [vmem:[#allocation72_spill] sm:$0xff]  ;;  %v3857_v16 = vpack.i.bf16 %v470_v15, %v478_v42  ;;  %v3867_v32 = vpack.i.bf16 %v315_v43, %v447_v6  ;;  %v469_v43 = vld [vmem:[%s4283_s14 + $0x112] sm:$0x3f] }
 0x13c   : > { %v3074_v17 = vpack.c.bf16 %v5907_v1, %v5906_v23  ;;  %3853 = vrot.lane.b32.xlu1 %v3852_v21, %s3977_s15  ;;  %3848 = vrot.lane.b32.xlu0 %v3847_v31, %s3979_s17  ;;  %v3574_v40 = vpop.permute.xlu1 %3573  ;;  %v3872_v24 = vpack.i.bf16 %v467_v34, %v475_v44  ;;  %v199_v1 = vld [vmem:[%s4283_s14 + $0x78] sm:$0xff] }
 0x13d   : > { %1829 = vmatmul.mubr.f32.gmra.mrb[26].mxu1 %v4944_v3  ;;  %2279 = vmatmul.mubr.f32.gmra.mrb[22].mxu0 %v4944_v3  ;;  %v1437_v45 = vsel %vm1322_vm1, %v330_v13, %v3560_v9  ;;  %v1337_v23 = vsel %vm1322_vm1, %v198_v0, %v3561_v18  ;;  %v3576_v15 = vunpack.i.h.bf16 %v3574_v40  ;;  %v3575_v42 = vunpack.i.l.bf16 %v3574_v40  ;;  %v331_v13 = vld [vmem:[%s4283_s14 + $0x7c] sm:$0xff]  ;;  %v477_v6 = vld [vmem:[%s4283_s14 + $0x116] sm:$0x3f] }
 0x13e   : > { %v3569_v14 = vpop.permute.xlu0 %3568  ;;  %3075 = vmatpush1.bf16.msra.mxu1 %v3074_v17  ;;  %v1470_v9 = vsel %vm40_vm0, %v1437_v45, %v3565_v5  ;;  %v1370_v0 = vsel %vm40_vm0, %v1337_v23, %v3566_v22  ;;  %v471_v45 = vld [vmem:[%s4283_s14 + $0x113] sm:$0x3f] }
 0x13f   : > { %v3571_v21 = vunpack.i.h.bf16 %v3569_v14  ;;  %v3570_v31 = vunpack.i.l.bf16 %v3569_v14  ;;  %v479_v22 = vld [vmem:[%s4283_s14 + $0x117] sm:$0x3f]  ;;  %v1438_v23 = vsel %vm1322_vm1, %v331_v13, %v3575_v42  ;;  %v1338_v14 = vsel %vm1322_vm1, %v199_v1, %v3576_v15  ;;  %v453_v13 = vld [vmem:[%s4283_s14 + $0x10a] sm:$0x3f] }
 0x140   : > { %3863 = vrot.lane.b32.xlu1 %v3862_v36, %s3979_s17  ;;  %3858 = vrot.lane.b32.xlu0 %v3857_v16, %s3978_s16  ;;  %v3584_v18 = vpop.permute.xlu1 %3583  ;;  %v461_v1 = vld [vmem:[%s4283_s14 + $0x10e] sm:$0x3f] }
 0x141   : > { %v4970_v17 = vsel %vm1389_vm2, %v1470_v9, %v3570_v31  ;;  %v4973_v44 = vsel %vm1389_vm2, %v1370_v0, %v3571_v21  ;;  %v3586_v36 = vunpack.i.h.bf16 %v3584_v18  ;;  %v3585_v34 = vunpack.i.l.bf16 %v3584_v18 }
 0x142   : > { %v3579_v40 = vpop.permute.xlu0 %3578  ;;  %1833 = vmatprep.mubr.f32.mxu1 %v4970_v17  ;;  %2283 = vmatprep.mubr.f32.mxu0 %v4970_v17  ;;  %v3877_v21 = vpack.i.bf16 %v469_v43, %v477_v6  ;;  %v3882_v18 = vpack.i.bf16 %v471_v45, %v479_v22 }
 0x143   : > { %v3581_v5 = vunpack.i.h.bf16 %v3579_v40  ;;  %v3580_v16 = vunpack.i.l.bf16 %v3579_v40  ;;  %1834 = vmatmul.mubr.f32.gmra.mrb[28].mxu1 %v4973_v44  ;;  %2284 = vmatmul.mubr.f32.gmra.mrb[24].mxu0 %v4973_v44  ;;  %v332_v40 = vld [vmem:[%s4283_s14 + $0x84] sm:$0xff] }
 0x144   : > { %3868 = vrot.lane.b32.xlu0 %v3867_v32, %s3978_s16  ;;  %3873 = vrot.lane.b32.xlu1 %v3872_v24, %s3977_s15  ;;  %v3594_v0 = vpop.permute.xlu1 %3593  ;;  %v4999_v24 = vld [vmem:[%s4283_s14 + $0x80] sm:$0xff] }
 0x145   : > { %v1371_v31 = vsel %vm40_vm0, %v1338_v14, %v3581_v5  ;;  %v1471_v9 = vsel %vm40_vm0, %v1438_v23, %v3580_v16  ;;  %v3596_v45 = vunpack.i.h.bf16 %v3594_v0  ;;  %v3595_v22 = vunpack.i.l.bf16 %v3594_v0  ;;  %v455_v5 = vld [vmem:[%s4283_s14 + $0x10b] sm:$0x3f] }
 0x146   : > { %v3589_v42 = vpop.permute.xlu0 %3588  ;;  %v4993_v15 = vsel %vm1389_vm2, %v1471_v9, %v3585_v34  ;;  %v4996_v32 = vsel %vm1389_vm2, %v1371_v31, %v3586_v36  ;;  %v3887_v34 = vpack.i.bf16 %v451_v46, %v459_v47  ;;  %v463_v36 = vld [vmem:[%s4283_s14 + $0x10f] sm:$0x3f]  ;;  %v3892_v31 = vpack.i.bf16 %v453_v13, %v461_v1 }
 0x147   : > { %v3591_v43 = vunpack.i.h.bf16 %v3589_v42  ;;  %v3590_v6 = vunpack.i.l.bf16 %v3589_v42  ;;  %1838 = vmatprep.mubr.f32.mxu1 %v4993_v15  ;;  %2288 = vmatprep.mubr.f32.mxu0 %v4993_v15  ;;  %v3897_v42 = vpack.i.bf16 %v455_v5, %v463_v36 }
 0x148   : > { %3878 = vrot.lane.b32.xlu0 %v3877_v21, %s3979_s17  ;;  %1839 = vmatmul.mubr.f32.gmra.mrb[30].mxu1 %v4996_v32  ;;  %v3604_v16 = vpop.permute.xlu1 %3603 }
 0x149   : > { %2289 = vmatmul.mubr.f32.gmra.mrb[26].mxu0 %v4996_v32  ;;  %3883 = vrot.lane.b32.xlu1 %v3882_v18, %s3978_s16  ;;  %v1439_v23 = vsel %vm1322_vm1, %v332_v40, %v3590_v6  ;;  %v1339_v14 = vsel %vm1322_vm1, %v4999_v24, %v3591_v43  ;;  %v3606_v46 = vunpack.i.h.bf16 %v3604_v16  ;;  %v3605_v47 = vunpack.i.l.bf16 %v3604_v16 }
 0x14a   : > { %v3599_v9 = vpop.permute.xlu0 %3598  ;;  %v1472_v48 = vsel %vm40_vm0, %v1439_v23, %v3595_v22  ;;  %v1372_v49 = vsel %vm40_vm0, %v1339_v14, %v3596_v45 }
 0x14b   : > { %v3601_v21 = vunpack.i.h.bf16 %v3599_v9  ;;  %v3600_v0 = vunpack.i.l.bf16 %v3599_v9  ;;  %v5046_v9 = vld [vmem:[%s4283_s14 + $0x90] sm:$0xff] }
 0x14c   : > { %3888 = vrot.lane.b32.xlu0 %v3887_v34, %s3977_s15  ;;  %v3614_v18 = vpop.permute.xlu1 %3613 }
 0x14d   : > { %v5022_v40 = vsel %vm1389_vm2, %v1472_v48, %v3600_v0  ;;  %v5025_v13 = vsel %vm1389_vm2, %v1372_v49, %v3601_v21  ;;  %3893 = vrot.lane.b32.xlu1 %v3892_v31, %s3979_s17  ;;  %v3616_v1 = vunpack.i.h.bf16 %v3614_v18  ;;  %v3615_v43 = vunpack.i.l.bf16 %v3614_v18  ;;  %v334_v31 = vld [vmem:[%s4283_s14 + $0x94] sm:$0xff] }
 0x14e   : > { %v3609_v6 = vpop.permute.xlu0 %3608  ;;  %1843 = vmatprep.mubr.f32.mxu1 %v5022_v40  ;;  %2293 = vmatprep.mubr.f32.mxu0 %v5022_v40  ;;  %v1440_v48 = vsel %vm1322_vm1, %v333_v50, %v3605_v47  ;;  %v1340_v49 = vsel %vm1322_vm1, %v5019_v51, %v3606_v46 }
 0x14f   : > { %v3611_v45 = vunpack.i.h.bf16 %v3609_v6  ;;  %v3610_v22 = vunpack.i.l.bf16 %v3609_v6  ;;  %1844 = vmatmul.mubr.f32.gmra.mrb[32].mxu1 %v5025_v13  ;;  %2294 = vmatmul.mubr.f32.gmra.mrb[28].mxu0 %v5025_v13 }
 0x150   : > { %3898 = vrot.lane.b32.xlu0 %v3897_v42, %s3978_s16  ;;  %v3624_v36 = vpop.permute.xlu1 %3623 }
 0x151   : > { %v1373_v34 = vsel %vm40_vm0, %v1340_v49, %v3611_v45  ;;  %v1473_v5 = vsel %vm40_vm0, %v1440_v48, %v3610_v22  ;;  %v3626_v0 = vunpack.i.h.bf16 %v3624_v36  ;;  %v3625_v42 = vunpack.i.l.bf16 %v3624_v36  ;;  %v5059_v36 = vld [vmem:[%s4283_s14 + $0x98] sm:$0xff] }
 0x152   : > { %v3619_v16 = vpop.permute.xlu0 %3618  ;;  %v5039_v23 = vsel %vm1389_vm2, %v1473_v5, %v3615_v43  ;;  %v5042_v14 = vsel %vm1389_vm2, %v1373_v34, %v3616_v1  ;;  %v335_v5 = vld [vmem:[%s4283_s14 + $0x9c] sm:$0xff] }
 0x153   : > { %v3621_v50 = vunpack.i.h.bf16 %v3619_v16  ;;  %v3620_v21 = vunpack.i.l.bf16 %v3619_v16  ;;  %1848 = vmatprep.mubr.f32.mxu1 %v5039_v23  ;;  %2298 = vmatprep.mubr.f32.mxu0 %v5039_v23 }
 0x154   : > { %1849 = vmatmul.mubr.f32.gmra.mrb[34].mxu1 %v5042_v14  ;;  %2299 = vmatmul.mubr.f32.gmra.mrb[30].mxu0 %v5042_v14  ;;  %v3634_v46 = vpop.permute.xlu1 %3633 }
 0x155   : > { %v1441_v47 = vsel %vm1322_vm1, %v334_v31, %v3620_v21  ;;  %v1341_v18 = vsel %vm1322_vm1, %v5046_v9, %v3621_v50  ;;  %v3636_v45 = vunpack.i.h.bf16 %v3634_v46  ;;  %v3635_v22 = vunpack.i.l.bf16 %v3634_v46 }
 0x156   : > { %v3629_v1 = vpop.permute.xlu0 %3628  ;;  %v1474_v48 = vsel %vm40_vm0, %v1441_v47, %v3625_v42  ;;  %v1374_v49 = vsel %vm40_vm0, %v1341_v18, %v3626_v0 }
 0x157   : > { %v3631_v43 = vunpack.i.h.bf16 %v3629_v1  ;;  %v3630_v6 = vunpack.i.l.bf16 %v3629_v1  ;;  %v1442_v46 = vsel %vm1322_vm1, %v335_v5, %v3635_v22  ;;  %v1342_v47 = vsel %vm1322_vm1, %v5059_v36, %v3636_v45 }
 0x158   : > { %v3644_v34 = vpop.permute.xlu1 %3643 }
 0x159   : > { %v5062_v16 = vsel %vm1389_vm2, %v1474_v48, %v3630_v6  ;;  %v5065_v31 = vsel %vm1389_vm2, %v1374_v49, %v3631_v43  ;;  %v3646_v50 = vunpack.i.h.bf16 %v3644_v34  ;;  %v3645_v21 = vunpack.i.l.bf16 %v3644_v34 }
 0x15a   : > { %v3639_v1 = vpop.permute.xlu0 %3638  ;;  %1853 = vmatprep.mubr.f32.mxu1 %v5062_v16  ;;  %2303 = vmatprep.mubr.f32.mxu0 %v5062_v16 }
 0x15b   : > { %v3641_v0 = vunpack.i.h.bf16 %v3639_v1  ;;  %v3640_v42 = vunpack.i.l.bf16 %v3639_v1  ;;  %1854 = vmatmul.mubr.f32.gmra.mrb[36].mxu1 %v5065_v31  ;;  %2304 = vmatmul.mubr.f32.gmra.mrb[32].mxu0 %v5065_v31  ;;  %v336_v1 = vld [vmem:[%s4283_s14 + $0xa4] sm:$0xff] }
 0x15c   : > { %v3654_v6 = vpop.permute.xlu1 %3653 }
 0x15d   : > { %v1375_v18 = vsel %vm40_vm0, %v1342_v47, %v3641_v0  ;;  %v1475_v43 = vsel %vm40_vm0, %v1442_v46, %v3640_v42  ;;  %v3656_v45 = vunpack.i.h.bf16 %v3654_v6  ;;  %v3655_v5 = vunpack.i.l.bf16 %v3654_v6 }
 0x15e   : > { %v3649_v48 = vpop.permute.xlu0 %3648  ;;  %v5077_v49 = vsel %vm1389_vm2, %v1475_v43, %v3645_v21  ;;  %v5080_v34 = vsel %vm1389_vm2, %v1375_v18, %v3646_v50 }
 0x15f   : > { %5908 = vst [vmem:[#allocation110_spill] sm:$0xff] %v5080_v34  ;;  %v3651_v53 = vunpack.i.h.bf16 %v3649_v48  ;;  %v3650_v22 = vunpack.i.l.bf16 %v3649_v48  ;;  %1858 = vmatprep.mubr.f32.mxu1 %v5077_v49  ;;  %2308 = vmatprep.mubr.f32.mxu0 %v5077_v49 }
 0x160   : > { %1859 = vmatmul.mubr.f32.gmra.mrb[38].mxu1 %v5080_v34  ;;  %2309 = vmatmul.mubr.f32.gmra.mrb[34].mxu0 %v5080_v34  ;;  %v3664_v21 = vpop.permute.xlu1 %3663  ;;  %v465_v34 = vld [vmem:[%s4283_s14 + $0x110] sm:$0x3f] }
 0x161   : > { %v1443_v50 = vsel %vm1322_vm1, %v336_v1, %v3650_v22  ;;  %v1343_v0 = vsel %vm1322_vm1, %v5084_v52, %v3651_v53  ;;  %v3666_v18 = vunpack.i.h.bf16 %v3664_v21  ;;  %v3665_v43 = vunpack.i.l.bf16 %v3664_v21 }
 0x162   : > { %v3659_v42 = vpop.permute.xlu0 %3658  ;;  %v1476_v48 = vsel %vm40_vm0, %v1443_v50, %v3655_v5  ;;  %v1376_v58 = vsel %vm40_vm0, %v1343_v0, %v3656_v45 }
 0x163   : > { %v3661_v46 = vunpack.i.h.bf16 %v3659_v42  ;;  %v3660_v47 = vunpack.i.l.bf16 %v3659_v42  ;;  %v1444_v21 = vsel %vm1322_vm1, %v337_v59, %v3665_v43 }
 0x164   : > { %v3674_v6 = vpop.permute.xlu1 %3673 }
 0x165   : > { %v5100_v61 = vsel %vm1389_vm2, %v1476_v48, %v3660_v47  ;;  %v5103_v1 = vsel %vm1389_vm2, %v1376_v58, %v3661_v46  ;;  %v3676_v53 = vunpack.i.h.bf16 %v3674_v6  ;;  %v3675_v22 = vunpack.i.l.bf16 %v3674_v6 }
 0x166   : > { %5911 = vst [vmem:[#allocation113_spill] sm:$0xff] %v5100_v61  ;;  %5912 = vst [vmem:[#allocation114_spill] sm:$0xff] %v5103_v1  ;;  %v3669_v42 = vpop.permute.xlu0 %3668  ;;  %1863 = vmatprep.mubr.f32.mxu1 %v5100_v61  ;;  %2313 = vmatprep.mubr.f32.mxu0 %v5100_v61  ;;  %v1344_v58 = vsel %vm1322_vm1, %v5097_v60, %v3666_v18 }
 0x167   : > { %v3671_v45 = vunpack.i.h.bf16 %v3669_v42  ;;  %v3670_v5 = vunpack.i.l.bf16 %v3669_v42  ;;  %1864 = vmatmul.mubr.f32.gmra.mrb[40].mxu1 %v5103_v1  ;;  %2314 = vmatmul.mubr.f32.gmra.mrb[36].mxu0 %v5103_v1  ;;  %v338_v42 = vld [vmem:[%s4283_s14 + $0xb4] sm:$0xff] }
 0x168   : > { %v5135_v1 = vld [vmem:[%s4283_s14 + $0xb8] sm:$0xff] }
 0x169   : > { %v1377_v50 = vsel %vm40_vm0, %v1344_v58, %v3671_v45  ;;  %v1477_v0 = vsel %vm40_vm0, %v1444_v21, %v3670_v5  ;;  %v3684_v46 = vpop.permute.xlu1 %3683  ;;  %5916 = vst [vmem:[#allocation118_spill] sm:$0xff] %v5135_v1 }
 0x16a   : > { %v3679_v47 = vpop.permute.xlu0 %3678  ;;  %v5115_v48 = vsel %vm1389_vm2, %v1477_v0, %v3675_v22  ;;  %v5118_v6 = vsel %vm1389_vm2, %v1377_v50, %v3676_v53  ;;  %v3686_v18 = vunpack.i.h.bf16 %v3684_v46  ;;  %v3685_v43 = vunpack.i.l.bf16 %v3684_v46 }
 0x16b   : > { %5913 = vst [vmem:[#allocation115_spill] sm:$0xff] %v5115_v48  ;;  %5914 = vst [vmem:[#allocation116_spill] sm:$0xff] %v5118_v6  ;;  %v3681_v63 = vunpack.i.h.bf16 %v3679_v47  ;;  %v3680_v59 = vunpack.i.l.bf16 %v3679_v47  ;;  %1868 = vmatprep.mubr.f32.mxu1 %v5115_v48  ;;  %2318 = vmatprep.mubr.f32.mxu0 %v5115_v48  ;;  %v339_v48 = vld [vmem:[%s4283_s14 + $0xbc] sm:$0xff] }
 0x16c   : > { %1869 = vmatmul.mubr.f32.gmra.mrb[42].mxu1 %v5118_v6  ;;  %2319 = vmatmul.mubr.f32.gmra.mrb[38].mxu0 %v5118_v6 }
 0x16d   : > { %v3694_v22 = vpop.permute.xlu1 %3693  ;;  %v1445_v53 = vsel %vm1322_vm1, %v338_v42, %v3680_v59  ;;  %v1345_v45 = vsel %vm1322_vm1, %v5122_v62, %v3681_v63  ;;  %v5160_v62 = vld [vmem:[%s4283_s14 + $0xc0] sm:$0xff] }
 0x16e   : > { %v3689_v5 = vpop.permute.xlu0 %3688  ;;  %v3696_v50 = vunpack.i.h.bf16 %v3694_v22  ;;  %v3695_v0 = vunpack.i.l.bf16 %v3694_v22  ;;  %v1478_v47 = vsel %vm40_vm0, %v1445_v53, %v3685_v43  ;;  %v1378_v60 = vsel %vm40_vm0, %v1345_v45, %v3686_v18  ;;  %5921 = vst [vmem:[#allocation123_spill] sm:$0xff] %v5160_v62 }
 0x16f   : > { %v3691_v21 = vunpack.i.h.bf16 %v3689_v5  ;;  %v3690_v58 = vunpack.i.l.bf16 %v3689_v5 }
 0x170   : > { %v1446_v22 = vsel %vm1322_vm1, %v339_v48, %v3695_v0 }
 0x171   : > { %v3704_v46 = vpop.permute.xlu1 %3703  ;;  %v5138_v6 = vsel %vm1389_vm2, %v1478_v47, %v3690_v58  ;;  %v5141_v42 = vsel %vm1389_vm2, %v1378_v60, %v3691_v21  ;;  %v1346_v60 = vsel %vm1322_vm1, %v5135_v1, %v3696_v50 }
 0x172   : > { %5917 = vst [vmem:[#allocation119_spill] sm:$0xff] %v5138_v6  ;;  %5918 = vst [vmem:[#allocation120_spill] sm:$0xff] %v5141_v42  ;;  %v3706_v63 = vunpack.i.h.bf16 %v3704_v46  ;;  %v3705_v59 = vunpack.i.l.bf16 %v3704_v46  ;;  %v3699_v5 = vpop.permute.xlu0 %3698  ;;  %1873 = vmatprep.mubr.f32.mxu1 %v5138_v6  ;;  %2323 = vmatprep.mubr.f32.mxu0 %v5138_v6  ;;  %v348_v6 = vld [vmem:[%s4283_s14 + $0x104] sm:$0x3f] }
 0x173   : > { %v3701_v18 = vunpack.i.h.bf16 %v3699_v5  ;;  %v3700_v43 = vunpack.i.l.bf16 %v3699_v5  ;;  %1874 = vmatmul.mubr.f32.gmra.mrb[44].mxu1 %v5141_v42  ;;  %2324 = vmatmul.mubr.f32.gmra.mrb[40].mxu0 %v5141_v42  ;;  %v340_v5 = vld [vmem:[%s4283_s14 + $0xc4] sm:$0xff] }
 0x175   : > { %v1379_v53 = vsel %vm40_vm0, %v1346_v60, %v3701_v18  ;;  %v1479_v45 = vsel %vm40_vm0, %v1446_v22, %v3700_v43  ;;  %v3714_v21 = vpop.permute.xlu1 %3713 }
 0x176   : > { %v3709_v58 = vpop.permute.xlu0 %3708  ;;  %v5153_v47 = vsel %vm1389_vm2, %v1479_v45, %v3705_v59  ;;  %v5156_v46 = vsel %vm1389_vm2, %v1379_v53, %v3706_v63  ;;  %v3716_v50 = vunpack.i.h.bf16 %v3714_v21  ;;  %v3715_v0 = vunpack.i.l.bf16 %v3714_v21  ;;  %v341_v21 = vld [vmem:[%s4283_s14 + $0xcc] sm:$0xff] }
 0x177   : > { %5919 = vst [vmem:[#allocation121_spill] sm:$0xff] %v5153_v47  ;;  %5920 = vst [vmem:[#allocation122_spill] sm:$0xff] %v5156_v46  ;;  %v3711_v42 = vunpack.i.h.bf16 %v3709_v58  ;;  %v3710_v48 = vunpack.i.l.bf16 %v3709_v58  ;;  %1878 = vmatprep.mubr.f32.mxu1 %v5153_v47  ;;  %2328 = vmatprep.mubr.f32.mxu0 %v5153_v47  ;;  %v5173_v47 = vld [vmem:[%s4283_s14 + $0xc8] sm:$0xff] }
 0x178   : > { %1879 = vmatmul.mubr.f32.gmra.mrb[46].mxu1 %v5156_v46  ;;  %2329 = vmatmul.mubr.f32.gmra.mrb[42].mxu0 %v5156_v46  ;;  %5922 = vst [vmem:[#allocation124_spill] sm:$0xff] %v5173_v47 }
 0x179   : > { %v1447_v63 = vsel %vm1322_vm1, %v340_v5, %v3710_v48  ;;  %v1347_v59 = vsel %vm1322_vm1, %v5160_v62, %v3711_v42 }
 0x17a   : > { %v3724_v18 = vpop.permute.xlu1 %3723  ;;  %v3719_v43 = vpop.permute.xlu0 %3718  ;;  %v1480_v58 = vsel %vm40_vm0, %v1447_v63, %v3715_v0  ;;  %v1380_v1 = vsel %vm40_vm0, %v1347_v59, %v3716_v50 }
 0x17b   : > { %v3721_v22 = vunpack.i.h.bf16 %v3719_v43  ;;  %v3720_v60 = vunpack.i.l.bf16 %v3719_v43  ;;  %v3726_v53 = vunpack.i.h.bf16 %v3724_v18  ;;  %v3725_v45 = vunpack.i.l.bf16 %v3724_v18 }
 0x17d   : > { %v5176_v46 = vsel %vm1389_vm2, %v1480_v58, %v3720_v60  ;;  %v5179_v5 = vsel %vm1389_vm2, %v1380_v1, %v3721_v22  ;;  %v1448_v18 = vsel %vm1322_vm1, %v341_v21, %v3725_v45  ;;  %v1348_v1 = vsel %vm1322_vm1, %v5173_v47, %v3726_v53 }
 0x17e   : > { %5923 = vst [vmem:[#allocation125_spill] sm:$0xff] %v5176_v46  ;;  %5924 = vst [vmem:[#allocation126_spill] sm:$0xff] %v5179_v5  ;;  %v3734_v42 = vpop.permute.xlu1 %3733  ;;  %v3729_v48 = vpop.permute.xlu0 %3728  ;;  %1883 = vmatprep.mubr.f32.mxu1 %v5176_v46  ;;  %2333 = vmatprep.mubr.f32.mxu0 %v5176_v46  ;;  %v5198_v46 = vld [vmem:[%s4283_s14 + $0xd0] sm:$0xff] }
 0x17f   : > { %v3736_v0 = vunpack.i.h.bf16 %v3734_v42  ;;  %v3735_v63 = vunpack.i.l.bf16 %v3734_v42  ;;  %v3731_v50 = vunpack.i.h.bf16 %v3729_v48  ;;  %v3730_v59 = vunpack.i.l.bf16 %v3729_v48  ;;  %1884 = vmatmul.mubr.f32.gmra.mrb[48].mxu1 %v5179_v5  ;;  %2334 = vmatmul.mubr.f32.gmra.mrb[44].mxu0 %v5179_v5  ;;  %v342_v48 = vld [vmem:[%s4283_s14 + $0xd4] sm:$0xff]  ;;  %5927 = vst [vmem:[#allocation129_spill] sm:$0xff] %v5198_v46 }
 0x181   : > { %v1381_v43 = vsel %vm40_vm0, %v1348_v1, %v3731_v50  ;;  %v1481_v22 = vsel %vm40_vm0, %v1448_v18, %v3730_v59 }
 0x182   : > { %v3744_v60 = vpop.permute.xlu1 %3743  ;;  %v3739_v58 = vpop.permute.xlu0 %3738  ;;  %v5191_v62 = vsel %vm1389_vm2, %v1481_v22, %v3735_v63  ;;  %v5194_v42 = vsel %vm1389_vm2, %v1381_v43, %v3736_v0 }
 0x183   : > { %5925 = vst [vmem:[#allocation127_spill] sm:$0xff] %v5191_v62  ;;  %5926 = vst [vmem:[#allocation128_spill] sm:$0xff] %v5194_v42  ;;  %v3741_v5 = vunpack.i.h.bf16 %v3739_v58  ;;  %v3740_v45 = vunpack.i.l.bf16 %v3739_v58  ;;  %1888 = vmatprep.mubr.f32.mxu1 %v5191_v62  ;;  %2338 = vmatprep.mubr.f32.mxu0 %v5191_v62  ;;  %v3746_v53 = vunpack.i.h.bf16 %v3744_v60  ;;  %v3745_v21 = vunpack.i.l.bf16 %v3744_v60  ;;  %v343_v60 = vld [vmem:[%s4283_s14 + $0xdc] sm:$0xff] }
 0x184   : > { %1889 = vmatmul.mubr.f32.gmra.mrb[50].mxu1 %v5194_v42  ;;  %2339 = vmatmul.mubr.f32.gmra.mrb[46].mxu0 %v5194_v42  ;;  %v5211_v62 = vld [vmem:[%s4283_s14 + $0xd8] sm:$0xff] }
 0x185   : > { %v1449_v0 = vsel %vm1322_vm1, %v342_v48, %v3740_v45  ;;  %v1349_v63 = vsel %vm1322_vm1, %v5198_v46, %v3741_v5  ;;  %5928 = vst [vmem:[#allocation130_spill] sm:$0xff] %v5211_v62 }
 0x186   : > { %v3754_v50 = vpop.permute.xlu1 %3753  ;;  %v3749_v59 = vpop.permute.xlu0 %3748  ;;  %v1482_v58 = vsel %vm40_vm0, %v1449_v0, %v3745_v21  ;;  %v1382_v47 = vsel %vm40_vm0, %v1349_v63, %v3746_v53 }
 0x187   : > { %v3751_v18 = vunpack.i.h.bf16 %v3749_v59  ;;  %v3750_v1 = vunpack.i.l.bf16 %v3749_v59  ;;  %v3756_v43 = vunpack.i.h.bf16 %v3754_v50  ;;  %v3755_v22 = vunpack.i.l.bf16 %v3754_v50 }
 0x189   : > { %v5214_v42 = vsel %vm1389_vm2, %v1482_v58, %v3750_v1  ;;  %v5217_v48 = vsel %vm1389_vm2, %v1382_v47, %v3751_v18  ;;  %v1450_v50 = vsel %vm1322_vm1, %v343_v60, %v3755_v22  ;;  %v1350_v47 = vsel %vm1322_vm1, %v5211_v62, %v3756_v43 }
 0x18a   : > { %5929 = vst [vmem:[#allocation131_spill] sm:$0xff] %v5214_v42  ;;  %5930 = vst [vmem:[#allocation132_spill] sm:$0xff] %v5217_v48  ;;  %v3764_v5 = vpop.permute.xlu1 %3763  ;;  %v3759_v45 = vpop.permute.xlu0 %3758  ;;  %1893 = vmatprep.mubr.f32.mxu1 %v5214_v42  ;;  %2343 = vmatprep.mubr.f32.mxu0 %v5214_v42  ;;  %v5236_v42 = vld [vmem:[%s4283_s14 + $0xe0] sm:$0xff] }
 0x18b   : > { %v3766_v21 = vunpack.i.h.bf16 %v3764_v5  ;;  %v3765_v0 = vunpack.i.l.bf16 %v3764_v5  ;;  %v3761_v53 = vunpack.i.h.bf16 %v3759_v45  ;;  %v3760_v63 = vunpack.i.l.bf16 %v3759_v45  ;;  %1894 = vmatmul.mubr.f32.gmra.mrb[52].mxu1 %v5217_v48  ;;  %2344 = vmatmul.mubr.f32.gmra.mrb[48].mxu0 %v5217_v48  ;;  %v344_v45 = vld [vmem:[%s4283_s14 + $0xe4] sm:$0xff]  ;;  %5933 = vst [vmem:[#allocation135_spill] sm:$0xff] %v5236_v42 }
 0x18d   : > { %v1383_v59 = vsel %vm40_vm0, %v1350_v47, %v3761_v53  ;;  %v1483_v18 = vsel %vm40_vm0, %v1450_v50, %v3760_v63 }
 0x18e   : > { %v3774_v1 = vpop.permute.xlu1 %3773  ;;  %v3769_v58 = vpop.permute.xlu0 %3768  ;;  %v5229_v46 = vsel %vm1389_vm2, %v1483_v18, %v3765_v0  ;;  %v5232_v5 = vsel %vm1389_vm2, %v1383_v59, %v3766_v21 }
 0x18f   : > { %5931 = vst [vmem:[#allocation133_spill] sm:$0xff] %v5229_v46  ;;  %5932 = vst [vmem:[#allocation134_spill] sm:$0xff] %v5232_v5  ;;  %v3771_v48 = vunpack.i.h.bf16 %v3769_v58  ;;  %v3770_v22 = vunpack.i.l.bf16 %v3769_v58  ;;  %1898 = vmatprep.mubr.f32.mxu1 %v5229_v46  ;;  %2348 = vmatprep.mubr.f32.mxu0 %v5229_v46  ;;  %v3776_v43 = vunpack.i.h.bf16 %v3774_v1  ;;  %v3775_v60 = vunpack.i.l.bf16 %v3774_v1  ;;  %v345_v1 = vld [vmem:[%s4283_s14 + $0xec] sm:$0xff] }
 0x190   : > { %1899 = vmatmul.mubr.f32.gmra.mrb[54].mxu1 %v5232_v5  ;;  %2349 = vmatmul.mubr.f32.gmra.mrb[50].mxu0 %v5232_v5  ;;  %v5249_v46 = vld [vmem:[%s4283_s14 + $0xe8] sm:$0xff] }
 0x191   : > { %v1451_v21 = vsel %vm1322_vm1, %v344_v45, %v3770_v22  ;;  %v1351_v0 = vsel %vm1322_vm1, %v5236_v42, %v3771_v48  ;;  %5934 = vst [vmem:[#allocation136_spill] sm:$0xff] %v5249_v46 }
 0x192   : > { %v3784_v53 = vpop.permute.xlu1 %3783  ;;  %v3779_v63 = vpop.permute.xlu0 %3778  ;;  %v1484_v58 = vsel %vm40_vm0, %v1451_v21, %v3775_v60  ;;  %v1384_v62 = vsel %vm40_vm0, %v1351_v0, %v3776_v43 }
 0x193   : > { %v3781_v50 = vunpack.i.h.bf16 %v3779_v63  ;;  %v3780_v47 = vunpack.i.l.bf16 %v3779_v63  ;;  %v3786_v59 = vunpack.i.h.bf16 %v3784_v53  ;;  %v3785_v18 = vunpack.i.l.bf16 %v3784_v53 }
 0x195   : > { %v5252_v5 = vsel %vm1389_vm2, %v1484_v58, %v3780_v47  ;;  %v5255_v45 = vsel %vm1389_vm2, %v1384_v62, %v3781_v50  ;;  %v1452_v53 = vsel %vm1322_vm1, %v345_v1, %v3785_v18  ;;  %v1352_v62 = vsel %vm1322_vm1, %v5249_v46, %v3786_v59 }
 0x196   : > { %5935 = vst [vmem:[#allocation137_spill] sm:$0xff] %v5252_v5  ;;  %5936 = vst [vmem:[#allocation138_spill] sm:$0xff] %v5255_v45  ;;  %v3794_v48 = vpop.permute.xlu1 %3793  ;;  %v3789_v22 = vpop.permute.xlu0 %3788  ;;  %1903 = vmatprep.mubr.f32.mxu1 %v5252_v5  ;;  %2353 = vmatprep.mubr.f32.mxu0 %v5252_v5  ;;  %v5274_v5 = vld [vmem:[%s4283_s14 + $0xf0] sm:$0xff] }
 0x197   : > { %v3796_v60 = vunpack.i.h.bf16 %v3794_v48  ;;  %v3795_v21 = vunpack.i.l.bf16 %v3794_v48  ;;  %v3791_v43 = vunpack.i.h.bf16 %v3789_v22  ;;  %v3790_v0 = vunpack.i.l.bf16 %v3789_v22  ;;  %1904 = vmatmul.mubr.f32.gmra.mrb[56].mxu1 %v5255_v45  ;;  %2354 = vmatmul.mubr.f32.gmra.mrb[52].mxu0 %v5255_v45  ;;  %v346_v22 = vld [vmem:[%s4283_s14 + $0xf4] sm:$0xff]  ;;  %5939 = vst [vmem:[#allocation141_spill] sm:$0xff] %v5274_v5 }
 0x199   : > { %v1385_v63 = vsel %vm40_vm0, %v1352_v62, %v3791_v43  ;;  %v1485_v50 = vsel %vm40_vm0, %v1452_v53, %v3790_v0 }
 0x19a   : > { %v3804_v47 = vpop.permute.xlu1 %3803  ;;  %v3799_v58 = vpop.permute.xlu0 %3798  ;;  %v5267_v42 = vsel %vm1389_vm2, %v1485_v50, %v3795_v21  ;;  %v5270_v48 = vsel %vm1389_vm2, %v1385_v63, %v3796_v60 }
 0x19b   : > { %5937 = vst [vmem:[#allocation139_spill] sm:$0xff] %v5267_v42  ;;  %5938 = vst [vmem:[#allocation140_spill] sm:$0xff] %v5270_v48  ;;  %v3801_v45 = vunpack.i.h.bf16 %v3799_v58  ;;  %v3800_v18 = vunpack.i.l.bf16 %v3799_v58  ;;  %1908 = vmatprep.mubr.f32.mxu1 %v5267_v42  ;;  %2358 = vmatprep.mubr.f32.mxu0 %v5267_v42  ;;  %v3806_v59 = vunpack.i.h.bf16 %v3804_v47  ;;  %v3805_v1 = vunpack.i.l.bf16 %v3804_v47  ;;  %v347_v47 = vld [vmem:[%s4283_s14 + $0xfc] sm:$0xff] }
 0x19c   : > { %1909 = vmatmul.mubr.f32.gmra.mrb[58].mxu1 %v5270_v48  ;;  %2359 = vmatmul.mubr.f32.gmra.mrb[54].mxu0 %v5270_v48  ;;  %v5287_v42 = vld [vmem:[%s4283_s14 + $0xf8] sm:$0xff] }
 0x19d   : > { %v1453_v60 = vsel %vm1322_vm1, %v346_v22, %v3800_v18  ;;  %v1353_v21 = vsel %vm1322_vm1, %v5274_v5, %v3801_v45  ;;  %5940 = vst [vmem:[#allocation142_spill] sm:$0xff] %v5287_v42 }
 0x19e   : > { %v3814_v43 = vpop.permute.xlu1 %3813  ;;  %v3809_v0 = vpop.permute.xlu0 %3808  ;;  %v1486_v58 = vsel %vm40_vm0, %v1453_v60, %v3805_v1  ;;  %v1386_v46 = vsel %vm40_vm0, %v1353_v21, %v3806_v59 }
 0x19f   : > { %v3811_v53 = vunpack.i.h.bf16 %v3809_v0  ;;  %v3810_v62 = vunpack.i.l.bf16 %v3809_v0  ;;  %v3816_v63 = vunpack.i.h.bf16 %v3814_v43  ;;  %v3815_v50 = vunpack.i.l.bf16 %v3814_v43 }
 0x1a1   : > { %v5290_v48 = vsel %vm1389_vm2, %v1486_v58, %v3810_v62  ;;  %v5293_v22 = vsel %vm1389_vm2, %v1386_v46, %v3811_v53  ;;  %v1454_v43 = vsel %vm1322_vm1, %v347_v47, %v3815_v50  ;;  %v1354_v46 = vsel %vm1322_vm1, %v5287_v42, %v3816_v63 }
 0x1a2   : > { %5941 = vst [vmem:[#allocation143_spill] sm:$0xff] %v5290_v48  ;;  %5942 = vst [vmem:[#allocation144_spill] sm:$0xff] %v5293_v22  ;;  %v3824_v45 = vpop.permute.xlu1 %3823  ;;  %v3819_v18 = vpop.permute.xlu0 %3818  ;;  %1913 = vmatprep.mubr.f32.mxu1 %v5290_v48  ;;  %2363 = vmatprep.mubr.f32.mxu0 %v5290_v48  ;;  %v5312_v48 = vld [vmem:[%s4283_s14 + $0x100] sm:$0xff] }
 0x1a3   : > { %v3826_v1 = vunpack.i.h.bf16 %v3824_v45  ;;  %v3825_v60 = vunpack.i.l.bf16 %v3824_v45  ;;  %v3821_v59 = vunpack.i.h.bf16 %v3819_v18  ;;  %v3820_v21 = vunpack.i.l.bf16 %v3819_v18  ;;  %1914 = vmatmul.mubr.f32.gmra.mrb[60].mxu1 %v5293_v22  ;;  %2364 = vmatmul.mubr.f32.gmra.mrb[56].mxu0 %v5293_v22  ;;  %v456_v18 = vld [vmem:[%s4283_s14 + $0x104] sm:$0xff]  ;;  %5945 = vst [vmem:[#allocation147_spill] sm:$0xff] %v5312_v48 }
 0x1a5   : > { %v1387_v0 = vsel %vm40_vm0, %v1354_v46, %v3821_v59  ;;  %v1487_v53 = vsel %vm40_vm0, %v1454_v43, %v3820_v21 }
 0x1a6   : > { %v3834_v62 = vpop.permute.xlu1 %3833  ;;  %v3829_v58 = vpop.permute.xlu0 %3828  ;;  %v5305_v5 = vsel %vm1389_vm2, %v1487_v53, %v3825_v60  ;;  %v5308_v45 = vsel %vm1389_vm2, %v1387_v0, %v3826_v1 }
 0x1a7   : > { %5943 = vst [vmem:[#allocation145_spill] sm:$0xff] %v5305_v5  ;;  %5944 = vst [vmem:[#allocation146_spill] sm:$0xff] %v5308_v45  ;;  %v3831_v22 = vunpack.i.h.bf16 %v3829_v58  ;;  %v3830_v50 = vunpack.i.l.bf16 %v3829_v58  ;;  %1918 = vmatprep.mubr.f32.mxu1 %v5305_v5  ;;  %2368 = vmatprep.mubr.f32.mxu0 %v5305_v5  ;;  %v3836_v63 = vunpack.i.h.bf16 %v3834_v62  ;;  %v3835_v47 = vunpack.i.l.bf16 %v3834_v62 }
 0x1a8   : > { %1919 = vmatmul.mubr.f32.gmra.mrb[62].mxu1 %v5308_v45  ;;  %2369 = vmatmul.mubr.f32.gmra.mrb[58].mxu0 %v5308_v45 }
 0x1a9   : > { %v1528_v60 = vsel %vm1322_vm1, %v456_v18, %v3830_v50  ;;  %v1522_v1 = vsel %vm1322_vm1, %v5312_v48, %v3831_v22  ;;  %v5331_v22 = vld [vmem:[%s4283_s14 + $0x108] sm:$0xff] }
 0x1aa   : > { %v3844_v59 = vpop.permute.xlu1 %3843  ;;  %v3839_v21 = vpop.permute.xlu0 %3838  ;;  %v1530_v0 = vsel %vm40_vm0, %v1528_v60, %v3835_v47  ;;  %v1524_v53 = vsel %vm40_vm0, %v1522_v1, %v3836_v63  ;;  %5948 = vst [vmem:[#allocation150_spill] sm:$0xff] %v5331_v22 }
 0x1ab   : > { %v3841_v43 = vunpack.i.h.bf16 %v3839_v21  ;;  %v3840_v46 = vunpack.i.l.bf16 %v3839_v21  ;;  %v3846_v45 = vunpack.i.h.bf16 %v3844_v59  ;;  %v3845_v18 = vunpack.i.l.bf16 %v3844_v59  ;;  %v472_v21 = vld [vmem:[%s4283_s14 + $0x10c] sm:$0xff] }
 0x1ad   : > { %v5324_v62 = vsel %vm1389_vm2, %v1530_v0, %v3840_v46  ;;  %v5327_v58 = vsel %vm1389_vm2, %v1524_v53, %v3841_v43  ;;  %v1582_v60 = vsel %vm1322_vm1, %v5331_v22, %v3846_v45  ;;  %v1588_v1 = vsel %vm1322_vm1, %v472_v21, %v3845_v18 }
 0x1ae   : > { %5946 = vst [vmem:[#allocation148_spill] sm:$0xff] %v5324_v62  ;;  %5947 = vst [vmem:[#allocation149_spill] sm:$0xff] %v5327_v58  ;;  %v3854_v50 = vpop.permute.xlu1 %3853  ;;  %v3849_v42 = vpop.permute.xlu0 %3848  ;;  %2373 = vmatprep.mubr.f32.mxu0 %v5324_v62 }
 0x1af   : > { %2374 = vmatmul.mubr.f32.gmra.mrb[60].mxu0 %v5327_v58  ;;  %v3851_v63 = vunpack.i.h.bf16 %v3849_v42  ;;  %v3850_v47 = vunpack.i.l.bf16 %v3849_v42  ;;  %v3856_v46 = vunpack.i.h.bf16 %v3854_v50  ;;  %v3855_v0 = vunpack.i.l.bf16 %v3854_v50  ;;  %v216_v42 = vld [vmem:[%s4283_s14 + $0x100] sm:$0x3f] }
 0x1b1   : > { %v1584_v62 = vsel %vm40_vm0, %v1582_v60, %v3851_v63  ;;  %v1590_v5 = vsel %vm40_vm0, %v1588_v1, %v3850_v47  ;;  %v1355_v50 = vsel %vm1322_vm1, %v216_v42, %v3856_v46 }
 0x1b2   : > { %v3864_v43 = vpop.permute.xlu1 %3863  ;;  %v3859_v59 = vpop.permute.xlu0 %3858 }
 0x1b3   : > { %v3861_v53 = vunpack.i.h.bf16 %v3859_v59  ;;  %v3860_v48 = vunpack.i.l.bf16 %v3859_v59  ;;  %v3866_v58 = vunpack.i.h.bf16 %v3864_v43  ;;  %v3865_v52 = vunpack.i.l.bf16 %v3864_v43 }
 0x1b4   : > { %v1455_v59 = vsel %vm1322_vm1, %v348_v6, %v3855_v0 }
 0x1b5   : > { %v1592_v45 = vsel %vm1389_vm2, %v1590_v5, %v3860_v48  ;;  %v1586_v18 = vsel %vm1389_vm2, %v1584_v62, %v3861_v53  ;;  %v1388_v47 = vsel %vm40_vm0, %v1355_v50, %v3866_v58  ;;  %v1488_v1 = vsel %vm40_vm0, %v1455_v59, %v3865_v52  ;;  %v473_v5 = vld [vmem:[%s4283_s14 + $0x114] sm:$0x3f]  ;;  %v5978_v59 = vld [vmem:[#allocation136_spill] sm:$0xff] }
 0x1b6   : > { %v3869_v21 = vpop.permute.xlu0 %3868  ;;  %2378 = vmatprep.mubr.f32.mxu0 %v1592_v45  ;;  %v3874_v22 = vpop.permute.xlu1 %3873 }
 0x1b7   : > { %v3871_v63 = vunpack.i.h.bf16 %v3869_v21  ;;  %v3870_v60 = vunpack.i.l.bf16 %v3869_v21  ;;  %2379 = vmatmul.mubr.f32.gmra.mrb[62].mxu0 %v1586_v18  ;;  %v3876_v43 = vunpack.i.h.bf16 %v3874_v22  ;;  %v3875_v61 = vunpack.i.l.bf16 %v3874_v22 }
 0x1b9   : > { %v1521_v48 = vsel %vm1389_vm2, %v1488_v1, %v3870_v60  ;;  %v1422_v62 = vsel %vm1389_vm2, %v1388_v47, %v3871_v63  ;;  %v1583_v0 = vsel %vm1322_vm1, %v465_v34, %v3876_v43  ;;  %v1589_v58 = vsel %vm1322_vm1, %v473_v5, %v3875_v61  ;;  %v5977_v34 = vld [vmem:[#allocation139_spill] sm:$0xff]  ;;  %v5979_v60 = vld [vmem:[#allocation140_spill] sm:$0xff]  ;;  %v5981_v5 = vld [vmem:[#allocation141_spill] sm:$0xff] }
 0x1ba   : > { %v3879_v53 = vpop.permute.xlu0 %3878  ;;  %1923 = vmatprep.mubr.f32.mxu1 %v1521_v48  ;;  %v3981_v61 = vmov 0.0   ;;  %v5980_v43 = vld [vmem:[#allocation143_spill] sm:$0xff]  ;;  %v457_v48 = vld [vmem:[%s4283_s14 + $0x10c] sm:$0x3f] }
 0x1bb   : > { %v3881_v46 = vunpack.i.h.bf16 %v3879_v53  ;;  %v3880_v42 = vunpack.i.l.bf16 %v3879_v53  ;;  %v3884_v6 = vpop.permute.xlu1 %3883  ;;  %1924 = vmatmul.mubr.f32.gmra.mrb[64].mxu1 %v1422_v62 }
 0x1bc   : > { %v3886_v45 = vunpack.i.h.bf16 %v3884_v6  ;;  %v3885_v52 = vunpack.i.l.bf16 %v3884_v6  ;;  %1993 = vmatprep.mubr.f32.mxu1 %v4626_v55  ;;  %v3902_v55 = vld [vmem:[%s4283_s14 + $0x18] sm:$0xff]  ;;  %v449_v6 = vld [vmem:[%s4283_s14 + $0x108] sm:$0x3f] }
 0x1bd   : > { %v1585_v22 = vsel %vm40_vm0, %v1583_v0, %v3881_v46  ;;  %v1591_v18 = vsel %vm40_vm0, %v1589_v58, %v3880_v42  ;;  %v5982_v42 = vld [vmem:[#allocation144_spill] sm:$0xff]  ;;  %v5983_v58 = vld [vmem:[#allocation145_spill] sm:$0xff] }
 0x1be   : > { %v1593_v21 = vsel %vm1389_vm2, %v1591_v18, %v3885_v52  ;;  %v1587_v50 = vsel %vm1389_vm2, %v1585_v22, %v3886_v45  ;;  %v3889_v63 = vpop.permute.xlu0 %3888  ;;  %v5984_v45 = vld [vmem:[#allocation142_spill] sm:$0xff] }
 0x1bf   : > { %1994 = vmatmul.mubr.f32.vlgmr.msra.gmra.mrb[0].mxu1 %v4629_v2  ;;  %2383 = vmatprep.mubr.f32.mxu0 %v1593_v21  ;;  %v3905_v2 = vld [vmem:[%s4283_s14 + $0x30] sm:$0xff]  ;;  %v3890_v47 = vunpack.i.l.bf16 %v3889_v63  ;;  %v3894_v1 = vpop.permute.xlu1 %3893  ;;  %v3891_v62 = vunpack.i.h.bf16 %v3889_v63 }
 0x1c0   : > { %1998 = vmatprep.mubr.f32.mxu1 %v4609_v56  ;;  %2384 = vmatmul.mubr.f32.gmra.mrb[64].mxu0 %v1587_v50  ;;  %v3903_v56 = vld [vmem:[%s4283_s14 + $0x20] sm:$0xff]  ;;  %v3895_v53 = vunpack.i.l.bf16 %v3894_v1  ;;  %v3896_v52 = vunpack.i.h.bf16 %v3894_v1 }
 0x1c1   : > { %2881 = vmatprep.mubr.msk.f32.mxu0 %vm3980_vm3, %v3981_v61  ;;  %v1529_v0 = vsel %vm1322_vm1, %v457_v48, %v3890_v47  ;;  %v1523_v18 = vsel %vm1322_vm1, %v449_v6, %v3891_v62  ;;  %v5985_v50 = vld [vmem:[#allocation146_spill] sm:$0xff] }
 0x1c2   : > { %v3899_v46 = vpop.permute.xlu0 %3898  ;;  %v1531_v21 = vsel %vm40_vm0, %v1529_v0, %v3895_v53 }
 0x1c3   : > { %1999 = vmatmul.mubr.f32.gmra.mrb[2].mxu1 %v4612_v29  ;;  %v3904_v29 = vld [vmem:[%s4283_s14 + $0x28] sm:$0xff]  ;;  %v3900_v22 = vunpack.i.l.bf16 %v3899_v46 }
 0x1c4   : > { %2003 = vmatprep.mubr.f32.mxu1 %v4658_v11  ;;  %2882 = vmatmul.mubr.msk.f32.vlgmr.msra.gmra.mrb[0].mxu0 %vm1322_vm1, %v3902_v55  ;;  %v3906_v11 = vld [vmem:[%s4283_s14 + $0x38] sm:$0xff]  ;;  %v5986_v55 = vld [vmem:[#allocation148_spill] sm:$0xff] }
 0x1c5   : > { %2884 = vmatprep.mubr.msk.f32.mxu0 %vm3980_vm3, %v3981_v61 }
 0x1c7   : > { %2004 = vmatmul.mubr.f32.gmra.mrb[4].mxu1 %v4661_v54  ;;  %v3908_v54 = vld [vmem:[%s4283_s14 + $0x48] sm:$0xff] }
 0x1c8   : > { %2008 = vmatprep.mubr.f32.mxu1 %v4692_v4  ;;  %2885 = vmatmul.mubr.msk.f32.gmra.mrb[2].mxu0 %vm1322_vm1, %v3903_v56  ;;  %v3909_v4 = vld [vmem:[%s4283_s14 + $0x50] sm:$0xff]  ;;  %v5987_v56 = vld [vmem:[#allocation147_spill] sm:$0xff] }
 0x1c9   : > { %2887 = vmatprep.mubr.msk.f32.mxu0 %vm3980_vm3, %v3981_v61 }
 0x1cb   : > { %2009 = vmatmul.mubr.f32.gmra.mrb[6].mxu1 %v4695_v28  ;;  %v3910_v28 = vld [vmem:[%s4283_s14 + $0x58] sm:$0xff] }
 0x1cc   : > { %2013 = vmatprep.mubr.f32.mxu1 %v4717_v57  ;;  %2888 = vmatmul.mubr.msk.f32.gmra.mrb[4].mxu0 %vm1322_vm1, %v3904_v29  ;;  %v3911_v57 = vld [vmem:[%s4283_s14 + $0x60] sm:$0xff]  ;;  %v3901_v29 = vunpack.i.h.bf16 %v3899_v46 }
 0x1cd   : > { %2890 = vmatprep.mubr.msk.f32.mxu0 %vm3980_vm3, %v3981_v61 }
 0x1cf   : > { %2014 = vmatmul.mubr.f32.gmra.mrb[8].mxu1 %v4720_v7  ;;  %v3912_v7 = vld [vmem:[%s4283_s14 + $0x68] sm:$0xff] }
 0x1d0   : > { %2018 = vmatprep.mubr.f32.mxu1 %v4748_v25  ;;  %2891 = vmatmul.mubr.msk.f32.gmra.mrb[6].mxu0 %vm1322_vm1, %v3905_v2  ;;  %v3907_v25 = vld [vmem:[%s4283_s14 + $0x40] sm:$0xff]  ;;  %v1525_v2 = vsel %vm40_vm0, %v1523_v18, %v3896_v52 }
 0x1d1   : > { %2893 = vmatprep.mubr.msk.f32.mxu0 %vm3980_vm3, %v3981_v61 }
 0x1d3   : > { %2019 = vmatmul.mubr.f32.gmra.mrb[10].mxu1 %v4751_v20  ;;  %v3913_v20 = vld [vmem:[%s4283_s14 + $0x70] sm:$0xff] }
 0x1d4   : > { %2023 = vmatprep.mubr.f32.mxu1 %v4773_v33  ;;  %2894 = vmatmul.mubr.msk.f32.gmra.mrb[8].mxu0 %vm1322_vm1, %v3906_v11  ;;  %v3914_v33 = vld [vmem:[%s4283_s14 + $0x78] sm:$0xff]  ;;  %v1533_v11 = vsel %vm1389_vm2, %v1531_v21, %v3900_v22 }
 0x1d5   : > { %2896 = vmatprep.mubr.msk.f32.mxu0 %vm3980_vm3, %v3981_v61 }
 0x1d7   : > { %2024 = vmatmul.mubr.f32.gmra.mrb[12].mxu1 %v4776_v8  ;;  %v5950_v8 = vld [vmem:[#allocation113_spill] sm:$0xff] }
 0x1d8   : > { %2028 = vmatprep.mubr.f32.mxu1 %v4805_v10  ;;  %2897 = vmatmul.mubr.msk.f32.gmra.mrb[10].mxu0 %vm1322_vm1, %v3907_v25  ;;  %v5951_v10 = vld [vmem:[#allocation111_spill] sm:$0xff]  ;;  %v5988_v25 = vld [vmem:[#allocation149_spill] sm:$0xff] }
 0x1d9   : > { %2899 = vmatprep.mubr.msk.f32.mxu0 %vm3980_vm3, %v3981_v61 }
 0x1db   : > { %2029 = vmatmul.mubr.f32.gmra.mrb[14].mxu1 %v4808_v26  ;;  %v5952_v26 = vld [vmem:[#allocation114_spill] sm:$0xff] }
 0x1dc   : > { %2033 = vmatprep.mubr.f32.mxu1 %v4829_v12  ;;  %2900 = vmatmul.mubr.msk.f32.gmra.mrb[12].mxu0 %vm1322_vm1, %v3908_v54  ;;  %v5953_v12 = vld [vmem:[#allocation115_spill] sm:$0xff]  ;;  %v5989_v54 = vld [vmem:[#allocation150_spill] sm:$0xff] }
 0x1dd   : > { %2902 = vmatprep.mubr.msk.f32.mxu0 %vm3980_vm3, %v3981_v61 }
 0x1df   : > { %2034 = vmatmul.mubr.f32.gmra.mrb[16].mxu1 %v4832_v19  ;;  %v5954_v19 = vld [vmem:[#allocation112_spill] sm:$0xff] }
 0x1e0   : > { %2038 = vmatprep.mubr.f32.mxu1 %v4861_v35  ;;  %2903 = vmatmul.mubr.msk.f32.gmra.mrb[14].mxu0 %vm1322_vm1, %v3909_v4  ;;  %v5955_v35 = vld [vmem:[#allocation116_spill] sm:$0xff]  ;;  %v1527_v4 = vsel %vm1389_vm2, %v1525_v2, %v3901_v29 }
 0x1e1   : > { %2905 = vmatprep.mubr.msk.f32.mxu0 %vm3980_vm3, %v3981_v61 }
 0x1e3   : > { %2039 = vmatmul.mubr.f32.gmra.mrb[18].mxu1 %v4864_v37  ;;  %v5956_v37 = vld [vmem:[#allocation119_spill] sm:$0xff] }
 0x1e4   : > { %2043 = vmatprep.mubr.f32.mxu1 %v4885_v27  ;;  %2906 = vmatmul.mubr.msk.f32.gmra.mrb[16].mxu0 %vm1322_vm1, %v3910_v28  ;;  %v5957_v27 = vld [vmem:[#allocation117_spill] sm:$0xff] }
 0x1e5   : > { %2908 = vmatprep.mubr.msk.f32.mxu0 %vm3980_vm3, %v3981_v61  ;;  %v480_v28 = vld [vmem:[%s4283_s14 + $0x110] sm:$0xff] }
 0x1e7   : > { %2044 = vmatmul.mubr.f32.gmra.mrb[20].mxu1 %v4888_v30  ;;  %v5958_v30 = vld [vmem:[#allocation120_spill] sm:$0xff] }
 0x1e8   : > { %2048 = vmatprep.mubr.f32.mxu1 %v4917_v39  ;;  %2909 = vmatmul.mubr.msk.f32.gmra.mrb[18].mxu0 %vm1322_vm1, %v3911_v57  ;;  %v5959_v39 = vld [vmem:[#allocation121_spill] sm:$0xff] }
 0x1e9   : > { %2911 = vmatprep.mubr.msk.f32.mxu0 %vm3980_vm3, %v3981_v61  ;;  %v481_v57 = vld [vmem:[%s4283_s14 + $0x118] sm:$0x3f] }
 0x1eb   : > { %2049 = vmatmul.mubr.f32.gmra.mrb[22].mxu1 %v4920_v41  ;;  %v5960_v41 = vld [vmem:[#allocation118_spill] sm:$0xff] }
 0x1ec   : > { %2053 = vmatprep.mubr.f32.mxu1 %v4941_v38  ;;  %2912 = vmatmul.mubr.msk.f32.gmra.mrb[20].mxu0 %vm1322_vm1, %v3912_v7  ;;  %v5961_v38 = vld [vmem:[#allocation122_spill] sm:$0xff] }
 0x1ed   : > { %2914 = vmatprep.mubr.msk.f32.mxu0 %vm3980_vm3, %v3981_v61 }
 0x1ef   : > { %2054 = vmatmul.mubr.f32.gmra.mrb[24].mxu1 %v4944_v3  ;;  %v5962_v3 = vld [vmem:[#allocation125_spill] sm:$0xff] }
 0x1f0   : > { %2058 = vmatprep.mubr.f32.mxu1 %v4970_v17  ;;  %2915 = vmatmul.mubr.msk.f32.gmra.mrb[22].mxu0 %vm1322_vm1, %v3913_v20  ;;  %v5963_v17 = vld [vmem:[#allocation123_spill] sm:$0xff] }
 0x1f1   : > { %2917 = vmatprep.mubr.msk.f32.mxu0 %vm3980_vm3, %v3981_v61 }
 0x1f3   : > { %2059 = vmatmul.mubr.f32.gmra.mrb[26].mxu1 %v4973_v44  ;;  %v5964_v44 = vld [vmem:[#allocation126_spill] sm:$0xff] }
 0x1f4   : > { %2063 = vmatprep.mubr.f32.mxu1 %v4993_v15  ;;  %2918 = vmatmul.mubr.msk.f32.gmra.mrb[24].mxu0 %vm1322_vm1, %v3914_v33  ;;  %v5965_v15 = vld [vmem:[#allocation127_spill] sm:$0xff]  ;;  %v5990_v33 = vld [vmem:[#allocation109_spill] sm:$0xff] }
 0x1f5   : > { %2920 = vmatprep.mubr.msk.f32.mxu0 %vm3980_vm3, %v3981_v61 }
 0x1f7   : > { %2064 = vmatmul.mubr.f32.gmra.mrb[28].mxu1 %v4996_v32  ;;  %v5966_v32 = vld [vmem:[#allocation124_spill] sm:$0xff] }
 0x1f8   : > { %2068 = vmatprep.mubr.f32.mxu1 %v5022_v40  ;;  %2921 = vmatmul.mubr.msk.f32.gmra.mrb[26].mxu0 %vm1322_vm1, %v4999_v24  ;;  %v5967_v24 = vld [vmem:[#allocation128_spill] sm:$0xff]  ;;  %v5968_v40 = vld [vmem:[#allocation131_spill] sm:$0xff] }
 0x1f9   : > { %2923 = vmatprep.mubr.msk.f32.mxu0 %vm3980_vm3, %v3981_v61 }
 0x1fb   : > { %2069 = vmatmul.mubr.f32.gmra.mrb[30].mxu1 %v5025_v13  ;;  %v5969_v13 = vld [vmem:[#allocation129_spill] sm:$0xff] }
 0x1fc   : > { %2073 = vmatprep.mubr.f32.mxu1 %v5039_v23  ;;  %2924 = vmatmul.mubr.msk.f32.gmra.mrb[28].mxu0 %vm1322_vm1, %v5019_v51  ;;  %v5949_v51 = vld [vmem:[#allocation110_spill] sm:$0xff]  ;;  %v5970_v23 = vld [vmem:[#allocation132_spill] sm:$0xff] }
 0x1fd   : > { %2926 = vmatprep.mubr.msk.f32.mxu0 %vm3980_vm3, %v3981_v61 }
 0x1ff   : > { %2074 = vmatmul.mubr.f32.gmra.mrb[32].mxu1 %v5042_v14  ;;  %v5971_v14 = vld [vmem:[#allocation133_spill] sm:$0xff] }
 0x200   : > { %2078 = vmatprep.mubr.f32.mxu1 %v5062_v16  ;;  %2927 = vmatmul.mubr.msk.f32.gmra.mrb[30].mxu0 %vm1322_vm1, %v5046_v9  ;;  %v5972_v9 = vld [vmem:[#allocation130_spill] sm:$0xff]  ;;  %v5974_v16 = vld [vmem:[#allocation137_spill] sm:$0xff] }
 0x201   : > { %2929 = vmatprep.mubr.msk.f32.mxu0 %vm3980_vm3, %v3981_v61 }
 0x203   : > { %2079 = vmatmul.mubr.f32.gmra.mrb[34].mxu1 %v5065_v31  ;;  %v5975_v31 = vld [vmem:[#allocation135_spill] sm:$0xff] }
 0x204   : > { %2083 = vmatprep.mubr.f32.mxu1 %v5077_v49  ;;  %2930 = vmatmul.mubr.msk.f32.gmra.mrb[32].mxu0 %vm1322_vm1, %v5059_v36  ;;  %v5973_v36 = vld [vmem:[#allocation134_spill] sm:$0xff] }
 0x205   : > { %2932 = vmatprep.mubr.msk.f32.mxu0 %vm3980_vm3, %v3981_v61  ;;  %v5976_v49 = vld [vmem:[#allocation138_spill] sm:$0xff] }
 0x207   : > { %2084 = vmatmul.mubr.f32.gmra.mrb[36].mxu1 %v5949_v51 }
 0x208   : > { %2088 = vmatprep.mubr.f32.mxu1 %v5950_v8  ;;  %2933 = vmatmul.mubr.msk.f32.gmra.mrb[34].mxu0 %vm1322_vm1, %v5951_v10 }
 0x209   : > { %2935 = vmatprep.mubr.msk.f32.mxu0 %vm3980_vm3, %v3981_v61 }
 0x20b   : > { %2089 = vmatmul.mubr.f32.gmra.mrb[38].mxu1 %v5952_v26 }
 0x20c   : > { %2093 = vmatprep.mubr.f32.mxu1 %v5953_v12  ;;  %2936 = vmatmul.mubr.msk.f32.gmra.mrb[36].mxu0 %vm1322_vm1, %v5954_v19 }
 0x20d   : > { %2938 = vmatprep.mubr.msk.f32.mxu0 %vm3980_vm3, %v3981_v61 }
 0x20f   : > { %2094 = vmatmul.mubr.f32.gmra.mrb[40].mxu1 %v5955_v35 }
 0x210   : > { %2098 = vmatprep.mubr.f32.mxu1 %v5956_v37  ;;  %2939 = vmatmul.mubr.msk.f32.gmra.mrb[38].mxu0 %vm1322_vm1, %v5957_v27 }
 0x211   : > { %2941 = vmatprep.mubr.msk.f32.mxu0 %vm3980_vm3, %v3981_v61 }
 0x213   : > { %2099 = vmatmul.mubr.f32.gmra.mrb[42].mxu1 %v5958_v30 }
 0x214   : > { %2103 = vmatprep.mubr.f32.mxu1 %v5959_v39  ;;  %2942 = vmatmul.mubr.msk.f32.gmra.mrb[40].mxu0 %vm1322_vm1, %v5960_v41 }
 0x215   : > { %2944 = vmatprep.mubr.msk.f32.mxu0 %vm3980_vm3, %v3981_v61 }
 0x217   : > { %2104 = vmatmul.mubr.f32.gmra.mrb[44].mxu1 %v5961_v38 }
 0x218   : > { %2108 = vmatprep.mubr.f32.mxu1 %v5962_v3  ;;  %2945 = vmatmul.mubr.msk.f32.gmra.mrb[42].mxu0 %vm1322_vm1, %v5963_v17 }
 0x219   : > { %2947 = vmatprep.mubr.msk.f32.mxu0 %vm3980_vm3, %v3981_v61 }
 0x21b   : > { %2109 = vmatmul.mubr.f32.gmra.mrb[46].mxu1 %v5964_v44 }
 0x21c   : > { %2113 = vmatprep.mubr.f32.mxu1 %v5965_v15  ;;  %2948 = vmatmul.mubr.msk.f32.gmra.mrb[44].mxu0 %vm1322_vm1, %v5966_v32 }
 0x21d   : > { %2950 = vmatprep.mubr.msk.f32.mxu0 %vm3980_vm3, %v3981_v61 }
 0x21f   : > { %2114 = vmatmul.mubr.f32.gmra.mrb[48].mxu1 %v5967_v24 }
 0x220   : > { %2118 = vmatprep.mubr.f32.mxu1 %v5968_v40  ;;  %2951 = vmatmul.mubr.msk.f32.gmra.mrb[46].mxu0 %vm1322_vm1, %v5969_v13 }
 0x221   : > { %2953 = vmatprep.mubr.msk.f32.mxu0 %vm3980_vm3, %v3981_v61 }
 0x223   : > { %2119 = vmatmul.mubr.f32.gmra.mrb[50].mxu1 %v5970_v23 }
 0x224   : > { %2123 = vmatprep.mubr.f32.mxu1 %v5971_v14  ;;  %2954 = vmatmul.mubr.msk.f32.gmra.mrb[48].mxu0 %vm1322_vm1, %v5972_v9 }
 0x225   : > { %2956 = vmatprep.mubr.msk.f32.mxu0 %vm3980_vm3, %v3981_v61 }
 0x227   : > { %2124 = vmatmul.mubr.f32.gmra.mrb[52].mxu1 %v5973_v36 }
 0x228   : > { %2128 = vmatprep.mubr.f32.mxu1 %v5974_v16  ;;  %2957 = vmatmul.mubr.msk.f32.gmra.mrb[50].mxu0 %vm1322_vm1, %v5975_v31 }
 0x229   : > { %2959 = vmatprep.mubr.msk.f32.mxu0 %vm3980_vm3, %v3981_v61 }
 0x22b   : > { %2129 = vmatmul.mubr.f32.gmra.mrb[54].mxu1 %v5976_v49 }
 0x22c   : > { %2133 = vmatprep.mubr.f32.mxu1 %v5977_v34  ;;  %2960 = vmatmul.mubr.msk.f32.gmra.mrb[52].mxu0 %vm1322_vm1, %v5978_v59 }
 0x22d   : > { %2962 = vmatprep.mubr.msk.f32.mxu0 %vm3980_vm3, %v3981_v61 }
 0x22f   : > { %2134 = vmatmul.mubr.f32.gmra.mrb[56].mxu1 %v5979_v60 }
 0x230   : > { %2138 = vmatprep.mubr.f32.mxu1 %v5980_v43  ;;  %2963 = vmatmul.mubr.msk.f32.gmra.mrb[54].mxu0 %vm1322_vm1, %v5981_v5 }
 0x231   : > { %2965 = vmatprep.mubr.msk.f32.mxu0 %vm3980_vm3, %v3981_v61 }
 0x233   : > { %2139 = vmatmul.mubr.f32.gmra.mrb[58].mxu1 %v5982_v42 }
 0x234   : > { %2143 = vmatprep.mubr.f32.mxu1 %v5983_v58  ;;  %2966 = vmatmul.mubr.msk.f32.gmra.mrb[56].mxu0 %vm1322_vm1, %v5984_v45 }
 0x235   : > { %2968 = vmatprep.mubr.msk.f32.mxu0 %vm3980_vm3, %v3981_v61 }
 0x237   : > { %2144 = vmatmul.mubr.f32.gmra.mrb[60].mxu1 %v5985_v50 }
 0x238   : > { %2148 = vmatprep.mubr.f32.mxu1 %v5986_v55  ;;  %2969 = vmatmul.mubr.msk.f32.gmra.mrb[58].mxu0 %vm1322_vm1, %v5987_v56 }
 0x239   : > { %2971 = vmatprep.mubr.msk.f32.mxu0 %vm3980_vm3, %v3981_v61 }
 0x23b   : > { %2149 = vmatmul.mubr.f32.gmra.mrb[62].mxu1 %v5988_v25 }
 0x23c   : > { %2972 = vmatmul.mubr.msk.f32.gmra.mrb[60].mxu0 %vm1322_vm1, %v5989_v54  ;;  %2153 = vmatprep.mubr.f32.mxu1 %v1533_v11 }
 0x23d   : > { %2974 = vmatprep.mubr.msk.f32.mxu0 %vm3980_vm3, %v3981_v61 }
 0x23f   : > { %2154 = vmatmul.mubr.f32.gmra.mrb[64].mxu1 %v1527_v4 }
 0x240   : > { %2975 = vmatmul.mubr.msk.f32.gmra.mrb[62].mxu0 %vm1322_vm1, %v480_v28 }
 0x241   : > { %2977 = vmatprep.mubr.msk.f32.mxu0 %vm3980_vm3, %v3981_v61 }
 0x244   : > { %2978 = vmatmul.mubr.msk.f32.gmra.mrb[64].mxu0 %vm1322_vm1, %v481_v57 }
 0x292   : > { %v1995_v7 = vpop.f32.mrb[0].mxu1 }
 0x293   : > { %v1997_v20 = vpop.f32.mrb[1].mxu1  ;;  %v3130_v51 = vadd.f32 %v5990_v33, %v1995_v7 }
 0x296   : > { %v2000_v8 = vpop.f32.mrb[2].mxu1 }
 0x297   : > { %v2002_v10 = vpop.f32.mrb[3].mxu1  ;;  %v2455_v26 = vpop.f32.mrb[0].mxu0  ;;  %v3132_v35 = vadd.f32 %v5990_v33, %v2000_v8 }
 0x298   : > { %v3131_v12 = vadd.f32 %v3130_v51, %v2455_v26  ;;  %v2883_v19 = vpop.f32.mrb[1].mxu0 }
 0x29a   : > { %v2619_v37 = vmax.f32 %v3131_v12, 0.0  ;;  %v2005_v27 = vpop.f32.mrb[4].mxu1 }
 0x29b   : > { %v2007_v30 = vpop.f32.mrb[5].mxu1  ;;  %v2460_v39 = vpop.f32.mrb[2].mxu0  ;;  %v3134_v38 = vadd.f32 %v5990_v33, %v2005_v27 }
 0x29c   : > { %2652 = vst.msk [vmem:[#allocation2 + $0x2] sm:$0xff] %vm40_vm0, %v2619_v37  ;;  %v3133_v61 = vadd.f32 %v3132_v35, %v2460_v39  ;;  %v2886_v41 = vpop.f32.mrb[3].mxu0 }
 0x29e   : > { %v2620_v3 = vmax.f32 %v3133_v61, 0.0  ;;  %v2010_v17 = vpop.f32.mrb[6].mxu1 }
 0x29f   : > { %v2012_v44 = vpop.f32.mrb[7].mxu1  ;;  %v2465_v15 = vpop.f32.mrb[4].mxu0  ;;  %v3136_v40 = vadd.f32 %v5990_v33, %v2010_v17 }
 0x2a0   : > { %2653 = vst.msk [vmem:[#allocation2 + $0xa] sm:$0xff] %vm40_vm0, %v2620_v3  ;;  %v3135_v32 = vadd.f32 %v3134_v38, %v2465_v15  ;;  %v2889_v24 = vpop.f32.mrb[5].mxu0 }
 0x2a2   : > { %v2621_v13 = vmax.f32 %v3135_v32, 0.0  ;;  %v2015_v23 = vpop.f32.mrb[8].mxu1 }
 0x2a3   : > { %v2017_v14 = vpop.f32.mrb[9].mxu1  ;;  %v2470_v9 = vpop.f32.mrb[6].mxu0  ;;  %v3138_v31 = vadd.f32 %v5990_v33, %v2015_v23 }
 0x2a4   : > { %2654 = vst.msk [vmem:[#allocation2 + $0x12] sm:$0xff] %vm40_vm0, %v2621_v13  ;;  %v3137_v36 = vadd.f32 %v3136_v40, %v2470_v9  ;;  %v2892_v16 = vpop.f32.mrb[7].mxu0 }
 0x2a6   : > { %v2622_v49 = vmax.f32 %v3137_v36, 0.0  ;;  %v2020_v34 = vpop.f32.mrb[10].mxu1 }
 0x2a7   : > { %v2022_v59 = vpop.f32.mrb[11].mxu1  ;;  %v2475_v63 = vpop.f32.mrb[8].mxu0  ;;  %v3140_v62 = vadd.f32 %v5990_v33, %v2020_v34 }
 0x2a8   : > { %2655 = vst.msk [vmem:[#allocation2 + $0x1a] sm:$0xff] %vm40_vm0, %v2622_v49  ;;  %v3139_v60 = vadd.f32 %v3138_v31, %v2475_v63  ;;  %v2895_v47 = vpop.f32.mrb[9].mxu0 }
 0x2aa   : > { %v2623_v1 = vmax.f32 %v3139_v60, 0.0  ;;  %v2025_v43 = vpop.f32.mrb[12].mxu1 }
 0x2ab   : > { %v2687_v5 = vld [vmem:[#allocation2 + $0x1] ss:$3 sm:$0xff]  ;;  %v2709_v48 = vld [vmem:[#allocation2 + $0x2] ss:$3 sm:$0xff]  ;;  %v2027_v46 = vpop.f32.mrb[13].mxu1  ;;  %v2480_v42 = vpop.f32.mrb[10].mxu0  ;;  %v3142_v52 = vadd.f32 %v5990_v33, %v2025_v43 }
 0x2ac   : > { %v2752_v53 = vmax.f32 %v2687_v5, %v2709_v48  ;;  %2656 = vst.msk [vmem:[#allocation2 + $0x22] sm:$0xff] %vm40_vm0, %v2623_v1  ;;  %v2731_v6 = vld [vmem:[#allocation2 + $0x3] ss:$3 sm:$0xff]  ;;  %v3141_v0 = vadd.f32 %v3140_v62, %v2480_v42  ;;  %v2898_v58 = vpop.f32.mrb[11].mxu0 }
 0x2ae   : > { %v2763_v45 = vmax.f32 %v2752_v53, %v2731_v6  ;;  %v2030_v22 = vpop.f32.mrb[14].mxu1  ;;  %v2624_v18 = vmax.f32 %v3141_v0, 0.0 }
 0x2af   : > { %v2032_v21 = vpop.f32.mrb[15].mxu1  ;;  %v2485_v50 = vpop.f32.mrb[12].mxu0  ;;  %v3144_v29 = vadd.f32 %v5990_v33, %v2030_v22 }
 0x2b0   : > { %2776 = vst.msk [vmem:[%s5577_s21] sm:$0xff] %vm40_vm0, %v2763_v45  ;;  %v3143_v55 = vadd.f32 %v3142_v52, %v2485_v50  ;;  %v2901_v56 = vpop.f32.mrb[13].mxu0  ;;  %2657 = vst.msk [vmem:[#allocation2 + $0x2a] sm:$0xff] %vm40_vm0, %v2624_v18 }
 0x2b2   : > { %v2625_v2 = vmax.f32 %v3143_v55, 0.0  ;;  %v2035_v11 = vpop.f32.mrb[16].mxu1 }
 0x2b3   : > { %v2037_v25 = vpop.f32.mrb[17].mxu1  ;;  %v2490_v54 = vpop.f32.mrb[14].mxu0  ;;  %v3146_v57 = vadd.f32 %v5990_v33, %v2035_v11 }
 0x2b4   : > { %2658 = vst.msk [vmem:[#allocation2 + $0x32] sm:$0xff] %vm40_vm0, %v2625_v2  ;;  %v3145_v4 = vadd.f32 %v3144_v29, %v2490_v54  ;;  %v2904_v28 = vpop.f32.mrb[15].mxu0 }
 0x2b6   : > { %v2626_v7 = vmax.f32 %v3145_v4, 0.0  ;;  %v2040_v20 = vpop.f32.mrb[18].mxu1 }
 0x2b7   : > { %v2042_v51 = vpop.f32.mrb[19].mxu1  ;;  %v2495_v8 = vpop.f32.mrb[16].mxu0  ;;  %v2689_v10 = vld [vmem:[#allocation2 + $0x19] ss:$3 sm:$0xff]  ;;  %v2711_v26 = vld [vmem:[#allocation2 + $0x1a] ss:$3 sm:$0xff]  ;;  %v3148_v27 = vadd.f32 %v5990_v33, %v2040_v20 }
 0x2b8   : > { %2659 = vst.msk [vmem:[#allocation2 + $0x3a] sm:$0xff] %vm40_vm0, %v2626_v7  ;;  %v3147_v12 = vadd.f32 %v3146_v57, %v2495_v8  ;;  %v2753_v19 = vmax.f32 %v2689_v10, %v2711_v26  ;;  %v2907_v35 = vpop.f32.mrb[17].mxu0  ;;  %v2733_v37 = vld [vmem:[#allocation2 + $0x1b] ss:$3 sm:$0xff] }
 0x2ba   : > { %v2627_v30 = vmax.f32 %v3147_v12, 0.0  ;;  %v2045_v39 = vpop.f32.mrb[20].mxu1  ;;  %v2764_v61 = vmax.f32 %v2753_v19, %v2733_v37 }
 0x2bb   : > { %v2047_v41 = vpop.f32.mrb[21].mxu1  ;;  %v2500_v38 = vpop.f32.mrb[18].mxu0  ;;  %v3150_v44 = vadd.f32 %v5990_v33, %v2045_v39 }
 0x2bc   : > { %2660 = vst.msk [vmem:[#allocation2 + $0x42] sm:$0xff] %vm40_vm0, %v2627_v30  ;;  %v3149_v3 = vadd.f32 %v3148_v27, %v2500_v38  ;;  %v2910_v17 = vpop.f32.mrb[19].mxu0  ;;  %2777 = vst.msk [vmem:[%s5577_s21 + $0x8] sm:$0xff] %vm40_vm0, %v2764_v61 }
 0x2be   : > { %v2628_v15 = vmax.f32 %v3149_v3, 0.0  ;;  %v2050_v32 = vpop.f32.mrb[22].mxu1 }
 0x2bf   : > { %v2052_v24 = vpop.f32.mrb[23].mxu1  ;;  %v2505_v40 = vpop.f32.mrb[20].mxu0  ;;  %v3152_v31 = vadd.f32 %v5990_v33, %v2050_v32 }
 0x2c0   : > { %2661 = vst.msk [vmem:[#allocation2 + $0x4a] sm:$0xff] %vm40_vm0, %v2628_v15  ;;  %v3151_v13 = vadd.f32 %v3150_v44, %v2505_v40  ;;  %v2913_v23 = vpop.f32.mrb[21].mxu0 }
 0x2c2   : > { %v2629_v14 = vmax.f32 %v3151_v13, 0.0  ;;  %v2055_v9 = vpop.f32.mrb[24].mxu1 }
 0x2c3   : > { %v2691_v36 = vld [vmem:[#allocation2 + $0x31] ss:$3 sm:$0xff]  ;;  %v2713_v16 = vld [vmem:[#allocation2 + $0x32] ss:$3 sm:$0xff]  ;;  %v2057_v34 = vpop.f32.mrb[25].mxu1  ;;  %v2510_v59 = vpop.f32.mrb[22].mxu0  ;;  %v3154_v43 = vadd.f32 %v5990_v33, %v2055_v9 }
 0x2c4   : > { %v2754_v49 = vmax.f32 %v2691_v36, %v2713_v16  ;;  %2662 = vst.msk [vmem:[#allocation2 + $0x52] sm:$0xff] %vm40_vm0, %v2629_v14  ;;  %v2735_v63 = vld [vmem:[#allocation2 + $0x33] ss:$3 sm:$0xff]  ;;  %v3153_v60 = vadd.f32 %v3152_v31, %v2510_v59  ;;  %v2916_v47 = vpop.f32.mrb[23].mxu0 }
 0x2c6   : > { %v2765_v1 = vmax.f32 %v2754_v49, %v2735_v63  ;;  %v2060_v5 = vpop.f32.mrb[26].mxu1  ;;  %v2630_v48 = vmax.f32 %v3153_v60, 0.0 }
 0x2c7   : > { %v2062_v62 = vpop.f32.mrb[27].mxu1  ;;  %v2515_v53 = vpop.f32.mrb[24].mxu0  ;;  %v3156_v6 = vadd.f32 %v5990_v33, %v2060_v5 }
 0x2c8   : > { %2778 = vst.msk [vmem:[%s5577_s21 + $0x10] sm:$0xff] %vm40_vm0, %v2765_v1  ;;  %v3155_v46 = vadd.f32 %v3154_v43, %v2515_v53  ;;  %v2919_v42 = vpop.f32.mrb[25].mxu0  ;;  %2663 = vst.msk [vmem:[#allocation2 + $0x5a] sm:$0xff] %vm40_vm0, %v2630_v48 }
 0x2ca   : > { %v2631_v0 = vmax.f32 %v3155_v46, 0.0  ;;  %v2065_v58 = vpop.f32.mrb[28].mxu1 }
 0x2cb   : > { %v2067_v45 = vpop.f32.mrb[29].mxu1  ;;  %v2520_v52 = vpop.f32.mrb[26].mxu0  ;;  %v3158_v21 = vadd.f32 %v5990_v33, %v2065_v58 }
 0x2cc   : > { %2664 = vst.msk [vmem:[#allocation2 + $0x62] sm:$0xff] %vm40_vm0, %v2631_v0  ;;  %v3157_v22 = vadd.f32 %v3156_v6, %v2520_v52  ;;  %v2922_v18 = vpop.f32.mrb[27].mxu0 }
 0x2ce   : > { %v2632_v50 = vmax.f32 %v3157_v22, 0.0  ;;  %v2070_v55 = vpop.f32.mrb[30].mxu1 }
 0x2cf   : > { %v2072_v56 = vpop.f32.mrb[31].mxu1  ;;  %v2525_v29 = vpop.f32.mrb[28].mxu0  ;;  %v2693_v2 = vld [vmem:[#allocation2 + $0x49] ss:$3 sm:$0xff]  ;;  %v2715_v11 = vld [vmem:[#allocation2 + $0x4a] ss:$3 sm:$0xff]  ;;  %v3160_v57 = vadd.f32 %v5990_v33, %v2070_v55 }
 0x2d0   : > { %2665 = vst.msk [vmem:[#allocation2 + $0x6a] sm:$0xff] %vm40_vm0, %v2632_v50  ;;  %v3159_v25 = vadd.f32 %v3158_v21, %v2525_v29  ;;  %v2755_v54 = vmax.f32 %v2693_v2, %v2715_v11  ;;  %v2925_v4 = vpop.f32.mrb[29].mxu0  ;;  %v2737_v28 = vld [vmem:[#allocation2 + $0x4b] ss:$3 sm:$0xff] }
 0x2d2   : > { %v2633_v7 = vmax.f32 %v3159_v25, 0.0  ;;  %v2075_v20 = vpop.f32.mrb[32].mxu1  ;;  %v2766_v51 = vmax.f32 %v2755_v54, %v2737_v28 }
 0x2d3   : > { %v2077_v8 = vpop.f32.mrb[33].mxu1  ;;  %v2530_v10 = vpop.f32.mrb[30].mxu0  ;;  %v3162_v19 = vadd.f32 %v5990_v33, %v2075_v20 }
 0x2d4   : > { %2666 = vst.msk [vmem:[#allocation2 + $0x72] sm:$0xff] %vm40_vm0, %v2633_v7  ;;  %v3161_v26 = vadd.f32 %v3160_v57, %v2530_v10  ;;  %v2928_v12 = vpop.f32.mrb[31].mxu0  ;;  %2779 = vst.msk [vmem:[%s5577_s21 + $0x18] sm:$0xff] %vm40_vm0, %v2766_v51 }
 0x2d6   : > { %v2634_v35 = vmax.f32 %v3161_v26, 0.0  ;;  %v2080_v37 = vpop.f32.mrb[34].mxu1 }
 0x2d7   : > { %v2082_v27 = vpop.f32.mrb[35].mxu1  ;;  %v2535_v30 = vpop.f32.mrb[32].mxu0  ;;  %v3164_v44 = vadd.f32 %v5990_v33, %v2080_v37 }
 0x2d8   : > { %2667 = vst.msk [vmem:[#allocation2 + $0x7a] sm:$0xff] %vm40_vm0, %v2634_v35  ;;  %v3163_v39 = vadd.f32 %v3162_v19, %v2535_v30  ;;  %v2931_v61 = vpop.f32.mrb[33].mxu0 }
 0x2da   : > { %v2635_v41 = vmax.f32 %v3163_v39, 0.0  ;;  %v2085_v38 = vpop.f32.mrb[36].mxu1 }
 0x2db   : > { %v2695_v3 = vld [vmem:[#allocation2 + $0x61] ss:$3 sm:$0xff]  ;;  %v2717_v17 = vld [vmem:[#allocation2 + $0x62] ss:$3 sm:$0xff]  ;;  %v2087_v32 = vpop.f32.mrb[37].mxu1  ;;  %v2540_v24 = vpop.f32.mrb[34].mxu0  ;;  %v3166_v9 = vadd.f32 %v5990_v33, %v2085_v38 }
 0x2dc   : > { %v2756_v15 = vmax.f32 %v2695_v3, %v2717_v17  ;;  %2668 = vst.msk [vmem:[#allocation2 + $0x82] sm:$0xff] %vm40_vm0, %v2635_v41  ;;  %v2739_v40 = vld [vmem:[#allocation2 + $0x63] ss:$3 sm:$0xff]  ;;  %v3165_v13 = vadd.f32 %v3164_v44, %v2540_v24  ;;  %v2934_v23 = vpop.f32.mrb[35].mxu0 }
 0x2de   : > { %v2767_v14 = vmax.f32 %v2756_v15, %v2739_v40  ;;  %v2090_v36 = vpop.f32.mrb[38].mxu1  ;;  %v2636_v16 = vmax.f32 %v3165_v13, 0.0 }
 0x2df   : > { %v2092_v31 = vpop.f32.mrb[39].mxu1  ;;  %v2545_v49 = vpop.f32.mrb[36].mxu0  ;;  %v3168_v63 = vadd.f32 %v5990_v33, %v2090_v36 }
 0x2e0   : > { %2780 = vst.msk [vmem:[%s5577_s21 + $0x20] sm:$0xff] %vm40_vm0, %v2767_v14  ;;  %v3167_v34 = vadd.f32 %v3166_v9, %v2545_v49  ;;  %v2937_v59 = vpop.f32.mrb[37].mxu0  ;;  %2669 = vst.msk [vmem:[#allocation2 + $0x8a] sm:$0xff] %vm40_vm0, %v2636_v16 }
 0x2e2   : > { %v2637_v60 = vmax.f32 %v3167_v34, 0.0  ;;  %v2095_v47 = vpop.f32.mrb[40].mxu1 }
 0x2e3   : > { %v2097_v1 = vpop.f32.mrb[41].mxu1  ;;  %v2550_v43 = vpop.f32.mrb[38].mxu0  ;;  %v3170_v62 = vadd.f32 %v5990_v33, %v2095_v47 }
 0x2e4   : > { %2670 = vst.msk [vmem:[#allocation2 + $0x92] sm:$0xff] %vm40_vm0, %v2637_v60  ;;  %v3169_v5 = vadd.f32 %v3168_v63, %v2550_v43  ;;  %v2940_v48 = vpop.f32.mrb[39].mxu0 }
 0x2e6   : > { %v2638_v53 = vmax.f32 %v3169_v5, 0.0  ;;  %v2100_v46 = vpop.f32.mrb[42].mxu1 }
 0x2e7   : > { %v2102_v42 = vpop.f32.mrb[43].mxu1  ;;  %v2555_v6 = vpop.f32.mrb[40].mxu0  ;;  %v2697_v0 = vld [vmem:[#allocation2 + $0x79] ss:$3 sm:$0xff]  ;;  %v2719_v58 = vld [vmem:[#allocation2 + $0x7a] ss:$3 sm:$0xff]  ;;  %v3172_v21 = vadd.f32 %v5990_v33, %v2100_v46 }
 0x2e8   : > { %2671 = vst.msk [vmem:[#allocation2 + $0x9a] sm:$0xff] %vm40_vm0, %v2638_v53  ;;  %v3171_v45 = vadd.f32 %v3170_v62, %v2555_v6  ;;  %v2757_v52 = vmax.f32 %v2697_v0, %v2719_v58  ;;  %v2943_v22 = vpop.f32.mrb[41].mxu0  ;;  %v2741_v18 = vld [vmem:[#allocation2 + $0x7b] ss:$3 sm:$0xff] }
 0x2ea   : > { %v2639_v50 = vmax.f32 %v3171_v45, 0.0  ;;  %v2105_v55 = vpop.f32.mrb[44].mxu1  ;;  %v2768_v56 = vmax.f32 %v2757_v52, %v2741_v18 }
 0x2eb   : > { %v2107_v29 = vpop.f32.mrb[45].mxu1  ;;  %v2560_v2 = vpop.f32.mrb[42].mxu0  ;;  %v3174_v54 = vadd.f32 %v5990_v33, %v2105_v55 }
 0x2ec   : > { %2672 = vst.msk [vmem:[#allocation2 + $0xa2] sm:$0xff] %vm40_vm0, %v2639_v50  ;;  %v3173_v11 = vadd.f32 %v3172_v21, %v2560_v2  ;;  %v2946_v25 = vpop.f32.mrb[43].mxu0  ;;  %2781 = vst.msk [vmem:[%s5577_s21 + $0x28] sm:$0xff] %vm40_vm0, %v2768_v56 }
 0x2ee   : > { %v2640_v4 = vmax.f32 %v3173_v11, 0.0  ;;  %v2110_v28 = vpop.f32.mrb[46].mxu1 }
 0x2ef   : > { %v2112_v57 = vpop.f32.mrb[47].mxu1  ;;  %v2565_v7 = vpop.f32.mrb[44].mxu0  ;;  %v3176_v19 = vadd.f32 %v5990_v33, %v2110_v28 }
 0x2f0   : > { %2673 = vst.msk [vmem:[#allocation2 + $0xaa] sm:$0xff] %vm40_vm0, %v2640_v4  ;;  %v3175_v20 = vadd.f32 %v3174_v54, %v2565_v7  ;;  %v2949_v51 = vpop.f32.mrb[45].mxu0 }
 0x2f2   : > { %v2641_v8 = vmax.f32 %v3175_v20, 0.0  ;;  %v2115_v10 = vpop.f32.mrb[48].mxu1 }
 0x2f3   : > { %v2699_v26 = vld [vmem:[#allocation2 + $0x91] ss:$3 sm:$0xff]  ;;  %v2721_v12 = vld [vmem:[#allocation2 + $0x92] ss:$3 sm:$0xff]  ;;  %v2117_v37 = vpop.f32.mrb[49].mxu1  ;;  %v2570_v27 = vpop.f32.mrb[46].mxu0  ;;  %v3178_v38 = vadd.f32 %v5990_v33, %v2115_v10 }
 0x2f4   : > { %v2758_v35 = vmax.f32 %v2699_v26, %v2721_v12  ;;  %2674 = vst.msk [vmem:[#allocation2 + $0xb2] sm:$0xff] %vm40_vm0, %v2641_v8  ;;  %v2743_v30 = vld [vmem:[#allocation2 + $0x93] ss:$3 sm:$0xff]  ;;  %v3177_v39 = vadd.f32 %v3176_v19, %v2570_v27  ;;  %v2952_v61 = vpop.f32.mrb[47].mxu0 }
 0x2f6   : > { %v2769_v41 = vmax.f32 %v2758_v35, %v2743_v30  ;;  %v2120_v3 = vpop.f32.mrb[50].mxu1  ;;  %v2642_v17 = vmax.f32 %v3177_v39, 0.0 }
 0x2f7   : > { %v2122_v44 = vpop.f32.mrb[51].mxu1  ;;  %v2575_v15 = vpop.f32.mrb[48].mxu0  ;;  %v3180_v40 = vadd.f32 %v5990_v33, %v2120_v3 }
 0x2f8   : > { %2782 = vst.msk [vmem:[%s5577_s21 + $0x30] sm:$0xff] %vm40_vm0, %v2769_v41  ;;  %v3179_v32 = vadd.f32 %v3178_v38, %v2575_v15  ;;  %v2955_v24 = vpop.f32.mrb[49].mxu0  ;;  %2675 = vst.msk [vmem:[#allocation2 + $0xba] sm:$0xff] %vm40_vm0, %v2642_v17 }
 0x2fa   : > { %v2643_v13 = vmax.f32 %v3179_v32, 0.0  ;;  %v2125_v23 = vpop.f32.mrb[52].mxu1 }
 0x2fb   : > { %v2127_v14 = vpop.f32.mrb[53].mxu1  ;;  %v2580_v9 = vpop.f32.mrb[50].mxu0  ;;  %v3182_v31 = vadd.f32 %v5990_v33, %v2125_v23 }
 0x2fc   : > { %2676 = vst.msk [vmem:[#allocation2 + $0xc2] sm:$0xff] %vm40_vm0, %v2643_v13  ;;  %v3181_v36 = vadd.f32 %v3180_v40, %v2580_v9  ;;  %v2958_v16 = vpop.f32.mrb[51].mxu0 }
 0x2fe   : > { %v2644_v49 = vmax.f32 %v3181_v36, 0.0  ;;  %v2130_v34 = vpop.f32.mrb[54].mxu1 }
 0x2ff   : > { %v2132_v59 = vpop.f32.mrb[55].mxu1  ;;  %v2585_v63 = vpop.f32.mrb[52].mxu0  ;;  %v2701_v60 = vld [vmem:[#allocation2 + $0xa9] ss:$3 sm:$0xff]  ;;  %v2723_v47 = vld [vmem:[#allocation2 + $0xaa] ss:$3 sm:$0xff]  ;;  %v3184_v62 = vadd.f32 %v5990_v33, %v2130_v34 }
 0x300   : > { %2677 = vst.msk [vmem:[#allocation2 + $0xca] sm:$0xff] %vm40_vm0, %v2644_v49  ;;  %v3183_v1 = vadd.f32 %v3182_v31, %v2585_v63  ;;  %v2759_v43 = vmax.f32 %v2701_v60, %v2723_v47  ;;  %v2961_v5 = vpop.f32.mrb[53].mxu0  ;;  %v2745_v48 = vld [vmem:[#allocation2 + $0xab] ss:$3 sm:$0xff] }
 0x302   : > { %v2645_v53 = vmax.f32 %v3183_v1, 0.0  ;;  %v2135_v46 = vpop.f32.mrb[56].mxu1  ;;  %v2770_v42 = vmax.f32 %v2759_v43, %v2745_v48 }
 0x303   : > { %v2137_v6 = vpop.f32.mrb[57].mxu1  ;;  %v2590_v0 = vpop.f32.mrb[54].mxu0  ;;  %v3186_v52 = vadd.f32 %v5990_v33, %v2135_v46 }
 0x304   : > { %2678 = vst.msk [vmem:[#allocation2 + $0xd2] sm:$0xff] %vm40_vm0, %v2645_v53  ;;  %v3185_v58 = vadd.f32 %v3184_v62, %v2590_v0  ;;  %v2964_v45 = vpop.f32.mrb[55].mxu0  ;;  %2783 = vst.msk [vmem:[%s5577_s21 + $0x38] sm:$0xff] %vm40_vm0, %v2770_v42 }
 0x306   : > { %v2646_v22 = vmax.f32 %v3185_v58, 0.0  ;;  %v2140_v18 = vpop.f32.mrb[58].mxu1 }
 0x307   : > { %v2142_v21 = vpop.f32.mrb[59].mxu1  ;;  %v2595_v50 = vpop.f32.mrb[56].mxu0  ;;  %v3188_v54 = vadd.f32 %v5990_v33, %v2140_v18 }
 0x308   : > { %2679 = vst.msk [vmem:[#allocation2 + $0xda] sm:$0xff] %vm40_vm0, %v2646_v22  ;;  %v3187_v55 = vadd.f32 %v3186_v52, %v2595_v50  ;;  %v2967_v56 = vpop.f32.mrb[57].mxu0 }
 0x30a   : > { %v2647_v29 = vmax.f32 %v3187_v55, 0.0  ;;  %v2145_v2 = vpop.f32.mrb[60].mxu1 }
 0x30b   : > { %v2703_v11 = vld [vmem:[#allocation2 + $0xc1] ss:$3 sm:$0xff]  ;;  %v2725_v25 = vld [vmem:[#allocation2 + $0xc2] ss:$3 sm:$0xff]  ;;  %v2147_v28 = vpop.f32.mrb[61].mxu1  ;;  %v2600_v57 = vpop.f32.mrb[58].mxu0  ;;  %v3190_v10 = vadd.f32 %v5990_v33, %v2145_v2 }
 0x30c   : > { %v2760_v4 = vmax.f32 %v2703_v11, %v2725_v25  ;;  %2680 = vst.msk [vmem:[#allocation2 + $0xe2] sm:$0xff] %vm40_vm0, %v2647_v29  ;;  %v2747_v7 = vld [vmem:[#allocation2 + $0xc3] ss:$3 sm:$0xff]  ;;  %v3189_v20 = vadd.f32 %v3188_v54, %v2600_v57  ;;  %v2970_v51 = vpop.f32.mrb[59].mxu0 }
 0x30e   : > { %v2771_v8 = vmax.f32 %v2760_v4, %v2747_v7  ;;  %v2150_v26 = vpop.f32.mrb[62].mxu1  ;;  %v2648_v12 = vmax.f32 %v3189_v20, 0.0 }
 0x30f   : > { %v2152_v19 = vpop.f32.mrb[63].mxu1  ;;  %v2605_v35 = vpop.f32.mrb[60].mxu0  ;;  %v3192_v30 = vadd.f32 %v5990_v33, %v2150_v26 }
 0x310   : > { %2784 = vst.msk [vmem:[%s5577_s21 + $0x40] sm:$0xff] %vm40_vm0, %v2771_v8  ;;  %v3191_v37 = vadd.f32 %v3190_v10, %v2605_v35  ;;  %v2973_v27 = vpop.f32.mrb[61].mxu0  ;;  %2681 = vst.msk [vmem:[#allocation2 + $0xea] sm:$0xff] %vm40_vm0, %v2648_v12 }
 0x312   : > { %v2649_v39 = vmax.f32 %v3191_v37, 0.0  ;;  %v2155_v61 = vpop.f32.mrb[64].mxu1 }
 0x313   : > { %v2157_v41 = vpop.f32.mrb[65].mxu1  ;;  %v2610_v38 = vpop.f32.mrb[62].mxu0  ;;  %v3194_v44 = vadd.f32 %v5990_v33, %v2155_v61 }
 0x314   : > { %2682 = vst.msk [vmem:[#allocation2 + $0xf2] sm:$0xff] %vm40_vm0, %v2649_v39  ;;  %v3193_v3 = vadd.f32 %v3192_v30, %v2610_v38  ;;  %v2976_v17 = vpop.f32.mrb[63].mxu0 }
 0x316   : > { %v2650_v15 = vmax.f32 %v3193_v3, 0.0 }
 0x317   : > { %v2615_v32 = vpop.f32.mrb[64].mxu0  ;;  %v2705_v24 = vld [vmem:[#allocation2 + $0xd9] ss:$3 sm:$0xff]  ;;  %v2727_v40 = vld [vmem:[#allocation2 + $0xda] ss:$3 sm:$0xff] }
 0x318   : > { %2683 = vst.msk [vmem:[#allocation2 + $0xfa] sm:$0xff] %vm40_vm0, %v2650_v15  ;;  %v3195_v13 = vadd.f32 %v3194_v44, %v2615_v32  ;;  %v2761_v23 = vmax.f32 %v2705_v24, %v2727_v40  ;;  %v2979_v14 = vpop.f32.mrb[65].mxu0  ;;  %v2749_v9 = vld [vmem:[#allocation2 + $0xdb] ss:$3 sm:$0xff] }
 0x31a   : > { %v2651_v36 = vmax.f32 %v3195_v13, 0.0  ;;  %v2772_v16 = vmax.f32 %v2761_v23, %v2749_v9 }
 0x31c   : > { %2685 = vst.msk [vmem:[#allocation2 + $0x102] sm:$0x3f] %vm2684_vm4, %v2651_v36 }
 0x31d   : > { %2785 = vst.msk [vmem:[%s5577_s21 + $0x48] sm:$0xff] %vm40_vm0, %v2772_v16 }
 0x322   :  { %180 = sbr.rel (!%p178_p2) target bundleno = 107 (0x6b), region = 82 }
 0x323   : > { %v2707_v31 = vld [vmem:[#allocation2 + $0xf1] ss:$3 sm:$0xff]  ;;  %v2729_v49 = vld [vmem:[#allocation2 + $0xf2] ss:$3 sm:$0xff]  ;;  %v2751_v59 = vld [vmem:[#allocation2 + $0xf3] ss:$3 sm:$0xff] }
 0x324   : > { %v2762_v34 = vmax.f32 %v2707_v31, %v2729_v49 }
 0x326   : > { %v2773_v63 = vmax.f32 %v2762_v34, %v2751_v59 }
 0x328   : > { %2786 = vst.msk [vmem:[%s5577_s21 + $0x50] sm:$0xff] %vm40_vm0, %v2773_v63 }
 0x329   :  { %2791 = vsyncpa [#allocation4], 1 }
 0x32a   :  { %2792 = vsyncpa [#allocation6], 1 }

// kernel: one_cnnc_forward.5
= control target key start
LH: loop header
LB: loop body
LE: loop exit
PB: predicated region body
PF: predicated region fallthrough
CT: control target
= control target key end

     0   :  { %10 = vsyncpa [#allocation4], 0  ;;  %s8960_s0 = inlined_call_operand.vmem [shape: f32[2,5632], index: 0, kind: input, shape index: {}]   ;;  %s8961_s1 = inlined_call_operand.hbm [shape: bf16[5632,1024], index: 1, kind: input, shape index: {}]   ;;  %s8962_s2 = inlined_call_operand.hbm [shape: f32[1,1024], index: 2, kind: input, shape index: {}]   ;;  %s8963_s3 = inlined_call_operand.vmem [shape: f32[1024,128], index: 3, kind: input, shape index: {}]   ;;  %s8964_s4 = inlined_call_operand.vmem [shape: f32[1,128], index: 4, kind: input, shape index: {}]   ;;  %s8965_s5 = inlined_call_operand.hbm [shape: f32[2,128], index: 5, kind: output, shape index: {}]  }
   0x1   :  { %12 = vsyncpa [#allocation4 + $0x1], 0 }
   0x2   :  { %13 = vsyncpa [#allocation7], 0 }
   0x3   :  { %14 = vsyncpa [#allocation5], 0  ;;  %s7532_s18 = smov 0   ;;  %s7534_s19 = smov 0  }
   0x4   :  { %s7536_s20 = smov 0   ;;  %s7538_s21 = smov 0  }
   0x5 LB: > { %s7551_s22 = sadd.s32 4294967295, %s7492_s21   ;;  %s7554_s23 = sadd.s32 1, %s7492_s21   ;;  %s7492_s21 = sphi %s7538_s21, %s8984_s21   ;;  %s7488_s20 = sphi %s7536_s20, %s8983_s20   ;;  %s7484_s19 = sphi %s7534_s19, %s8982_s19   ;;  %s7480_s18 = sphi %s7532_s18, %s8981_s18  }
   0x6   : > { %s50_s24 = ssub.s32 %s7492_s21, %s7554_s23  ;;  %s53_s25 = sadd.s32 1, %s7488_s20 }
   0x7   : > { %p51_p0 = scmp.eq.s32.totalorder %s50_s24, 0  ;;  %p60_p1 = scmp.ne.s32.totalorder %s7488_s20, %s7484_s19 }
   0x8   : > { %p61_p2 = scmp.eq.s32.totalorder %s7492_s21, 0  ;;  %p66_p3 = scmp.ne.s32.totalorder %s7484_s19, %s7480_s18 }
   0x9   : > { %s7564_s26 = scalar_select %p51_p0, %s7488_s20, %s53_s25  }
   0xa   : > { %p7566_p4 = por %p61_p2, %p60_p1  ;;  %p8966_p5 = scmp.eq.s32.totalorder %s7551_s22, 0 }
   0xb   : > { %p6229_p6 = scmp.ge.s32.totalorder %s7492_s21, 1  ;;  %p161_p7 = scmp.lt.s32.totalorder %s7492_s21, 5 }
   0xc   : > { %p7575_p8 = por %p8966_p5, %p66_p3  ;;  %s7494_s30 = smov [#allocation6]  }
   0xd   : > { %p7580_p10 = pnand %p6229_p6, %p161_p7  ;;  %s174_s6 = sshll.u32 %s7494_s30, 4  ;;  %s175_s6 = int_to_ptr.vmem [resolvable:$true] %s174_s6 }
   0xe   : > { %s8971_s28 = scalar_select %p7575_p8, 1, 0 }
   0xf   : > { %s8972_s29 = scalar_select %p7580_p10, 1, 0 }
  0x10   : > { %p7311_p11 = pneg %p7580_p10  ;;  %p7320_p12 = scmp.lt.s32.totalorder %s7492_s21, 4 }
  0x11   : > { %s200_s7 = sand.u32 1, %s7488_s20   ;;  %s6950_s11 = smul.u32 90112, %s7492_s21 }
  0x12   : > { %p7590_p13 = pnand %p7311_p11, %p8966_p5  ;;  %p7596_p0 = pnand %p7320_p12, %p7566_p4 }
  0x13   : > { %s7299_s10 = smul.u32 5632, %s200_s7  ;;  %s7366_s14 = scalar_lea.hbm %s8962_s2, 128 }
  0x14   : > { %s8974_s9 = scalar_select %p7596_p0, 1, 0 }
  0x15   : > { %p7367_p1 = scmp.ne.s32.totalorder %s8962_s2, %s7366_s14  ;;  %p7368_p2 = pneg %p7590_p13 }
  0x16   : > { %p7373_p4 = scmp.lt.u32.totalorder %s7366_s14, %s8962_s2 }
  0x17   : > { %p7369_p3 = pnand %p7368_p2, %p7367_p1 }
  0x19   : > { %p7370_p6 = pneg %p7369_p3 }
  0x1b   : > { %p7375_p7 = pnand %p7373_p4, %p7370_p6 }
  0x1d   : > { %7378 = shalt.err (!%p7375_p7)
}
  0x1e   : > { %s7379_s24 = scalar_lea.vmem %s175_s6, 128  ;;  %p7387_p5 = scmp.lt.s32.totalorder %s175_s6, %s175_s6 }
  0x1f   : > { %p7380_p11 = scmp.ne.s32.totalorder %s175_s6, %s7379_s24  ;;  %p7388_p8 = scmp.lt.s32.totalorder %s7379_s24, %s7379_s24 }
  0x21   : > { %p7382_p12 = pnand %p7380_p11, %p7368_p2  ;;  %p7389_p10 = por %p7388_p8, %p7387_p5 }
  0x23   : > { %p7383_p9 = pneg %p7382_p12 }
  0x25   : > { %p7390_p0 = pnand %p7389_p10, %p7383_p9 }
  0x27   : > { %7393 = shalt.err (!%p7390_p0)
}
  0x28   : > { %7314 = dma.hbm_to_vmem [thread:$0]  (!%p7590_p13), %s8962_s2, 128, %s175_s6, [#allocation7]  }
  0x29   : > { %s7620_s12 = scalar_lea.hbm %s8961_s1, %s6950_s11  ;;  %s204_s13 = scalar_lea.vmem [#allocation3], %s7299_s10 }
  0x2a   : > { %s212_s14 = sshll.u32 %s204_s13, 4  ;;  %s7624_s8 = scalar_lea.sflag [#allocation4], %s200_s7  ;;  %s7622_s14 = int_to_ptr.vmem [resolvable:$true] %s212_s14 }
  0x2b   : > { %s7394_s15 = scalar_lea.hbm %s7620_s12, 90112  ;;  %p8975_p8 = scmp.ne.s32.totalorder %s8974_s9, 0 }
  0x2c   : > { %p7395_p5 = scmp.ne.s32.totalorder %s7620_s12, %s7394_s15  ;;  %s7399_s16 = scalar_lea.hbm %s8961_s1, 360448 }
  0x2d   : > { %p7396_p9 = pneg %p8975_p8  ;;  %p7400_p0 = scmp.lt.u32.totalorder %s7620_s12, %s8961_s1 }
  0x2e   : > { %p7401_p1 = scmp.lt.u32.totalorder %s7399_s16, %s7394_s15  ;;  %p7403_p3 = scmp.lt.u32.totalorder %s7394_s15, %s7620_s12 }
  0x2f   : > { %p7397_p10 = pnand %p7396_p9, %p7395_p5 }
  0x30   : > { %p7402_p2 = por %p7401_p1, %p7400_p0 }
  0x31   : > { %p7398_p13 = pneg %p7397_p10 }
  0x32   : > { %p7404_p6 = por %p7403_p3, %p7402_p2 }
  0x34   : > { %p7405_p4 = pnand %p7404_p6, %p7398_p13 }
  0x36   : > { %7408 = shalt.err (!%p7405_p4)
}
  0x37   : > { %s7409_s7 = scalar_lea.vmem %s7622_s14, 90112  ;;  %s7495_s10 = smov [#allocation3]  }
  0x38   : > { %p7410_p7 = scmp.ne.s32.totalorder %s7622_s14, %s7409_s7  ;;  %s7414_s24 = sshll.u32 %s7495_s10, 4  ;;  %s7415_s24 = int_to_ptr.vmem [resolvable:$false] %s7414_s24 }
  0x39   : > { %s7416_s21 = scalar_lea.vmem %s7415_s24, 180224  ;;  %p7417_p5 = scmp.lt.s32.totalorder %s7622_s14, %s7415_s24 }
  0x3a   : > { %p7412_p11 = pnand %p7410_p7, %p7396_p9  ;;  %p7418_p10 = scmp.lt.s32.totalorder %s7416_s21, %s7409_s7 }
  0x3c   : > { %p7413_p12 = pneg %p7412_p11  ;;  %p7419_p0 = por %p7418_p10, %p7417_p5 }
  0x3e   : > { %p7420_p1 = pnand %p7419_p0, %p7413_p12 }
  0x40   : > { %7423 = shalt.err (!%p7420_p1)
}
  0x41   : > { %s7496_s25 = smov 512   ;;  %s7497_s27 = smov 32  }
  0x42   : > { %7318 = dma.hbm_to_vmem [thread:$0]  (!%p8975_p8), %s7620_s12, 90112, %s7622_s14, %s7624_s8, %s7496_s25, %s7496_s25, %s7497_s27  }
  0x43   : > { %p8976_p9 = scmp.ne.s32.totalorder %s8972_s29, 0 }
  0x44   : > { %s226_s30 = sand.u32 (!%p8976_p9), 1, %s7484_s19   ;;  %p8977_p13 = scmp.ne.s32.totalorder (!%p8976_p9), %s8971_s28, 0 }
  0x45   : > { %224 = sbr.rel (%p8976_p9) target bundleno = 1308 (0x51c), region = 40  ;;  %s227_s15 = scalar_lea.sflag (!%p8976_p9), [#allocation4], %s226_s30 }
  0x46   : > { %s7300_s13 = smul.u32 (!%p8976_p9), 5632, %s226_s30 }
  0x48   : > { %s7655_s6 = scalar_lea.vmem (!%p8976_p9), [#allocation3], %s7300_s13 }
  0x4c   : > { %7467 = dma.done.wait (%p8977_p13), %s227_s15, 90112  }
  0x4d   : > { %7469 = vsyncadd (%p8977_p13), %s227_s15, 4294877184  ;;  %p8978_p2 = scmp.eq.s32.totalorder %s7551_s22, 0 }
  0x4f   : > { %7471 = dma.done.wait (%p8978_p2), [#allocation7], 128   ;;  %p8979_p8 = pmov %p8978_p2 }
  0x50   : > { %s261_s29 = smul.u32 11, %s7551_s22  ;;  %p8980_p6 = scmp.ne.s32.totalorder %s7551_s22, 0 }
  0x51   : > { %7473 = vsyncadd (%p8979_p8), [#allocation7], 4294967168  ;;  %v7498_v0 = vmov (!%p8980_p6), 0.0  }
  0x52   : > { %p262_p3 = scmp.lt.s32.totalorder %s261_s29, 43  ;;  %272 = sbr.rel (%p8980_p6) target bundleno = 89 (0x59), region = 52  ;;  %273 = vst [vmem:[#allocation2] sm:$0xff] (!%p8980_p6), %v7498_v0  ;;  %274 = vst [vmem:[#allocation2 + $0x8] sm:$0xff] (!%p8980_p6), %v7498_v0 }
  0x54   : > { %s8986_s29 = smov (!%p262_p3, %s261_s29), 43 }
  0x55   : > { %s6236_s9 = sshll.u32 %s8986_s29, 1 }
  0x56   : > { %s7669_s8 = scalar_lea.vmem %s8960_s0, %s6236_s9 }
  0x59 PF: > { %v275_v1 = vld [vmem:[%s7655_s6] sm:$0xff]  ;;  %v276_v3 = vld [vmem:[%s7655_s6 + $0x8] sm:$0xff]  ;;  %v7499_v33 = vmov 1983009808   ;;  %v989_v35 = vlaneseq  ;;  %v7707_v60 = vld [vmem:[%s7669_s8] sm:$0xff]  ;;  %p6942_p4 = scmp.ne.s32.totalorder %s7551_s22, 3 }
  0x5a   : > { %v279_v2 = vld [vmem:[%s7655_s6 + $0x20] sm:$0xff]  ;;  %v280_v5 = vld [vmem:[%s7655_s6 + $0x28] sm:$0xff]  ;;  %v987_v34 = vunpack.c.l.s4 %v7499_v33 }
  0x5b   : > { %v6239_v4 = vcombine.high %v275_v1, %v279_v2  ;;  %v6238_v6 = vcombine.low %v275_v1, %v279_v2  ;;  %v283_v7 = vld [vmem:[%s7655_s6 + $0x40] sm:$0xff]  ;;  %v6241_v9 = vcombine.high %v276_v3, %v280_v5  ;;  %v6240_v10 = vcombine.low %v276_v3, %v280_v5  ;;  %v284_v12 = vld [vmem:[%s7655_s6 + $0x48] sm:$0xff] }
  0x5c   : > { %v287_v8 = vld [vmem:[%s7655_s6 + $0x60] sm:$0xff]  ;;  %v288_v13 = vld [vmem:[%s7655_s6 + $0x68] sm:$0xff]  ;;  %v988_v44 = vunpack.c.0.s8 %v987_v34  ;;  %v7695_v45 = vshrl.u32 %v989_v35, 7 }
  0x5d   : > { %v6247_v11 = vcombine.high %v283_v7, %v287_v8  ;;  %v291_v14 = vld [vmem:[%s7655_s6 + $0x80] sm:$0xff]  ;;  %4579 = vmatprep.subr.bf16.mxu0 %v6239_v4  ;;  %v6249_v15 = vcombine.high %v284_v12, %v288_v13  ;;  %v292_v17 = vld [vmem:[%s7655_s6 + $0x88] sm:$0xff]  ;;  %4825 = vmatprep.subr.bf16.mxu1 %v6241_v9  ;;  %v6246_v19 = vcombine.low %v283_v7, %v287_v8 }
  0x5e   : > { %v295_v16 = vld [vmem:[%s7655_s6 + $0xa0] sm:$0xff]  ;;  %v296_v18 = vld [vmem:[%s7655_s6 + $0xa8] sm:$0xff]  ;;  %4580 = vmatpush1.bf16.msra.mxu0 %v6238_v6  ;;  %4826 = vmatpush1.bf16.msra.mxu1 %v6240_v10  ;;  %v6248_v20 = vcombine.low %v284_v12, %v288_v13  ;;  %v7702_v54 = vsub.s32 %v988_v44, %v7695_v45 }
  0x5f   : > { %4581 = vmatprep.subr.bf16.mxu0 %v6247_v11  ;;  %v6255_v21 = vcombine.high %v291_v14, %v295_v16  ;;  %4827 = vmatprep.subr.bf16.mxu1 %v6249_v15  ;;  %v6257_v22 = vcombine.high %v292_v17, %v296_v18  ;;  %v299_v23 = vld [vmem:[%s7655_s6 + $0xc0] sm:$0xff]  ;;  %v300_v25 = vld [vmem:[%s7655_s6 + $0xc8] sm:$0xff]  ;;  %v6254_v27 = vcombine.low %v291_v14, %v295_v16 }
  0x60   : > { %v303_v24 = vld [vmem:[%s7655_s6 + $0xe0] sm:$0xff]  ;;  %v304_v26 = vld [vmem:[%s7655_s6 + $0xe8] sm:$0xff]  ;;  %v6256_v28 = vcombine.low %v292_v17, %v296_v18  ;;  %v7713_v0 = vrot.slane %v7707_v60, %v7702_v54 }
  0x61   : > { %v6263_v29 = vcombine.high %v299_v23, %v303_v24  ;;  %v6265_v30 = vcombine.high %v300_v25, %v304_v26  ;;  %v307_v31 = vld [vmem:[%s7655_s6 + $0x100] sm:$0xff]  ;;  %v308_v36 = vld [vmem:[%s7655_s6 + $0x108] sm:$0xff]  ;;  %v6262_v38 = vcombine.low %v299_v23, %v303_v24  ;;  %v6264_v39 = vcombine.low %v300_v25, %v304_v26 }
  0x62   : > { %4582 = vmatpush1.bf16.msra.mxu0 %v6246_v19  ;;  %4828 = vmatpush1.bf16.msra.mxu1 %v6248_v20  ;;  %v311_v32 = vld [vmem:[%s7655_s6 + $0x120] sm:$0xff]  ;;  %v312_v37 = vld [vmem:[%s7655_s6 + $0x128] sm:$0xff]  ;;  %v1000_v4 = vcombine.high %v7713_v0, %v7713_v0 }
  0x63   : > { %4583 = vmatprep.subr.bf16.mxu0 %v6255_v21  ;;  %4829 = vmatprep.subr.bf16.mxu1 %v6257_v22  ;;  %v6271_v40 = vcombine.high %v307_v31, %v311_v32  ;;  %v6273_v41 = vcombine.high %v308_v36, %v312_v37  ;;  %v315_v42 = vld [vmem:[%s7655_s6 + $0x140] sm:$0xff]  ;;  %v316_v46 = vld [vmem:[%s7655_s6 + $0x148] sm:$0xff]  ;;  %v6270_v48 = vcombine.low %v307_v31, %v311_v32 }
  0x64   : > { %v319_v43 = vld [vmem:[%s7655_s6 + $0x160] sm:$0xff]  ;;  %v320_v47 = vld [vmem:[%s7655_s6 + $0x168] sm:$0xff]  ;;  %v6272_v49 = vcombine.low %v308_v36, %v312_v37  ;;  %v7721_v10 = vpack.c.bf16 %v1000_v4, %v1000_v4 }
  0x65   : > { %v6279_v50 = vcombine.high %v315_v42, %v319_v43  ;;  %v6281_v51 = vcombine.high %v316_v46, %v320_v47  ;;  %v323_v52 = vld [vmem:[%s7655_s6 + $0x180] sm:$0xff]  ;;  %v324_v55 = vld [vmem:[%s7655_s6 + $0x188] sm:$0xff]  ;;  %v6278_v57 = vcombine.low %v315_v42, %v319_v43  ;;  %v6280_v58 = vcombine.low %v316_v46, %v320_v47 }
  0x66   : > { %4584 = vmatpush1.bf16.msra.mxu0 %v6254_v27  ;;  %4830 = vmatpush1.bf16.msra.mxu1 %v6256_v28  ;;  %v327_v53 = vld [vmem:[%s7655_s6 + $0x1a0] sm:$0xff]  ;;  %v328_v56 = vld [vmem:[%s7655_s6 + $0x1a8] sm:$0xff] }
  0x67   : > { %4585 = vmatprep.subr.bf16.mxu0 %v6263_v29  ;;  %4831 = vmatprep.subr.bf16.mxu1 %v6265_v30  ;;  %v6287_v59 = vcombine.high %v323_v52, %v327_v53  ;;  %v6289_v61 = vcombine.high %v324_v55, %v328_v56  ;;  %v331_v62 = vld [vmem:[%s7655_s6 + $0x1c0] sm:$0xff]  ;;  %v332_v1 = vld [vmem:[%s7655_s6 + $0x1c8] sm:$0xff]  ;;  %v6286_v3 = vcombine.low %v323_v52, %v327_v53 }
  0x68   : > { %v335_v63 = vld [vmem:[%s7655_s6 + $0x1e0] sm:$0xff]  ;;  %v336_v2 = vld [vmem:[%s7655_s6 + $0x1e8] sm:$0xff]  ;;  %v6288_v5 = vcombine.low %v324_v55, %v328_v56  ;;  %4611 = vmatprep.mubr.bf16.mxu0 %v7721_v10  ;;  %4857 = vmatprep.mubr.bf16.mxu1 %v7721_v10 }
  0x69   : > { %v6295_v6 = vcombine.high %v331_v62, %v335_v63  ;;  %v6297_v7 = vcombine.high %v332_v1, %v336_v2  ;;  %v339_v8 = vld [vmem:[%s7655_s6 + $0x200] sm:$0xff]  ;;  %v340_v11 = vld [vmem:[%s7655_s6 + $0x208] sm:$0xff]  ;;  %v6294_v13 = vcombine.low %v331_v62, %v335_v63  ;;  %v6296_v14 = vcombine.low %v332_v1, %v336_v2 }
  0x6a   : > { %4586 = vmatpush1.bf16.msra.mxu0 %v6262_v38  ;;  %4832 = vmatpush1.bf16.msra.mxu1 %v6264_v39  ;;  %v343_v9 = vld [vmem:[%s7655_s6 + $0x220] sm:$0xff]  ;;  %v344_v12 = vld [vmem:[%s7655_s6 + $0x228] sm:$0xff] }
  0x6b   : > { %4587 = vmatprep.subr.bf16.mxu0 %v6271_v40  ;;  %4833 = vmatprep.subr.bf16.mxu1 %v6273_v41  ;;  %v6303_v15 = vcombine.high %v339_v8, %v343_v9  ;;  %v6305_v16 = vcombine.high %v340_v11, %v344_v12  ;;  %v347_v17 = vld [vmem:[%s7655_s6 + $0x240] sm:$0xff]  ;;  %v348_v19 = vld [vmem:[%s7655_s6 + $0x248] sm:$0xff]  ;;  %v6302_v21 = vcombine.low %v339_v8, %v343_v9 }
  0x6c   : > { %v351_v18 = vld [vmem:[%s7655_s6 + $0x260] sm:$0xff]  ;;  %v352_v20 = vld [vmem:[%s7655_s6 + $0x268] sm:$0xff]  ;;  %v6304_v22 = vcombine.low %v340_v11, %v344_v12 }
  0x6d   : > { %v6311_v23 = vcombine.high %v347_v17, %v351_v18  ;;  %v6313_v24 = vcombine.high %v348_v19, %v352_v20  ;;  %v355_v25 = vld [vmem:[%s7655_s6 + $0x280] sm:$0xff]  ;;  %v356_v27 = vld [vmem:[%s7655_s6 + $0x288] sm:$0xff]  ;;  %v6310_v29 = vcombine.low %v347_v17, %v351_v18  ;;  %v6312_v30 = vcombine.low %v348_v19, %v352_v20 }
  0x6e   : > { %4588 = vmatpush1.bf16.msra.mxu0 %v6270_v48  ;;  %4834 = vmatpush1.bf16.msra.mxu1 %v6272_v49  ;;  %v359_v26 = vld [vmem:[%s7655_s6 + $0x2a0] sm:$0xff]  ;;  %v360_v28 = vld [vmem:[%s7655_s6 + $0x2a8] sm:$0xff] }
  0x6f   : > { %4589 = vmatprep.subr.bf16.mxu0 %v6279_v50  ;;  %4835 = vmatprep.subr.bf16.mxu1 %v6281_v51  ;;  %v6319_v31 = vcombine.high %v355_v25, %v359_v26  ;;  %v6321_v32 = vcombine.high %v356_v27, %v360_v28  ;;  %v363_v33 = vld [vmem:[%s7655_s6 + $0x2c0] sm:$0xff]  ;;  %v364_v35 = vld [vmem:[%s7655_s6 + $0x2c8] sm:$0xff]  ;;  %v6318_v37 = vcombine.low %v355_v25, %v359_v26 }
  0x70   : > { %v367_v34 = vld [vmem:[%s7655_s6 + $0x2e0] sm:$0xff]  ;;  %v368_v36 = vld [vmem:[%s7655_s6 + $0x2e8] sm:$0xff]  ;;  %v6320_v38 = vcombine.low %v356_v27, %v360_v28  ;;  %v7770_v26 = vpack.c.bf16 %v7713_v0, %v7713_v0 }
  0x71   : > { %v6327_v39 = vcombine.high %v363_v33, %v367_v34  ;;  %v6329_v40 = vcombine.high %v364_v35, %v368_v36  ;;  %v371_v41 = vld [vmem:[%s7655_s6 + $0x300] sm:$0xff]  ;;  %v372_v43 = vld [vmem:[%s7655_s6 + $0x308] sm:$0xff]  ;;  %v6326_v46 = vcombine.low %v363_v33, %v367_v34  ;;  %v6328_v47 = vcombine.low %v364_v35, %v368_v36 }
  0x72   : > { %4590 = vmatpush1.bf16.msra.mxu0 %v6278_v57  ;;  %4836 = vmatpush1.bf16.msra.mxu1 %v6280_v58  ;;  %v375_v42 = vld [vmem:[%s7655_s6 + $0x320] sm:$0xff]  ;;  %v376_v44 = vld [vmem:[%s7655_s6 + $0x328] sm:$0xff] }
  0x73   : > { %4591 = vmatprep.subr.bf16.mxu0 %v6287_v59  ;;  %4837 = vmatprep.subr.bf16.mxu1 %v6289_v61  ;;  %v6335_v48 = vcombine.high %v371_v41, %v375_v42  ;;  %v6337_v49 = vcombine.high %v372_v43, %v376_v44  ;;  %v379_v50 = vld [vmem:[%s7655_s6 + $0x340] sm:$0xff]  ;;  %v380_v52 = vld [vmem:[%s7655_s6 + $0x348] sm:$0xff]  ;;  %v6334_v55 = vcombine.low %v371_v41, %v375_v42 }
  0x74   : > { %v383_v51 = vld [vmem:[%s7655_s6 + $0x360] sm:$0xff]  ;;  %v384_v53 = vld [vmem:[%s7655_s6 + $0x368] sm:$0xff]  ;;  %v6336_v56 = vcombine.low %v372_v43, %v376_v44 }
  0x75   : > { %v6343_v57 = vcombine.high %v379_v50, %v383_v51  ;;  %v6345_v58 = vcombine.high %v380_v52, %v384_v53  ;;  %v387_v59 = vld [vmem:[%s7655_s6 + $0x380] sm:$0xff]  ;;  %v388_v62 = vld [vmem:[%s7655_s6 + $0x388] sm:$0xff]  ;;  %v6342_v1 = vcombine.low %v379_v50, %v383_v51  ;;  %v6344_v2 = vcombine.low %v380_v52, %v384_v53 }
  0x76   : > { %4592 = vmatpush1.bf16.msra.mxu0 %v6286_v3  ;;  %4838 = vmatpush1.bf16.msra.mxu1 %v6288_v5  ;;  %v391_v61 = vld [vmem:[%s7655_s6 + $0x3a0] sm:$0xff]  ;;  %v392_v63 = vld [vmem:[%s7655_s6 + $0x3a8] sm:$0xff] }
  0x77   : > { %4593 = vmatprep.subr.bf16.mxu0 %v6295_v6  ;;  %4839 = vmatprep.subr.bf16.mxu1 %v6297_v7  ;;  %v6351_v3 = vcombine.high %v387_v59, %v391_v61  ;;  %v6353_v4 = vcombine.high %v388_v62, %v392_v63  ;;  %v395_v5 = vld [vmem:[%s7655_s6 + $0x3c0] sm:$0xff]  ;;  %v985_v7 = vcombine.high %v7707_v60, %v7707_v60  ;;  %v396_v8 = vld [vmem:[%s7655_s6 + $0x3c8] sm:$0xff] }
  0x78   : > { %v399_v6 = vld [vmem:[%s7655_s6 + $0x3e0] sm:$0xff]  ;;  %v400_v9 = vld [vmem:[%s7655_s6 + $0x3e8] sm:$0xff]  ;;  %v6350_v11 = vcombine.low %v387_v59, %v391_v61  ;;  %v6352_v12 = vcombine.low %v388_v62, %v392_v63 }
  0x79   : > { %v7760_v17 = vrot.slane %v985_v7, %v7702_v54  ;;  %v404_v60 = vld [vmem:[%s7655_s6 + $0x408] sm:$0xff]  ;;  %v6358_v19 = vcombine.low %v395_v5, %v399_v6  ;;  %v6360_v20 = vcombine.low %v396_v8, %v400_v9  ;;  %v419_v33 = vld [vmem:[%s7655_s6 + $0x480] sm:$0xff] }
  0x7a   : > { %4594 = vmatpush1.bf16.msra.mxu0 %v6294_v13  ;;  %4840 = vmatpush1.bf16.msra.mxu1 %v6296_v14  ;;  %v6359_v13 = vcombine.high %v395_v5, %v399_v6  ;;  %v6361_v14 = vcombine.high %v396_v8, %v400_v9  ;;  %v408_v18 = vld [vmem:[%s7655_s6 + $0x428] sm:$0xff]  ;;  %v423_v34 = vld [vmem:[%s7655_s6 + $0x4a0] sm:$0xff] }
  0x7b   : > { %4595 = vmatprep.subr.bf16.mxu0 %v6303_v15  ;;  %4841 = vmatprep.subr.bf16.mxu1 %v6305_v16  ;;  %v403_v15 = vld [vmem:[%s7655_s6 + $0x400] sm:$0xff]  ;;  %v1001_v25 = vcombine.high %v7760_v17, %v7760_v17  ;;  %v412_v27 = vld [vmem:[%s7655_s6 + $0x448] sm:$0xff] }
  0x7c   : > { %v407_v16 = vld [vmem:[%s7655_s6 + $0x420] sm:$0xff]  ;;  %v416_v28 = vld [vmem:[%s7655_s6 + $0x468] sm:$0xff] }
  0x7d   : > { %v7776_v35 = vpack.c.bf16 %v1001_v25, %v1001_v25  ;;  %v420_v0 = vld [vmem:[%s7655_s6 + $0x488] sm:$0xff]  ;;  %v427_v41 = vld [vmem:[%s7655_s6 + $0x4c0] sm:$0xff] }
  0x7e   : > { %4596 = vmatpush1.bf16.msra.mxu0 %v6302_v21  ;;  %4842 = vmatpush1.bf16.msra.mxu1 %v6304_v22  ;;  %v6367_v21 = vcombine.high %v403_v15, %v407_v16  ;;  %v6369_v22 = vcombine.high %v404_v60, %v408_v18  ;;  %v424_v36 = vld [vmem:[%s7655_s6 + $0x4a8] sm:$0xff]  ;;  %v431_v42 = vld [vmem:[%s7655_s6 + $0x4e0] sm:$0xff] }
  0x7f   : > { %4597 = vmatprep.subr.bf16.mxu0 %v6311_v23  ;;  %4843 = vmatprep.subr.bf16.mxu1 %v6313_v24  ;;  %v411_v23 = vld [vmem:[%s7655_s6 + $0x440] sm:$0xff]  ;;  %v428_v43 = vld [vmem:[%s7655_s6 + $0x4c8] sm:$0xff] }
  0x80   : > { %v415_v24 = vld [vmem:[%s7655_s6 + $0x460] sm:$0xff]  ;;  %v432_v44 = vld [vmem:[%s7655_s6 + $0x4e8] sm:$0xff] }
  0x81   : > { %v435_v50 = vld [vmem:[%s7655_s6 + $0x500] sm:$0xff]  ;;  %v436_v52 = vld [vmem:[%s7655_s6 + $0x508] sm:$0xff] }
  0x82   : > { %4598 = vmatpush1.bf16.msra.mxu0 %v6310_v29  ;;  %4844 = vmatpush1.bf16.msra.mxu1 %v6312_v30  ;;  %v6366_v29 = vcombine.low %v403_v15, %v407_v16  ;;  %v6368_v30 = vcombine.low %v404_v60, %v408_v18  ;;  %v439_v51 = vld [vmem:[%s7655_s6 + $0x520] sm:$0xff]  ;;  %v440_v53 = vld [vmem:[%s7655_s6 + $0x528] sm:$0xff] }
  0x83   : > { %4599 = vmatprep.subr.bf16.mxu0 %v6319_v31  ;;  %4845 = vmatprep.subr.bf16.mxu1 %v6321_v32  ;;  %v6375_v31 = vcombine.high %v411_v23, %v415_v24  ;;  %v6377_v32 = vcombine.high %v412_v27, %v416_v28  ;;  %v443_v59 = vld [vmem:[%s7655_s6 + $0x540] sm:$0xff]  ;;  %v444_v62 = vld [vmem:[%s7655_s6 + $0x548] sm:$0xff] }
  0x84   : > { %v447_v61 = vld [vmem:[%s7655_s6 + $0x560] sm:$0xff]  ;;  %v448_v63 = vld [vmem:[%s7655_s6 + $0x568] sm:$0xff] }
  0x85   : > { %v451_v5 = vld [vmem:[%s7655_s6 + $0x580] sm:$0xff]  ;;  %v452_v7 = vld [vmem:[%s7655_s6 + $0x588] sm:$0xff]  ;;  %v6406_v9 = vcombine.low %v443_v59, %v447_v61 }
  0x86   : > { %4600 = vmatpush1.bf16.msra.mxu0 %v6318_v37  ;;  %4846 = vmatpush1.bf16.msra.mxu1 %v6320_v38  ;;  %v6374_v37 = vcombine.low %v411_v23, %v415_v24  ;;  %v6376_v38 = vcombine.low %v412_v27, %v416_v28  ;;  %v455_v6 = vld [vmem:[%s7655_s6 + $0x5a0] sm:$0xff]  ;;  %v456_v8 = vld [vmem:[%s7655_s6 + $0x5a8] sm:$0xff] }
  0x87   : > { %4601 = vmatprep.subr.bf16.mxu0 %v6327_v39  ;;  %4847 = vmatprep.subr.bf16.mxu1 %v6329_v40  ;;  %v6383_v39 = vcombine.high %v419_v33, %v423_v34  ;;  %v6385_v40 = vcombine.high %v420_v0, %v424_v36  ;;  %v463_v15 = vld [vmem:[%s7655_s6 + $0x5e0] sm:$0xff]  ;;  %v460_v16 = vld [vmem:[%s7655_s6 + $0x5c8] sm:$0xff]  ;;  %v6414_v18 = vcombine.low %v451_v5, %v455_v6 }
  0x88   : > { %v464_v60 = vld [vmem:[%s7655_s6 + $0x5e8] sm:$0xff]  ;;  %v471_v23 = vld [vmem:[%s7655_s6 + $0x620] sm:$0xff] }
  0x89   : > { %v468_v24 = vld [vmem:[%s7655_s6 + $0x608] sm:$0xff]  ;;  %v6424_v28 = vcombine.low %v460_v16, %v464_v60 }
  0x8a   : > { %4602 = vmatpush1.bf16.msra.mxu0 %v6326_v46  ;;  %4848 = vmatpush1.bf16.msra.mxu1 %v6328_v47  ;;  %v6382_v46 = vcombine.low %v419_v33, %v423_v34  ;;  %v6384_v47 = vcombine.low %v420_v0, %v424_v36  ;;  %v472_v25 = vld [vmem:[%s7655_s6 + $0x628] sm:$0xff] }
  0x8b   : > { %4603 = vmatprep.subr.bf16.mxu0 %v6335_v48  ;;  %4849 = vmatprep.subr.bf16.mxu1 %v6337_v49  ;;  %v6391_v48 = vcombine.high %v427_v41, %v431_v42  ;;  %v6393_v49 = vcombine.high %v428_v43, %v432_v44  ;;  %v476_v33 = vld [vmem:[%s7655_s6 + $0x648] sm:$0xff]  ;;  %v6432_v36 = vcombine.low %v468_v24, %v472_v25 }
  0x8c   : > { %v480_v34 = vld [vmem:[%s7655_s6 + $0x668] sm:$0xff] }
  0x8e   : > { %4604 = vmatpush1.bf16.msra.mxu0 %v6334_v55  ;;  %4850 = vmatpush1.bf16.msra.mxu1 %v6336_v56  ;;  %v6390_v55 = vcombine.low %v427_v41, %v431_v42  ;;  %v6392_v56 = vcombine.low %v428_v43, %v432_v44  ;;  %v484_v41 = vld [vmem:[%s7655_s6 + $0x688] sm:$0xff]  ;;  %v6440_v44 = vcombine.low %v476_v33, %v480_v34 }
  0x8f   : > { %4605 = vmatprep.subr.bf16.mxu0 %v6343_v57  ;;  %4851 = vmatprep.subr.bf16.mxu1 %v6345_v58  ;;  %v6399_v57 = vcombine.high %v435_v50, %v439_v51  ;;  %v6401_v58 = vcombine.high %v436_v52, %v440_v53  ;;  %v488_v42 = vld [vmem:[%s7655_s6 + $0x6a8] sm:$0xff] }
  0x92   : > { %4606 = vmatpush1.bf16.msra.mxu0 %v6342_v1  ;;  %4852 = vmatpush1.bf16.msra.mxu1 %v6344_v2  ;;  %v6398_v1 = vcombine.low %v435_v50, %v439_v51  ;;  %v6400_v2 = vcombine.low %v436_v52, %v440_v53  ;;  %v492_v50 = vld [vmem:[%s7655_s6 + $0x6c8] sm:$0xff]  ;;  %v6448_v53 = vcombine.low %v484_v41, %v488_v42 }
  0x93   : > { %4607 = vmatprep.subr.bf16.mxu0 %v6351_v3  ;;  %4853 = vmatprep.subr.bf16.mxu1 %v6353_v4  ;;  %v6407_v3 = vcombine.high %v443_v59, %v447_v61  ;;  %v6409_v4 = vcombine.high %v444_v62, %v448_v63  ;;  %v496_v51 = vld [vmem:[%s7655_s6 + $0x6e8] sm:$0xff] }
  0x94   : > { %v500_v59 = vld [vmem:[%s7655_s6 + $0x708] sm:$0xff] }
  0x95   : > { %v504_v61 = vld [vmem:[%s7655_s6 + $0x728] sm:$0xff] }
  0x96   : > { %4608 = vmatpush1.bf16.msra.mxu0 %v6350_v11  ;;  %4854 = vmatpush1.bf16.msra.mxu1 %v6352_v12  ;;  %v6408_v11 = vcombine.low %v444_v62, %v448_v63  ;;  %v6415_v12 = vcombine.high %v451_v5, %v455_v6  ;;  %v6456_v63 = vcombine.low %v492_v50, %v496_v51  ;;  %v508_v5 = vld [vmem:[%s7655_s6 + $0x748] sm:$0xff] }
  0x97   : > { %4609 = vmatprep.subr.bf16.mxu0 %v6359_v13  ;;  %4855 = vmatprep.subr.bf16.mxu1 %v6361_v14  ;;  %v6417_v13 = vcombine.high %v452_v7, %v456_v8  ;;  %v459_v14 = vld [vmem:[%s7655_s6 + $0x5c0] sm:$0xff]  ;;  %v512_v6 = vld [vmem:[%s7655_s6 + $0x768] sm:$0xff] }
  0x98   : > { %v6422_v27 = vcombine.low %v459_v14, %v463_v15 }
  0x9a   : > { %4610 = vmatpush1.bf16.msra.mxu0 %v6358_v19  ;;  %4856 = vmatpush1.bf16.msra.mxu1 %v6360_v20  ;;  %v6416_v19 = vcombine.low %v452_v7, %v456_v8  ;;  %v6423_v20 = vcombine.high %v459_v14, %v463_v15  ;;  %v6464_v8 = vcombine.low %v500_v59, %v504_v61  ;;  %v516_v14 = vld [vmem:[%s7655_s6 + $0x788] sm:$0xff] }
  0x9b   : > { %4620 = vmatprep.subr.bf16.mxu0 %v6367_v21  ;;  %4866 = vmatprep.subr.bf16.mxu1 %v6369_v22  ;;  %v6425_v21 = vcombine.high %v460_v16, %v464_v60  ;;  %v467_v22 = vld [vmem:[%s7655_s6 + $0x600] sm:$0xff]  ;;  %v520_v15 = vld [vmem:[%s7655_s6 + $0x7a8] sm:$0xff]  ;;  %v6472_v60 = vcombine.low %v508_v5, %v512_v6 }
  0x9c   : > { %v6430_v0 = vcombine.low %v467_v22, %v471_v23 }
  0x9d   : > { %4612 = vmatmul.mubr.bf16.vlgmr.msra.gmra.mrb[0].mxu0 %v7770_v26  ;;  %4858 = vmatmul.mubr.bf16.vlgmr.msra.gmra.mrb[0].mxu1 %v7770_v26 }
  0x9e   : > { %4621 = vmatpush1.bf16.msra.mxu0 %v6366_v29  ;;  %4867 = vmatpush1.bf16.msra.mxu1 %v6368_v30  ;;  %v6431_v29 = vcombine.high %v467_v22, %v471_v23  ;;  %v6433_v30 = vcombine.high %v468_v24, %v472_v25  ;;  %v524_v22 = vld [vmem:[%s7655_s6 + $0x7c8] sm:$0xff]  ;;  %v7837_v24 = vld [vmem:[%s7669_s8 + $0x8] sm:$0xff] }
  0x9f   : > { %4622 = vmatprep.subr.bf16.mxu0 %v6375_v31  ;;  %4868 = vmatprep.subr.bf16.mxu1 %v6377_v32  ;;  %v475_v31 = vld [vmem:[%s7655_s6 + $0x640] sm:$0xff]  ;;  %v528_v23 = vld [vmem:[%s7655_s6 + $0x7e8] sm:$0xff] }
  0xa0   : > { %4652 = vmatprep.mubr.bf16.mxu0 %v7776_v35  ;;  %4898 = vmatprep.mubr.bf16.mxu1 %v7776_v35  ;;  %v479_v32 = vld [vmem:[%s7655_s6 + $0x660] sm:$0xff] }
  0xa1   : > { %v6438_v43 = vcombine.low %v475_v31, %v479_v32 }
  0xa2   : > { %4623 = vmatpush1.bf16.msra.mxu0 %v6374_v37  ;;  %4869 = vmatpush1.bf16.msra.mxu1 %v6376_v38  ;;  %v6439_v37 = vcombine.high %v475_v31, %v479_v32  ;;  %v6441_v38 = vcombine.high %v476_v33, %v480_v34  ;;  %v535_v31 = vld [vmem:[%s7655_s6 + $0x820] sm:$0xff]  ;;  %v7843_v32 = vrot.slane %v7837_v24, %v7702_v54  ;;  %v532_v33 = vld [vmem:[%s7655_s6 + $0x808] sm:$0xff] }
  0xa3   : > { %4624 = vmatprep.subr.bf16.mxu0 %v6383_v39  ;;  %4870 = vmatprep.subr.bf16.mxu1 %v6385_v40  ;;  %v483_v39 = vld [vmem:[%s7655_s6 + $0x680] sm:$0xff]  ;;  %v536_v34 = vld [vmem:[%s7655_s6 + $0x828] sm:$0xff] }
  0xa4   : > { %v487_v40 = vld [vmem:[%s7655_s6 + $0x6a0] sm:$0xff] }
  0xa5   : > { %v6446_v52 = vcombine.low %v483_v39, %v487_v40 }
  0xa6   : > { %4625 = vmatpush1.bf16.msra.mxu0 %v6382_v46  ;;  %4871 = vmatpush1.bf16.msra.mxu1 %v6384_v47  ;;  %v6447_v46 = vcombine.high %v483_v39, %v487_v40  ;;  %v6449_v47 = vcombine.high %v484_v41, %v488_v42  ;;  %v539_v39 = vld [vmem:[%s7655_s6 + $0x840] sm:$0xff]  ;;  %v1017_v41 = vcombine.high %v7843_v32, %v7843_v32 }
  0xa7   : > { %4626 = vmatprep.subr.bf16.mxu0 %v6391_v48  ;;  %4872 = vmatprep.subr.bf16.mxu1 %v6393_v49  ;;  %v491_v48 = vld [vmem:[%s7655_s6 + $0x6c0] sm:$0xff]  ;;  %v7853_v42 = vpack.c.bf16 %v7760_v17, %v7760_v17  ;;  %v548_v17 = vld [vmem:[%s7655_s6 + $0x888] sm:$0xff] }
  0xa8   : > { %v495_v49 = vld [vmem:[%s7655_s6 + $0x6e0] sm:$0xff] }
  0xa9   : > { %v6454_v62 = vcombine.low %v491_v48, %v495_v49  ;;  %v543_v40 = vld [vmem:[%s7655_s6 + $0x860] sm:$0xff] }
  0xaa   : > { %4627 = vmatpush1.bf16.msra.mxu0 %v6390_v55  ;;  %4873 = vmatpush1.bf16.msra.mxu1 %v6392_v56  ;;  %v6455_v55 = vcombine.high %v491_v48, %v495_v49  ;;  %v6457_v56 = vcombine.high %v492_v50, %v496_v51  ;;  %v6503_v48 = vcombine.high %v539_v39, %v543_v40  ;;  %v547_v50 = vld [vmem:[%s7655_s6 + $0x880] sm:$0xff] }
  0xab   : > { %4628 = vmatprep.subr.bf16.mxu0 %v6399_v57  ;;  %4874 = vmatprep.subr.bf16.mxu1 %v6401_v58  ;;  %v499_v57 = vld [vmem:[%s7655_s6 + $0x700] sm:$0xff] }
  0xac   : > { %v503_v58 = vld [vmem:[%s7655_s6 + $0x720] sm:$0xff] }
  0xad   : > { %v6462_v7 = vcombine.low %v499_v57, %v503_v58  ;;  %v551_v51 = vld [vmem:[%s7655_s6 + $0x8a0] sm:$0xff] }
  0xae   : > { %4629 = vmatpush1.bf16.msra.mxu0 %v6398_v1  ;;  %4875 = vmatpush1.bf16.msra.mxu1 %v6400_v2  ;;  %v6463_v1 = vcombine.high %v499_v57, %v503_v58  ;;  %v6465_v2 = vcombine.high %v500_v59, %v504_v61  ;;  %v6511_v57 = vcombine.high %v547_v50, %v551_v51  ;;  %v555_v59 = vld [vmem:[%s7655_s6 + $0x8c0] sm:$0xff] }
  0xaf   : > { %4630 = vmatprep.subr.bf16.mxu0 %v6407_v3  ;;  %4876 = vmatprep.subr.bf16.mxu1 %v6409_v4  ;;  %v507_v3 = vld [vmem:[%s7655_s6 + $0x740] sm:$0xff] }
  0xb0   : > { %v511_v4 = vld [vmem:[%s7655_s6 + $0x760] sm:$0xff] }
  0xb1   : > { %v6470_v16 = vcombine.low %v507_v3, %v511_v4  ;;  %v559_v61 = vld [vmem:[%s7655_s6 + $0x8e0] sm:$0xff] }
  0xb2   : > { %4631 = vmatpush1.bf16.msra.mxu0 %v6406_v9  ;;  %4877 = vmatpush1.bf16.msra.mxu1 %v6408_v11  ;;  %v6471_v9 = vcombine.high %v507_v3, %v511_v4  ;;  %v6473_v11 = vcombine.high %v508_v5, %v512_v6  ;;  %v6519_v3 = vcombine.high %v555_v59, %v559_v61  ;;  %v563_v5 = vld [vmem:[%s7655_s6 + $0x900] sm:$0xff] }
  0xb3   : > { %4632 = vmatprep.subr.bf16.mxu0 %v6415_v12  ;;  %4878 = vmatprep.subr.bf16.mxu1 %v6417_v13  ;;  %v515_v12 = vld [vmem:[%s7655_s6 + $0x780] sm:$0xff] }
  0xb4   : > { %v519_v13 = vld [vmem:[%s7655_s6 + $0x7a0] sm:$0xff] }
  0xb5   : > { %v6478_v25 = vcombine.low %v515_v12, %v519_v13  ;;  %v567_v6 = vld [vmem:[%s7655_s6 + $0x920] sm:$0xff] }
  0xb6   : > { %4633 = vmatpush1.bf16.msra.mxu0 %v6414_v18  ;;  %4879 = vmatpush1.bf16.msra.mxu1 %v6416_v19  ;;  %v6479_v18 = vcombine.high %v515_v12, %v519_v13  ;;  %v6481_v19 = vcombine.high %v516_v14, %v520_v15  ;;  %v6527_v12 = vcombine.high %v563_v5, %v567_v6 }
  0xb7   : > { %4634 = vmatprep.subr.bf16.mxu0 %v6423_v20  ;;  %4880 = vmatprep.subr.bf16.mxu1 %v6425_v21  ;;  %v523_v20 = vld [vmem:[%s7655_s6 + $0x7c0] sm:$0xff] }
  0xb8   : > { %v527_v21 = vld [vmem:[%s7655_s6 + $0x7e0] sm:$0xff] }
  0xba   : > { %4635 = vmatpush1.bf16.msra.mxu0 %v6422_v27  ;;  %4881 = vmatpush1.bf16.msra.mxu1 %v6424_v28  ;;  %v6480_v27 = vcombine.low %v516_v14, %v520_v15  ;;  %v6487_v28 = vcombine.high %v523_v20, %v527_v21  ;;  %v571_v14 = vld [vmem:[%s7655_s6 + $0x940] sm:$0xff] }
  0xbb   : > { %4636 = vmatprep.subr.bf16.mxu0 %v6431_v29  ;;  %4882 = vmatprep.subr.bf16.mxu1 %v6433_v30  ;;  %v6489_v29 = vcombine.high %v524_v22, %v528_v23  ;;  %v531_v30 = vld [vmem:[%s7655_s6 + $0x800] sm:$0xff] }
  0xbc   : > { %v575_v15 = vld [vmem:[%s7655_s6 + $0x960] sm:$0xff] }
  0xbe   : > { %4637 = vmatpush1.bf16.msra.mxu0 %v6430_v0  ;;  %4883 = vmatpush1.bf16.msra.mxu1 %v6432_v36  ;;  %v6486_v0 = vcombine.low %v523_v20, %v527_v21  ;;  %v6488_v36 = vcombine.low %v524_v22, %v528_v23  ;;  %v6535_v20 = vcombine.high %v571_v14, %v575_v15  ;;  %v579_v22 = vld [vmem:[%s7655_s6 + $0x980] sm:$0xff] }
  0xbf   : > { %4638 = vmatprep.subr.bf16.mxu0 %v6439_v37  ;;  %4884 = vmatprep.subr.bf16.mxu1 %v6441_v38  ;;  %v6495_v37 = vcombine.high %v531_v30, %v535_v31  ;;  %v6497_v38 = vcombine.high %v532_v33, %v536_v34  ;;  %v583_v23 = vld [vmem:[%s7655_s6 + $0x9a0] sm:$0xff] }
  0xc2   : > { %4639 = vmatpush1.bf16.msra.mxu0 %v6438_v43  ;;  %4885 = vmatpush1.bf16.msra.mxu1 %v6440_v44  ;;  %v540_v43 = vld [vmem:[%s7655_s6 + $0x848] sm:$0xff] }
  0xc3   : > { %4640 = vmatprep.subr.bf16.mxu0 %v6447_v46  ;;  %4886 = vmatprep.subr.bf16.mxu1 %v6449_v47  ;;  %v544_v44 = vld [vmem:[%s7655_s6 + $0x868] sm:$0xff]  ;;  %v6494_v46 = vcombine.low %v531_v30, %v535_v31  ;;  %v6496_v47 = vcombine.low %v532_v33, %v536_v34  ;;  %v6543_v30 = vcombine.high %v579_v22, %v583_v23  ;;  %v587_v33 = vld [vmem:[%s7655_s6 + $0x9c0] sm:$0xff] }
  0xc4   : > { %v6505_v49 = vcombine.high %v540_v43, %v544_v44  ;;  %v591_v34 = vld [vmem:[%s7655_s6 + $0x9e0] sm:$0xff] }
  0xc6   : > { %4641 = vmatpush1.bf16.msra.mxu0 %v6446_v52  ;;  %4887 = vmatpush1.bf16.msra.mxu1 %v6448_v53  ;;  %v7859_v52 = vpack.c.bf16 %v1017_v41, %v1017_v41  ;;  %v552_v53 = vld [vmem:[%s7655_s6 + $0x8a8] sm:$0xff]  ;;  %v595_v41 = vld [vmem:[%s7655_s6 + $0xa00] sm:$0xff] }
  0xc7   : > { %4642 = vmatprep.subr.bf16.mxu0 %v6455_v55  ;;  %4888 = vmatprep.subr.bf16.mxu1 %v6457_v56  ;;  %v6502_v55 = vcombine.low %v539_v39, %v543_v40  ;;  %v6504_v56 = vcombine.low %v540_v43, %v544_v44  ;;  %v6513_v58 = vcombine.high %v548_v17, %v552_v53  ;;  %v599_v43 = vld [vmem:[%s7655_s6 + $0xa20] sm:$0xff]  ;;  %v596_v44 = vld [vmem:[%s7655_s6 + $0xa08] sm:$0xff] }
  0xc8   : > { %v6551_v39 = vcombine.high %v587_v33, %v591_v34 }
  0xca   : > { %4643 = vmatpush1.bf16.msra.mxu0 %v6454_v62  ;;  %4889 = vmatpush1.bf16.msra.mxu1 %v6456_v63  ;;  %v556_v62 = vld [vmem:[%s7655_s6 + $0x8c8] sm:$0xff] }
  0xcb   : > { %4644 = vmatprep.subr.bf16.mxu0 %v6463_v1  ;;  %4890 = vmatprep.subr.bf16.mxu1 %v6465_v2  ;;  %v560_v63 = vld [vmem:[%s7655_s6 + $0x8e8] sm:$0xff]  ;;  %v6510_v1 = vcombine.low %v547_v50, %v551_v51  ;;  %v6512_v2 = vcombine.low %v548_v17, %v552_v53  ;;  %v603_v51 = vld [vmem:[%s7655_s6 + $0xa40] sm:$0xff] }
  0xcc   : > { %v6521_v4 = vcombine.high %v556_v62, %v560_v63  ;;  %v607_v17 = vld [vmem:[%s7655_s6 + $0xa60] sm:$0xff]  ;;  %v604_v53 = vld [vmem:[%s7655_s6 + $0xa48] sm:$0xff] }
  0xce   : > { %4645 = vmatpush1.bf16.msra.mxu0 %v6462_v7  ;;  %4891 = vmatpush1.bf16.msra.mxu1 %v6464_v8  ;;  %v564_v7 = vld [vmem:[%s7655_s6 + $0x908] sm:$0xff] }
  0xcf   : > { %4646 = vmatprep.subr.bf16.mxu0 %v6471_v9  ;;  %4892 = vmatprep.subr.bf16.mxu1 %v6473_v11  ;;  %v568_v8 = vld [vmem:[%s7655_s6 + $0x928] sm:$0xff]  ;;  %v6518_v9 = vcombine.low %v555_v59, %v559_v61  ;;  %v6520_v11 = vcombine.low %v556_v62, %v560_v63  ;;  %v611_v61 = vld [vmem:[%s7655_s6 + $0xa80] sm:$0xff] }
  0xd0   : > { %v6529_v13 = vcombine.high %v564_v7, %v568_v8  ;;  %v615_v62 = vld [vmem:[%s7655_s6 + $0xaa0] sm:$0xff]  ;;  %v612_v63 = vld [vmem:[%s7655_s6 + $0xa88] sm:$0xff] }
  0xd2   : > { %4647 = vmatpush1.bf16.msra.mxu0 %v6470_v16  ;;  %4893 = vmatpush1.bf16.msra.mxu1 %v6472_v60  ;;  %v572_v16 = vld [vmem:[%s7655_s6 + $0x948] sm:$0xff] }
  0xd3   : > { %4648 = vmatprep.subr.bf16.mxu0 %v6479_v18  ;;  %4894 = vmatprep.subr.bf16.mxu1 %v6481_v19  ;;  %v576_v60 = vld [vmem:[%s7655_s6 + $0x968] sm:$0xff]  ;;  %v6526_v18 = vcombine.low %v563_v5, %v567_v6  ;;  %v6528_v19 = vcombine.low %v564_v7, %v568_v8  ;;  %v619_v6 = vld [vmem:[%s7655_s6 + $0xac0] sm:$0xff] }
  0xd4   : > { %v6537_v21 = vcombine.high %v572_v16, %v576_v60  ;;  %v623_v7 = vld [vmem:[%s7655_s6 + $0xae0] sm:$0xff]  ;;  %v620_v8 = vld [vmem:[%s7655_s6 + $0xac8] sm:$0xff] }
  0xd6   : > { %4649 = vmatpush1.bf16.msra.mxu0 %v6478_v25  ;;  %4895 = vmatpush1.bf16.msra.mxu1 %v6480_v27  ;;  %v580_v25 = vld [vmem:[%s7655_s6 + $0x988] sm:$0xff] }
  0xd7   : > { %4650 = vmatprep.subr.bf16.mxu0 %v6487_v28  ;;  %4896 = vmatprep.subr.bf16.mxu1 %v6489_v29  ;;  %v584_v27 = vld [vmem:[%s7655_s6 + $0x9a8] sm:$0xff]  ;;  %v6534_v28 = vcombine.low %v571_v14, %v575_v15  ;;  %v6536_v29 = vcombine.low %v572_v16, %v576_v60  ;;  %v627_v15 = vld [vmem:[%s7655_s6 + $0xb00] sm:$0xff] }
  0xd8   : > { %v6545_v31 = vcombine.high %v580_v25, %v584_v27  ;;  %v631_v16 = vld [vmem:[%s7655_s6 + $0xb20] sm:$0xff]  ;;  %v628_v60 = vld [vmem:[%s7655_s6 + $0xb08] sm:$0xff] }
  0xda   : > { %4651 = vmatpush1.bf16.msra.mxu0 %v6486_v0  ;;  %4897 = vmatpush1.bf16.msra.mxu1 %v6488_v36  ;;  %v588_v0 = vld [vmem:[%s7655_s6 + $0x9c8] sm:$0xff] }
  0xdb   : > { %4661 = vmatprep.subr.bf16.mxu0 %v6495_v37  ;;  %4907 = vmatprep.subr.bf16.mxu1 %v6497_v38  ;;  %v592_v36 = vld [vmem:[%s7655_s6 + $0x9e8] sm:$0xff]  ;;  %v6542_v37 = vcombine.low %v579_v22, %v583_v23  ;;  %v6544_v38 = vcombine.low %v580_v25, %v584_v27  ;;  %v635_v23 = vld [vmem:[%s7655_s6 + $0xb40] sm:$0xff] }
  0xdc   : > { %v6553_v40 = vcombine.high %v588_v0, %v592_v36  ;;  %v639_v25 = vld [vmem:[%s7655_s6 + $0xb60] sm:$0xff]  ;;  %v636_v27 = vld [vmem:[%s7655_s6 + $0xb48] sm:$0xff] }
  0xdd   : > { %4653 = vmatmul.mubr.bf16.vlgmr.msra.gmra.mrb[0].mxu0 %v7853_v42  ;;  %4899 = vmatmul.mubr.bf16.vlgmr.msra.gmra.mrb[0].mxu1 %v7853_v42 }
  0xde   : > { %4662 = vmatpush1.bf16.msra.mxu0 %v6494_v46  ;;  %4908 = vmatpush1.bf16.msra.mxu1 %v6496_v47  ;;  %v600_v46 = vld [vmem:[%s7655_s6 + $0xa28] sm:$0xff]  ;;  %v6550_v47 = vcombine.low %v587_v33, %v591_v34  ;;  %v643_v34 = vld [vmem:[%s7655_s6 + $0xb80] sm:$0xff] }
  0xdf   : > { %4663 = vmatprep.subr.bf16.mxu0 %v6503_v48  ;;  %4909 = vmatprep.subr.bf16.mxu1 %v6505_v49  ;;  %v6552_v48 = vcombine.low %v588_v0, %v592_v36  ;;  %v6559_v49 = vcombine.high %v595_v41, %v599_v43  ;;  %v6561_v50 = vcombine.high %v596_v44, %v600_v46  ;;  %v647_v0 = vld [vmem:[%s7655_s6 + $0xba0] sm:$0xff]  ;;  %v644_v36 = vld [vmem:[%s7655_s6 + $0xb88] sm:$0xff] }
  0xe0   : > { %4693 = vmatprep.mubr.bf16.mxu0 %v7859_v52  ;;  %4939 = vmatprep.mubr.bf16.mxu1 %v7859_v52 }
  0xe2   : > { %4664 = vmatpush1.bf16.msra.mxu0 %v6502_v55  ;;  %4910 = vmatpush1.bf16.msra.mxu1 %v6504_v56  ;;  %v608_v55 = vld [vmem:[%s7655_s6 + $0xa68] sm:$0xff]  ;;  %v6558_v56 = vcombine.low %v595_v41, %v599_v43  ;;  %v651_v43 = vld [vmem:[%s7655_s6 + $0xbc0] sm:$0xff] }
  0xe3   : > { %4665 = vmatprep.subr.bf16.mxu0 %v6511_v57  ;;  %4911 = vmatprep.subr.bf16.mxu1 %v6513_v58  ;;  %v6560_v57 = vcombine.low %v596_v44, %v600_v46  ;;  %v6567_v58 = vcombine.high %v603_v51, %v607_v17  ;;  %v6569_v59 = vcombine.high %v604_v53, %v608_v55  ;;  %v655_v44 = vld [vmem:[%s7655_s6 + $0xbe0] sm:$0xff] }
  0xe4   : > { %v1002_v46 = vcombine.high %v7837_v24, %v7837_v24  ;;  %v660_v24 = vld [vmem:[%s7655_s6 + $0xc08] sm:$0xff] }
  0xe6   : > { %4666 = vmatpush1.bf16.msra.mxu0 %v6510_v1  ;;  %4912 = vmatpush1.bf16.msra.mxu1 %v6512_v2  ;;  %v616_v1 = vld [vmem:[%s7655_s6 + $0xaa8] sm:$0xff]  ;;  %v6566_v2 = vcombine.low %v603_v51, %v607_v17  ;;  %v6615_v51 = vcombine.high %v651_v43, %v655_v44 }
  0xe7   : > { %4667 = vmatprep.subr.bf16.mxu0 %v6519_v3  ;;  %4913 = vmatprep.subr.bf16.mxu1 %v6521_v4  ;;  %v6568_v3 = vcombine.low %v604_v53, %v608_v55  ;;  %v6575_v4 = vcombine.high %v611_v61, %v615_v62  ;;  %v6577_v5 = vcombine.high %v612_v63, %v616_v1  ;;  %v659_v53 = vld [vmem:[%s7655_s6 + $0xc00] sm:$0xff] }
  0xe8   : > { %v663_v55 = vld [vmem:[%s7655_s6 + $0xc20] sm:$0xff] }
  0xea   : > { %4668 = vmatpush1.bf16.msra.mxu0 %v6518_v9  ;;  %4914 = vmatpush1.bf16.msra.mxu1 %v6520_v11  ;;  %v624_v9 = vld [vmem:[%s7655_s6 + $0xae8] sm:$0xff]  ;;  %v6574_v11 = vcombine.low %v611_v61, %v615_v62  ;;  %v6623_v61 = vcombine.high %v659_v53, %v663_v55 }
  0xeb   : > { %4669 = vmatprep.subr.bf16.mxu0 %v6527_v12  ;;  %4915 = vmatprep.subr.bf16.mxu1 %v6529_v13  ;;  %v6576_v12 = vcombine.low %v612_v63, %v616_v1  ;;  %v6583_v13 = vcombine.high %v619_v6, %v623_v7  ;;  %v6585_v14 = vcombine.high %v620_v8, %v624_v9  ;;  %v667_v63 = vld [vmem:[%s7655_s6 + $0xc40] sm:$0xff] }
  0xec   : > { %v671_v1 = vld [vmem:[%s7655_s6 + $0xc60] sm:$0xff] }
  0xee   : > { %4670 = vmatpush1.bf16.msra.mxu0 %v6526_v18  ;;  %4916 = vmatpush1.bf16.msra.mxu1 %v6528_v19  ;;  %v632_v18 = vld [vmem:[%s7655_s6 + $0xb28] sm:$0xff]  ;;  %v6582_v19 = vcombine.low %v619_v6, %v623_v7  ;;  %v6622_v6 = vcombine.low %v659_v53, %v663_v55 }
  0xef   : > { %4671 = vmatprep.subr.bf16.mxu0 %v6535_v20  ;;  %4917 = vmatprep.subr.bf16.mxu1 %v6537_v21  ;;  %v6584_v20 = vcombine.low %v620_v8, %v624_v9  ;;  %v6591_v21 = vcombine.high %v627_v15, %v631_v16  ;;  %v6593_v22 = vcombine.high %v628_v60, %v632_v18 }
  0xf0   : > { %v6631_v8 = vcombine.high %v667_v63, %v671_v1 }
  0xf2   : > { %4672 = vmatpush1.bf16.msra.mxu0 %v6534_v28  ;;  %4918 = vmatpush1.bf16.msra.mxu1 %v6536_v29  ;;  %v640_v28 = vld [vmem:[%s7655_s6 + $0xb68] sm:$0xff]  ;;  %v6590_v29 = vcombine.low %v627_v15, %v631_v16  ;;  %v6630_v15 = vcombine.low %v667_v63, %v671_v1 }
  0xf3   : > { %4673 = vmatprep.subr.bf16.mxu0 %v6543_v30  ;;  %4919 = vmatprep.subr.bf16.mxu1 %v6545_v31  ;;  %v6592_v30 = vcombine.low %v628_v60, %v632_v18  ;;  %v6599_v31 = vcombine.high %v635_v23, %v639_v25  ;;  %v6601_v33 = vcombine.high %v636_v27, %v640_v28 }
  0xf6   : > { %4674 = vmatpush1.bf16.msra.mxu0 %v6542_v37  ;;  %4920 = vmatpush1.bf16.msra.mxu1 %v6544_v38  ;;  %v648_v37 = vld [vmem:[%s7655_s6 + $0xba8] sm:$0xff]  ;;  %v6598_v38 = vcombine.low %v635_v23, %v639_v25 }
  0xf7   : > { %4675 = vmatprep.subr.bf16.mxu0 %v6551_v39  ;;  %4921 = vmatprep.subr.bf16.mxu1 %v6553_v40  ;;  %v6600_v39 = vcombine.low %v636_v27, %v640_v28  ;;  %v6607_v40 = vcombine.high %v643_v34, %v647_v0  ;;  %v6609_v41 = vcombine.high %v644_v36, %v648_v37 }
  0xfa   : > { %4676 = vmatpush1.bf16.msra.mxu0 %v6550_v47  ;;  %4922 = vmatpush1.bf16.msra.mxu1 %v6552_v48  ;;  %v652_v47 = vld [vmem:[%s7655_s6 + $0xbc8] sm:$0xff] }
  0xfb   : > { %4677 = vmatprep.subr.bf16.mxu0 %v6559_v49  ;;  %4923 = vmatprep.subr.bf16.mxu1 %v6561_v50  ;;  %v656_v48 = vld [vmem:[%s7655_s6 + $0xbe8] sm:$0xff]  ;;  %v6606_v49 = vcombine.low %v643_v34, %v647_v0  ;;  %v6608_v50 = vcombine.low %v644_v36, %v648_v37 }
  0xfc   : > { %v6617_v17 = vcombine.high %v652_v47, %v656_v48 }
  0xfe   : > { %4678 = vmatpush1.bf16.msra.mxu0 %v6558_v56  ;;  %4924 = vmatpush1.bf16.msra.mxu1 %v6560_v57  ;;  %v7924_v56 = vrot.slane %v1002_v46, %v7702_v54  ;;  %v664_v57 = vld [vmem:[%s7655_s6 + $0xc28] sm:$0xff] }
  0xff   : > { %4679 = vmatprep.subr.bf16.mxu0 %v6567_v58  ;;  %4925 = vmatprep.subr.bf16.mxu1 %v6569_v59  ;;  %v6614_v58 = vcombine.low %v651_v43, %v655_v44  ;;  %v6616_v59 = vcombine.low %v652_v47, %v656_v48  ;;  %v6625_v62 = vcombine.high %v660_v24, %v664_v57  ;;  %v707_v48 = vld [vmem:[%s7655_s6 + $0xd80] sm:$0xff] }
 0x100   : > { %v6624_v7 = vcombine.low %v660_v24, %v664_v57  ;;  %v715_v57 = vld [vmem:[%s7655_s6 + $0xdc0] sm:$0xff] }
 0x102   : > { %4680 = vmatpush1.bf16.msra.mxu0 %v6566_v2  ;;  %4926 = vmatpush1.bf16.msra.mxu1 %v6568_v3  ;;  %v1018_v2 = vcombine.high %v7924_v56, %v7924_v56  ;;  %v7934_v3 = vpack.c.bf16 %v7843_v32, %v7843_v32  ;;  %v676_v32 = vld [vmem:[%s7655_s6 + $0xc88] sm:$0xff] }
 0x103   : > { %4681 = vmatprep.subr.bf16.mxu0 %v6575_v4  ;;  %4927 = vmatprep.subr.bf16.mxu1 %v6577_v5  ;;  %v668_v4 = vld [vmem:[%s7655_s6 + $0xc48] sm:$0xff] }
 0x104   : > { %v672_v5 = vld [vmem:[%s7655_s6 + $0xc68] sm:$0xff] }
 0x105   : > { %v6633_v9 = vcombine.high %v668_v4, %v672_v5  ;;  %v6632_v16 = vcombine.low %v668_v4, %v672_v5  ;;  %v723_v4 = vld [vmem:[%s7655_s6 + $0xe00] sm:$0xff] }
 0x106   : > { %4682 = vmatpush1.bf16.msra.mxu0 %v6574_v11  ;;  %4928 = vmatpush1.bf16.msra.mxu1 %v6576_v12  ;;  %v675_v11 = vld [vmem:[%s7655_s6 + $0xc80] sm:$0xff] }
 0x107   : > { %4683 = vmatprep.subr.bf16.mxu0 %v6583_v13  ;;  %4929 = vmatprep.subr.bf16.mxu1 %v6585_v14  ;;  %v679_v12 = vld [vmem:[%s7655_s6 + $0xca0] sm:$0xff]  ;;  %v7940_v13 = vpack.c.bf16 %v1018_v2, %v1018_v2  ;;  %v680_v14 = vld [vmem:[%s7655_s6 + $0xca8] sm:$0xff] }
 0x108   : > { %v6639_v60 = vcombine.high %v675_v11, %v679_v12  ;;  %v6641_v18 = vcombine.high %v676_v32, %v680_v14  ;;  %v6638_v23 = vcombine.low %v675_v11, %v679_v12  ;;  %v6640_v25 = vcombine.low %v676_v32, %v680_v14  ;;  %v727_v5 = vld [vmem:[%s7655_s6 + $0xe20] sm:$0xff] }
 0x109   : > { %v6687_v11 = vcombine.high %v723_v4, %v727_v5  ;;  %v731_v32 = vld [vmem:[%s7655_s6 + $0xe40] sm:$0xff] }
 0x10a   : > { %4684 = vmatpush1.bf16.msra.mxu0 %v6582_v19  ;;  %4930 = vmatpush1.bf16.msra.mxu1 %v6584_v20  ;;  %v683_v19 = vld [vmem:[%s7655_s6 + $0xcc0] sm:$0xff] }
 0x10b   : > { %4685 = vmatprep.subr.bf16.mxu0 %v6591_v21  ;;  %4931 = vmatprep.subr.bf16.mxu1 %v6593_v22  ;;  %v687_v20 = vld [vmem:[%s7655_s6 + $0xce0] sm:$0xff]  ;;  %v684_v21 = vld [vmem:[%s7655_s6 + $0xcc8] sm:$0xff] }
 0x10c   : > { %v688_v22 = vld [vmem:[%s7655_s6 + $0xce8] sm:$0xff]  ;;  %v6647_v27 = vcombine.high %v683_v19, %v687_v20  ;;  %v6646_v34 = vcombine.low %v683_v19, %v687_v20  ;;  %v735_v14 = vld [vmem:[%s7655_s6 + $0xe60] sm:$0xff] }
 0x10d   : > { %v6649_v28 = vcombine.high %v684_v21, %v688_v22  ;;  %v6648_v0 = vcombine.low %v684_v21, %v688_v22  ;;  %v6695_v19 = vcombine.high %v731_v32, %v735_v14  ;;  %v739_v21 = vld [vmem:[%s7655_s6 + $0xe80] sm:$0xff] }
 0x10e   : > { %4686 = vmatpush1.bf16.msra.mxu0 %v6590_v29  ;;  %4932 = vmatpush1.bf16.msra.mxu1 %v6592_v30  ;;  %v691_v29 = vld [vmem:[%s7655_s6 + $0xd00] sm:$0xff] }
 0x10f   : > { %4687 = vmatprep.subr.bf16.mxu0 %v6599_v31  ;;  %4933 = vmatprep.subr.bf16.mxu1 %v6601_v33  ;;  %v695_v30 = vld [vmem:[%s7655_s6 + $0xd20] sm:$0xff]  ;;  %v692_v31 = vld [vmem:[%s7655_s6 + $0xd08] sm:$0xff] }
 0x110   : > { %v696_v33 = vld [vmem:[%s7655_s6 + $0xd28] sm:$0xff]  ;;  %v6655_v36 = vcombine.high %v691_v29, %v695_v30  ;;  %v6654_v43 = vcombine.low %v691_v29, %v695_v30  ;;  %v743_v22 = vld [vmem:[%s7655_s6 + $0xea0] sm:$0xff] }
 0x111   : > { %v6657_v37 = vcombine.high %v692_v31, %v696_v33  ;;  %v6656_v44 = vcombine.low %v692_v31, %v696_v33  ;;  %v6703_v29 = vcombine.high %v739_v21, %v743_v22  ;;  %v747_v31 = vld [vmem:[%s7655_s6 + $0xec0] sm:$0xff] }
 0x112   : > { %4688 = vmatpush1.bf16.msra.mxu0 %v6598_v38  ;;  %4934 = vmatpush1.bf16.msra.mxu1 %v6600_v39  ;;  %v699_v38 = vld [vmem:[%s7655_s6 + $0xd40] sm:$0xff] }
 0x113   : > { %4689 = vmatprep.subr.bf16.mxu0 %v6607_v40  ;;  %4935 = vmatprep.subr.bf16.mxu1 %v6609_v41  ;;  %v703_v39 = vld [vmem:[%s7655_s6 + $0xd60] sm:$0xff]  ;;  %v700_v40 = vld [vmem:[%s7655_s6 + $0xd48] sm:$0xff] }
 0x114   : > { %v704_v41 = vld [vmem:[%s7655_s6 + $0xd68] sm:$0xff]  ;;  %v6663_v46 = vcombine.high %v699_v38, %v703_v39  ;;  %v751_v33 = vld [vmem:[%s7655_s6 + $0xee0] sm:$0xff] }
 0x115   : > { %v6665_v47 = vcombine.high %v700_v40, %v704_v41  ;;  %v6664_v53 = vcombine.low %v700_v40, %v704_v41  ;;  %v755_v40 = vld [vmem:[%s7655_s6 + $0xf00] sm:$0xff] }
 0x116   : > { %4690 = vmatpush1.bf16.msra.mxu0 %v6606_v49  ;;  %4936 = vmatpush1.bf16.msra.mxu1 %v6608_v50  ;;  %v711_v49 = vld [vmem:[%s7655_s6 + $0xda0] sm:$0xff]  ;;  %v708_v50 = vld [vmem:[%s7655_s6 + $0xd88] sm:$0xff] }
 0x117   : > { %4691 = vmatprep.subr.bf16.mxu0 %v6615_v51  ;;  %4937 = vmatprep.subr.bf16.mxu1 %v6617_v17  ;;  %v712_v51 = vld [vmem:[%s7655_s6 + $0xda8] sm:$0xff]  ;;  %v6662_v17 = vcombine.low %v699_v38, %v703_v39  ;;  %v6671_v55 = vcombine.high %v707_v48, %v711_v49  ;;  %v6711_v38 = vcombine.high %v747_v31, %v751_v33  ;;  %v759_v41 = vld [vmem:[%s7655_s6 + $0xf20] sm:$0xff] }
 0x118   : > { %v6673_v24 = vcombine.high %v708_v50, %v712_v51  ;;  %v6672_v63 = vcombine.low %v708_v50, %v712_v51  ;;  %v763_v50 = vld [vmem:[%s7655_s6 + $0xf40] sm:$0xff] }
 0x119   : > { %v767_v51 = vld [vmem:[%s7655_s6 + $0xf60] sm:$0xff] }
 0x11a   : > { %4692 = vmatpush1.bf16.msra.mxu0 %v6614_v58  ;;  %4938 = vmatpush1.bf16.msra.mxu1 %v6616_v59  ;;  %v719_v58 = vld [vmem:[%s7655_s6 + $0xde0] sm:$0xff]  ;;  %v716_v59 = vld [vmem:[%s7655_s6 + $0xdc8] sm:$0xff] }
 0x11b   : > { %4702 = vmatprep.subr.bf16.mxu0 %v6623_v61  ;;  %4948 = vmatprep.subr.bf16.mxu1 %v6625_v62  ;;  %v720_v61 = vld [vmem:[%s7655_s6 + $0xde8] sm:$0xff]  ;;  %v6670_v62 = vcombine.low %v707_v48, %v711_v49  ;;  %v6679_v1 = vcombine.high %v715_v57, %v719_v58  ;;  %v6719_v48 = vcombine.high %v755_v40, %v759_v41 }
 0x11c   : > { %v6681_v2 = vcombine.high %v716_v59, %v720_v61 }
 0x11d   : > { %4694 = vmatmul.mubr.bf16.vlgmr.msra.gmra.mrb[0].mxu0 %v7934_v3  ;;  %4940 = vmatmul.mubr.bf16.vlgmr.msra.gmra.mrb[0].mxu1 %v7934_v3 }
 0x11e   : > { %4703 = vmatpush1.bf16.msra.mxu0 %v6622_v6  ;;  %4949 = vmatpush1.bf16.msra.mxu1 %v6624_v7  ;;  %v724_v6 = vld [vmem:[%s7655_s6 + $0xe08] sm:$0xff] }
 0x11f   : > { %4704 = vmatprep.subr.bf16.mxu0 %v6631_v8  ;;  %4950 = vmatprep.subr.bf16.mxu1 %v6633_v9  ;;  %v728_v7 = vld [vmem:[%s7655_s6 + $0xe28] sm:$0xff]  ;;  %v6678_v8 = vcombine.low %v715_v57, %v719_v58  ;;  %v6680_v9 = vcombine.low %v716_v59, %v720_v61  ;;  %v6727_v57 = vcombine.high %v763_v50, %v767_v51  ;;  %v771_v59 = vld [vmem:[%s7655_s6 + $0xf80] sm:$0xff] }
 0x120   : > { %4734 = vmatprep.mubr.bf16.mxu0 %v7940_v13  ;;  %4980 = vmatprep.mubr.bf16.mxu1 %v7940_v13  ;;  %v6689_v12 = vcombine.high %v724_v6, %v728_v7  ;;  %v775_v61 = vld [vmem:[%s7655_s6 + $0xfa0] sm:$0xff] }
 0x122   : > { %4705 = vmatpush1.bf16.msra.mxu0 %v6630_v15  ;;  %4951 = vmatpush1.bf16.msra.mxu1 %v6632_v16  ;;  %v732_v15 = vld [vmem:[%s7655_s6 + $0xe48] sm:$0xff] }
 0x123   : > { %4706 = vmatprep.subr.bf16.mxu0 %v6639_v60  ;;  %4952 = vmatprep.subr.bf16.mxu1 %v6641_v18  ;;  %v736_v16 = vld [vmem:[%s7655_s6 + $0xe68] sm:$0xff]  ;;  %v6686_v60 = vcombine.low %v723_v4, %v727_v5  ;;  %v6688_v18 = vcombine.low %v724_v6, %v728_v7  ;;  %v6735_v4 = vcombine.high %v771_v59, %v775_v61  ;;  %v779_v6 = vld [vmem:[%s7655_s6 + $0xfc0] sm:$0xff] }
 0x124   : > { %v6697_v20 = vcombine.high %v732_v15, %v736_v16  ;;  %v783_v7 = vld [vmem:[%s7655_s6 + $0xfe0] sm:$0xff] }
 0x126   : > { %4707 = vmatpush1.bf16.msra.mxu0 %v6638_v23  ;;  %4953 = vmatpush1.bf16.msra.mxu1 %v6640_v25  ;;  %v740_v23 = vld [vmem:[%s7655_s6 + $0xe88] sm:$0xff] }
 0x127   : > { %4708 = vmatprep.subr.bf16.mxu0 %v6647_v27  ;;  %4954 = vmatprep.subr.bf16.mxu1 %v6649_v28  ;;  %v744_v25 = vld [vmem:[%s7655_s6 + $0xea8] sm:$0xff]  ;;  %v6694_v27 = vcombine.low %v731_v32, %v735_v14  ;;  %v6696_v28 = vcombine.low %v732_v15, %v736_v16  ;;  %v6743_v14 = vcombine.high %v779_v6, %v783_v7  ;;  %v787_v16 = vld [vmem:[%s7655_s6 + $0x1000] sm:$0xff] }
 0x128   : > { %v6705_v30 = vcombine.high %v740_v23, %v744_v25 }
 0x12a   : > { %4709 = vmatpush1.bf16.msra.mxu0 %v6646_v34  ;;  %4955 = vmatpush1.bf16.msra.mxu1 %v6648_v0  ;;  %v748_v34 = vld [vmem:[%s7655_s6 + $0xec8] sm:$0xff] }
 0x12b   : > { %4710 = vmatprep.subr.bf16.mxu0 %v6655_v36  ;;  %4956 = vmatprep.subr.bf16.mxu1 %v6657_v37  ;;  %v752_v0 = vld [vmem:[%s7655_s6 + $0xee8] sm:$0xff]  ;;  %v6702_v36 = vcombine.low %v739_v21, %v743_v22  ;;  %v6704_v37 = vcombine.low %v740_v23, %v744_v25  ;;  %v6742_v21 = vcombine.low %v779_v6, %v783_v7 }
 0x12c   : > { %v6713_v39 = vcombine.high %v748_v34, %v752_v0  ;;  %v828_v6 = vld [vmem:[%s7655_s6 + $0x1148] sm:$0xff] }
 0x12d   : > { %v832_v7 = vld [vmem:[%s7655_s6 + $0x1168] sm:$0xff] }
 0x12e   : > { %4711 = vmatpush1.bf16.msra.mxu0 %v6654_v43  ;;  %4957 = vmatpush1.bf16.msra.mxu1 %v6656_v44  ;;  %v756_v43 = vld [vmem:[%s7655_s6 + $0xf08] sm:$0xff] }
 0x12f   : > { %4712 = vmatprep.subr.bf16.mxu0 %v6663_v46  ;;  %4958 = vmatprep.subr.bf16.mxu1 %v6665_v47  ;;  %v760_v44 = vld [vmem:[%s7655_s6 + $0xf28] sm:$0xff]  ;;  %v6710_v46 = vcombine.low %v747_v31, %v751_v33  ;;  %v6712_v47 = vcombine.low %v748_v34, %v752_v0 }
 0x130   : > { %v6721_v49 = vcombine.high %v756_v43, %v760_v44  ;;  %v796_v31 = vld [vmem:[%s7655_s6 + $0x1048] sm:$0xff] }
 0x131   : > { %v800_v33 = vld [vmem:[%s7655_s6 + $0x1068] sm:$0xff] }
 0x132   : > { %4713 = vmatpush1.bf16.msra.mxu0 %v6662_v17  ;;  %4959 = vmatpush1.bf16.msra.mxu1 %v6664_v53  ;;  %v764_v17 = vld [vmem:[%s7655_s6 + $0xf48] sm:$0xff] }
 0x133   : > { %4714 = vmatprep.subr.bf16.mxu0 %v6671_v55  ;;  %4960 = vmatprep.subr.bf16.mxu1 %v6673_v24  ;;  %v768_v53 = vld [vmem:[%s7655_s6 + $0xf68] sm:$0xff]  ;;  %v6718_v55 = vcombine.low %v755_v40, %v759_v41  ;;  %v6720_v24 = vcombine.low %v756_v43, %v760_v44  ;;  %v6760_v44 = vcombine.low %v796_v31, %v800_v33 }
 0x134   : > { %v6729_v58 = vcombine.high %v764_v17, %v768_v53  ;;  %v808_v41 = vld [vmem:[%s7655_s6 + $0x10a8] sm:$0xff] }
 0x136   : > { %4715 = vmatpush1.bf16.msra.mxu0 %v6670_v62  ;;  %4961 = vmatpush1.bf16.msra.mxu1 %v6672_v63  ;;  %v772_v62 = vld [vmem:[%s7655_s6 + $0xf88] sm:$0xff] }
 0x137   : > { %4716 = vmatprep.subr.bf16.mxu0 %v6679_v1  ;;  %4962 = vmatprep.subr.bf16.mxu1 %v6681_v2  ;;  %v776_v63 = vld [vmem:[%s7655_s6 + $0xfa8] sm:$0xff]  ;;  %v6726_v1 = vcombine.low %v763_v50, %v767_v51  ;;  %v6728_v2 = vcombine.low %v764_v17, %v768_v53 }
 0x138   : > { %v6737_v5 = vcombine.high %v772_v62, %v776_v63  ;;  %v6736_v32 = vcombine.low %v772_v62, %v776_v63  ;;  %v812_v50 = vld [vmem:[%s7655_s6 + $0x10c8] sm:$0xff] }
 0x139   : > { %v816_v51 = vld [vmem:[%s7655_s6 + $0x10e8] sm:$0xff] }
 0x13a   : > { %4717 = vmatpush1.bf16.msra.mxu0 %v6678_v8  ;;  %4963 = vmatpush1.bf16.msra.mxu1 %v6680_v9  ;;  %v780_v8 = vld [vmem:[%s7655_s6 + $0xfc8] sm:$0xff]  ;;  %v6776_v63 = vcombine.low %v812_v50, %v816_v51 }
 0x13b   : > { %4718 = vmatprep.subr.bf16.mxu0 %v6687_v11  ;;  %4964 = vmatprep.subr.bf16.mxu1 %v6689_v12  ;;  %v784_v9 = vld [vmem:[%s7655_s6 + $0xfe8] sm:$0xff]  ;;  %v8001_v11 = vld [vmem:[%s7669_s8 + $0x10] sm:$0x3f]  ;;  %v6734_v12 = vcombine.low %v771_v59, %v775_v61 }
 0x13c   : > { %v6745_v15 = vcombine.high %v780_v8, %v784_v9  ;;  %v6744_v22 = vcombine.low %v780_v8, %v784_v9  ;;  %v820_v59 = vld [vmem:[%s7655_s6 + $0x1108] sm:$0xff] }
 0x13d   : > { %v824_v61 = vld [vmem:[%s7655_s6 + $0x1128] sm:$0xff] }
 0x13e   : > { %4719 = vmatpush1.bf16.msra.mxu0 %v6686_v60  ;;  %4965 = vmatpush1.bf16.msra.mxu1 %v6688_v18  ;;  %v791_v60 = vld [vmem:[%s7655_s6 + $0x1020] sm:$0xff]  ;;  %v8007_v18 = vrot.slane %v8001_v11, %v7702_v54  ;;  %v6784_v9 = vcombine.low %v820_v59, %v824_v61 }
 0x13f   : > { %4720 = vmatprep.subr.bf16.mxu0 %v6695_v19  ;;  %4966 = vmatprep.subr.bf16.mxu1 %v6697_v20  ;;  %v788_v19 = vld [vmem:[%s7655_s6 + $0x1008] sm:$0xff]  ;;  %v6751_v23 = vcombine.high %v787_v16, %v791_v60  ;;  %v6750_v34 = vcombine.low %v787_v16, %v791_v60 }
 0x140   : > { %v792_v20 = vld [vmem:[%s7655_s6 + $0x1028] sm:$0xff] }
 0x141   : > { %v6753_v25 = vcombine.high %v788_v19, %v792_v20  ;;  %v6752_v0 = vcombine.low %v788_v19, %v792_v20  ;;  %v836_v16 = vld [vmem:[%s7655_s6 + $0x1188] sm:$0xff]  ;;  %v6792_v20 = vcombine.low %v828_v6, %v832_v7 }
 0x142   : > { %4721 = vmatpush1.bf16.msra.mxu0 %v6694_v27  ;;  %4967 = vmatpush1.bf16.msra.mxu1 %v6696_v28  ;;  %v795_v27 = vld [vmem:[%s7655_s6 + $0x1040] sm:$0xff]  ;;  %v840_v60 = vld [vmem:[%s7655_s6 + $0x11a8] sm:$0xff] }
 0x143   : > { %4722 = vmatprep.subr.bf16.mxu0 %v6703_v29  ;;  %4968 = vmatprep.subr.bf16.mxu1 %v6705_v30  ;;  %v799_v28 = vld [vmem:[%s7655_s6 + $0x1060] sm:$0xff]  ;;  %v1034_v29 = vcombine.high %v8007_v18, %v8007_v18  ;;  %v8017_v30 = vpack.c.bf16 %v7924_v56, %v7924_v56  ;;  %v804_v56 = vld [vmem:[%s7655_s6 + $0x1088] sm:$0xff] }
 0x144   : > { %v6758_v43 = vcombine.low %v795_v27, %v799_v28  ;;  %v6768_v53 = vcombine.low %v804_v56, %v808_v41 }
 0x145   : > { %v8023_v40 = vpack.c.bf16 %v1034_v29, %v1034_v29 }
 0x146   : > { %4723 = vmatpush1.bf16.msra.mxu0 %v6702_v36  ;;  %4969 = vmatpush1.bf16.msra.mxu1 %v6704_v37  ;;  %v6759_v36 = vcombine.high %v795_v27, %v799_v28  ;;  %v6761_v37 = vcombine.high %v796_v31, %v800_v33  ;;  %v844_v27 = vld [vmem:[%s7655_s6 + $0x11c8] sm:$0xff]  ;;  %v6800_v31 = vcombine.low %v836_v16, %v840_v60 }
 0x147   : > { %4724 = vmatprep.subr.bf16.mxu0 %v6711_v38  ;;  %4970 = vmatprep.subr.bf16.mxu1 %v6713_v39  ;;  %v803_v38 = vld [vmem:[%s7655_s6 + $0x1080] sm:$0xff]  ;;  %v848_v28 = vld [vmem:[%s7655_s6 + $0x11e8] sm:$0xff] }
 0x148   : > { %v807_v39 = vld [vmem:[%s7655_s6 + $0x10a0] sm:$0xff] }
 0x149   : > { %v6766_v17 = vcombine.low %v803_v38, %v807_v39 }
 0x14a   : > { %4725 = vmatpush1.bf16.msra.mxu0 %v6710_v46  ;;  %4971 = vmatpush1.bf16.msra.mxu1 %v6712_v47  ;;  %v6767_v46 = vcombine.high %v803_v38, %v807_v39  ;;  %v6769_v47 = vcombine.high %v804_v56, %v808_v41  ;;  %v856_v38 = vld [vmem:[%s7655_s6 + $0x1228] sm:$0xff]  ;;  %v6808_v56 = vcombine.low %v844_v27, %v848_v28 }
 0x14b   : > { %4726 = vmatprep.subr.bf16.mxu0 %v6719_v48  ;;  %4972 = vmatprep.subr.bf16.mxu1 %v6721_v49  ;;  %v811_v48 = vld [vmem:[%s7655_s6 + $0x10c0] sm:$0xff] }
 0x14c   : > { %v815_v49 = vld [vmem:[%s7655_s6 + $0x10e0] sm:$0xff] }
 0x14d   : > { %v6774_v62 = vcombine.low %v811_v48, %v815_v49 }
 0x14e   : > { %4727 = vmatpush1.bf16.msra.mxu0 %v6718_v55  ;;  %4973 = vmatpush1.bf16.msra.mxu1 %v6720_v24  ;;  %v6775_v55 = vcombine.high %v811_v48, %v815_v49  ;;  %v6777_v24 = vcombine.high %v812_v50, %v816_v51  ;;  %v864_v48 = vld [vmem:[%s7655_s6 + $0x1268] sm:$0xff] }
 0x14f   : > { %4728 = vmatprep.subr.bf16.mxu0 %v6727_v57  ;;  %4974 = vmatprep.subr.bf16.mxu1 %v6729_v58  ;;  %v819_v57 = vld [vmem:[%s7655_s6 + $0x1100] sm:$0xff] }
 0x150   : > { %v823_v58 = vld [vmem:[%s7655_s6 + $0x1120] sm:$0xff] }
 0x151   : > { %v6782_v8 = vcombine.low %v819_v57, %v823_v58 }
 0x152   : > { %4729 = vmatpush1.bf16.msra.mxu0 %v6726_v1  ;;  %4975 = vmatpush1.bf16.msra.mxu1 %v6728_v2  ;;  %v6783_v1 = vcombine.high %v819_v57, %v823_v58  ;;  %v6785_v2 = vcombine.high %v820_v59, %v824_v61  ;;  %v872_v57 = vld [vmem:[%s7655_s6 + $0x12a8] sm:$0xff] }
 0x153   : > { %4730 = vmatprep.subr.bf16.mxu0 %v6735_v4  ;;  %4976 = vmatprep.subr.bf16.mxu1 %v6737_v5  ;;  %v827_v4 = vld [vmem:[%s7655_s6 + $0x1140] sm:$0xff] }
 0x154   : > { %v831_v5 = vld [vmem:[%s7655_s6 + $0x1160] sm:$0xff] }
 0x155   : > { %v6790_v19 = vcombine.low %v827_v4, %v831_v5 }
 0x156   : > { %4731 = vmatpush1.bf16.msra.mxu0 %v6734_v12  ;;  %4977 = vmatpush1.bf16.msra.mxu1 %v6736_v32  ;;  %v6791_v12 = vcombine.high %v827_v4, %v831_v5  ;;  %v6793_v32 = vcombine.high %v828_v6, %v832_v7  ;;  %v880_v4 = vld [vmem:[%s7655_s6 + $0x12e8] sm:$0xff] }
 0x157   : > { %4732 = vmatprep.subr.bf16.mxu0 %v6743_v14  ;;  %4978 = vmatprep.subr.bf16.mxu1 %v6745_v15  ;;  %v835_v14 = vld [vmem:[%s7655_s6 + $0x1180] sm:$0xff] }
 0x158   : > { %v839_v15 = vld [vmem:[%s7655_s6 + $0x11a0] sm:$0xff] }
 0x159   : > { %v6798_v29 = vcombine.low %v835_v14, %v839_v15 }
 0x15a   : > { %4733 = vmatpush1.bf16.msra.mxu0 %v6742_v21  ;;  %4979 = vmatpush1.bf16.msra.mxu1 %v6744_v22  ;;  %v6799_v21 = vcombine.high %v835_v14, %v839_v15  ;;  %v6801_v22 = vcombine.high %v836_v16, %v840_v60  ;;  %v888_v14 = vld [vmem:[%s7655_s6 + $0x1328] sm:$0xff] }
 0x15b   : > { %4743 = vmatprep.subr.bf16.mxu0 %v6751_v23  ;;  %4989 = vmatprep.subr.bf16.mxu1 %v6753_v25  ;;  %v843_v23 = vld [vmem:[%s7655_s6 + $0x11c0] sm:$0xff] }
 0x15c   : > { %v847_v25 = vld [vmem:[%s7655_s6 + $0x11e0] sm:$0xff] }
 0x15d   : > { %4735 = vmatmul.mubr.bf16.vlgmr.msra.gmra.mrb[0].mxu0 %v8017_v30  ;;  %4981 = vmatmul.mubr.bf16.vlgmr.msra.gmra.mrb[0].mxu1 %v8017_v30  ;;  %v6807_v33 = vcombine.high %v843_v23, %v847_v25  ;;  %v6806_v39 = vcombine.low %v843_v23, %v847_v25  ;;  %v896_v23 = vld [vmem:[%s7655_s6 + $0x1368] sm:$0xff] }
 0x15e   : > { %4744 = vmatpush1.bf16.msra.mxu0 %v6750_v34  ;;  %4990 = vmatpush1.bf16.msra.mxu1 %v6752_v0  ;;  %v6809_v34 = vcombine.high %v844_v27, %v848_v28  ;;  %v851_v0 = vld [vmem:[%s7655_s6 + $0x1200] sm:$0xff] }
 0x15f   : > { %4745 = vmatprep.subr.bf16.mxu0 %v6759_v36  ;;  %4991 = vmatprep.subr.bf16.mxu1 %v6761_v37  ;;  %v855_v36 = vld [vmem:[%s7655_s6 + $0x1220] sm:$0xff]  ;;  %v852_v37 = vld [vmem:[%s7655_s6 + $0x1208] sm:$0xff] }
 0x160   : > { %4775 = vmatprep.mubr.bf16.mxu0 %v8023_v40  ;;  %5021 = vmatprep.mubr.bf16.mxu1 %v8023_v40  ;;  %v6815_v41 = vcombine.high %v851_v0, %v855_v36  ;;  %v6814_v49 = vcombine.low %v851_v0, %v855_v36  ;;  %v6816_v50 = vcombine.low %v852_v37, %v856_v38  ;;  %v904_v0 = vld [vmem:[%s7655_s6 + $0x13a8] sm:$0xff] }
 0x162   : > { %4746 = vmatpush1.bf16.msra.mxu0 %v6758_v43  ;;  %4992 = vmatpush1.bf16.msra.mxu1 %v6760_v44  ;;  %v6817_v43 = vcombine.high %v852_v37, %v856_v38  ;;  %v859_v44 = vld [vmem:[%s7655_s6 + $0x1240] sm:$0xff] }
 0x163   : > { %4747 = vmatprep.subr.bf16.mxu0 %v6767_v46  ;;  %4993 = vmatprep.subr.bf16.mxu1 %v6769_v47  ;;  %v863_v46 = vld [vmem:[%s7655_s6 + $0x1260] sm:$0xff]  ;;  %v860_v47 = vld [vmem:[%s7655_s6 + $0x1248] sm:$0xff] }
 0x164   : > { %v6823_v51 = vcombine.high %v859_v44, %v863_v46  ;;  %v6822_v58 = vcombine.low %v859_v44, %v863_v46  ;;  %v6824_v59 = vcombine.low %v860_v47, %v864_v48  ;;  %v912_v44 = vld [vmem:[%s7655_s6 + $0x13e8] sm:$0xff] }
 0x166   : > { %4748 = vmatpush1.bf16.msra.mxu0 %v6766_v17  ;;  %4994 = vmatpush1.bf16.msra.mxu1 %v6768_v53  ;;  %v6825_v17 = vcombine.high %v860_v47, %v864_v48  ;;  %v867_v53 = vld [vmem:[%s7655_s6 + $0x1280] sm:$0xff] }
 0x167   : > { %4749 = vmatprep.subr.bf16.mxu0 %v6775_v55  ;;  %4995 = vmatprep.subr.bf16.mxu1 %v6777_v24  ;;  %v871_v55 = vld [vmem:[%s7655_s6 + $0x12a0] sm:$0xff]  ;;  %v868_v24 = vld [vmem:[%s7655_s6 + $0x1288] sm:$0xff] }
 0x168   : > { %v6831_v61 = vcombine.high %v867_v53, %v871_v55  ;;  %v6830_v5 = vcombine.low %v867_v53, %v871_v55  ;;  %v6832_v6 = vcombine.low %v868_v24, %v872_v57  ;;  %v920_v53 = vld [vmem:[%s7655_s6 + $0x1428] sm:$0xff] }
 0x16a   : > { %4750 = vmatpush1.bf16.msra.mxu0 %v6774_v62  ;;  %4996 = vmatpush1.bf16.msra.mxu1 %v6776_v63  ;;  %v6833_v62 = vcombine.high %v868_v24, %v872_v57  ;;  %v875_v63 = vld [vmem:[%s7655_s6 + $0x12c0] sm:$0xff] }
 0x16b   : > { %4751 = vmatprep.subr.bf16.mxu0 %v6783_v1  ;;  %4997 = vmatprep.subr.bf16.mxu1 %v6785_v2  ;;  %v879_v1 = vld [vmem:[%s7655_s6 + $0x12e0] sm:$0xff]  ;;  %v876_v2 = vld [vmem:[%s7655_s6 + $0x12c8] sm:$0xff] }
 0x16c   : > { %v6839_v7 = vcombine.high %v875_v63, %v879_v1  ;;  %v6838_v15 = vcombine.low %v875_v63, %v879_v1  ;;  %v6840_v16 = vcombine.low %v876_v2, %v880_v4  ;;  %v924_v63 = vld [vmem:[%s7655_s6 + $0x1448] sm:$0xff] }
 0x16d   : > { %v928_v1 = vld [vmem:[%s7655_s6 + $0x1468] sm:$0xff] }
 0x16e   : > { %4752 = vmatpush1.bf16.msra.mxu0 %v6782_v8  ;;  %4998 = vmatpush1.bf16.msra.mxu1 %v6784_v9  ;;  %v6841_v8 = vcombine.high %v876_v2, %v880_v4  ;;  %v883_v9 = vld [vmem:[%s7655_s6 + $0x1300] sm:$0xff] }
 0x16f   : > { %4753 = vmatprep.subr.bf16.mxu0 %v6791_v12  ;;  %4999 = vmatprep.subr.bf16.mxu1 %v6793_v32  ;;  %v887_v12 = vld [vmem:[%s7655_s6 + $0x1320] sm:$0xff]  ;;  %v884_v32 = vld [vmem:[%s7655_s6 + $0x1308] sm:$0xff] }
 0x170   : > { %v6847_v60 = vcombine.high %v883_v9, %v887_v12  ;;  %v6846_v25 = vcombine.low %v883_v9, %v887_v12  ;;  %v6848_v27 = vcombine.low %v884_v32, %v888_v14  ;;  %v932_v9 = vld [vmem:[%s7655_s6 + $0x1488] sm:$0xff] }
 0x172   : > { %4754 = vmatpush1.bf16.msra.mxu0 %v6790_v19  ;;  %5000 = vmatpush1.bf16.msra.mxu1 %v6792_v20  ;;  %v6849_v19 = vcombine.high %v884_v32, %v888_v14  ;;  %v891_v20 = vld [vmem:[%s7655_s6 + $0x1340] sm:$0xff]  ;;  %v6888_v32 = vcombine.low %v924_v63, %v928_v1 }
 0x173   : > { %4755 = vmatprep.subr.bf16.mxu0 %v6799_v21  ;;  %5001 = vmatprep.subr.bf16.mxu1 %v6801_v22  ;;  %v895_v21 = vld [vmem:[%s7655_s6 + $0x1360] sm:$0xff]  ;;  %v892_v22 = vld [vmem:[%s7655_s6 + $0x1348] sm:$0xff] }
 0x174   : > { %v6855_v28 = vcombine.high %v891_v20, %v895_v21  ;;  %v6854_v36 = vcombine.low %v891_v20, %v895_v21  ;;  %v6856_v37 = vcombine.low %v892_v22, %v896_v23  ;;  %v940_v20 = vld [vmem:[%s7655_s6 + $0x14c8] sm:$0xff] }
 0x175   : > { %v944_v21 = vld [vmem:[%s7655_s6 + $0x14e8] sm:$0xff] }
 0x176   : > { %4756 = vmatpush1.bf16.msra.mxu0 %v6798_v29  ;;  %5002 = vmatpush1.bf16.msra.mxu1 %v6800_v31  ;;  %v6857_v29 = vcombine.high %v892_v22, %v896_v23  ;;  %v899_v31 = vld [vmem:[%s7655_s6 + $0x1380] sm:$0xff] }
 0x177   : > { %4757 = vmatprep.subr.bf16.mxu0 %v6807_v33  ;;  %5003 = vmatprep.subr.bf16.mxu1 %v6809_v34  ;;  %v903_v33 = vld [vmem:[%s7655_s6 + $0x13a0] sm:$0xff]  ;;  %v900_v34 = vld [vmem:[%s7655_s6 + $0x1388] sm:$0xff] }
 0x178   : > { %v6863_v38 = vcombine.high %v899_v31, %v903_v33  ;;  %v6862_v46 = vcombine.low %v899_v31, %v903_v33  ;;  %v6864_v47 = vcombine.low %v900_v34, %v904_v0  ;;  %v948_v31 = vld [vmem:[%s7655_s6 + $0x1508] sm:$0xff] }
 0x179   : > { %v952_v33 = vld [vmem:[%s7655_s6 + $0x1528] sm:$0xff] }
 0x17a   : > { %4758 = vmatpush1.bf16.msra.mxu0 %v6806_v39  ;;  %5004 = vmatpush1.bf16.msra.mxu1 %v6808_v56  ;;  %v6865_v39 = vcombine.high %v900_v34, %v904_v0  ;;  %v907_v56 = vld [vmem:[%s7655_s6 + $0x13c0] sm:$0xff]  ;;  %v6904_v0 = vcombine.low %v940_v20, %v944_v21 }
 0x17b   : > { %4759 = vmatprep.subr.bf16.mxu0 %v6815_v41  ;;  %5005 = vmatprep.subr.bf16.mxu1 %v6817_v43  ;;  %v911_v41 = vld [vmem:[%s7655_s6 + $0x13e0] sm:$0xff]  ;;  %v908_v43 = vld [vmem:[%s7655_s6 + $0x13c8] sm:$0xff] }
 0x17c   : > { %v6871_v48 = vcombine.high %v907_v56, %v911_v41  ;;  %v6870_v55 = vcombine.low %v907_v56, %v911_v41  ;;  %v6872_v24 = vcombine.low %v908_v43, %v912_v44  ;;  %v956_v56 = vld [vmem:[%s7655_s6 + $0x1548] sm:$0xff] }
 0x17d   : > { %v960_v41 = vld [vmem:[%s7655_s6 + $0x1568] sm:$0xff] }
 0x17e   : > { %4760 = vmatpush1.bf16.msra.mxu0 %v6814_v49  ;;  %5006 = vmatpush1.bf16.msra.mxu1 %v6816_v50  ;;  %v6873_v49 = vcombine.high %v908_v43, %v912_v44  ;;  %v915_v50 = vld [vmem:[%s7655_s6 + $0x1400] sm:$0xff]  ;;  %v6912_v44 = vcombine.low %v948_v31, %v952_v33 }
 0x17f   : > { %4761 = vmatprep.subr.bf16.mxu0 %v6823_v51  ;;  %5007 = vmatprep.subr.bf16.mxu1 %v6825_v17  ;;  %v919_v51 = vld [vmem:[%s7655_s6 + $0x1420] sm:$0xff]  ;;  %v916_v17 = vld [vmem:[%s7655_s6 + $0x1408] sm:$0xff] }
 0x180   : > { %v6879_v57 = vcombine.high %v915_v50, %v919_v51  ;;  %v6878_v2 = vcombine.low %v915_v50, %v919_v51  ;;  %v6880_v4 = vcombine.low %v916_v17, %v920_v53  ;;  %v964_v50 = vld [vmem:[%s7655_s6 + $0x1588] sm:$0xff] }
 0x181   : > { %v968_v51 = vld [vmem:[%s7655_s6 + $0x15a8] sm:$0xff] }
 0x182   : > { %4762 = vmatpush1.bf16.msra.mxu0 %v6822_v58  ;;  %5008 = vmatpush1.bf16.msra.mxu1 %v6824_v59  ;;  %v6881_v58 = vcombine.high %v916_v17, %v920_v53  ;;  %v923_v59 = vld [vmem:[%s7655_s6 + $0x1440] sm:$0xff]  ;;  %v6920_v53 = vcombine.low %v956_v56, %v960_v41 }
 0x183   : > { %4763 = vmatprep.subr.bf16.mxu0 %v6831_v61  ;;  %5009 = vmatprep.subr.bf16.mxu1 %v6833_v62  ;;  %v927_v61 = vld [vmem:[%s7655_s6 + $0x1460] sm:$0xff]  ;;  %v8091_v62 = vpack.c.bf16 %v8007_v18, %v8007_v18  ;;  %v936_v18 = vld [vmem:[%s7655_s6 + $0x14a8] sm:$0xff] }
 0x184   : > { %v6886_v12 = vcombine.low %v923_v59, %v927_v61  ;;  %v6896_v23 = vcombine.low %v932_v9, %v936_v18 }
 0x186   : > { %4764 = vmatpush1.bf16.msra.mxu0 %v6830_v5  ;;  %5010 = vmatpush1.bf16.msra.mxu1 %v6832_v6  ;;  %v6887_v5 = vcombine.high %v923_v59, %v927_v61  ;;  %v6889_v6 = vcombine.high %v924_v63, %v928_v1  ;;  %v972_v59 = vld [vmem:[%s7655_s6 + $0x15c8] sm:$0xff]  ;;  %v1019_v63 = vcombine.high %v8001_v11, %v8001_v11 }
 0x187   : > { %4765 = vmatprep.subr.bf16.mxu0 %v6839_v7  ;;  %5011 = vmatprep.subr.bf16.mxu1 %v6841_v8  ;;  %v931_v7 = vld [vmem:[%s7655_s6 + $0x1480] sm:$0xff]  ;;  %v976_v61 = vld [vmem:[%s7655_s6 + $0x15e8] sm:$0xff] }
 0x188   : > { %v935_v8 = vld [vmem:[%s7655_s6 + $0x14a0] sm:$0xff] }
 0x189   : > { %v6895_v14 = vcombine.high %v931_v7, %v935_v8  ;;  %v6894_v22 = vcombine.low %v931_v7, %v935_v8  ;;  %v281_v7 = vld [vmem:[%s7655_s6 + $0x30] sm:$0xff]  ;;  %v1033_v8 = vrot.slane %v1019_v63, %v7702_v54 }
 0x18a   : > { %4766 = vmatpush1.bf16.msra.mxu0 %v6838_v15  ;;  %5012 = vmatpush1.bf16.msra.mxu1 %v6840_v16  ;;  %v6897_v15 = vcombine.high %v932_v9, %v936_v18  ;;  %v939_v16 = vld [vmem:[%s7655_s6 + $0x14c0] sm:$0xff]  ;;  %v278_v9 = vld [vmem:[%s7655_s6 + $0x18] sm:$0xff] }
 0x18b   : > { %4767 = vmatprep.subr.bf16.mxu0 %v6847_v60  ;;  %5013 = vmatprep.subr.bf16.mxu1 %v6849_v19  ;;  %v943_v60 = vld [vmem:[%s7655_s6 + $0x14e0] sm:$0xff]  ;;  %v7500_v19 = vmov 0   ;;  %v282_v18 = vld [vmem:[%s7655_s6 + $0x38] sm:$0xff] }
 0x18c   : > { %v6902_v34 = vcombine.low %v939_v16, %v943_v60 }
 0x18e   : > { %4768 = vmatpush1.bf16.msra.mxu0 %v6846_v25  ;;  %5014 = vmatpush1.bf16.msra.mxu1 %v6848_v27  ;;  %v6903_v25 = vcombine.high %v939_v16, %v943_v60  ;;  %v6905_v27 = vcombine.high %v940_v20, %v944_v21  ;;  %v289_v16 = vld [vmem:[%s7655_s6 + $0x70] sm:$0xff]  ;;  %v8132_v60 = vpack.c.bf16 %v1033_v8, %v1033_v8  ;;  %v286_v20 = vld [vmem:[%s7655_s6 + $0x58] sm:$0xff] }
 0x18f   : > { %4769 = vmatprep.subr.bf16.mxu0 %v6855_v28  ;;  %5015 = vmatprep.subr.bf16.mxu1 %v6857_v29  ;;  %v947_v28 = vld [vmem:[%s7655_s6 + $0x1500] sm:$0xff]  ;;  %v290_v21 = vld [vmem:[%s7655_s6 + $0x78] sm:$0xff] }
 0x190   : > { %v951_v29 = vld [vmem:[%s7655_s6 + $0x1520] sm:$0xff] }
 0x191   : > { %v6910_v43 = vcombine.low %v947_v28, %v951_v29 }
 0x192   : > { %4770 = vmatpush1.bf16.msra.mxu0 %v6854_v36  ;;  %5016 = vmatpush1.bf16.msra.mxu1 %v6856_v37  ;;  %v6911_v36 = vcombine.high %v947_v28, %v951_v29  ;;  %v6913_v37 = vcombine.high %v948_v31, %v952_v33  ;;  %v293_v28 = vld [vmem:[%s7655_s6 + $0x90] sm:$0xff]  ;;  %v294_v31 = vld [vmem:[%s7655_s6 + $0x98] sm:$0xff] }
 0x193   : > { %4771 = vmatprep.subr.bf16.mxu0 %v6863_v38  ;;  %5017 = vmatprep.subr.bf16.mxu1 %v6865_v39  ;;  %v955_v38 = vld [vmem:[%s7655_s6 + $0x1540] sm:$0xff]  ;;  %v297_v29 = vld [vmem:[%s7655_s6 + $0xb0] sm:$0xff]  ;;  %v298_v33 = vld [vmem:[%s7655_s6 + $0xb8] sm:$0xff] }
 0x194   : > { %v959_v39 = vld [vmem:[%s7655_s6 + $0x1560] sm:$0xff] }
 0x195   : > { %v6918_v17 = vcombine.low %v955_v38, %v959_v39 }
 0x196   : > { %4772 = vmatpush1.bf16.msra.mxu0 %v6862_v46  ;;  %5018 = vmatpush1.bf16.msra.mxu1 %v6864_v47  ;;  %v6919_v46 = vcombine.high %v955_v38, %v959_v39  ;;  %v6921_v47 = vcombine.high %v956_v56, %v960_v41  ;;  %v301_v38 = vld [vmem:[%s7655_s6 + $0xd0] sm:$0xff]  ;;  %v302_v56 = vld [vmem:[%s7655_s6 + $0xd8] sm:$0xff] }
 0x197   : > { %4773 = vmatprep.subr.bf16.mxu0 %v6871_v48  ;;  %5019 = vmatprep.subr.bf16.mxu1 %v6873_v49  ;;  %v963_v48 = vld [vmem:[%s7655_s6 + $0x1580] sm:$0xff]  ;;  %v305_v39 = vld [vmem:[%s7655_s6 + $0xf0] sm:$0xff]  ;;  %v306_v41 = vld [vmem:[%s7655_s6 + $0xf8] sm:$0xff] }
 0x198   : > { %v967_v49 = vld [vmem:[%s7655_s6 + $0x15a0] sm:$0xff] }
 0x199   : > { %v6926_v1 = vcombine.low %v963_v48, %v967_v49 }
 0x19a   : > { %4774 = vmatpush1.bf16.msra.mxu0 %v6870_v55  ;;  %5020 = vmatpush1.bf16.msra.mxu1 %v6872_v24  ;;  %v6927_v55 = vcombine.high %v963_v48, %v967_v49  ;;  %v6929_v24 = vcombine.high %v964_v50, %v968_v51  ;;  %v309_v48 = vld [vmem:[%s7655_s6 + $0x110] sm:$0xff] }
 0x19b   : > { %4784 = vmatprep.subr.bf16.mxu0 %v6879_v57  ;;  %5030 = vmatprep.subr.bf16.mxu1 %v6881_v58  ;;  %v971_v57 = vld [vmem:[%s7655_s6 + $0x15c0] sm:$0xff]  ;;  %v313_v49 = vld [vmem:[%s7655_s6 + $0x130] sm:$0xff] }
 0x19c   : > { %v975_v58 = vld [vmem:[%s7655_s6 + $0x15e0] sm:$0xff] }
 0x19d   : > { %4776 = vmatmul.mubr.bf16.vlgmr.msra.gmra.mrb[0].mxu0 %v8091_v62  ;;  %5022 = vmatmul.mubr.bf16.vlgmr.msra.gmra.mrb[0].mxu1 %v8091_v62  ;;  %v6934_v11 = vcombine.low %v971_v57, %v975_v58 }
 0x19e   : > { %4785 = vmatpush1.bf16.msra.mxu0 %v6878_v2  ;;  %5031 = vmatpush1.bf16.msra.mxu1 %v6880_v4  ;;  %v6928_v2 = vcombine.low %v964_v50, %v968_v51  ;;  %v6935_v4 = vcombine.high %v971_v57, %v975_v58  ;;  %v310_v50 = vld [vmem:[%s7655_s6 + $0x118] sm:$0xff]  ;;  %v321_v57 = vld [vmem:[%s7655_s6 + $0x170] sm:$0xff] }
 0x19f   : > { %4786 = vmatprep.subr.bf16.mxu0 %v6887_v5  ;;  %5032 = vmatprep.subr.bf16.mxu1 %v6889_v6  ;;  %v6937_v5 = vcombine.high %v972_v59, %v976_v61  ;;  %v277_v6 = vld [vmem:[%s7655_s6 + $0x10] sm:$0xff]  ;;  %v314_v51 = vld [vmem:[%s7655_s6 + $0x138] sm:$0xff] }
 0x1a0   : > { %4816 = vmatprep.mubr.bf16.mxu0 %v7500_v19  ;;  %5062 = vmatprep.mubr.bf16.mxu1 %v7500_v19  ;;  %v318_v58 = vld [vmem:[%s7655_s6 + $0x158] sm:$0xff]  ;;  %v6276_v63 = vcombine.low %v310_v50, %v314_v51 }
 0x1a2   : > { %4787 = vmatpush1.bf16.msra.mxu0 %v6886_v12  ;;  %5033 = vmatpush1.bf16.msra.mxu1 %v6888_v32  ;;  %v6936_v12 = vcombine.low %v972_v59, %v976_v61  ;;  %v6243_v32 = vcombine.high %v277_v6, %v281_v7  ;;  %v322_v59 = vld [vmem:[%s7655_s6 + $0x178] sm:$0xff]  ;;  %v6274_v61 = vcombine.low %v309_v48, %v313_v49 }
 0x1a3   : > { %4788 = vmatprep.subr.bf16.mxu0 %v6895_v14  ;;  %5034 = vmatprep.subr.bf16.mxu1 %v6897_v15  ;;  %v6245_v14 = vcombine.high %v278_v9, %v282_v18  ;;  %v285_v15 = vld [vmem:[%s7655_s6 + $0x50] sm:$0xff] }
 0x1a6   : > { %4789 = vmatpush1.bf16.msra.mxu0 %v6894_v22  ;;  %5035 = vmatpush1.bf16.msra.mxu1 %v6896_v23  ;;  %v6242_v22 = vcombine.low %v277_v6, %v281_v7  ;;  %v6244_v23 = vcombine.low %v278_v9, %v282_v18  ;;  %v326_v6 = vld [vmem:[%s7655_s6 + $0x198] sm:$0xff]  ;;  %v6284_v9 = vcombine.low %v318_v58, %v322_v59 }
 0x1a7   : > { %4790 = vmatprep.subr.bf16.mxu0 %v6903_v25  ;;  %5036 = vmatprep.subr.bf16.mxu1 %v6905_v27  ;;  %v6251_v25 = vcombine.high %v285_v15, %v289_v16  ;;  %v6253_v27 = vcombine.high %v286_v20, %v290_v21  ;;  %v330_v7 = vld [vmem:[%s7655_s6 + $0x1b8] sm:$0xff] }
 0x1aa   : > { %4791 = vmatpush1.bf16.msra.mxu0 %v6902_v34  ;;  %5037 = vmatpush1.bf16.msra.mxu1 %v6904_v0  ;;  %v6250_v34 = vcombine.low %v285_v15, %v289_v16  ;;  %v6252_v0 = vcombine.low %v286_v20, %v290_v21  ;;  %v338_v15 = vld [vmem:[%s7655_s6 + $0x1f8] sm:$0xff]  ;;  %v6292_v20 = vcombine.low %v326_v6, %v330_v7 }
 0x1ab   : > { %4792 = vmatprep.subr.bf16.mxu0 %v6911_v36  ;;  %5038 = vmatprep.subr.bf16.mxu1 %v6913_v37  ;;  %v6259_v36 = vcombine.high %v293_v28, %v297_v29  ;;  %v6261_v37 = vcombine.high %v294_v31, %v298_v33 }
 0x1ae   : > { %4793 = vmatpush1.bf16.msra.mxu0 %v6910_v43  ;;  %5039 = vmatpush1.bf16.msra.mxu1 %v6912_v44  ;;  %v6258_v43 = vcombine.low %v293_v28, %v297_v29  ;;  %v6260_v44 = vcombine.low %v294_v31, %v298_v33  ;;  %v346_v28 = vld [vmem:[%s7655_s6 + $0x238] sm:$0xff] }
 0x1af   : > { %4794 = vmatprep.subr.bf16.mxu0 %v6919_v46  ;;  %5040 = vmatprep.subr.bf16.mxu1 %v6921_v47  ;;  %v6267_v46 = vcombine.high %v301_v38, %v305_v39  ;;  %v6269_v47 = vcombine.high %v302_v56, %v306_v41 }
 0x1b2   : > { %4795 = vmatpush1.bf16.msra.mxu0 %v6918_v17  ;;  %5041 = vmatpush1.bf16.msra.mxu1 %v6920_v53  ;;  %v6266_v17 = vcombine.low %v301_v38, %v305_v39  ;;  %v6275_v53 = vcombine.high %v309_v48, %v313_v49  ;;  %v354_v38 = vld [vmem:[%s7655_s6 + $0x278] sm:$0xff] }
 0x1b3   : > { %4796 = vmatprep.subr.bf16.mxu0 %v6927_v55  ;;  %5042 = vmatprep.subr.bf16.mxu1 %v6929_v24  ;;  %v6277_v55 = vcombine.high %v310_v50, %v314_v51  ;;  %v317_v24 = vld [vmem:[%s7655_s6 + $0x150] sm:$0xff]  ;;  %v362_v48 = vld [vmem:[%s7655_s6 + $0x2b8] sm:$0xff] }
 0x1b4   : > { %v6282_v8 = vcombine.low %v317_v24, %v321_v57 }
 0x1b6   : > { %4797 = vmatpush1.bf16.msra.mxu0 %v6926_v1  ;;  %5043 = vmatpush1.bf16.msra.mxu1 %v6928_v2  ;;  %v6283_v1 = vcombine.high %v317_v24, %v321_v57  ;;  %v6285_v2 = vcombine.high %v318_v58, %v322_v59  ;;  %v370_v24 = vld [vmem:[%s7655_s6 + $0x2f8] sm:$0xff] }
 0x1b7   : > { %4798 = vmatprep.subr.bf16.mxu0 %v6935_v4  ;;  %5044 = vmatprep.subr.bf16.mxu1 %v6937_v5  ;;  %v325_v4 = vld [vmem:[%s7655_s6 + $0x190] sm:$0xff] }
 0x1b8   : > { %v329_v5 = vld [vmem:[%s7655_s6 + $0x1b0] sm:$0xff] }
 0x1b9   : > { %v6291_v18 = vcombine.high %v325_v4, %v329_v5  ;;  %v6290_v16 = vcombine.low %v325_v4, %v329_v5  ;;  %v378_v4 = vld [vmem:[%s7655_s6 + $0x338] sm:$0xff] }
 0x1ba   : > { %4799 = vmatpush1.bf16.msra.mxu0 %v6934_v11  ;;  %5045 = vmatpush1.bf16.msra.mxu1 %v6936_v12  ;;  %v6293_v11 = vcombine.high %v326_v6, %v330_v7  ;;  %v333_v12 = vld [vmem:[%s7655_s6 + $0x1d0] sm:$0xff] }
 0x1bb   : > { %5071 = vmatprep.subr.bf16.mxu0 %v6243_v32  ;;  %5317 = vmatprep.subr.bf16.mxu1 %v6245_v14  ;;  %v337_v32 = vld [vmem:[%s7655_s6 + $0x1f0] sm:$0xff]  ;;  %v334_v14 = vld [vmem:[%s7655_s6 + $0x1d8] sm:$0xff] }
 0x1bc   : > { %v6299_v21 = vcombine.high %v333_v12, %v337_v32  ;;  %v6298_v29 = vcombine.low %v333_v12, %v337_v32  ;;  %v6300_v31 = vcombine.low %v334_v14, %v338_v15  ;;  %v386_v12 = vld [vmem:[%s7655_s6 + $0x378] sm:$0xff] }
 0x1bd   : > { %4817 = vmatmul.mubr.bf16.vlgmr.msra.gmra.mrb[0].mxu0 %v8132_v60  ;;  %5063 = vmatmul.mubr.bf16.vlgmr.msra.gmra.mrb[0].mxu1 %v8132_v60 }
 0x1be   : > { %5072 = vmatpush1.bf16.msra.mxu0 %v6242_v22  ;;  %5318 = vmatpush1.bf16.msra.mxu1 %v6244_v23  ;;  %v6301_v22 = vcombine.high %v334_v14, %v338_v15  ;;  %v341_v23 = vld [vmem:[%s7655_s6 + $0x210] sm:$0xff] }
 0x1bf   : > { %5073 = vmatprep.subr.bf16.mxu0 %v6251_v25  ;;  %5319 = vmatprep.subr.bf16.mxu1 %v6253_v27  ;;  %v345_v25 = vld [vmem:[%s7655_s6 + $0x230] sm:$0xff]  ;;  %v342_v27 = vld [vmem:[%s7655_s6 + $0x218] sm:$0xff] }
 0x1c0   : > { %5103 = vmatprep.mubr.bf16.mxu0 %v7721_v10  ;;  %5349 = vmatprep.mubr.bf16.mxu1 %v7721_v10  ;;  %v6268_v10 = vcombine.low %v302_v56, %v306_v41  ;;  %v6307_v33 = vcombine.high %v341_v23, %v345_v25  ;;  %v6306_v39 = vcombine.low %v341_v23, %v345_v25  ;;  %v394_v23 = vld [vmem:[%s7655_s6 + $0x3b8] sm:$0xff] }
 0x1c1   : > { %v6308_v56 = vcombine.low %v342_v27, %v346_v28 }
 0x1c2   : > { %5074 = vmatpush1.bf16.msra.mxu0 %v6250_v34  ;;  %5320 = vmatpush1.bf16.msra.mxu1 %v6252_v0  ;;  %v6309_v34 = vcombine.high %v342_v27, %v346_v28  ;;  %v349_v0 = vld [vmem:[%s7655_s6 + $0x250] sm:$0xff] }
 0x1c3   : > { %5075 = vmatprep.subr.bf16.mxu0 %v6259_v36  ;;  %5321 = vmatprep.subr.bf16.mxu1 %v6261_v37  ;;  %v353_v36 = vld [vmem:[%s7655_s6 + $0x270] sm:$0xff]  ;;  %v350_v37 = vld [vmem:[%s7655_s6 + $0x258] sm:$0xff] }
 0x1c4   : > { %v6315_v41 = vcombine.high %v349_v0, %v353_v36  ;;  %v6314_v49 = vcombine.low %v349_v0, %v353_v36  ;;  %v6316_v50 = vcombine.low %v350_v37, %v354_v38  ;;  %v402_v0 = vld [vmem:[%s7655_s6 + $0x3f8] sm:$0xff] }
 0x1c6   : > { %5076 = vmatpush1.bf16.msra.mxu0 %v6258_v43  ;;  %5322 = vmatpush1.bf16.msra.mxu1 %v6260_v44  ;;  %v6317_v43 = vcombine.high %v350_v37, %v354_v38  ;;  %v357_v44 = vld [vmem:[%s7655_s6 + $0x290] sm:$0xff] }
 0x1c7   : > { %5077 = vmatprep.subr.bf16.mxu0 %v6267_v46  ;;  %5323 = vmatprep.subr.bf16.mxu1 %v6269_v47  ;;  %v361_v46 = vld [vmem:[%s7655_s6 + $0x2b0] sm:$0xff]  ;;  %v358_v47 = vld [vmem:[%s7655_s6 + $0x298] sm:$0xff] }
 0x1c8   : > { %v6323_v51 = vcombine.high %v357_v44, %v361_v46  ;;  %v6322_v57 = vcombine.low %v357_v44, %v361_v46  ;;  %v6324_v58 = vcombine.low %v358_v47, %v362_v48  ;;  %v410_v44 = vld [vmem:[%s7655_s6 + $0x438] sm:$0xff] }
 0x1ca   : > { %5078 = vmatpush1.bf16.msra.mxu0 %v6266_v17  ;;  %5324 = vmatpush1.bf16.msra.mxu1 %v6268_v10  ;;  %v6325_v17 = vcombine.high %v358_v47, %v362_v48  ;;  %v365_v10 = vld [vmem:[%s7655_s6 + $0x2d0] sm:$0xff] }
 0x1cb   : > { %5079 = vmatprep.subr.bf16.mxu0 %v6275_v53  ;;  %5325 = vmatprep.subr.bf16.mxu1 %v6277_v55  ;;  %v369_v53 = vld [vmem:[%s7655_s6 + $0x2f0] sm:$0xff]  ;;  %v366_v55 = vld [vmem:[%s7655_s6 + $0x2d8] sm:$0xff] }
 0x1cc   : > { %v6331_v59 = vcombine.high %v365_v10, %v369_v53  ;;  %v6330_v5 = vcombine.low %v365_v10, %v369_v53  ;;  %v6332_v6 = vcombine.low %v366_v55, %v370_v24  ;;  %v418_v10 = vld [vmem:[%s7655_s6 + $0x478] sm:$0xff] }
 0x1ce   : > { %5080 = vmatpush1.bf16.msra.mxu0 %v6274_v61  ;;  %5326 = vmatpush1.bf16.msra.mxu1 %v6276_v63  ;;  %v6333_v61 = vcombine.high %v366_v55, %v370_v24  ;;  %v373_v63 = vld [vmem:[%s7655_s6 + $0x310] sm:$0xff] }
 0x1cf   : > { %5081 = vmatprep.subr.bf16.mxu0 %v6283_v1  ;;  %5327 = vmatprep.subr.bf16.mxu1 %v6285_v2  ;;  %v377_v1 = vld [vmem:[%s7655_s6 + $0x330] sm:$0xff]  ;;  %v374_v2 = vld [vmem:[%s7655_s6 + $0x318] sm:$0xff] }
 0x1d0   : > { %v6339_v7 = vcombine.high %v373_v63, %v377_v1  ;;  %v6338_v32 = vcombine.low %v373_v63, %v377_v1  ;;  %v6340_v14 = vcombine.low %v374_v2, %v378_v4  ;;  %v426_v63 = vld [vmem:[%s7655_s6 + $0x4b8] sm:$0xff] }
 0x1d2   : > { %5082 = vmatpush1.bf16.msra.mxu0 %v6282_v8  ;;  %5328 = vmatpush1.bf16.msra.mxu1 %v6284_v9  ;;  %v6341_v8 = vcombine.high %v374_v2, %v378_v4  ;;  %v381_v9 = vld [vmem:[%s7655_s6 + $0x350] sm:$0xff] }
 0x1d3   : > { %5083 = vmatprep.subr.bf16.mxu0 %v6291_v18  ;;  %5329 = vmatprep.subr.bf16.mxu1 %v6293_v11  ;;  %v385_v18 = vld [vmem:[%s7655_s6 + $0x370] sm:$0xff]  ;;  %v382_v11 = vld [vmem:[%s7655_s6 + $0x358] sm:$0xff] }
 0x1d4   : > { %v6347_v15 = vcombine.high %v381_v9, %v385_v18  ;;  %v6346_v25 = vcombine.low %v381_v9, %v385_v18  ;;  %v6348_v27 = vcombine.low %v382_v11, %v386_v12  ;;  %v434_v9 = vld [vmem:[%s7655_s6 + $0x4f8] sm:$0xff] }
 0x1d6   : > { %5084 = vmatpush1.bf16.msra.mxu0 %v6290_v16  ;;  %5330 = vmatpush1.bf16.msra.mxu1 %v6292_v20  ;;  %v6349_v16 = vcombine.high %v382_v11, %v386_v12  ;;  %v389_v20 = vld [vmem:[%s7655_s6 + $0x390] sm:$0xff] }
 0x1d7   : > { %5085 = vmatprep.subr.bf16.mxu0 %v6299_v21  ;;  %5331 = vmatprep.subr.bf16.mxu1 %v6301_v22  ;;  %v393_v21 = vld [vmem:[%s7655_s6 + $0x3b0] sm:$0xff]  ;;  %v390_v22 = vld [vmem:[%s7655_s6 + $0x398] sm:$0xff] }
 0x1d8   : > { %v6355_v28 = vcombine.high %v389_v20, %v393_v21  ;;  %v6354_v36 = vcombine.low %v389_v20, %v393_v21  ;;  %v6356_v37 = vcombine.low %v390_v22, %v394_v23 }
 0x1da   : > { %5086 = vmatpush1.bf16.msra.mxu0 %v6298_v29  ;;  %5332 = vmatpush1.bf16.msra.mxu1 %v6300_v31  ;;  %v6357_v29 = vcombine.high %v390_v22, %v394_v23  ;;  %v397_v31 = vld [vmem:[%s7655_s6 + $0x3d0] sm:$0xff] }
 0x1db   : > { %5087 = vmatprep.subr.bf16.mxu0 %v6307_v33  ;;  %5333 = vmatprep.subr.bf16.mxu1 %v6309_v34  ;;  %v401_v33 = vld [vmem:[%s7655_s6 + $0x3f0] sm:$0xff]  ;;  %v398_v34 = vld [vmem:[%s7655_s6 + $0x3d8] sm:$0xff] }
 0x1dc   : > { %v6363_v38 = vcombine.high %v397_v31, %v401_v33  ;;  %v6362_v46 = vcombine.low %v397_v31, %v401_v33  ;;  %v6364_v47 = vcombine.low %v398_v34, %v402_v0  ;;  %v445_v23 = vld [vmem:[%s7655_s6 + $0x550] sm:$0xff] }
 0x1de   : > { %5088 = vmatpush1.bf16.msra.mxu0 %v6306_v39  ;;  %5334 = vmatpush1.bf16.msra.mxu1 %v6308_v56  ;;  %v6365_v39 = vcombine.high %v398_v34, %v402_v0  ;;  %v405_v56 = vld [vmem:[%s7655_s6 + $0x410] sm:$0xff] }
 0x1df   : > { %5089 = vmatprep.subr.bf16.mxu0 %v6315_v41  ;;  %5335 = vmatprep.subr.bf16.mxu1 %v6317_v43  ;;  %v409_v41 = vld [vmem:[%s7655_s6 + $0x430] sm:$0xff]  ;;  %v406_v43 = vld [vmem:[%s7655_s6 + $0x418] sm:$0xff] }
 0x1e0   : > { %v6371_v48 = vcombine.high %v405_v56, %v409_v41  ;;  %v6370_v53 = vcombine.low %v405_v56, %v409_v41  ;;  %v6372_v55 = vcombine.low %v406_v43, %v410_v44  ;;  %v453_v0 = vld [vmem:[%s7655_s6 + $0x590] sm:$0xff] }
 0x1e2   : > { %5090 = vmatpush1.bf16.msra.mxu0 %v6314_v49  ;;  %5336 = vmatpush1.bf16.msra.mxu1 %v6316_v50  ;;  %v6373_v49 = vcombine.high %v406_v43, %v410_v44  ;;  %v413_v50 = vld [vmem:[%s7655_s6 + $0x450] sm:$0xff] }
 0x1e3   : > { %5091 = vmatprep.subr.bf16.mxu0 %v6323_v51  ;;  %5337 = vmatprep.subr.bf16.mxu1 %v6325_v17  ;;  %v417_v51 = vld [vmem:[%s7655_s6 + $0x470] sm:$0xff]  ;;  %v414_v17 = vld [vmem:[%s7655_s6 + $0x458] sm:$0xff] }
 0x1e4   : > { %v6379_v24 = vcombine.high %v413_v50, %v417_v51  ;;  %v6378_v1 = vcombine.low %v413_v50, %v417_v51  ;;  %v6380_v2 = vcombine.low %v414_v17, %v418_v10  ;;  %v461_v44 = vld [vmem:[%s7655_s6 + $0x5d0] sm:$0xff] }
 0x1e6   : > { %5092 = vmatpush1.bf16.msra.mxu0 %v6322_v57  ;;  %5338 = vmatpush1.bf16.msra.mxu1 %v6324_v58  ;;  %v6381_v57 = vcombine.high %v414_v17, %v418_v10  ;;  %v421_v58 = vld [vmem:[%s7655_s6 + $0x490] sm:$0xff] }
 0x1e7   : > { %5093 = vmatprep.subr.bf16.mxu0 %v6331_v59  ;;  %5339 = vmatprep.subr.bf16.mxu1 %v6333_v61  ;;  %v425_v59 = vld [vmem:[%s7655_s6 + $0x4b0] sm:$0xff]  ;;  %v422_v61 = vld [vmem:[%s7655_s6 + $0x498] sm:$0xff] }
 0x1e8   : > { %v6387_v4 = vcombine.high %v421_v58, %v425_v59  ;;  %v6388_v18 = vcombine.low %v422_v61, %v426_v63  ;;  %v469_v10 = vld [vmem:[%s7655_s6 + $0x610] sm:$0xff] }
 0x1ea   : > { %5094 = vmatpush1.bf16.msra.mxu0 %v6330_v5  ;;  %5340 = vmatpush1.bf16.msra.mxu1 %v6332_v6  ;;  %v6389_v5 = vcombine.high %v422_v61, %v426_v63  ;;  %v429_v6 = vld [vmem:[%s7655_s6 + $0x4d0] sm:$0xff] }
 0x1eb   : > { %5095 = vmatprep.subr.bf16.mxu0 %v6339_v7  ;;  %5341 = vmatprep.subr.bf16.mxu1 %v6341_v8  ;;  %v433_v7 = vld [vmem:[%s7655_s6 + $0x4f0] sm:$0xff]  ;;  %v430_v8 = vld [vmem:[%s7655_s6 + $0x4d8] sm:$0xff] }
 0x1ec   : > { %v6395_v11 = vcombine.high %v429_v6, %v433_v7  ;;  %v6397_v12 = vcombine.high %v430_v8, %v434_v9  ;;  %v6394_v20 = vcombine.low %v429_v6, %v433_v7  ;;  %v477_v63 = vld [vmem:[%s7655_s6 + $0x650] sm:$0xff] }
 0x1ee   : > { %5096 = vmatpush1.bf16.msra.mxu0 %v6338_v32  ;;  %5342 = vmatpush1.bf16.msra.mxu1 %v6340_v14  ;;  %v437_v32 = vld [vmem:[%s7655_s6 + $0x510] sm:$0xff] }
 0x1ef   : > { %5097 = vmatprep.subr.bf16.mxu0 %v6347_v15  ;;  %5343 = vmatprep.subr.bf16.mxu1 %v6349_v16  ;;  %v441_v14 = vld [vmem:[%s7655_s6 + $0x530] sm:$0xff]  ;;  %v438_v15 = vld [vmem:[%s7655_s6 + $0x518] sm:$0xff] }
 0x1f0   : > { %v442_v16 = vld [vmem:[%s7655_s6 + $0x538] sm:$0xff]  ;;  %v6403_v21 = vcombine.high %v437_v32, %v441_v14 }
 0x1f1   : > { %v6405_v22 = vcombine.high %v438_v15, %v442_v16  ;;  %v6404_v31 = vcombine.low %v438_v15, %v442_v16  ;;  %v493_v16 = vld [vmem:[%s7655_s6 + $0x6d0] sm:$0xff] }
 0x1f2   : > { %5098 = vmatpush1.bf16.msra.mxu0 %v6346_v25  ;;  %5344 = vmatpush1.bf16.msra.mxu1 %v6348_v27  ;;  %v449_v25 = vld [vmem:[%s7655_s6 + $0x570] sm:$0xff]  ;;  %v446_v27 = vld [vmem:[%s7655_s6 + $0x558] sm:$0xff] }
 0x1f3   : > { %5099 = vmatprep.subr.bf16.mxu0 %v6355_v28  ;;  %5345 = vmatprep.subr.bf16.mxu1 %v6357_v29  ;;  %v450_v28 = vld [vmem:[%s7655_s6 + $0x578] sm:$0xff]  ;;  %v6402_v29 = vcombine.low %v437_v32, %v441_v14  ;;  %v6411_v33 = vcombine.high %v445_v23, %v449_v25 }
 0x1f4   : > { %v6413_v34 = vcombine.high %v446_v27, %v450_v28  ;;  %v6412_v56 = vcombine.low %v446_v27, %v450_v28  ;;  %v501_v28 = vld [vmem:[%s7655_s6 + $0x710] sm:$0xff] }
 0x1f6   : > { %5100 = vmatpush1.bf16.msra.mxu0 %v6354_v36  ;;  %5346 = vmatpush1.bf16.msra.mxu1 %v6356_v37  ;;  %v457_v36 = vld [vmem:[%s7655_s6 + $0x5b0] sm:$0xff]  ;;  %v454_v37 = vld [vmem:[%s7655_s6 + $0x598] sm:$0xff] }
 0x1f7   : > { %5101 = vmatprep.subr.bf16.mxu0 %v6363_v38  ;;  %5347 = vmatprep.subr.bf16.mxu1 %v6365_v39  ;;  %v458_v38 = vld [vmem:[%s7655_s6 + $0x5b8] sm:$0xff]  ;;  %v6410_v39 = vcombine.low %v445_v23, %v449_v25  ;;  %v6419_v41 = vcombine.high %v453_v0, %v457_v36 }
 0x1f8   : > { %v6421_v43 = vcombine.high %v454_v37, %v458_v38  ;;  %v6420_v50 = vcombine.low %v454_v37, %v458_v38  ;;  %v509_v38 = vld [vmem:[%s7655_s6 + $0x750] sm:$0xff] }
 0x1fa   : > { %5102 = vmatpush1.bf16.msra.mxu0 %v6362_v46  ;;  %5348 = vmatpush1.bf16.msra.mxu1 %v6364_v47  ;;  %v465_v46 = vld [vmem:[%s7655_s6 + $0x5f0] sm:$0xff]  ;;  %v462_v47 = vld [vmem:[%s7655_s6 + $0x5d8] sm:$0xff] }
 0x1fb   : > { %5112 = vmatprep.subr.bf16.mxu0 %v6371_v48  ;;  %5358 = vmatprep.subr.bf16.mxu1 %v6373_v49  ;;  %v466_v48 = vld [vmem:[%s7655_s6 + $0x5f8] sm:$0xff]  ;;  %v6418_v49 = vcombine.low %v453_v0, %v457_v36  ;;  %v6427_v51 = vcombine.high %v461_v44, %v465_v46 }
 0x1fc   : > { %v6429_v17 = vcombine.high %v462_v47, %v466_v48 }
 0x1fd   : > { %5104 = vmatmul.mubr.bf16.vlgmr.msra.gmra.mrb[4].mxu0 %v7770_v26  ;;  %5350 = vmatmul.mubr.bf16.vlgmr.msra.gmra.mrb[4].mxu1 %v7770_v26  ;;  %v6386_v26 = vcombine.low %v421_v58, %v425_v59  ;;  %v6428_v58 = vcombine.low %v462_v47, %v466_v48  ;;  %v517_v48 = vld [vmem:[%s7655_s6 + $0x790] sm:$0xff] }
 0x1fe   : > { %5113 = vmatpush1.bf16.msra.mxu0 %v6370_v53  ;;  %5359 = vmatpush1.bf16.msra.mxu1 %v6372_v55  ;;  %v473_v53 = vld [vmem:[%s7655_s6 + $0x630] sm:$0xff]  ;;  %v470_v55 = vld [vmem:[%s7655_s6 + $0x618] sm:$0xff] }
 0x1ff   : > { %5114 = vmatprep.subr.bf16.mxu0 %v6379_v24  ;;  %5360 = vmatprep.subr.bf16.mxu1 %v6381_v57  ;;  %v474_v24 = vld [vmem:[%s7655_s6 + $0x638] sm:$0xff]  ;;  %v6426_v57 = vcombine.low %v461_v44, %v465_v46  ;;  %v6435_v59 = vcombine.high %v469_v10, %v473_v53 }
 0x200   : > { %5144 = vmatprep.mubr.bf16.mxu0 %v7776_v35  ;;  %5390 = vmatprep.mubr.bf16.mxu1 %v7776_v35  ;;  %v6396_v35 = vcombine.low %v430_v8, %v434_v9  ;;  %v6437_v61 = vcombine.high %v470_v55, %v474_v24  ;;  %v6436_v6 = vcombine.low %v470_v55, %v474_v24  ;;  %v485_v9 = vld [vmem:[%s7655_s6 + $0x690] sm:$0xff] }
 0x201   : > { %v525_v24 = vld [vmem:[%s7655_s6 + $0x7d0] sm:$0xff] }
 0x202   : > { %5115 = vmatpush1.bf16.msra.mxu0 %v6378_v1  ;;  %5361 = vmatpush1.bf16.msra.mxu1 %v6380_v2  ;;  %v481_v1 = vld [vmem:[%s7655_s6 + $0x670] sm:$0xff]  ;;  %v478_v2 = vld [vmem:[%s7655_s6 + $0x658] sm:$0xff] }
 0x203   : > { %5116 = vmatprep.subr.bf16.mxu0 %v6387_v4  ;;  %5362 = vmatprep.subr.bf16.mxu1 %v6389_v5  ;;  %v482_v4 = vld [vmem:[%s7655_s6 + $0x678] sm:$0xff]  ;;  %v6434_v5 = vcombine.low %v469_v10, %v473_v53  ;;  %v6443_v7 = vcombine.high %v477_v63, %v481_v1 }
 0x204   : > { %v6445_v8 = vcombine.high %v478_v2, %v482_v4  ;;  %v6444_v32 = vcombine.low %v478_v2, %v482_v4  ;;  %v533_v4 = vld [vmem:[%s7655_s6 + $0x810] sm:$0xff] }
 0x206   : > { %5117 = vmatpush1.bf16.msra.mxu0 %v6386_v26  ;;  %5363 = vmatpush1.bf16.msra.mxu1 %v6388_v18  ;;  %v489_v26 = vld [vmem:[%s7655_s6 + $0x6b0] sm:$0xff]  ;;  %v486_v18 = vld [vmem:[%s7655_s6 + $0x698] sm:$0xff] }
 0x207   : > { %5118 = vmatprep.subr.bf16.mxu0 %v6395_v11  ;;  %5364 = vmatprep.subr.bf16.mxu1 %v6397_v12  ;;  %v490_v11 = vld [vmem:[%s7655_s6 + $0x6b8] sm:$0xff]  ;;  %v6442_v12 = vcombine.low %v477_v63, %v481_v1  ;;  %v6451_v14 = vcombine.high %v485_v9, %v489_v26 }
 0x208   : > { %v6453_v15 = vcombine.high %v486_v18, %v490_v11  ;;  %v6452_v23 = vcombine.low %v486_v18, %v490_v11  ;;  %v541_v11 = vld [vmem:[%s7655_s6 + $0x850] sm:$0xff] }
 0x20a   : > { %5119 = vmatpush1.bf16.msra.mxu0 %v6394_v20  ;;  %5365 = vmatpush1.bf16.msra.mxu1 %v6396_v35  ;;  %v497_v20 = vld [vmem:[%s7655_s6 + $0x6f0] sm:$0xff]  ;;  %v494_v35 = vld [vmem:[%s7655_s6 + $0x6d8] sm:$0xff] }
 0x20b   : > { %5120 = vmatprep.subr.bf16.mxu0 %v6403_v21  ;;  %5366 = vmatprep.subr.bf16.mxu1 %v6405_v22  ;;  %v498_v21 = vld [vmem:[%s7655_s6 + $0x6f8] sm:$0xff]  ;;  %v6450_v22 = vcombine.low %v485_v9, %v489_v26  ;;  %v6459_v25 = vcombine.high %v493_v16, %v497_v20 }
 0x20c   : > { %v6461_v27 = vcombine.high %v494_v35, %v498_v21  ;;  %v6460_v0 = vcombine.low %v494_v35, %v498_v21  ;;  %v549_v21 = vld [vmem:[%s7655_s6 + $0x890] sm:$0xff] }
 0x20e   : > { %5121 = vmatpush1.bf16.msra.mxu0 %v6402_v29  ;;  %5367 = vmatpush1.bf16.msra.mxu1 %v6404_v31  ;;  %v505_v29 = vld [vmem:[%s7655_s6 + $0x730] sm:$0xff]  ;;  %v502_v31 = vld [vmem:[%s7655_s6 + $0x718] sm:$0xff] }
 0x20f   : > { %5122 = vmatprep.subr.bf16.mxu0 %v6411_v33  ;;  %5368 = vmatprep.subr.bf16.mxu1 %v6413_v34  ;;  %v506_v33 = vld [vmem:[%s7655_s6 + $0x738] sm:$0xff]  ;;  %v6458_v34 = vcombine.low %v493_v16, %v497_v20  ;;  %v6467_v36 = vcombine.high %v501_v28, %v505_v29 }
 0x210   : > { %v6469_v37 = vcombine.high %v502_v31, %v506_v33  ;;  %v6468_v44 = vcombine.low %v502_v31, %v506_v33  ;;  %v557_v33 = vld [vmem:[%s7655_s6 + $0x8d0] sm:$0xff] }
 0x212   : > { %5123 = vmatpush1.bf16.msra.mxu0 %v6410_v39  ;;  %5369 = vmatpush1.bf16.msra.mxu1 %v6412_v56  ;;  %v513_v39 = vld [vmem:[%s7655_s6 + $0x770] sm:$0xff]  ;;  %v510_v56 = vld [vmem:[%s7655_s6 + $0x758] sm:$0xff] }
 0x213   : > { %5124 = vmatprep.subr.bf16.mxu0 %v6419_v41  ;;  %5370 = vmatprep.subr.bf16.mxu1 %v6421_v43  ;;  %v514_v41 = vld [vmem:[%s7655_s6 + $0x778] sm:$0xff]  ;;  %v6466_v43 = vcombine.low %v501_v28, %v505_v29  ;;  %v6475_v46 = vcombine.high %v509_v38, %v513_v39 }
 0x214   : > { %v6477_v47 = vcombine.high %v510_v56, %v514_v41  ;;  %v6476_v10 = vcombine.low %v510_v56, %v514_v41  ;;  %v565_v56 = vld [vmem:[%s7655_s6 + $0x910] sm:$0xff] }
 0x215   : > { %v569_v41 = vld [vmem:[%s7655_s6 + $0x930] sm:$0xff] }
 0x216   : > { %5125 = vmatpush1.bf16.msra.mxu0 %v6418_v49  ;;  %5371 = vmatpush1.bf16.msra.mxu1 %v6420_v50  ;;  %v521_v49 = vld [vmem:[%s7655_s6 + $0x7b0] sm:$0xff]  ;;  %v518_v50 = vld [vmem:[%s7655_s6 + $0x798] sm:$0xff] }
 0x217   : > { %5126 = vmatprep.subr.bf16.mxu0 %v6427_v51  ;;  %5372 = vmatprep.subr.bf16.mxu1 %v6429_v17  ;;  %v522_v51 = vld [vmem:[%s7655_s6 + $0x7b8] sm:$0xff]  ;;  %v6474_v17 = vcombine.low %v509_v38, %v513_v39  ;;  %v6483_v53 = vcombine.high %v517_v48, %v521_v49 }
 0x218   : > { %v6485_v55 = vcombine.high %v518_v50, %v522_v51  ;;  %v6484_v63 = vcombine.low %v518_v50, %v522_v51  ;;  %v577_v50 = vld [vmem:[%s7655_s6 + $0x970] sm:$0xff]  ;;  %v574_v51 = vld [vmem:[%s7655_s6 + $0x958] sm:$0xff] }
 0x21a   : > { %5127 = vmatpush1.bf16.msra.mxu0 %v6426_v57  ;;  %5373 = vmatpush1.bf16.msra.mxu1 %v6428_v58  ;;  %v529_v57 = vld [vmem:[%s7655_s6 + $0x7f0] sm:$0xff]  ;;  %v526_v58 = vld [vmem:[%s7655_s6 + $0x7d8] sm:$0xff] }
 0x21b   : > { %5128 = vmatprep.subr.bf16.mxu0 %v6435_v59  ;;  %5374 = vmatprep.subr.bf16.mxu1 %v6437_v61  ;;  %v530_v59 = vld [vmem:[%s7655_s6 + $0x7f8] sm:$0xff]  ;;  %v6482_v61 = vcombine.low %v517_v48, %v521_v49  ;;  %v6491_v1 = vcombine.high %v525_v24, %v529_v57  ;;  %v573_v49 = vld [vmem:[%s7655_s6 + $0x950] sm:$0xff] }
 0x21c   : > { %v6493_v2 = vcombine.high %v526_v58, %v530_v59  ;;  %v6492_v9 = vcombine.low %v526_v58, %v530_v59  ;;  %v585_v58 = vld [vmem:[%s7655_s6 + $0x9b0] sm:$0xff]  ;;  %v582_v59 = vld [vmem:[%s7655_s6 + $0x998] sm:$0xff] }
 0x21e   : > { %5129 = vmatpush1.bf16.msra.mxu0 %v6434_v5  ;;  %5375 = vmatpush1.bf16.msra.mxu1 %v6436_v6  ;;  %v537_v5 = vld [vmem:[%s7655_s6 + $0x830] sm:$0xff]  ;;  %v534_v6 = vld [vmem:[%s7655_s6 + $0x818] sm:$0xff] }
 0x21f   : > { %5130 = vmatprep.subr.bf16.mxu0 %v6443_v7  ;;  %5376 = vmatprep.subr.bf16.mxu1 %v6445_v8  ;;  %v538_v7 = vld [vmem:[%s7655_s6 + $0x838] sm:$0xff]  ;;  %v6490_v8 = vcombine.low %v525_v24, %v529_v57  ;;  %v6499_v26 = vcombine.high %v533_v4, %v537_v5  ;;  %v581_v57 = vld [vmem:[%s7655_s6 + $0x990] sm:$0xff] }
 0x220   : > { %v6501_v18 = vcombine.high %v534_v6, %v538_v7  ;;  %v6500_v16 = vcombine.low %v534_v6, %v538_v7  ;;  %v593_v6 = vld [vmem:[%s7655_s6 + $0x9f0] sm:$0xff]  ;;  %v590_v7 = vld [vmem:[%s7655_s6 + $0x9d8] sm:$0xff] }
 0x222   : > { %5131 = vmatpush1.bf16.msra.mxu0 %v6442_v12  ;;  %5377 = vmatpush1.bf16.msra.mxu1 %v6444_v32  ;;  %v545_v12 = vld [vmem:[%s7655_s6 + $0x870] sm:$0xff]  ;;  %v542_v32 = vld [vmem:[%s7655_s6 + $0x858] sm:$0xff] }
 0x223   : > { %5132 = vmatprep.subr.bf16.mxu0 %v6451_v14  ;;  %5378 = vmatprep.subr.bf16.mxu1 %v6453_v15  ;;  %v546_v14 = vld [vmem:[%s7655_s6 + $0x878] sm:$0xff]  ;;  %v6498_v15 = vcombine.low %v533_v4, %v537_v5  ;;  %v6507_v20 = vcombine.high %v541_v11, %v545_v12  ;;  %v589_v5 = vld [vmem:[%s7655_s6 + $0x9d0] sm:$0xff] }
 0x224   : > { %v6509_v35 = vcombine.high %v542_v32, %v546_v14  ;;  %v6508_v28 = vcombine.low %v542_v32, %v546_v14  ;;  %v601_v32 = vld [vmem:[%s7655_s6 + $0xa30] sm:$0xff]  ;;  %v598_v14 = vld [vmem:[%s7655_s6 + $0xa18] sm:$0xff] }
 0x226   : > { %5133 = vmatpush1.bf16.msra.mxu0 %v6450_v22  ;;  %5379 = vmatpush1.bf16.msra.mxu1 %v6452_v23  ;;  %v553_v22 = vld [vmem:[%s7655_s6 + $0x8b0] sm:$0xff]  ;;  %v550_v23 = vld [vmem:[%s7655_s6 + $0x898] sm:$0xff] }
 0x227   : > { %5134 = vmatprep.subr.bf16.mxu0 %v6459_v25  ;;  %5380 = vmatprep.subr.bf16.mxu1 %v6461_v27  ;;  %v554_v25 = vld [vmem:[%s7655_s6 + $0x8b8] sm:$0xff]  ;;  %v6506_v27 = vcombine.low %v541_v11, %v545_v12  ;;  %v6515_v29 = vcombine.high %v549_v21, %v553_v22  ;;  %v597_v12 = vld [vmem:[%s7655_s6 + $0xa10] sm:$0xff] }
 0x228   : > { %v6517_v31 = vcombine.high %v550_v23, %v554_v25 }
 0x22a   : > { %5135 = vmatpush1.bf16.msra.mxu0 %v6458_v34  ;;  %5381 = vmatpush1.bf16.msra.mxu1 %v6460_v0  ;;  %v561_v34 = vld [vmem:[%s7655_s6 + $0x8f0] sm:$0xff]  ;;  %v558_v0 = vld [vmem:[%s7655_s6 + $0x8d8] sm:$0xff] }
 0x22b   : > { %5136 = vmatprep.subr.bf16.mxu0 %v6467_v36  ;;  %5382 = vmatprep.subr.bf16.mxu1 %v6469_v37  ;;  %v562_v36 = vld [vmem:[%s7655_s6 + $0x8f8] sm:$0xff]  ;;  %v6516_v37 = vcombine.low %v550_v23, %v554_v25  ;;  %v6523_v38 = vcombine.high %v557_v33, %v561_v34  ;;  %v609_v23 = vld [vmem:[%s7655_s6 + $0xa70] sm:$0xff] }
 0x22c   : > { %v6525_v39 = vcombine.high %v558_v0, %v562_v36  ;;  %v606_v25 = vld [vmem:[%s7655_s6 + $0xa58] sm:$0xff] }
 0x22e   : > { %5137 = vmatpush1.bf16.msra.mxu0 %v6466_v43  ;;  %5383 = vmatpush1.bf16.msra.mxu1 %v6468_v44  ;;  %v566_v43 = vld [vmem:[%s7655_s6 + $0x918] sm:$0xff] }
 0x22f   : > { %5138 = vmatprep.subr.bf16.mxu0 %v6475_v46  ;;  %5384 = vmatprep.subr.bf16.mxu1 %v6477_v47  ;;  %v570_v44 = vld [vmem:[%s7655_s6 + $0x938] sm:$0xff]  ;;  %v6522_v46 = vcombine.low %v557_v33, %v561_v34  ;;  %v6531_v47 = vcombine.high %v565_v56, %v569_v41  ;;  %v613_v34 = vld [vmem:[%s7655_s6 + $0xa90] sm:$0xff] }
 0x230   : > { %v6533_v48 = vcombine.high %v566_v43, %v570_v44 }
 0x232   : > { %5139 = vmatpush1.bf16.msra.mxu0 %v6474_v17  ;;  %5385 = vmatpush1.bf16.msra.mxu1 %v6476_v10  ;;  %v578_v17 = vld [vmem:[%s7655_s6 + $0x978] sm:$0xff]  ;;  %v6530_v10 = vcombine.low %v565_v56, %v569_v41  ;;  %v621_v41 = vld [vmem:[%s7655_s6 + $0xad0] sm:$0xff] }
 0x233   : > { %5140 = vmatprep.subr.bf16.mxu0 %v6483_v53  ;;  %5386 = vmatprep.subr.bf16.mxu1 %v6485_v55  ;;  %v6532_v53 = vcombine.low %v566_v43, %v570_v44  ;;  %v6539_v55 = vcombine.high %v573_v49, %v577_v50  ;;  %v6541_v24 = vcombine.high %v574_v51, %v578_v17  ;;  %v625_v43 = vld [vmem:[%s7655_s6 + $0xaf0] sm:$0xff]  ;;  %v622_v44 = vld [vmem:[%s7655_s6 + $0xad8] sm:$0xff] }
 0x236   : > { %5141 = vmatpush1.bf16.msra.mxu0 %v6482_v61  ;;  %5387 = vmatpush1.bf16.msra.mxu1 %v6484_v63  ;;  %v586_v61 = vld [vmem:[%s7655_s6 + $0x9b8] sm:$0xff]  ;;  %v6538_v63 = vcombine.low %v573_v49, %v577_v50  ;;  %v629_v50 = vld [vmem:[%s7655_s6 + $0xb10] sm:$0xff] }
 0x237   : > { %5142 = vmatprep.subr.bf16.mxu0 %v6491_v1  ;;  %5388 = vmatprep.subr.bf16.mxu1 %v6493_v2  ;;  %v6540_v1 = vcombine.low %v574_v51, %v578_v17  ;;  %v6547_v2 = vcombine.high %v581_v57, %v585_v58  ;;  %v6549_v4 = vcombine.high %v582_v59, %v586_v61  ;;  %v633_v51 = vld [vmem:[%s7655_s6 + $0xb30] sm:$0xff]  ;;  %v630_v17 = vld [vmem:[%s7655_s6 + $0xb18] sm:$0xff] }
 0x23a   : > { %5143 = vmatpush1.bf16.msra.mxu0 %v6490_v8  ;;  %5389 = vmatpush1.bf16.msra.mxu1 %v6492_v9  ;;  %v594_v8 = vld [vmem:[%s7655_s6 + $0x9f8] sm:$0xff]  ;;  %v6546_v9 = vcombine.low %v581_v57, %v585_v58  ;;  %v637_v58 = vld [vmem:[%s7655_s6 + $0xb50] sm:$0xff] }
 0x23b   : > { %5153 = vmatprep.subr.bf16.mxu0 %v6499_v26  ;;  %5399 = vmatprep.subr.bf16.mxu1 %v6501_v18  ;;  %v6548_v26 = vcombine.low %v582_v59, %v586_v61  ;;  %v6555_v18 = vcombine.high %v589_v5, %v593_v6  ;;  %v6557_v11 = vcombine.high %v590_v7, %v594_v8  ;;  %v641_v59 = vld [vmem:[%s7655_s6 + $0xb70] sm:$0xff]  ;;  %v638_v61 = vld [vmem:[%s7655_s6 + $0xb58] sm:$0xff] }
 0x23d   : > { %5145 = vmatmul.mubr.bf16.vlgmr.msra.gmra.mrb[4].mxu0 %v7853_v42  ;;  %5391 = vmatmul.mubr.bf16.vlgmr.msra.gmra.mrb[4].mxu1 %v7853_v42  ;;  %v6514_v42 = vcombine.low %v549_v21, %v553_v22  ;;  %v605_v22 = vld [vmem:[%s7655_s6 + $0xa50] sm:$0xff] }
 0x23e   : > { %5154 = vmatpush1.bf16.msra.mxu0 %v6498_v15  ;;  %5400 = vmatpush1.bf16.msra.mxu1 %v6500_v16  ;;  %v602_v15 = vld [vmem:[%s7655_s6 + $0xa38] sm:$0xff]  ;;  %v6554_v16 = vcombine.low %v589_v5, %v593_v6  ;;  %v645_v6 = vld [vmem:[%s7655_s6 + $0xb90] sm:$0xff] }
 0x23f   : > { %5155 = vmatprep.subr.bf16.mxu0 %v6507_v20  ;;  %5401 = vmatprep.subr.bf16.mxu1 %v6509_v35  ;;  %v6556_v20 = vcombine.low %v590_v7, %v594_v8  ;;  %v6563_v35 = vcombine.high %v597_v12, %v601_v32  ;;  %v6565_v21 = vcombine.high %v598_v14, %v602_v15  ;;  %v649_v7 = vld [vmem:[%s7655_s6 + $0xbb0] sm:$0xff]  ;;  %v646_v8 = vld [vmem:[%s7655_s6 + $0xb98] sm:$0xff] }
 0x240   : > { %5185 = vmatprep.mubr.bf16.mxu0 %v7859_v52  ;;  %5431 = vmatprep.mubr.bf16.mxu1 %v7859_v52  ;;  %v6524_v52 = vcombine.low %v558_v0, %v562_v36  ;;  %v617_v0 = vld [vmem:[%s7655_s6 + $0xab0] sm:$0xff]  ;;  %v614_v36 = vld [vmem:[%s7655_s6 + $0xa98] sm:$0xff] }
 0x242   : > { %5156 = vmatpush1.bf16.msra.mxu0 %v6506_v27  ;;  %5402 = vmatpush1.bf16.msra.mxu1 %v6508_v28  ;;  %v610_v27 = vld [vmem:[%s7655_s6 + $0xa78] sm:$0xff]  ;;  %v6562_v28 = vcombine.low %v597_v12, %v601_v32  ;;  %v653_v32 = vld [vmem:[%s7655_s6 + $0xbd0] sm:$0xff] }
 0x243   : > { %5157 = vmatprep.subr.bf16.mxu0 %v6515_v29  ;;  %5403 = vmatprep.subr.bf16.mxu1 %v6517_v31  ;;  %v6564_v29 = vcombine.low %v598_v14, %v602_v15  ;;  %v6571_v31 = vcombine.high %v605_v22, %v609_v23  ;;  %v6573_v33 = vcombine.high %v606_v25, %v610_v27  ;;  %v657_v14 = vld [vmem:[%s7655_s6 + $0xbf0] sm:$0xff]  ;;  %v654_v15 = vld [vmem:[%s7655_s6 + $0xbd8] sm:$0xff] }
 0x246   : > { %5158 = vmatpush1.bf16.msra.mxu0 %v6514_v42  ;;  %5404 = vmatpush1.bf16.msra.mxu1 %v6516_v37  ;;  %v618_v42 = vld [vmem:[%s7655_s6 + $0xab8] sm:$0xff]  ;;  %v6570_v37 = vcombine.low %v605_v22, %v609_v23  ;;  %v661_v23 = vld [vmem:[%s7655_s6 + $0xc10] sm:$0xff] }
 0x247   : > { %5159 = vmatprep.subr.bf16.mxu0 %v6523_v38  ;;  %5405 = vmatprep.subr.bf16.mxu1 %v6525_v39  ;;  %v6572_v38 = vcombine.low %v606_v25, %v610_v27  ;;  %v6579_v39 = vcombine.high %v613_v34, %v617_v0  ;;  %v6581_v56 = vcombine.high %v614_v36, %v618_v42  ;;  %v665_v25 = vld [vmem:[%s7655_s6 + $0xc30] sm:$0xff]  ;;  %v662_v27 = vld [vmem:[%s7655_s6 + $0xc18] sm:$0xff] }
 0x24a   : > { %5160 = vmatpush1.bf16.msra.mxu0 %v6522_v46  ;;  %5406 = vmatpush1.bf16.msra.mxu1 %v6524_v52  ;;  %v626_v46 = vld [vmem:[%s7655_s6 + $0xaf8] sm:$0xff]  ;;  %v6578_v52 = vcombine.low %v613_v34, %v617_v0  ;;  %v669_v0 = vld [vmem:[%s7655_s6 + $0xc50] sm:$0xff] }
 0x24b   : > { %5161 = vmatprep.subr.bf16.mxu0 %v6531_v47  ;;  %5407 = vmatprep.subr.bf16.mxu1 %v6533_v48  ;;  %v6580_v47 = vcombine.low %v614_v36, %v618_v42  ;;  %v6587_v48 = vcombine.high %v621_v41, %v625_v43  ;;  %v6589_v49 = vcombine.high %v622_v44, %v626_v46  ;;  %v673_v36 = vld [vmem:[%s7655_s6 + $0xc70] sm:$0xff]  ;;  %v670_v42 = vld [vmem:[%s7655_s6 + $0xc58] sm:$0xff] }
 0x24e   : > { %5162 = vmatpush1.bf16.msra.mxu0 %v6530_v10  ;;  %5408 = vmatpush1.bf16.msra.mxu1 %v6532_v53  ;;  %v634_v10 = vld [vmem:[%s7655_s6 + $0xb38] sm:$0xff]  ;;  %v6586_v53 = vcombine.low %v621_v41, %v625_v43  ;;  %v677_v43 = vld [vmem:[%s7655_s6 + $0xc90] sm:$0xff] }
 0x24f   : > { %5163 = vmatprep.subr.bf16.mxu0 %v6539_v55  ;;  %5409 = vmatprep.subr.bf16.mxu1 %v6541_v24  ;;  %v6588_v55 = vcombine.low %v622_v44, %v626_v46  ;;  %v6595_v24 = vcombine.high %v629_v50, %v633_v51  ;;  %v6597_v57 = vcombine.high %v630_v17, %v634_v10  ;;  %v681_v44 = vld [vmem:[%s7655_s6 + $0xcb0] sm:$0xff]  ;;  %v678_v46 = vld [vmem:[%s7655_s6 + $0xc98] sm:$0xff] }
 0x252   : > { %5164 = vmatpush1.bf16.msra.mxu0 %v6538_v63  ;;  %5410 = vmatpush1.bf16.msra.mxu1 %v6540_v1  ;;  %v642_v63 = vld [vmem:[%s7655_s6 + $0xb78] sm:$0xff]  ;;  %v6594_v1 = vcombine.low %v629_v50, %v633_v51  ;;  %v685_v51 = vld [vmem:[%s7655_s6 + $0xcd0] sm:$0xff] }
 0x253   : > { %5165 = vmatprep.subr.bf16.mxu0 %v6547_v2  ;;  %5411 = vmatprep.subr.bf16.mxu1 %v6549_v4  ;;  %v6596_v2 = vcombine.low %v630_v17, %v634_v10  ;;  %v6603_v4 = vcombine.high %v637_v58, %v641_v59  ;;  %v6605_v5 = vcombine.high %v638_v61, %v642_v63  ;;  %v689_v17 = vld [vmem:[%s7655_s6 + $0xcf0] sm:$0xff]  ;;  %v686_v10 = vld [vmem:[%s7655_s6 + $0xcd8] sm:$0xff] }
 0x256   : > { %5166 = vmatpush1.bf16.msra.mxu0 %v6546_v9  ;;  %5412 = vmatpush1.bf16.msra.mxu1 %v6548_v26  ;;  %v650_v9 = vld [vmem:[%s7655_s6 + $0xbb8] sm:$0xff]  ;;  %v6602_v26 = vcombine.low %v637_v58, %v641_v59  ;;  %v693_v58 = vld [vmem:[%s7655_s6 + $0xd10] sm:$0xff] }
 0x257   : > { %5167 = vmatprep.subr.bf16.mxu0 %v6555_v18  ;;  %5413 = vmatprep.subr.bf16.mxu1 %v6557_v11  ;;  %v6604_v18 = vcombine.low %v638_v61, %v642_v63  ;;  %v6611_v11 = vcombine.high %v645_v6, %v649_v7  ;;  %v6613_v12 = vcombine.high %v646_v8, %v650_v9  ;;  %v697_v59 = vld [vmem:[%s7655_s6 + $0xd30] sm:$0xff]  ;;  %v694_v61 = vld [vmem:[%s7655_s6 + $0xd18] sm:$0xff] }
 0x258   : > { %v698_v63 = vld [vmem:[%s7655_s6 + $0xd38] sm:$0xff] }
 0x25a   : > { %5168 = vmatpush1.bf16.msra.mxu0 %v6554_v16  ;;  %5414 = vmatpush1.bf16.msra.mxu1 %v6556_v20  ;;  %v658_v16 = vld [vmem:[%s7655_s6 + $0xbf8] sm:$0xff]  ;;  %v6610_v20 = vcombine.low %v645_v6, %v649_v7  ;;  %v705_v6 = vld [vmem:[%s7655_s6 + $0xd70] sm:$0xff] }
 0x25b   : > { %5169 = vmatprep.subr.bf16.mxu0 %v6563_v35  ;;  %5415 = vmatprep.subr.bf16.mxu1 %v6565_v21  ;;  %v6612_v35 = vcombine.low %v646_v8, %v650_v9  ;;  %v6619_v21 = vcombine.high %v653_v32, %v657_v14  ;;  %v6621_v22 = vcombine.high %v654_v15, %v658_v16  ;;  %v702_v7 = vld [vmem:[%s7655_s6 + $0xd58] sm:$0xff] }
 0x25c   : > { %v706_v8 = vld [vmem:[%s7655_s6 + $0xd78] sm:$0xff]  ;;  %v6658_v9 = vcombine.low %v693_v58, %v697_v59 }
 0x25e   : > { %5170 = vmatpush1.bf16.msra.mxu0 %v6562_v28  ;;  %5416 = vmatpush1.bf16.msra.mxu1 %v6564_v29  ;;  %v666_v28 = vld [vmem:[%s7655_s6 + $0xc38] sm:$0xff]  ;;  %v6618_v29 = vcombine.low %v653_v32, %v657_v14  ;;  %v713_v32 = vld [vmem:[%s7655_s6 + $0xdb0] sm:$0xff] }
 0x25f   : > { %5171 = vmatprep.subr.bf16.mxu0 %v6571_v31  ;;  %5417 = vmatprep.subr.bf16.mxu1 %v6573_v33  ;;  %v6620_v31 = vcombine.low %v654_v15, %v658_v16  ;;  %v6627_v33 = vcombine.high %v661_v23, %v665_v25  ;;  %v6629_v34 = vcombine.high %v662_v27, %v666_v28  ;;  %v710_v14 = vld [vmem:[%s7655_s6 + $0xd98] sm:$0xff] }
 0x260   : > { %v714_v15 = vld [vmem:[%s7655_s6 + $0xdb8] sm:$0xff] }
 0x262   : > { %5172 = vmatpush1.bf16.msra.mxu0 %v6570_v37  ;;  %5418 = vmatpush1.bf16.msra.mxu1 %v6572_v38  ;;  %v674_v37 = vld [vmem:[%s7655_s6 + $0xc78] sm:$0xff]  ;;  %v6626_v38 = vcombine.low %v661_v23, %v665_v25  ;;  %v717_v23 = vld [vmem:[%s7655_s6 + $0xdd0] sm:$0xff] }
 0x263   : > { %5173 = vmatprep.subr.bf16.mxu0 %v6579_v39  ;;  %5419 = vmatprep.subr.bf16.mxu1 %v6581_v56  ;;  %v6628_v39 = vcombine.low %v662_v27, %v666_v28  ;;  %v6635_v56 = vcombine.high %v669_v0, %v673_v36  ;;  %v6637_v41 = vcombine.high %v670_v42, %v674_v37  ;;  %v721_v25 = vld [vmem:[%s7655_s6 + $0xdf0] sm:$0xff] }
 0x266   : > { %5174 = vmatpush1.bf16.msra.mxu0 %v6578_v52  ;;  %5420 = vmatpush1.bf16.msra.mxu1 %v6580_v47  ;;  %v682_v52 = vld [vmem:[%s7655_s6 + $0xcb8] sm:$0xff]  ;;  %v6634_v47 = vcombine.low %v669_v0, %v673_v36 }
 0x267   : > { %5175 = vmatprep.subr.bf16.mxu0 %v6587_v48  ;;  %5421 = vmatprep.subr.bf16.mxu1 %v6589_v49  ;;  %v6636_v48 = vcombine.low %v670_v42, %v674_v37  ;;  %v6643_v49 = vcombine.high %v677_v43, %v681_v44  ;;  %v6645_v50 = vcombine.high %v678_v46, %v682_v52 }
 0x26a   : > { %5176 = vmatpush1.bf16.msra.mxu0 %v6586_v53  ;;  %5422 = vmatpush1.bf16.msra.mxu1 %v6588_v55  ;;  %v690_v53 = vld [vmem:[%s7655_s6 + $0xcf8] sm:$0xff]  ;;  %v6644_v55 = vcombine.low %v678_v46, %v682_v52  ;;  %v725_v46 = vld [vmem:[%s7655_s6 + $0xe10] sm:$0xff] }
 0x26b   : > { %5177 = vmatprep.subr.bf16.mxu0 %v6595_v24  ;;  %5423 = vmatprep.subr.bf16.mxu1 %v6597_v57  ;;  %v6651_v24 = vcombine.high %v685_v51, %v689_v17  ;;  %v6653_v57 = vcombine.high %v686_v10, %v690_v53  ;;  %v729_v52 = vld [vmem:[%s7655_s6 + $0xe30] sm:$0xff] }
 0x26e   : > { %5178 = vmatpush1.bf16.msra.mxu0 %v6594_v1  ;;  %5424 = vmatpush1.bf16.msra.mxu1 %v6596_v2  ;;  %v6650_v1 = vcombine.low %v685_v51, %v689_v17  ;;  %v6659_v2 = vcombine.high %v693_v58, %v697_v59  ;;  %v6682_v51 = vcombine.low %v717_v23, %v721_v25  ;;  %v734_v58 = vld [vmem:[%s7655_s6 + $0xe58] sm:$0xff] }
 0x26f   : > { %5179 = vmatprep.subr.bf16.mxu0 %v6603_v4  ;;  %5425 = vmatprep.subr.bf16.mxu1 %v6605_v5  ;;  %v6661_v4 = vcombine.high %v694_v61, %v698_v63  ;;  %v701_v5 = vld [vmem:[%s7655_s6 + $0xd50] sm:$0xff]  ;;  %v738_v59 = vld [vmem:[%s7655_s6 + $0xe78] sm:$0xff] }
 0x270   : > { %v6666_v16 = vcombine.low %v701_v5, %v705_v6 }
 0x272   : > { %5180 = vmatpush1.bf16.msra.mxu0 %v6602_v26  ;;  %5426 = vmatpush1.bf16.msra.mxu1 %v6604_v18  ;;  %v6660_v26 = vcombine.low %v694_v61, %v698_v63  ;;  %v6667_v18 = vcombine.high %v701_v5, %v705_v6  ;;  %v6690_v61 = vcombine.low %v725_v46, %v729_v52  ;;  %v742_v5 = vld [vmem:[%s7655_s6 + $0xe98] sm:$0xff] }
 0x273   : > { %5181 = vmatprep.subr.bf16.mxu0 %v6611_v11  ;;  %5427 = vmatprep.subr.bf16.mxu1 %v6613_v12  ;;  %v6669_v11 = vcombine.high %v702_v7, %v706_v8  ;;  %v709_v12 = vld [vmem:[%s7655_s6 + $0xd90] sm:$0xff]  ;;  %v746_v6 = vld [vmem:[%s7655_s6 + $0xeb8] sm:$0xff] }
 0x274   : > { %v6674_v36 = vcombine.low %v709_v12, %v713_v32 }
 0x276   : > { %5182 = vmatpush1.bf16.msra.mxu0 %v6610_v20  ;;  %5428 = vmatpush1.bf16.msra.mxu1 %v6612_v35  ;;  %v6668_v20 = vcombine.low %v702_v7, %v706_v8  ;;  %v6675_v35 = vcombine.high %v709_v12, %v713_v32  ;;  %v6700_v8 = vcombine.low %v734_v58, %v738_v59  ;;  %v750_v12 = vld [vmem:[%s7655_s6 + $0xed8] sm:$0xff] }
 0x277   : > { %5183 = vmatprep.subr.bf16.mxu0 %v6619_v21  ;;  %5429 = vmatprep.subr.bf16.mxu1 %v6621_v22  ;;  %v6677_v22 = vcombine.high %v710_v14, %v714_v15  ;;  %v754_v32 = vld [vmem:[%s7655_s6 + $0xef8] sm:$0xff] }
 0x27a   : > { %5184 = vmatpush1.bf16.msra.mxu0 %v6618_v29  ;;  %5430 = vmatpush1.bf16.msra.mxu1 %v6620_v31  ;;  %v718_v29 = vld [vmem:[%s7655_s6 + $0xdd8] sm:$0xff] }
 0x27b   : > { %5194 = vmatprep.subr.bf16.mxu0 %v6627_v33  ;;  %5440 = vmatprep.subr.bf16.mxu1 %v6629_v34  ;;  %v722_v31 = vld [vmem:[%s7655_s6 + $0xdf8] sm:$0xff] }
 0x27d   : > { %5186 = vmatmul.mubr.bf16.vlgmr.msra.gmra.mrb[4].mxu0 %v7934_v3  ;;  %5432 = vmatmul.mubr.bf16.vlgmr.msra.gmra.mrb[4].mxu1 %v7934_v3  ;;  %v6642_v3 = vcombine.low %v677_v43, %v681_v44  ;;  %v6685_v44 = vcombine.high %v718_v29, %v722_v31 }
 0x27e   : > { %5195 = vmatpush1.bf16.msra.mxu0 %v6626_v38  ;;  %5441 = vmatpush1.bf16.msra.mxu1 %v6628_v39  ;;  %v6676_v39 = vcombine.low %v710_v14, %v714_v15  ;;  %v6708_v15 = vcombine.low %v742_v5, %v746_v6 }
 0x27f   : > { %5196 = vmatprep.subr.bf16.mxu0 %v6635_v56  ;;  %5442 = vmatprep.subr.bf16.mxu1 %v6637_v41  ;;  %v6683_v56 = vcombine.high %v717_v23, %v721_v25  ;;  %v762_v23 = vld [vmem:[%s7655_s6 + $0xf38] sm:$0xff] }
 0x280   : > { %5226 = vmatprep.mubr.bf16.mxu0 %v7940_v13  ;;  %5472 = vmatprep.mubr.bf16.mxu1 %v7940_v13  ;;  %v6652_v13 = vcombine.low %v686_v10, %v690_v53  ;;  %v6684_v10 = vcombine.low %v718_v29, %v722_v31  ;;  %v6691_v53 = vcombine.high %v725_v46, %v729_v52  ;;  %v765_v31 = vld [vmem:[%s7655_s6 + $0xf50] sm:$0xff] }
 0x282   : > { %5197 = vmatpush1.bf16.msra.mxu0 %v6634_v47  ;;  %5443 = vmatpush1.bf16.msra.mxu1 %v6636_v48  ;;  %v726_v48 = vld [vmem:[%s7655_s6 + $0xe18] sm:$0xff] }
 0x283   : > { %5198 = vmatprep.subr.bf16.mxu0 %v6643_v49  ;;  %5444 = vmatprep.subr.bf16.mxu1 %v6645_v50  ;;  %v730_v49 = vld [vmem:[%s7655_s6 + $0xe38] sm:$0xff]  ;;  %v1057_v50 = vld [vmem:[#allocation2] sm:$0xff] }
 0x284   : > { %v6692_v63 = vcombine.low %v726_v48, %v730_v49 }
 0x286   : > { %5199 = vmatpush1.bf16.msra.mxu0 %v6642_v3  ;;  %5445 = vmatpush1.bf16.msra.mxu1 %v6644_v55  ;;  %v6693_v3 = vcombine.high %v726_v48, %v730_v49  ;;  %v733_v55 = vld [vmem:[%s7655_s6 + $0xe50] sm:$0xff] }
 0x287   : > { %5200 = vmatprep.subr.bf16.mxu0 %v6651_v24  ;;  %5446 = vmatprep.subr.bf16.mxu1 %v6653_v57  ;;  %v737_v24 = vld [vmem:[%s7655_s6 + $0xe70] sm:$0xff] }
 0x288   : > { %v6698_v7 = vcombine.low %v733_v55, %v737_v24  ;;  %v781_v48 = vld [vmem:[%s7655_s6 + $0xfd0] sm:$0xff] }
 0x289   : > { %v785_v49 = vld [vmem:[%s7655_s6 + $0xff0] sm:$0xff] }
 0x28a   : > { %5201 = vmatpush1.bf16.msra.mxu0 %v6650_v1  ;;  %5447 = vmatpush1.bf16.msra.mxu1 %v6652_v13  ;;  %v6699_v1 = vcombine.high %v733_v55, %v737_v24  ;;  %v6701_v13 = vcombine.high %v734_v58, %v738_v59  ;;  %v789_v55 = vld [vmem:[%s7655_s6 + $0x1010] sm:$0xff]  ;;  %v794_v58 = vld [vmem:[%s7655_s6 + $0x1038] sm:$0xff]  ;;  %v6746_v59 = vcombine.low %v781_v48, %v785_v49 }
 0x28b   : > { %5202 = vmatprep.subr.bf16.mxu0 %v6659_v2  ;;  %5448 = vmatprep.subr.bf16.mxu1 %v6661_v4  ;;  %v741_v2 = vld [vmem:[%s7655_s6 + $0xe90] sm:$0xff] }
 0x28c   : > { %v745_v4 = vld [vmem:[%s7655_s6 + $0xeb0] sm:$0xff] }
 0x28d   : > { %v6706_v14 = vcombine.low %v741_v2, %v745_v4  ;;  %v793_v24 = vld [vmem:[%s7655_s6 + $0x1030] sm:$0xff] }
 0x28e   : > { %5203 = vmatpush1.bf16.msra.mxu0 %v6658_v9  ;;  %5449 = vmatpush1.bf16.msra.mxu1 %v6660_v26  ;;  %v6707_v9 = vcombine.high %v741_v2, %v745_v4  ;;  %v6709_v26 = vcombine.high %v742_v5, %v746_v6  ;;  %v801_v2 = vld [vmem:[%s7655_s6 + $0x1070] sm:$0xff]  ;;  %v798_v4 = vld [vmem:[%s7655_s6 + $0x1058] sm:$0xff]  ;;  %v6754_v6 = vcombine.low %v789_v55, %v793_v24 }
 0x28f   : > { %5204 = vmatprep.subr.bf16.mxu0 %v6667_v18  ;;  %5450 = vmatprep.subr.bf16.mxu1 %v6669_v11  ;;  %v749_v18 = vld [vmem:[%s7655_s6 + $0xed0] sm:$0xff]  ;;  %v802_v5 = vld [vmem:[%s7655_s6 + $0x1078] sm:$0xff] }
 0x290   : > { %v4818_v21 = vpop.f32.mrb[0].mxu0  ;;  %v5064_v27 = vpop.f32.mrb[0].mxu1  ;;  %v753_v11 = vld [vmem:[%s7655_s6 + $0xef0] sm:$0xff] }
 0x291   : > { %v4820_v28 = vpop.f32.mrb[1].mxu0  ;;  %v5066_v34 = vpop.f32.mrb[1].mxu1  ;;  %v6714_v25 = vcombine.low %v749_v18, %v753_v11 }
 0x292   : > { %v5571_v33 = vcombine.low %v4818_v21, %v4820_v28  ;;  %v4822_v0 = vpop.f32.mrb[2].mxu0  ;;  %5205 = vmatpush1.bf16.msra.mxu0 %v6666_v16  ;;  %v5572_v42 = vcombine.low %v5064_v27, %v5066_v34  ;;  %v5068_v37 = vpop.f32.mrb[2].mxu1  ;;  %5451 = vmatpush1.bf16.msra.mxu1 %v6668_v20  ;;  %v6715_v16 = vcombine.high %v749_v18, %v753_v11  ;;  %v761_v21 = vld [vmem:[%s7655_s6 + $0xf30] sm:$0xff]  ;;  %v766_v34 = vld [vmem:[%s7655_s6 + $0xf58] sm:$0xff] }
 0x293   : > { %v4823_v38 = vpop.f32.mrb[3].mxu0  ;;  %5206 = vmatprep.subr.bf16.mxu0 %v6675_v35  ;;  %v5069_v43 = vpop.f32.mrb[3].mxu1  ;;  %5452 = vmatprep.subr.bf16.mxu1 %v6677_v22  ;;  %v6717_v20 = vcombine.high %v750_v12, %v754_v32  ;;  %v757_v35 = vld [vmem:[%s7655_s6 + $0xf10] sm:$0xff]  ;;  %v758_v22 = vld [vmem:[%s7655_s6 + $0xf18] sm:$0xff]  ;;  %v6716_v27 = vcombine.low %v750_v12, %v754_v32 }
 0x294   : > { %v5579_v41 = vrot.slane %v5571_v33, %v7702_v54  ;;  %v5586_v47 = vrot.slane %v5572_v42, %v7702_v54  ;;  %v6723_v28 = vcombine.high %v757_v35, %v761_v21  ;;  %v6725_v29 = vcombine.high %v758_v22, %v762_v23  ;;  %v769_v33 = vld [vmem:[%s7655_s6 + $0xf70] sm:$0xff]  ;;  %v770_v0 = vld [vmem:[%s7655_s6 + $0xf78] sm:$0xff] }
 0x295   : > { %v6724_v42 = vcombine.low %v758_v22, %v762_v23  ;;  %v6731_v37 = vcombine.high %v765_v31, %v769_v33  ;;  %v6733_v38 = vcombine.high %v766_v34, %v770_v0  ;;  %v778_v43 = vld [vmem:[%s7655_s6 + $0xfb8] sm:$0xff]  ;;  %v6732_v46 = vcombine.low %v766_v34, %v770_v0  ;;  %v809_v18 = vld [vmem:[%s7655_s6 + $0x10b0] sm:$0xff] }
 0x296   : > { %5207 = vmatpush1.bf16.msra.mxu0 %v6674_v36  ;;  %v5587_v17 = vcombine.low %v5579_v41, %v5586_v47  ;;  %5453 = vmatpush1.bf16.msra.mxu1 %v6676_v39  ;;  %v6722_v36 = vcombine.low %v757_v35, %v761_v21  ;;  %v773_v39 = vld [vmem:[%s7655_s6 + $0xf90] sm:$0xff]  ;;  %v774_v41 = vld [vmem:[%s7655_s6 + $0xf98] sm:$0xff] }
 0x297   : > { %5208 = vmatprep.subr.bf16.mxu0 %v6683_v56  ;;  %5454 = vmatprep.subr.bf16.mxu1 %v6685_v44  ;;  %v777_v56 = vld [vmem:[%s7655_s6 + $0xfb0] sm:$0xff]  ;;  %v6730_v44 = vcombine.low %v765_v31, %v769_v33  ;;  %v6741_v47 = vcombine.high %v774_v41, %v778_v43  ;;  %v806_v11 = vld [vmem:[%s7655_s6 + $0x1098] sm:$0xff] }
 0x298   : > { %v5607_v57 = vadd.f32 %v5587_v17, %v1057_v50  ;;  %v6739_v52 = vcombine.high %v773_v39, %v777_v56  ;;  %v782_v50 = vld [vmem:[%s7655_s6 + $0xfd8] sm:$0xff]  ;;  %v6738_v17 = vcombine.low %v773_v39, %v777_v56  ;;  %v817_v35 = vld [vmem:[%s7655_s6 + $0x10f0] sm:$0xff] }
 0x299   : > { %v810_v12 = vld [vmem:[%s7655_s6 + $0x10b8] sm:$0xff] }
 0x29a   : > { %5209 = vmatpush1.bf16.msra.mxu0 %v6682_v51  ;;  %5609 = vst [vmem:[#allocation2] sm:$0xff] %v5607_v57  ;;  %5455 = vmatpush1.bf16.msra.mxu1 %v6684_v10  ;;  %v786_v51 = vld [vmem:[%s7655_s6 + $0xff8] sm:$0xff]  ;;  %v6740_v10 = vcombine.low %v774_v41, %v778_v43  ;;  %v6772_v23 = vcombine.low %v806_v11, %v810_v12 }
 0x29b   : > { %5210 = vmatprep.subr.bf16.mxu0 %v6691_v53  ;;  %5456 = vmatprep.subr.bf16.mxu1 %v6693_v3  ;;  %v6747_v53 = vcombine.high %v781_v48, %v785_v49  ;;  %v6749_v3 = vcombine.high %v782_v50, %v786_v51  ;;  %v790_v57 = vld [vmem:[%s7655_s6 + $0x1018] sm:$0xff] }
 0x29c   : > { %v814_v21 = vld [vmem:[%s7655_s6 + $0x10d8] sm:$0xff] }
 0x29d   : > { %v818_v22 = vld [vmem:[%s7655_s6 + $0x10f8] sm:$0xff] }
 0x29e   : > { %5211 = vmatpush1.bf16.msra.mxu0 %v6690_v61  ;;  %5457 = vmatpush1.bf16.msra.mxu1 %v6692_v63  ;;  %v6748_v61 = vcombine.low %v782_v50, %v786_v51  ;;  %v6755_v63 = vcombine.high %v789_v55, %v793_v24  ;;  %v822_v31 = vld [vmem:[%s7655_s6 + $0x1118] sm:$0xff] }
 0x29f   : > { %5212 = vmatprep.subr.bf16.mxu0 %v6699_v1  ;;  %5458 = vmatprep.subr.bf16.mxu1 %v6701_v13  ;;  %v6757_v1 = vcombine.high %v790_v57, %v794_v58  ;;  %v797_v13 = vld [vmem:[%s7655_s6 + $0x1050] sm:$0xff]  ;;  %v826_v33 = vld [vmem:[%s7655_s6 + $0x1138] sm:$0xff] }
 0x2a0   : > { %v6762_v32 = vcombine.low %v797_v13, %v801_v2  ;;  %v834_v39 = vld [vmem:[%s7655_s6 + $0x1178] sm:$0xff]  ;;  %v6788_v41 = vcombine.low %v822_v31, %v826_v33 }
 0x2a1   : > { %v842_v48 = vld [vmem:[%s7655_s6 + $0x11b8] sm:$0xff] }
 0x2a2   : > { %5213 = vmatpush1.bf16.msra.mxu0 %v6698_v7  ;;  %5459 = vmatpush1.bf16.msra.mxu1 %v6700_v8  ;;  %v6756_v7 = vcombine.low %v790_v57, %v794_v58  ;;  %v6763_v8 = vcombine.high %v797_v13, %v801_v2  ;;  %v850_v55 = vld [vmem:[%s7655_s6 + $0x11f8] sm:$0xff] }
 0x2a3   : > { %5214 = vmatprep.subr.bf16.mxu0 %v6707_v9  ;;  %5460 = vmatprep.subr.bf16.mxu1 %v6709_v26  ;;  %v6765_v9 = vcombine.high %v798_v4, %v802_v5  ;;  %v805_v26 = vld [vmem:[%s7655_s6 + $0x1090] sm:$0xff]  ;;  %v858_v13 = vld [vmem:[%s7655_s6 + $0x1238] sm:$0xff] }
 0x2a6   : > { %5215 = vmatpush1.bf16.msra.mxu0 %v6706_v14  ;;  %5461 = vmatpush1.bf16.msra.mxu1 %v6708_v15  ;;  %v6764_v14 = vcombine.low %v798_v4, %v802_v5  ;;  %v6771_v15 = vcombine.high %v805_v26, %v809_v18 }
 0x2a7   : > { %5216 = vmatprep.subr.bf16.mxu0 %v6715_v16  ;;  %5462 = vmatprep.subr.bf16.mxu1 %v6717_v20  ;;  %v6773_v16 = vcombine.high %v806_v11, %v810_v12  ;;  %v813_v20 = vld [vmem:[%s7655_s6 + $0x10d0] sm:$0xff] }
 0x2a8   : > { %v6778_v34 = vcombine.low %v813_v20, %v817_v35 }
 0x2aa   : > { %5217 = vmatpush1.bf16.msra.mxu0 %v6714_v25  ;;  %5463 = vmatpush1.bf16.msra.mxu1 %v6716_v27  ;;  %v6779_v25 = vcombine.high %v813_v20, %v817_v35  ;;  %v6781_v27 = vcombine.high %v814_v21, %v818_v22  ;;  %v874_v20 = vld [vmem:[%s7655_s6 + $0x12b8] sm:$0xff] }
 0x2ab   : > { %5218 = vmatprep.subr.bf16.mxu0 %v6723_v28  ;;  %5464 = vmatprep.subr.bf16.mxu1 %v6725_v29  ;;  %v821_v28 = vld [vmem:[%s7655_s6 + $0x1110] sm:$0xff] }
 0x2ac   : > { %v825_v29 = vld [vmem:[%s7655_s6 + $0x1130] sm:$0xff] }
 0x2ad   : > { %v6787_v0 = vcombine.high %v821_v28, %v825_v29  ;;  %v6786_v56 = vcombine.low %v821_v28, %v825_v29  ;;  %v882_v28 = vld [vmem:[%s7655_s6 + $0x12f8] sm:$0xff] }
 0x2ae   : > { %5219 = vmatpush1.bf16.msra.mxu0 %v6722_v36  ;;  %5465 = vmatpush1.bf16.msra.mxu1 %v6724_v42  ;;  %v6789_v36 = vcombine.high %v822_v31, %v826_v33  ;;  %v829_v42 = vld [vmem:[%s7655_s6 + $0x1150] sm:$0xff] }
 0x2af   : > { %5220 = vmatprep.subr.bf16.mxu0 %v6731_v37  ;;  %5466 = vmatprep.subr.bf16.mxu1 %v6733_v38  ;;  %v833_v37 = vld [vmem:[%s7655_s6 + $0x1170] sm:$0xff]  ;;  %v830_v38 = vld [vmem:[%s7655_s6 + $0x1158] sm:$0xff] }
 0x2b0   : > { %v6795_v43 = vcombine.high %v829_v42, %v833_v37  ;;  %v6794_v49 = vcombine.low %v829_v42, %v833_v37  ;;  %v6796_v50 = vcombine.low %v830_v38, %v834_v39  ;;  %v890_v42 = vld [vmem:[%s7655_s6 + $0x1338] sm:$0xff] }
 0x2b2   : > { %5221 = vmatpush1.bf16.msra.mxu0 %v6730_v44  ;;  %5467 = vmatpush1.bf16.msra.mxu1 %v6732_v46  ;;  %v6797_v44 = vcombine.high %v830_v38, %v834_v39  ;;  %v837_v46 = vld [vmem:[%s7655_s6 + $0x1190] sm:$0xff] }
 0x2b3   : > { %5222 = vmatprep.subr.bf16.mxu0 %v6739_v52  ;;  %5468 = vmatprep.subr.bf16.mxu1 %v6741_v47  ;;  %v841_v52 = vld [vmem:[%s7655_s6 + $0x11b0] sm:$0xff]  ;;  %v838_v47 = vld [vmem:[%s7655_s6 + $0x1198] sm:$0xff] }
 0x2b4   : > { %v6803_v51 = vcombine.high %v837_v46, %v841_v52  ;;  %v6802_v24 = vcombine.low %v837_v46, %v841_v52  ;;  %v6804_v57 = vcombine.low %v838_v47, %v842_v48  ;;  %v898_v46 = vld [vmem:[%s7655_s6 + $0x1378] sm:$0xff] }
 0x2b6   : > { %5223 = vmatpush1.bf16.msra.mxu0 %v6738_v17  ;;  %5469 = vmatpush1.bf16.msra.mxu1 %v6740_v10  ;;  %v6805_v17 = vcombine.high %v838_v47, %v842_v48  ;;  %v845_v10 = vld [vmem:[%s7655_s6 + $0x11d0] sm:$0xff] }
 0x2b7   : > { %5224 = vmatprep.subr.bf16.mxu0 %v6747_v53  ;;  %5470 = vmatprep.subr.bf16.mxu1 %v6749_v3  ;;  %v849_v53 = vld [vmem:[%s7655_s6 + $0x11f0] sm:$0xff]  ;;  %v846_v3 = vld [vmem:[%s7655_s6 + $0x11d8] sm:$0xff] }
 0x2b8   : > { %v6811_v58 = vcombine.high %v845_v10, %v849_v53  ;;  %v6810_v2 = vcombine.low %v845_v10, %v849_v53  ;;  %v6812_v4 = vcombine.low %v846_v3, %v850_v55  ;;  %v906_v10 = vld [vmem:[%s7655_s6 + $0x13b8] sm:$0xff] }
 0x2ba   : > { %5225 = vmatpush1.bf16.msra.mxu0 %v6746_v59  ;;  %5471 = vmatpush1.bf16.msra.mxu1 %v6748_v61  ;;  %v6813_v59 = vcombine.high %v846_v3, %v850_v55  ;;  %v853_v61 = vld [vmem:[%s7655_s6 + $0x1210] sm:$0xff] }
 0x2bb   : > { %5235 = vmatprep.subr.bf16.mxu0 %v6755_v63  ;;  %5481 = vmatprep.subr.bf16.mxu1 %v6757_v1  ;;  %v857_v63 = vld [vmem:[%s7655_s6 + $0x1230] sm:$0xff]  ;;  %v854_v1 = vld [vmem:[%s7655_s6 + $0x1218] sm:$0xff] }
 0x2bc   : > { %v6819_v5 = vcombine.high %v853_v61, %v857_v63  ;;  %v6820_v11 = vcombine.low %v854_v1, %v858_v13 }
 0x2bd   : > { %5227 = vmatmul.mubr.bf16.vlgmr.msra.gmra.mrb[4].mxu0 %v8017_v30  ;;  %5473 = vmatmul.mubr.bf16.vlgmr.msra.gmra.mrb[4].mxu1 %v8017_v30  ;;  %v6770_v30 = vcombine.low %v805_v26, %v809_v18  ;;  %v866_v26 = vld [vmem:[%s7655_s6 + $0x1278] sm:$0xff]  ;;  %v6818_v18 = vcombine.low %v853_v61, %v857_v63 }
 0x2be   : > { %5236 = vmatpush1.bf16.msra.mxu0 %v6754_v6  ;;  %5482 = vmatpush1.bf16.msra.mxu1 %v6756_v7  ;;  %v6821_v6 = vcombine.high %v854_v1, %v858_v13  ;;  %v861_v7 = vld [vmem:[%s7655_s6 + $0x1250] sm:$0xff]  ;;  %v914_v61 = vld [vmem:[%s7655_s6 + $0x13f8] sm:$0xff] }
 0x2bf   : > { %5237 = vmatprep.subr.bf16.mxu0 %v6763_v8  ;;  %5483 = vmatprep.subr.bf16.mxu1 %v6765_v9  ;;  %v865_v8 = vld [vmem:[%s7655_s6 + $0x1270] sm:$0xff]  ;;  %v862_v9 = vld [vmem:[%s7655_s6 + $0x1258] sm:$0xff] }
 0x2c0   : > { %5267 = vmatprep.mubr.bf16.mxu0 %v8023_v40  ;;  %5513 = vmatprep.mubr.bf16.mxu1 %v8023_v40  ;;  %v6780_v40 = vcombine.low %v814_v21, %v818_v22  ;;  %v6827_v12 = vcombine.high %v861_v7, %v865_v8  ;;  %v6826_v35 = vcombine.low %v861_v7, %v865_v8  ;;  %v922_v7 = vld [vmem:[%s7655_s6 + $0x1438] sm:$0xff] }
 0x2c1   : > { %v6828_v21 = vcombine.low %v862_v9, %v866_v26 }
 0x2c2   : > { %5238 = vmatpush1.bf16.msra.mxu0 %v6762_v32  ;;  %5484 = vmatpush1.bf16.msra.mxu1 %v6764_v14  ;;  %v6829_v32 = vcombine.high %v862_v9, %v866_v26  ;;  %v869_v14 = vld [vmem:[%s7655_s6 + $0x1290] sm:$0xff] }
 0x2c3   : > { %5239 = vmatprep.subr.bf16.mxu0 %v6771_v15  ;;  %5485 = vmatprep.subr.bf16.mxu1 %v6773_v16  ;;  %v873_v15 = vld [vmem:[%s7655_s6 + $0x12b0] sm:$0xff]  ;;  %v870_v16 = vld [vmem:[%s7655_s6 + $0x1298] sm:$0xff] }
 0x2c4   : > { %v6835_v22 = vcombine.high %v869_v14, %v873_v15  ;;  %v6834_v29 = vcombine.low %v869_v14, %v873_v15  ;;  %v6836_v31 = vcombine.low %v870_v16, %v874_v20  ;;  %v930_v14 = vld [vmem:[%s7655_s6 + $0x1478] sm:$0xff] }
 0x2c6   : > { %5240 = vmatpush1.bf16.msra.mxu0 %v6770_v30  ;;  %5486 = vmatpush1.bf16.msra.mxu1 %v6772_v23  ;;  %v6837_v30 = vcombine.high %v870_v16, %v874_v20  ;;  %v877_v23 = vld [vmem:[%s7655_s6 + $0x12d0] sm:$0xff] }
 0x2c7   : > { %5241 = vmatprep.subr.bf16.mxu0 %v6779_v25  ;;  %5487 = vmatprep.subr.bf16.mxu1 %v6781_v27  ;;  %v881_v25 = vld [vmem:[%s7655_s6 + $0x12f0] sm:$0xff]  ;;  %v878_v27 = vld [vmem:[%s7655_s6 + $0x12d8] sm:$0xff] }
 0x2c8   : > { %v6843_v33 = vcombine.high %v877_v23, %v881_v25  ;;  %v6842_v37 = vcombine.low %v877_v23, %v881_v25  ;;  %v6844_v38 = vcombine.low %v878_v27, %v882_v28  ;;  %v938_v23 = vld [vmem:[%s7655_s6 + $0x14b8] sm:$0xff] }
 0x2ca   : > { %5242 = vmatpush1.bf16.msra.mxu0 %v6778_v34  ;;  %5488 = vmatpush1.bf16.msra.mxu1 %v6780_v40  ;;  %v6845_v34 = vcombine.high %v878_v27, %v882_v28  ;;  %v885_v40 = vld [vmem:[%s7655_s6 + $0x1310] sm:$0xff] }
 0x2cb   : > { %5243 = vmatprep.subr.bf16.mxu0 %v6787_v0  ;;  %5489 = vmatprep.subr.bf16.mxu1 %v6789_v36  ;;  %v889_v0 = vld [vmem:[%s7655_s6 + $0x1330] sm:$0xff]  ;;  %v886_v36 = vld [vmem:[%s7655_s6 + $0x1318] sm:$0xff] }
 0x2cc   : > { %v6851_v39 = vcombine.high %v885_v40, %v889_v0  ;;  %v6850_v52 = vcombine.low %v885_v40, %v889_v0  ;;  %v6852_v47 = vcombine.low %v886_v36, %v890_v42  ;;  %v946_v40 = vld [vmem:[%s7655_s6 + $0x14f8] sm:$0xff] }
 0x2ce   : > { %5244 = vmatpush1.bf16.msra.mxu0 %v6786_v56  ;;  %5490 = vmatpush1.bf16.msra.mxu1 %v6788_v41  ;;  %v6853_v56 = vcombine.high %v886_v36, %v890_v42  ;;  %v893_v41 = vld [vmem:[%s7655_s6 + $0x1350] sm:$0xff] }
 0x2cf   : > { %5245 = vmatprep.subr.bf16.mxu0 %v6795_v43  ;;  %5491 = vmatprep.subr.bf16.mxu1 %v6797_v44  ;;  %v897_v43 = vld [vmem:[%s7655_s6 + $0x1370] sm:$0xff]  ;;  %v894_v44 = vld [vmem:[%s7655_s6 + $0x1358] sm:$0xff] }
 0x2d0   : > { %v6859_v48 = vcombine.high %v893_v41, %v897_v43  ;;  %v6858_v53 = vcombine.low %v893_v41, %v897_v43  ;;  %v6860_v3 = vcombine.low %v894_v44, %v898_v46 }
 0x2d2   : > { %5246 = vmatpush1.bf16.msra.mxu0 %v6794_v49  ;;  %5492 = vmatpush1.bf16.msra.mxu1 %v6796_v50  ;;  %v6861_v49 = vcombine.high %v894_v44, %v898_v46  ;;  %v901_v50 = vld [vmem:[%s7655_s6 + $0x1390] sm:$0xff] }
 0x2d3   : > { %5247 = vmatprep.subr.bf16.mxu0 %v6803_v51  ;;  %5493 = vmatprep.subr.bf16.mxu1 %v6805_v17  ;;  %v905_v51 = vld [vmem:[%s7655_s6 + $0x13b0] sm:$0xff]  ;;  %v902_v17 = vld [vmem:[%s7655_s6 + $0x1398] sm:$0xff] }
 0x2d4   : > { %v6867_v55 = vcombine.high %v901_v50, %v905_v51  ;;  %v6866_v63 = vcombine.low %v901_v50, %v905_v51  ;;  %v6868_v1 = vcombine.low %v902_v17, %v906_v10  ;;  %v957_v46 = vld [vmem:[%s7655_s6 + $0x1550] sm:$0xff] }
 0x2d6   : > { %5248 = vmatpush1.bf16.msra.mxu0 %v6802_v24  ;;  %5494 = vmatpush1.bf16.msra.mxu1 %v6804_v57  ;;  %v6869_v24 = vcombine.high %v902_v17, %v906_v10  ;;  %v909_v57 = vld [vmem:[%s7655_s6 + $0x13d0] sm:$0xff] }
 0x2d7   : > { %5249 = vmatprep.subr.bf16.mxu0 %v6811_v58  ;;  %5495 = vmatprep.subr.bf16.mxu1 %v6813_v59  ;;  %v913_v58 = vld [vmem:[%s7655_s6 + $0x13f0] sm:$0xff]  ;;  %v910_v59 = vld [vmem:[%s7655_s6 + $0x13d8] sm:$0xff] }
 0x2d8   : > { %v6875_v13 = vcombine.high %v909_v57, %v913_v58  ;;  %v6874_v8 = vcombine.low %v909_v57, %v913_v58  ;;  %v6876_v9 = vcombine.low %v910_v59, %v914_v61  ;;  %v965_v10 = vld [vmem:[%s7655_s6 + $0x1590] sm:$0xff] }
 0x2da   : > { %5250 = vmatpush1.bf16.msra.mxu0 %v6810_v2  ;;  %5496 = vmatpush1.bf16.msra.mxu1 %v6812_v4  ;;  %v6877_v2 = vcombine.high %v910_v59, %v914_v61  ;;  %v917_v4 = vld [vmem:[%s7655_s6 + $0x1410] sm:$0xff] }
 0x2db   : > { %5251 = vmatprep.subr.bf16.mxu0 %v6819_v5  ;;  %5497 = vmatprep.subr.bf16.mxu1 %v6821_v6  ;;  %v921_v5 = vld [vmem:[%s7655_s6 + $0x1430] sm:$0xff]  ;;  %v918_v6 = vld [vmem:[%s7655_s6 + $0x1418] sm:$0xff] }
 0x2dc   : > { %v6883_v26 = vcombine.high %v917_v4, %v921_v5  ;;  %v6882_v15 = vcombine.low %v917_v4, %v921_v5  ;;  %v6884_v16 = vcombine.low %v918_v6, %v922_v7  ;;  %v973_v61 = vld [vmem:[%s7655_s6 + $0x15d0] sm:$0xff] }
 0x2de   : > { %5252 = vmatpush1.bf16.msra.mxu0 %v6818_v18  ;;  %5498 = vmatpush1.bf16.msra.mxu1 %v6820_v11  ;;  %v6885_v18 = vcombine.high %v918_v6, %v922_v7  ;;  %v925_v11 = vld [vmem:[%s7655_s6 + $0x1450] sm:$0xff] }
 0x2df   : > { %5253 = vmatprep.subr.bf16.mxu0 %v6827_v12  ;;  %5499 = vmatprep.subr.bf16.mxu1 %v6829_v32  ;;  %v929_v12 = vld [vmem:[%s7655_s6 + $0x1470] sm:$0xff]  ;;  %v926_v32 = vld [vmem:[%s7655_s6 + $0x1458] sm:$0xff] }
 0x2e0   : > { %v6891_v20 = vcombine.high %v925_v11, %v929_v12  ;;  %v6890_v25 = vcombine.low %v925_v11, %v929_v12  ;;  %v6892_v27 = vcombine.low %v926_v32, %v930_v14 }
 0x2e2   : > { %5254 = vmatpush1.bf16.msra.mxu0 %v6826_v35  ;;  %5500 = vmatpush1.bf16.msra.mxu1 %v6828_v21  ;;  %v6893_v35 = vcombine.high %v926_v32, %v930_v14  ;;  %v933_v21 = vld [vmem:[%s7655_s6 + $0x1490] sm:$0xff] }
 0x2e3   : > { %5255 = vmatprep.subr.bf16.mxu0 %v6835_v22  ;;  %5501 = vmatprep.subr.bf16.mxu1 %v6837_v30  ;;  %v937_v22 = vld [vmem:[%s7655_s6 + $0x14b0] sm:$0xff]  ;;  %v934_v30 = vld [vmem:[%s7655_s6 + $0x1498] sm:$0xff] }
 0x2e4   : > { %v6899_v28 = vcombine.high %v933_v21, %v937_v22  ;;  %v6900_v0 = vcombine.low %v934_v30, %v938_v23 }
 0x2e6   : > { %5256 = vmatpush1.bf16.msra.mxu0 %v6834_v29  ;;  %5502 = vmatpush1.bf16.msra.mxu1 %v6836_v31  ;;  %v6901_v29 = vcombine.high %v934_v30, %v938_v23  ;;  %v941_v31 = vld [vmem:[%s7655_s6 + $0x14d0] sm:$0xff] }
 0x2e7   : > { %5257 = vmatprep.subr.bf16.mxu0 %v6843_v33  ;;  %5503 = vmatprep.subr.bf16.mxu1 %v6845_v34  ;;  %v945_v33 = vld [vmem:[%s7655_s6 + $0x14f0] sm:$0xff]  ;;  %v942_v34 = vld [vmem:[%s7655_s6 + $0x14d8] sm:$0xff] }
 0x2e8   : > { %v6907_v36 = vcombine.high %v941_v31, %v945_v33  ;;  %v6909_v42 = vcombine.high %v942_v34, %v946_v40  ;;  %v6906_v41 = vcombine.low %v941_v31, %v945_v33  ;;  %v5737_v31 = vld [vmem:[%s8963_s3 + $0x180] sm:$0xff] (!%p6942_p4)  ;;  %v5738_v33 = vld [vmem:[%s8963_s3 + $0x188] sm:$0xff] (!%p6942_p4) }
 0x2ea   : > { %5258 = vmatpush1.bf16.msra.mxu0 %v6842_v37  ;;  %5504 = vmatpush1.bf16.msra.mxu1 %v6844_v38  ;;  %v949_v37 = vld [vmem:[%s7655_s6 + $0x1510] sm:$0xff] }
 0x2eb   : > { %5259 = vmatprep.subr.bf16.mxu0 %v6851_v39  ;;  %5505 = vmatprep.subr.bf16.mxu1 %v6853_v56  ;;  %v953_v38 = vld [vmem:[%s7655_s6 + $0x1530] sm:$0xff]  ;;  %v950_v39 = vld [vmem:[%s7655_s6 + $0x1518] sm:$0xff] }
 0x2ec   : > { %v954_v56 = vld [vmem:[%s7655_s6 + $0x1538] sm:$0xff]  ;;  %v6915_v43 = vcombine.high %v949_v37, %v953_v38 }
 0x2ed   : > { %v6917_v44 = vcombine.high %v950_v39, %v954_v56  ;;  %v6916_v50 = vcombine.low %v950_v39, %v954_v56  ;;  %v5692_v39 = vld [vmem:[%s8963_s3 + $0x18] sm:$0xff] (!%p6942_p4) }
 0x2ee   : > { %5260 = vmatpush1.bf16.msra.mxu0 %v6850_v52  ;;  %5506 = vmatpush1.bf16.msra.mxu1 %v6852_v47  ;;  %v961_v52 = vld [vmem:[%s7655_s6 + $0x1570] sm:$0xff]  ;;  %v958_v47 = vld [vmem:[%s7655_s6 + $0x1558] sm:$0xff] }
 0x2ef   : > { %5261 = vmatprep.subr.bf16.mxu0 %v6859_v48  ;;  %5507 = vmatprep.subr.bf16.mxu1 %v6861_v49  ;;  %v962_v48 = vld [vmem:[%s7655_s6 + $0x1578] sm:$0xff]  ;;  %v6914_v49 = vcombine.low %v949_v37, %v953_v38  ;;  %v6923_v51 = vcombine.high %v957_v46, %v961_v52  ;;  %v5708_v37 = vld [vmem:[%s8963_s3 + $0x98] sm:$0xff] (!%p6942_p4)  ;;  %v5691_v38 = vld [vmem:[%s8963_s3 + $0x10] sm:$0xff] (!%p6942_p4) }
 0x2f0   : > { %v6925_v17 = vcombine.high %v958_v47, %v962_v48  ;;  %v6924_v57 = vcombine.low %v958_v47, %v962_v48  ;;  %v5709_v47 = vld [vmem:[%s8963_s3 + $0xa0] sm:$0xff] (!%p6942_p4)  ;;  %v5710_v48 = vld [vmem:[%s8963_s3 + $0xa8] sm:$0xff] (!%p6942_p4) }
 0x2f2   : > { %5262 = vmatpush1.bf16.msra.mxu0 %v6858_v53  ;;  %5508 = vmatpush1.bf16.msra.mxu1 %v6860_v3  ;;  %v969_v53 = vld [vmem:[%s7655_s6 + $0x15b0] sm:$0xff]  ;;  %v966_v3 = vld [vmem:[%s7655_s6 + $0x1598] sm:$0xff] }
 0x2f3   : > { %5263 = vmatprep.subr.bf16.mxu0 %v6867_v55  ;;  %5509 = vmatprep.subr.bf16.mxu1 %v6869_v24  ;;  %v970_v55 = vld [vmem:[%s7655_s6 + $0x15b8] sm:$0xff]  ;;  %v6922_v24 = vcombine.low %v957_v46, %v961_v52  ;;  %v6931_v58 = vcombine.high %v965_v10, %v969_v53  ;;  %v5724_v52 = vld [vmem:[%s8963_s3 + $0x118] sm:$0xff] (!%p6942_p4) }
 0x2f4   : > { %v6933_v59 = vcombine.high %v966_v3, %v970_v55  ;;  %v6932_v4 = vcombine.low %v966_v3, %v970_v55  ;;  %v5725_v3 = vld [vmem:[%s8963_s3 + $0x120] sm:$0xff] (!%p6942_p4)  ;;  %v5726_v55 = vld [vmem:[%s8963_s3 + $0x128] sm:$0xff] (!%p6942_p4) }
 0x2f6   : > { %5264 = vmatpush1.bf16.msra.mxu0 %v6866_v63  ;;  %5510 = vmatpush1.bf16.msra.mxu1 %v6868_v1  ;;  %v977_v63 = vld [vmem:[%s7655_s6 + $0x15f0] sm:$0xff]  ;;  %v974_v1 = vld [vmem:[%s7655_s6 + $0x15d8] sm:$0xff] }
 0x2f7   : > { %5265 = vmatprep.subr.bf16.mxu0 %v6875_v13  ;;  %5511 = vmatprep.subr.bf16.mxu1 %v6877_v2  ;;  %v978_v13 = vld [vmem:[%s7655_s6 + $0x15f8] sm:$0xff]  ;;  %v6930_v2 = vcombine.low %v965_v10, %v969_v53  ;;  %v6939_v5 = vcombine.high %v973_v61, %v977_v63  ;;  %v6938_v7 = vcombine.low %v973_v61, %v977_v63  ;;  %v5741_v10 = vld [vmem:[%s8963_s3 + $0x1a0] sm:$0xff] (!%p6942_p4)  ;;  %v5695_v61 = vld [vmem:[%s8963_s3 + $0x30] sm:$0xff] (!%p6942_p4) }
 0x2f8   : > { %v6941_v6 = vcombine.high %v974_v1, %v978_v13  ;;  %v5742_v53 = vld [vmem:[%s8963_s3 + $0x1a8] sm:$0xff] (!%p6942_p4)  ;;  %v7133_v63 = vpack.c.bf16 (!%p6942_p4), %v5726_v55, %v5725_v3  ;;  %v5752_v3 = vld [vmem:[%s8963_s3 + $0x1f8] sm:$0xff] (!%p6942_p4) }
 0x2fa   : > { %5266 = vmatpush1.bf16.msra.mxu0 %v6874_v8  ;;  %5512 = vmatpush1.bf16.msra.mxu1 %v6876_v9  ;;  %v6940_v8 = vcombine.low %v974_v1, %v978_v13  ;;  %v5696_v13 = vld [vmem:[%s8963_s3 + $0x38] sm:$0xff] (!%p6942_p4) }
 0x2fb   : > { %5276 = vmatprep.subr.bf16.mxu0 %v6883_v26  ;;  %5522 = vmatprep.subr.bf16.mxu1 %v6885_v18 }
 0x2fd   : > { %5268 = vmatmul.mubr.bf16.vlgmr.msra.gmra.mrb[4].mxu0 %v8091_v62  ;;  %5514 = vmatmul.mubr.bf16.vlgmr.msra.gmra.mrb[4].mxu1 %v8091_v62  ;;  %v6898_v62 = vcombine.low %v933_v21, %v937_v22  ;;  %v1058_v22 = vld [vmem:[#allocation2 + $0x8] sm:$0xff] }
 0x2fe   : > { %5277 = vmatpush1.bf16.msra.mxu0 %v6882_v15  ;;  %5523 = vmatpush1.bf16.msra.mxu1 %v6884_v16 }
 0x2ff   : > { %5278 = vmatprep.subr.bf16.mxu0 %v6891_v20  ;;  %5524 = vmatprep.subr.bf16.mxu1 %v6893_v35 }
 0x300   : > { %5308 = vmatprep.mubr.bf16.mxu0 %v7500_v19  ;;  %5554 = vmatprep.mubr.bf16.mxu1 %v7500_v19  ;;  %v6908_v19 = vcombine.low %v942_v34, %v946_v40  ;;  %v7123_v40 = vpack.c.bf16 (!%p6942_p4), %v5738_v33, %v5737_v31  ;;  %v5731_v31 = vld [vmem:[%s8963_s3 + $0x150] sm:$0xff] (!%p6942_p4) }
 0x302   : > { %5279 = vmatpush1.bf16.msra.mxu0 %v6890_v25  ;;  %5525 = vmatpush1.bf16.msra.mxu1 %v6892_v27  ;;  %v5706_v25 = vld [vmem:[%s8963_s3 + $0x88] sm:$0xff] (!%p6942_p4)  ;;  %v5689_v27 = vld [vmem:[%s8963_s3] sm:$0xff] (!%p6942_p4) }
 0x303   : > { %5280 = vmatprep.subr.bf16.mxu0 %v6899_v28  ;;  %5526 = vmatprep.subr.bf16.mxu1 %v6901_v29  ;;  %v5690_v29 = vld [vmem:[%s8963_s3 + $0x8] sm:$0xff] (!%p6942_p4) }
 0x304   : > { %v7093_v34 = vpack.c.bf16 (!%p6942_p4), %v5690_v29, %v5689_v27  ;;  %v5700_v29 = vld [vmem:[%s8963_s3 + $0x58] sm:$0xff] (!%p6942_p4) }
 0x306   : > { %5281 = vmatpush1.bf16.msra.mxu0 %v6898_v62  ;;  %5527 = vmatpush1.bf16.msra.mxu1 %v6900_v0  ;;  %v5721_v62 = vld [vmem:[%s8963_s3 + $0x100] sm:$0xff] (!%p6942_p4)  ;;  %v5722_v0 = vld [vmem:[%s8963_s3 + $0x108] sm:$0xff] (!%p6942_p4) }
 0x307   : > { %5282 = vmatprep.subr.bf16.mxu0 %v6907_v36  ;;  %5528 = vmatprep.subr.bf16.mxu1 %v6909_v42  ;;  %v5707_v36 = vld [vmem:[%s8963_s3 + $0x90] sm:$0xff] (!%p6942_p4)  ;;  %v7125_v42 = vpack.c.bf16 (!%p6942_p4), %v5722_v0, %v5721_v62  ;;  %v5718_v62 = vld [vmem:[%s8963_s3 + $0xe8] sm:$0xff] (!%p6942_p4)  ;;  %v5621_v0 = vsub.s32 (!%p6942_p4), 0, %v7695_v45 }
 0x308   : > { %v7095_v56 = vpack.c.bf16 (!%p6942_p4), %v5708_v37, %v5707_v36  ;;  %v5625_v36 = vsub.s32 (!%p6942_p4), 1, %v7695_v45  ;;  %v5749_v37 = vld [vmem:[%s8963_s3 + $0x1e0] sm:$0xff] (!%p6942_p4) }
 0x30a   : > { %5283 = vmatpush1.bf16.msra.mxu0 %v6906_v41  ;;  %5529 = vmatpush1.bf16.msra.mxu1 %v6908_v19  ;;  %v7097_v41 = vpack.c.bf16 (!%p6942_p4), %v5692_v39, %v5691_v38  ;;  %v5739_v19 = vld [vmem:[%s8963_s3 + $0x190] sm:$0xff] (!%p6942_p4)  ;;  %v5750_v38 = vld [vmem:[%s8963_s3 + $0x1e8] sm:$0xff] (!%p6942_p4)  ;;  %v5633_v39 = vsub.s32 (!%p6942_p4), 3, %v7695_v45 }
 0x30b   : > { %5284 = vmatprep.subr.bf16.mxu0 %v6915_v43  ;;  %5530 = vmatprep.subr.bf16.mxu1 %v6917_v44  ;;  %v5740_v43 = vld [vmem:[%s8963_s3 + $0x198] sm:$0xff] (!%p6942_p4)  ;;  %v5723_v44 = vld [vmem:[%s8963_s3 + $0x110] sm:$0xff] (!%p6942_p4) }
 0x30c   : > { %v7127_v46 = vpack.c.bf16 (!%p6942_p4), %v5740_v43, %v5739_v19 }
 0x30e   : > { %5285 = vmatpush1.bf16.msra.mxu0 %v6914_v49  ;;  %5531 = vmatpush1.bf16.msra.mxu1 %v6916_v50  ;;  %v7129_v49 = vpack.c.bf16 (!%p6942_p4), %v5724_v52, %v5723_v44  ;;  %v7099_v50 = vpack.c.bf16 (!%p6942_p4), %v5710_v48, %v5709_v47  ;;  %v5702_v44 = vld [vmem:[%s8963_s3 + $0x68] sm:$0xff] (!%p6942_p4)  ;;  %v5617_v52 = vld [vmem:[#allocation6] sm:$0xff] (!%p6942_p4)  ;;  %v7147_v47 = vpack.c.bf16 (!%p6942_p4), %v5750_v38, %v5749_v37 }
 0x30f   : > { %5286 = vmatprep.subr.bf16.mxu0 %v6923_v51  ;;  %5532 = vmatprep.subr.bf16.mxu1 %v6925_v17  ;;  %v5693_v51 = vld [vmem:[%s8963_s3 + $0x20] sm:$0xff] (!%p6942_p4)  ;;  %v5694_v17 = vld [vmem:[%s8963_s3 + $0x28] sm:$0xff] (!%p6942_p4)  ;;  %v5634_v55 = vrot.slane (!%p6942_p4), %v5617_v52, %v5633_v39  ;;  %v5803_v38 = vld [vmem:[%s8963_s3 + $0x390] sm:$0xff] (!%p6942_p4) }
 0x310   : > { %v5734_v48 = vld [vmem:[%s8963_s3 + $0x168] sm:$0xff] (!%p6942_p4)  ;;  %v5804_v39 = vld [vmem:[%s8963_s3 + $0x398] sm:$0xff] (!%p6942_p4) }
 0x312   : > { %5287 = vmatpush1.bf16.msra.mxu0 %v6922_v24  ;;  %5533 = vmatpush1.bf16.msra.mxu1 %v6924_v57  ;;  %v7101_v24 = vpack.c.bf16 (!%p6942_p4), %v5694_v17, %v5693_v51  ;;  %v7131_v57 = vpack.c.bf16 (!%p6942_p4), %v5742_v53, %v5741_v10  ;;  %v5622_v51 = vrot.slane (!%p6942_p4), %v5617_v52, %v5621_v0  ;;  %v5751_v53 = vld [vmem:[%s8963_s3 + $0x1f0] sm:$0xff] (!%p6942_p4)  ;;  %v5786_v0 = vld [vmem:[%s8963_s3 + $0x308] sm:$0xff] (!%p6942_p4) }
 0x313   : > { %5288 = vmatprep.subr.bf16.mxu0 %v6931_v58  ;;  %5534 = vmatprep.subr.bf16.mxu1 %v6933_v59  ;;  %v5711_v58 = vld [vmem:[%s8963_s3 + $0xb0] sm:$0xff] (!%p6942_p4)  ;;  %v5712_v59 = vld [vmem:[%s8963_s3 + $0xb8] sm:$0xff] (!%p6942_p4)  ;;  %v5626_v17 = vrot.slane (!%p6942_p4), %v5617_v52, %v5625_v36 }
 0x314   : > { %v7103_v1 = vpack.c.bf16 (!%p6942_p4), %v5712_v59, %v5711_v58  ;;  %v5703_v59 = vld [vmem:[%s8963_s3 + $0x70] sm:$0xff] (!%p6942_p4) }
 0x316   : > { %5289 = vmatpush1.bf16.msra.mxu0 %v6930_v2  ;;  %5535 = vmatpush1.bf16.msra.mxu1 %v6932_v4  ;;  %v5743_v2 = vld [vmem:[%s8963_s3 + $0x1b0] sm:$0xff] (!%p6942_p4)  ;;  %v5744_v4 = vld [vmem:[%s8963_s3 + $0x1b8] sm:$0xff] (!%p6942_p4) }
 0x317   : > { %5290 = vmatprep.subr.bf16.mxu0 %v6939_v5  ;;  %5536 = vmatprep.subr.bf16.mxu1 %v6941_v6  ;;  %v7135_v5 = vpack.c.bf16 (!%p6942_p4), %v5744_v4, %v5743_v2  ;;  %v5727_v6 = vld [vmem:[%s8963_s3 + $0x130] sm:$0xff] (!%p6942_p4) }
 0x31a   : > { %5291 = vmatpush1.bf16.msra.mxu0 %v6938_v7  ;;  %5537 = vmatpush1.bf16.msra.mxu1 %v6940_v8  ;;  %v5728_v7 = vld [vmem:[%s8963_s3 + $0x138] sm:$0xff] (!%p6942_p4)  ;;  %v5713_v8 = vld [vmem:[%s8963_s3 + $0xc0] sm:$0xff] (!%p6942_p4) }
 0x31b   : > { %7124 = vmatprep.subr.bf16.mxu1 (!%p6942_p4), %v7123_v40  ;;  %v5717_v40 = vld [vmem:[%s8963_s3 + $0xe0] sm:$0xff] (!%p6942_p4) }
 0x31c   : > { %v7115_v43 = vpack.c.bf16 (!%p6942_p4), %v5718_v62, %v5717_v40  ;;  %v5772_v40 = vld [vmem:[%s8963_s3 + $0x298] sm:$0xff] (!%p6942_p4)  ;;  %v5785_v62 = vld [vmem:[%s8963_s3 + $0x300] sm:$0xff] (!%p6942_p4) }
 0x31d   : > { %5309 = vmatmul.mubr.bf16.vlgmr.msra.gmra.mrb[4].mxu0 %v8132_v60  ;;  %5555 = vmatmul.mubr.bf16.vlgmr.msra.gmra.mrb[4].mxu1 %v8132_v60  ;;  %v5705_v60 = vld [vmem:[%s8963_s3 + $0x80] sm:$0xff] (!%p6942_p4) }
 0x31e   : > { %v7091_v28 = vpack.c.bf16 (!%p6942_p4), %v5706_v25, %v5705_v60  ;;  %7126 = vmatpush3.bf16.msra.mxu1 (!%p6942_p4), %v7125_v42  ;;  %v5629_v42 = vsub.s32 (!%p6942_p4), 2, %v7695_v45 }
 0x31f   : > { %7128 = vmatprep.subr.bf16.mxu1 (!%p6942_p4), %v7127_v46  ;;  %v5733_v46 = vld [vmem:[%s8963_s3 + $0x160] sm:$0xff] (!%p6942_p4) }
 0x320   : > { %7092 = vmatprep.subr.bf16.mxu0 (!%p6942_p4), %v7091_v28  ;;  %v5699_v28 = vld [vmem:[%s8963_s3 + $0x50] sm:$0xff] (!%p6942_p4)  ;;  %v5630_v10 = vrot.slane (!%p6942_p4), %v5617_v52, %v5629_v42  ;;  %v7149_v2 = vpack.c.bf16 (!%p6942_p4), %v5734_v48, %v5733_v46  ;;  %v5774_v48 = vld [vmem:[%s8963_s3 + $0x2a8] sm:$0xff] (!%p6942_p4) }
 0x321   : > { %7094 = vmatpush3.bf16.msra.mxu0 (!%p6942_p4), %v7093_v34  ;;  %v5732_v34 = vld [vmem:[%s8963_s3 + $0x158] sm:$0xff] (!%p6942_p4) }
 0x322   : > { %7096 = vmatprep.subr.bf16.mxu0 (!%p6942_p4), %v7095_v56  ;;  %7130 = vmatpush3.bf16.msra.mxu1 (!%p6942_p4), %v7129_v49  ;;  %v7113_v56 = vpack.c.bf16 (!%p6942_p4), %v5700_v29, %v5699_v28  ;;  %v7145_v19 = vpack.c.bf16 (!%p6942_p4), %v5732_v34, %v5731_v31  ;;  %v5719_v49 = vld [vmem:[%s8963_s3 + $0xf0] sm:$0xff] (!%p6942_p4) }
 0x323   : > { %7132 = vmatprep.subr.bf16.mxu1 (!%p6942_p4), %v7131_v57  ;;  %v5641_v57 = vsub.s32 (!%p6942_p4), 5, %v7695_v45  ;;  %v5771_v34 = vld [vmem:[%s8963_s3 + $0x290] sm:$0xff] (!%p6942_p4) }
 0x325   : > { %7098 = vmatpush3.bf16.msra.mxu0 (!%p6942_p4), %v7097_v41  ;;  %v5701_v41 = vld [vmem:[%s8963_s3 + $0x60] sm:$0xff] (!%p6942_p4) }
 0x326   : > { %7100 = vmatprep.subr.bf16.mxu0 (!%p6942_p4), %v7099_v50  ;;  %7134 = vmatpush3.bf16.msra.mxu1 (!%p6942_p4), %v7133_v63  ;;  %v5720_v50 = vld [vmem:[%s8963_s3 + $0xf8] sm:$0xff] (!%p6942_p4)  ;;  %v7117_v58 = vpack.c.bf16 (!%p6942_p4), %v5702_v44, %v5701_v41  ;;  %v5651_v63 = vcombine.low (!%p6942_p4), %v5622_v51, %v5626_v17  ;;  %v5755_v41 = vld [vmem:[%s8963_s3 + $0x210] sm:$0xff] (!%p6942_p4) }
 0x327   : > { %7136 = vmatprep.subr.bf16.mxu1 (!%p6942_p4), %v7135_v5  ;;  %v7119_v4 = vpack.c.bf16 (!%p6942_p4), %v5720_v50, %v5719_v49  ;;  %v5735_v5 = vld [vmem:[%s8963_s3 + $0x170] sm:$0xff] (!%p6942_p4)  ;;  %v7191_v49 = vpack.c.bf16 (!%p6942_p4), %v5804_v39, %v5803_v38  ;;  %v5788_v51 = vld [vmem:[%s8963_s3 + $0x318] sm:$0xff] (!%p6942_p4)  ;;  %v5781_v39 = vld [vmem:[%s8963_s3 + $0x2e0] sm:$0xff] (!%p6942_p4) }
 0x328   : > { %v5787_v50 = vld [vmem:[%s8963_s3 + $0x310] sm:$0xff] (!%p6942_p4) }
 0x329   : > { %7102 = vmatpush3.bf16.msra.mxu0 (!%p6942_p4), %v7101_v24  ;;  %v5637_v24 = vsub.s32 (!%p6942_p4), 4, %v7695_v45 }
 0x32a   : > { %7104 = vmatprep.subr.bf16.mxu0 (!%p6942_p4), %v7103_v1  ;;  %v5645_v1 = vsub.s32 (!%p6942_p4), 6, %v7695_v45 }
 0x3f0   : > { %v5310_v9 = vpop.f32.mrb[4].mxu0  ;;  %v5556_v26 = vpop.f32.mrb[4].mxu1 }
 0x3f1   : > { %v5312_v18 = vpop.f32.mrb[5].mxu0  ;;  %v5558_v12 = vpop.f32.mrb[5].mxu1 }
 0x3f2   : > { %v5588_v11 = vcombine.low %v5310_v9, %v5312_v18  ;;  %v5314_v32 = vpop.f32.mrb[6].mxu0  ;;  %v5589_v14 = vcombine.low %v5556_v26, %v5558_v12  ;;  %v5560_v15 = vpop.f32.mrb[6].mxu1  ;;  %v5714_v9 = vld [vmem:[%s8963_s3 + $0xc8] sm:$0xff] (!%p6942_p4)  ;;  %v7105_v26 = vpack.c.bf16 (!%p6942_p4), %v5696_v13, %v5695_v61  ;;  %v5745_v18 = vld [vmem:[%s8963_s3 + $0x1c0] sm:$0xff] (!%p6942_p4)  ;;  %v7137_v12 = vpack.c.bf16 (!%p6942_p4), %v5728_v7, %v5727_v6  ;;  %v5704_v61 = vld [vmem:[%s8963_s3 + $0x78] sm:$0xff] (!%p6942_p4) }
 0x3f3   : > { %v5315_v16 = vpop.f32.mrb[7].mxu0  ;;  %v5561_v35 = vpop.f32.mrb[7].mxu1  ;;  %v7107_v32 = vpack.c.bf16 (!%p6942_p4), %v5714_v9, %v5713_v8  ;;  %v5698_v15 = vld [vmem:[%s8963_s3 + $0x48] sm:$0xff] (!%p6942_p4)  ;;  %v5649_v13 = vsub.s32 (!%p6942_p4), 7, %v7695_v45  ;;  %v5652_v6 = vcombine.low (!%p6942_p4), %v5630_v10, %v5634_v55  ;;  %v7151_v7 = vpack.c.bf16 (!%p6942_p4), %v5752_v3, %v5751_v53  ;;  %v5736_v8 = vld [vmem:[%s8963_s3 + $0x178] sm:$0xff] (!%p6942_p4)  ;;  %v5769_v45 = vld [vmem:[%s8963_s3 + $0x280] sm:$0xff] (!%p6942_p4) }
 0x3f4   : > { %v5596_v20 = vrot.slane %v5588_v11, %v7702_v54  ;;  %v5603_v21 = vrot.slane %v5589_v14, %v7702_v54  ;;  %5614 = sbr.rel (%p6942_p4) target bundleno = 1283 (0x503), region = 56  ;;  %v5746_v11 = vld [vmem:[%s8963_s3 + $0x1c8] sm:$0xff] (!%p6942_p4)  ;;  %v5697_v14 = vld [vmem:[%s8963_s3 + $0x40] sm:$0xff] (!%p6942_p4)  ;;  %7106 = vmatpush3.bf16.msra.mxu0 (!%p6942_p4), %v7105_v26  ;;  %7138 = vmatpush3.bf16.msra.mxu1 (!%p6942_p4), %v7137_v12  ;;  %v5659_v9 = vrot.slane (!%p6942_p4), %v5651_v63, %v7702_v54 }
 0x3f5   : > { %v5729_v16 = vld [vmem:[%s8963_s3 + $0x140] sm:$0xff] (!%p6942_p4)  ;;  %v5730_v35 = vld [vmem:[%s8963_s3 + $0x148] sm:$0xff] (!%p6942_p4)  ;;  %v7109_v60 = vpack.c.bf16 (!%p6942_p4), %v5698_v15, %v5697_v14  ;;  %7108 = vmatprep.subr.bf16.mxu0 (!%p6942_p4), %v7107_v32  ;;  %v5638_v15 = vrot.slane (!%p6942_p4), %v5617_v52, %v5637_v24 }
 0x3f6   : > { %v5604_v30 = vcombine.low %v5596_v20, %v5603_v21  ;;  %v7139_v20 = vpack.c.bf16 (!%p6942_p4), %v5746_v11, %v5745_v18  ;;  %v5715_v21 = vld [vmem:[%s8963_s3 + $0xd0] sm:$0xff] (!%p6942_p4)  ;;  %v7141_v25 = vpack.c.bf16 (!%p6942_p4), %v5730_v35, %v5729_v16  ;;  %v5770_v26 = vld [vmem:[%s8963_s3 + $0x288] sm:$0xff] (!%p6942_p4)  ;;  %v7121_v18 = vpack.c.bf16 (!%p6942_p4), %v5704_v61, %v5703_v59  ;;  %v5801_v12 = vld [vmem:[%s8963_s3 + $0x380] sm:$0xff] (!%p6942_p4) }
 0x3f7   : > { %v5666_v11 = vrot.slane (!%p6942_p4), %v5652_v6, %v7702_v54  ;;  %v5802_v32 = vld [vmem:[%s8963_s3 + $0x388] sm:$0xff] (!%p6942_p4)  ;;  %v5615_v14 = vld [vmem:[#allocation2] sm:$0xff] (!%p6942_p4)  ;;  %v5642_v16 = vrot.slane (!%p6942_p4), %v5617_v52, %v5641_v57  ;;  %v5650_v35 = vrot.slane (!%p6942_p4), %v5617_v52, %v5649_v13  ;;  %v5775_v59 = vld [vmem:[%s8963_s3 + $0x2b0] sm:$0xff] (!%p6942_p4) }
 0x3f8   : > { %v5608_v23 = vadd.f32 %v5604_v30, %v1058_v22  ;;  %v5716_v22 = vld [vmem:[%s8963_s3 + $0xd8] sm:$0xff] (!%p6942_p4)  ;;  %v5747_v30 = vld [vmem:[%s8963_s3 + $0x1d0] sm:$0xff] (!%p6942_p4)  ;;  %7140 = vmatprep.subr.bf16.mxu1 (!%p6942_p4), %v7139_v20  ;;  %7110 = vmatpush3.bf16.msra.mxu0 (!%p6942_p4), %v7109_v60  ;;  %v5646_v20 = vrot.slane (!%p6942_p4), %v5617_v52, %v5645_v1  ;;  %v7189_v52 = vpack.c.bf16 (!%p6942_p4), %v5786_v0, %v5785_v62  ;;  %v5805_v10 = vld [vmem:[%s8963_s3 + $0x3a0] sm:$0xff] (!%p6942_p4) }
 0x3f9   : > { %v7111_v27 = vpack.c.bf16 (!%p6942_p4), %v5716_v22, %v5715_v21  ;;  %7142 = vmatpush3.bf16.msra.mxu1 (!%p6942_p4), %v7141_v25  ;;  %v7153_v21 = vpack.c.bf16 (!%p6942_p4), %v5736_v8, %v5735_v5  ;;  %v5667_v22 = vcombine.low (!%p6942_p4), %v5659_v9, %v5666_v11  ;;  %v5753_v25 = vld [vmem:[%s8963_s3 + $0x200] sm:$0xff] (!%p6942_p4)  ;;  %v5668_v28 = vcombine.low (!%p6942_p4), %v5638_v15, %v5642_v16  ;;  %v5806_v53 = vld [vmem:[%s8963_s3 + $0x3a8] sm:$0xff] (!%p6942_p4)  ;;  %v5776_v61 = vld [vmem:[%s8963_s3 + $0x2b8] sm:$0xff] (!%p6942_p4) }
 0x3fa   : > { %5610 = vst [vmem:[#allocation2 + $0x8] sm:$0xff] %v5608_v23  ;;  %v5748_v23 = vld [vmem:[%s8963_s3 + $0x1d8] sm:$0xff] (!%p6942_p4)  ;;  %v5669_v29 = vcombine.low (!%p6942_p4), %v5646_v20, %v5650_v35  ;;  %v5757_v55 = vld [vmem:[%s8963_s3 + $0x220] sm:$0xff] (!%p6942_p4)  ;;  %v5758_v24 = vld [vmem:[%s8963_s3 + $0x228] sm:$0xff] (!%p6942_p4)  ;;  %v7195_v63 = vpack.c.bf16 (!%p6942_p4), %v5806_v53, %v5805_v10 }
 0x3fb   : > { %v7143_v33 = vpack.c.bf16 %v5748_v23, %v5747_v30  ;;  %7112 = vmatprep.subr.bf16.mxu0 %v7111_v27  ;;  %v7155_v30 = vpack.c.bf16 %v5770_v26, %v5769_v45  ;;  %v7187_v23 = vpack.c.bf16 %v5802_v32, %v5801_v12  ;;  %v5687_v60 = vadd.f32 %v5667_v22, %v5615_v14  ;;  %v5754_v27 = vld [vmem:[%s8963_s3 + $0x208] sm:$0xff]  ;;  %v5789_v1 = vld [vmem:[%s8963_s3 + $0x320] sm:$0xff]  ;;  %v5808_v5 = vld [vmem:[%s8963_s3 + $0x3b8] sm:$0xff] }
 0x3fc   : > { %7114 = vmatpush3.bf16.msra.mxu0 %v7113_v56  ;;  %v7157_v37 = vpack.c.bf16 %v5754_v27, %v5753_v25  ;;  %v7159_v56 = vpack.c.bf16 %v5772_v40, %v5771_v34  ;;  %v5683_v44 = vrot.slane %v5669_v29, %v7702_v54  ;;  %v5790_v13 = vld [vmem:[%s8963_s3 + $0x328] sm:$0xff]  ;;  %v5759_v8 = vld [vmem:[%s8963_s3 + $0x230] sm:$0xff]  ;;  %v5760_v9 = vld [vmem:[%s8963_s3 + $0x238] sm:$0xff] }
 0x3fd   : > { %7144 = vmatprep.subr.bf16.mxu1 %v7143_v33  ;;  %7116 = vmatprep.subr.bf16.mxu0 %v7115_v43  ;;  %v5833_v31 = vrot.slane %v5687_v60, %v7702_v54  ;;  %v5826_v33 = vcombine.high %v5687_v60, %v5687_v60  ;;  %v5676_v43 = vrot.slane %v5668_v28, %v7702_v54  ;;  %v5778_v11 = vld [vmem:[%s8963_s3 + $0x2c8] sm:$0xff]  ;;  %v5791_v32 = vld [vmem:[%s8963_s3 + $0x330] sm:$0xff]  ;;  %v5792_v14 = vld [vmem:[%s8963_s3 + $0x338] sm:$0xff] }
 0x3fe   : > { %7146 = vmatpush3.bf16.msra.mxu1 %v7145_v19  ;;  %v5756_v19 = vld [vmem:[%s8963_s3 + $0x218] sm:$0xff]  ;;  %v7197_v26 = vpack.c.bf16 %v5790_v13, %v5789_v1  ;;  %v7169_v20 = vpack.c.bf16 %v5760_v9, %v5759_v8  ;;  %v5809_v35 = vld [vmem:[%s8963_s3 + $0x3c0] sm:$0xff]  ;;  %v7201_v27 = vpack.c.bf16 %v5792_v14, %v5791_v32  ;;  %v5779_v28 = vld [vmem:[%s8963_s3 + $0x2d0] sm:$0xff] }
 0x3ff   : > { %7148 = vmatprep.subr.bf16.mxu1 %v7147_v47  ;;  %v5841_v36 = vcombine.high %v5833_v31, %v5833_v31  ;;  %v5840_v42 = vrot.slane %v5826_v33, %v7702_v54  ;;  %v5773_v47 = vld [vmem:[%s8963_s3 + $0x2a0] sm:$0xff]  ;;  %v7161_v17 = vpack.c.bf16 %v5756_v19, %v5755_v41  ;;  %v5684_v57 = vcombine.low %v5676_v43, %v5683_v44  ;;  %v5780_v29 = vld [vmem:[%s8963_s3 + $0x2d8] sm:$0xff]  ;;  %v5811_v62 = vld [vmem:[%s8963_s3 + $0x3d0] sm:$0xff] }
 0x400   : > { %7118 = vmatpush3.bf16.msra.mxu0 %v7117_v58  ;;  %v7163_v3 = vpack.c.bf16 %v5774_v48, %v5773_v47  ;;  %v7193_v58 = vpack.c.bf16 %v5788_v51, %v5787_v50  ;;  %v5793_v33 = vld [vmem:[%s8963_s3 + $0x340] sm:$0xff]  ;;  %v5812_v0 = vld [vmem:[%s8963_s3 + $0x3d8] sm:$0xff]  ;;  %v5795_v19 = vld [vmem:[%s8963_s3 + $0x350] sm:$0xff] }
 0x401   : > { %7120 = vmatprep.subr.bf16.mxu0 %v7119_v4  ;;  %5932 = vmatprep.mubr.f32.mxu0 %v5841_v36  ;;  %v5842_v46 = vcombine.high %v5840_v42, %v5840_v42  ;;  %v5807_v4 = vld [vmem:[%s8963_s3 + $0x3b0] sm:$0xff]  ;;  %v5616_v6 = vld [vmem:[#allocation2 + $0x8] sm:$0xff]  ;;  %v7175_v36 = vpack.c.bf16 %v5780_v29, %v5779_v28  ;;  %v7207_v41 = vpack.c.bf16 %v5812_v0, %v5811_v62  ;;  %v5796_v43 = vld [vmem:[%s8963_s3 + $0x358] sm:$0xff] }
 0x402   : > { %7150 = vmatpush3.bf16.msra.mxu1 %v7149_v2  ;;  %v7165_v2 = vpack.c.bf16 %v5758_v24, %v5757_v55  ;;  %v5688_v45 = vadd.f32 %v5684_v57, %v5616_v6  ;;  %v7199_v12 = vpack.c.bf16 %v5808_v5, %v5807_v4  ;;  %v5765_v48 = vld [vmem:[%s8963_s3 + $0x260] sm:$0xff]  ;;  %v7209_v50 = vpack.c.bf16 %v5796_v43, %v5795_v19  ;;  %v5783_v51 = vld [vmem:[%s8963_s3 + $0x2f0] sm:$0xff]  ;;  %v5816_v57 = vld [vmem:[%s8963_s3 + $0x3f8] sm:$0xff] }
 0x403   : > { %7152 = vmatprep.subr.bf16.mxu1 %v7151_v7  ;;  %6002 = vmatprep.mubr.f32.mxu1 %v5842_v46  ;;  %v7167_v7 = vpack.c.bf16 %v5776_v61, %v5775_v59  ;;  %v5813_v46 = vld [vmem:[%s8963_s3 + $0x3e0] sm:$0xff]  ;;  %v5815_v24 = vld [vmem:[%s8963_s3 + $0x3f0] sm:$0xff]  ;;  %v5768_v61 = vld [vmem:[%s8963_s3 + $0x278] sm:$0xff] }
 0x404   : > { %7122 = vmatpush3.bf16.msra.mxu0 %v7121_v18  ;;  %v5777_v18 = vld [vmem:[%s8963_s3 + $0x2c0] sm:$0xff]  ;;  %v8820_v15 = vrot.slane %v5688_v45, %v7702_v54  ;;  %v5843_v16 = vcombine.high %v5688_v45, %v5688_v45  ;;  %v5767_v59 = vld [vmem:[%s8963_s3 + $0x270] sm:$0xff]  ;;  %v7215_v1 = vpack.c.bf16 %v5816_v57, %v5815_v24 }
 0x405   : > { %7156 = vmatprep.subr.bf16.mxu0 %v7155_v30  ;;  %v7171_v22 = vpack.c.bf16 %v5778_v11, %v5777_v18  ;;  %v5761_v30 = vld [vmem:[%s8963_s3 + $0x240] sm:$0xff]  ;;  %v5799_v13 = vld [vmem:[%s8963_s3 + $0x370] sm:$0xff]  ;;  %v7185_v4 = vpack.c.bf16 %v5768_v61, %v5767_v59 }
 0x406   : > { %7154 = vmatpush3.bf16.msra.mxu1 %v7153_v21  ;;  %v5810_v21 = vld [vmem:[%s8963_s3 + $0x3c8] sm:$0xff]  ;;  %v5858_v60 = vcombine.high %v8820_v15, %v8820_v15  ;;  %v8837_v25 = vrot.slane %v5843_v16, %v7702_v54  ;;  %v5797_v53 = vld [vmem:[%s8963_s3 + $0x360] sm:$0xff] }
 0x407   : > { %7188 = vmatprep.subr.bf16.mxu1 %v7187_v23  ;;  %5933 = vmatmul.mubr.f32.vlgmr.msra.gmra.mrb[0].mxu0 %v5833_v31  ;;  %v5762_v23 = vld [vmem:[%s8963_s3 + $0x248] sm:$0xff]  ;;  %v7203_v31 = vpack.c.bf16 %v5810_v21, %v5809_v35 }
 0x408   : > { %7158 = vmatpush3.bf16.msra.mxu0 %v7157_v37  ;;  %v5794_v54 = vld [vmem:[%s8963_s3 + $0x348] sm:$0xff]  ;;  %6072 = vmatprep.mubr.f32.mxu0 %v5858_v60  ;;  %v5859_v34 = vcombine.high %v8837_v25, %v8837_v25  ;;  %v7173_v40 = vpack.c.bf16 %v5762_v23, %v5761_v30  ;;  %v5764_v37 = vld [vmem:[%s8963_s3 + $0x258] sm:$0xff] }
 0x409   : > { %6003 = vmatmul.mubr.f32.vlgmr.msra.gmra.mrb[0].mxu1 %v5840_v42  ;;  %7160 = vmatprep.subr.bf16.mxu0 %v7159_v56  ;;  %v5763_v42 = vld [vmem:[%s8963_s3 + $0x250] sm:$0xff]  ;;  %v7205_v38 = vpack.c.bf16 %v5794_v54, %v5793_v33  ;;  %v5782_v56 = vld [vmem:[%s8963_s3 + $0x2e8] sm:$0xff] }
 0x40a   : > { %7190 = vmatpush3.bf16.msra.mxu1 %v7189_v52  ;;  %6142 = vmatprep.mubr.f32.mxu1 %v5859_v34  ;;  %v7177_v44 = vpack.c.bf16 %v5764_v37, %v5763_v42  ;;  %v5814_v52 = vld [vmem:[%s8963_s3 + $0x3e8] sm:$0xff]  ;;  %v7179_v47 = vpack.c.bf16 %v5782_v56, %v5781_v39 }
 0x40b   : > { %7192 = vmatprep.subr.bf16.mxu1 %v7191_v49  ;;  %v5766_v49 = vld [vmem:[%s8963_s3 + $0x268] sm:$0xff]  ;;  %v7211_v10 = vpack.c.bf16 %v5814_v52, %v5813_v46 }
 0x40c   : > { %7162 = vmatpush3.bf16.msra.mxu0 %v7161_v17  ;;  %v5784_v17 = vld [vmem:[%s8963_s3 + $0x2f8] sm:$0xff]  ;;  %v7181_v55 = vpack.c.bf16 %v5766_v49, %v5765_v48 }
 0x40d   : > { %7164 = vmatprep.subr.bf16.mxu0 %v7163_v3  ;;  %v5798_v3 = vld [vmem:[%s8963_s3 + $0x368] sm:$0xff] }
 0x40e   : > { %7194 = vmatpush3.bf16.msra.mxu1 %v7193_v58  ;;  %v7183_v58 = vpack.c.bf16 %v5784_v17, %v5783_v51 }
 0x40f   : > { %7196 = vmatprep.subr.bf16.mxu1 %v7195_v63  ;;  %v7213_v63 = vpack.c.bf16 %v5798_v3, %v5797_v53 }
 0x410   : > { %7166 = vmatpush3.bf16.msra.mxu0 %v7165_v2  ;;  %v5800_v2 = vld [vmem:[%s8963_s3 + $0x378] sm:$0xff] }
 0x411   : > { %7168 = vmatprep.subr.bf16.mxu0 %v7167_v7  ;;  %v7217_v5 = vpack.c.bf16 %v5800_v2, %v5799_v13  ;;  %v6943_v7 = vld [vmem:[%s8964_s4] ss:$0 sm:$0xff] }
 0x412   : > { %7198 = vmatpush3.bf16.msra.mxu1 %v7197_v26 }
 0x413   : > { %7200 = vmatprep.subr.bf16.mxu1 %v7199_v12 }
 0x414   : > { %7170 = vmatpush3.bf16.msra.mxu0 %v7169_v20 }
 0x415   : > { %7172 = vmatprep.subr.bf16.mxu0 %v7171_v22 }
 0x416   : > { %7202 = vmatpush3.bf16.msra.mxu1 %v7201_v27 }
 0x417   : > { %7204 = vmatprep.subr.bf16.mxu1 %v7203_v31 }
 0x418   : > { %7174 = vmatpush3.bf16.msra.mxu0 %v7173_v40 }
 0x419   : > { %7176 = vmatprep.subr.bf16.mxu0 %v7175_v36 }
 0x41a   : > { %7206 = vmatpush3.bf16.msra.mxu1 %v7205_v38 }
 0x41b   : > { %7208 = vmatprep.subr.bf16.mxu1 %v7207_v41 }
 0x41c   : > { %7178 = vmatpush3.bf16.msra.mxu0 %v7177_v44 }
 0x41d   : > { %7180 = vmatprep.subr.bf16.mxu0 %v7179_v47 }
 0x41e   : > { %7210 = vmatpush3.bf16.msra.mxu1 %v7209_v50 }
 0x41f   : > { %7212 = vmatprep.subr.bf16.mxu1 %v7211_v10 }
 0x420   : > { %7182 = vmatpush3.bf16.msra.mxu0 %v7181_v55 }
 0x421   : > { %7184 = vmatprep.subr.bf16.mxu0 %v7183_v58 }
 0x422   : > { %7214 = vmatpush3.bf16.msra.mxu1 %v7213_v63 }
 0x423   : > { %7216 = vmatprep.subr.bf16.mxu1 %v7215_v1 }
 0x424   : > { %7186 = vmatpush3.bf16.msra.mxu0 %v7185_v4 }
 0x426   : > { %7218 = vmatpush3.bf16.msra.mxu1 %v7217_v5 }
 0x427   : > { %6073 = vmatmul.mubr.f32.vlgmr.msra.gmra.mrb[2].mxu0 %v8820_v15 }
 0x429   : > { %6143 = vmatmul.mubr.f32.vlgmr.msra.gmra.mrb[2].mxu1 %v8837_v25 }
 0x4da   : > { %v6983_v6 = vpop.f32.mrb[0].mxu0 }
 0x4db   : > { %v6984_v8 = vpop.f32.mrb[1].mxu0 }
 0x4dc   : > { %v6985_v9 = vadd.f32 %v6984_v8, %v6983_v6  ;;  %v7018_v45 = vpop.f32.mrb[0].mxu1 }
 0x4dd   : > { %v7019_v26 = vpop.f32.mrb[1].mxu1 }
 0x4de   : > { %v5935_v18 = vadd.f32 %v6985_v9, %v6943_v7  ;;  %v7020_v11 = vadd.f32 %v7019_v26, %v7018_v45 }
 0x4e0   : > { %v6005_v12 = vadd.f32 %v7020_v11, %v5935_v18 }
 0x4fa   : > { %v7053_v32 = vpop.f32.mrb[2].mxu0 }
 0x4fb   : > { %v7054_v14 = vpop.f32.mrb[3].mxu0 }
 0x4fc   : > { %v7055_v16 = vadd.f32 %v7054_v14, %v7053_v32  ;;  %v7088_v20 = vpop.f32.mrb[2].mxu1 }
 0x4fd   : > { %v7089_v35 = vpop.f32.mrb[3].mxu1 }
 0x4fe   : > { %v6075_v15 = vadd.f32 %v7055_v16, %v6005_v12  ;;  %v7090_v21 = vadd.f32 %v7089_v35, %v7088_v20 }
 0x500   : > { %v6145_v22 = vadd.f32 %v7090_v21, %v6075_v15 }
 0x502   : > { %6148 = vst [vmem:[#allocation8] sm:$0x3] %v6145_v22 }
 0x503 PF: > { %p7322_p7 = scmp.eq.s32.totalorder %s7551_s22, 3  ;;  %s7501_s14 = smov [#allocation8]  }
 0x504   : > { %s6156_s8 = sshll.u32 %s7501_s14, 4  ;;  %s6157_s8 = int_to_ptr.vmem [resolvable:$true] %s6156_s8 }
 0x505   : > { %s7424_s28 = scalar_lea.vmem %s6157_s8, 32  ;;  %p7431_p10 = scmp.lt.s32.totalorder %s6157_s8, %s6157_s8 }
 0x506   : > { %p7425_p11 = scmp.ne.s32.totalorder %s6157_s8, %s7424_s28  ;;  %p7432_p0 = scmp.lt.s32.totalorder %s7424_s28, %s7424_s28 }
 0x508   : > { %p7426_p12 = pnand %p7425_p11, %p7322_p7  ;;  %p7433_p1 = por %p7432_p0, %p7431_p10 }
 0x50a   : > { %p7427_p5 = pneg %p7426_p12 }
 0x50c   : > { %p7434_p9 = pnand %p7433_p1, %p7427_p5 }
 0x50e   : > { %7437 = shalt.err (!%p7434_p9)
}
 0x50f   : > { %s7438_s17 = scalar_lea.hbm %s8965_s5, 32 }
 0x510   : > { %p7439_p13 = scmp.ne.s32.totalorder %s8965_s5, %s7438_s17  ;;  %p7444_p3 = scmp.lt.u32.totalorder %s7438_s17, %s8965_s5 }
 0x512   : > { %p7440_p2 = pnand %p7439_p13, %p7322_p7 }
 0x514   : > { %p7441_p8 = pneg %p7440_p2 }
 0x516   : > { %p7446_p6 = pnand %p7444_p3, %p7441_p8 }
 0x518   : > { %7449 = shalt.err (!%p7446_p6)
}
 0x519   : > { %7308 = dma.vmem_to_hbm [thread:$0]  (%p7322_p7), %s6157_s8, 32, %s8965_s5, [#allocation5]  }
 0x51a   : > { %7475 = dma.done.wait (%p7322_p7), [#allocation5], 32  }
 0x51b   : > { %7477 = vsyncadd (%p7322_p7), [#allocation5], 4294967264 }
 0x51c PF: > { %p17_p4 = scmp.ge.s32.totalorder %s7554_s23, 6   ;;  %s8981_s18 = smov %s7484_s19 }
 0x51d   : > { %s8982_s19 = smov %s7488_s20  ;;  %s8983_s20 = smov %s7564_s26 }
 0x51e   : > { %s8984_s21 = smov %s7554_s23  ;;  %19 = sbr.rel (!%p17_p4) target bundleno = 5 (0x5), region = 92 }
 0x525   :  { %6169 = vsyncpa [#allocation4], 1 }
 0x526   :  { %6171 = vsyncpa [#allocation4 + $0x1], 1 }
 0x527   :  { %6172 = vsyncpa [#allocation7], 1 }
 0x528   :  { %6173 = vsyncpa [#allocation5], 1 }
 0x529   :  { %6175 = vsyncpa [#allocation5 + $0x1], 1 }

</bundles_post_ra>
